<compile_context>
chip_gen: v7x
topology: tpu7x:2x2x1
jax: 0.10.0
libtpu: 0.0.40
codegen_flags: <defaults>
</compile_context>

<pallas_src>
import functools

import jax
import jax.numpy as jnp
from jax.experimental import pallas as pl
from jax.experimental.pallas import tpu as pltpu

LANE = 128          # channel dims are zero-padded to this lane width
EPS = 1e-5          # nn.BatchNorm2d default


def _round_up(c, m=LANE):
    return ((c + m - 1) // m) * m


# ----------------------------- in-kernel helpers -----------------------------

def _accum_stats(st_ref, y):
    """Accumulate per-channel sum and sum-of-squares of the f32 matmul output into the
    resident (8, C) stats output.  Initialized at the first grid step via pl.when."""
    @pl.when(pl.program_id(0) == 0)
    def _():
        st_ref[...] = jnp.zeros_like(st_ref)
    st_ref[0:1, :] = st_ref[0:1, :] + jnp.sum(y, axis=0, keepdims=True)
    st_ref[1:2, :] = st_ref[1:2, :] + jnp.sum(y * y, axis=0, keepdims=True)


def _bn_scale_shift(st_ref, gb_ref, inv_count):
    """Fold training-mode BN (batch stats) + affine into y*scale + shift (all f32).
    Single-pass var = E[x^2] - E[x]^2 accumulated in f32; clamped at 0 to guard against
    cancellation at large N*H*W."""
    mean = st_ref[0:1, :] * inv_count
    var = jnp.maximum(st_ref[1:2, :] * inv_count - mean * mean, 0.0)
    scale = jax.lax.rsqrt(var + EPS) * gb_ref[0:1, :]
    shift = gb_ref[1:2, :] - mean * scale
    return scale, shift


def _shift_axis(t, off, axis):
    """s[i] = t[i + off] along `axis` (off in {-1, 0, 1}), zero-filled at the border.
    Pure slice+concat (no iota/compare/select) -> cheap, mask-free im2col taps."""
    if off == 0:
        return t
    n = t.shape[axis]
    zshape = list(t.shape)
    zshape[axis] = 1
    zeros = jnp.zeros(zshape, t.dtype)
    if off == -1:                                   # s[i] = t[i-1]
        kept = jax.lax.slice_in_dim(t, 0, n - 1, axis=axis)
        return jnp.concatenate([zeros, kept], axis=axis)
    kept = jax.lax.slice_in_dim(t, 1, n, axis=axis)  # off == +1: s[i] = t[i+1]
    return jnp.concatenate([kept, zeros], axis=axis)


# --------------------------------- kernels -----------------------------------

def conv1x1_stats_kernel(x_ref, w_ref, y_ref, st_ref):
    """y = x @ w1 (1x1 conv as matmul), store bf16, accumulate bn1 batch stats."""
    BT, H, W, Ci = x_ref.shape
    Co = w_ref.shape[1]
    x2d = x_ref[...].reshape(BT * H * W, Ci)
    y = jnp.dot(x2d.astype(jnp.bfloat16), w_ref[...],
                preferred_element_type=jnp.float32)
    y_ref[...] = y.reshape(BT, H, W, Co).astype(y_ref.dtype)
    _accum_stats(st_ref, y)


def bn_relu_conv3x3_stats_kernel(y_in_ref, st_in_ref, gb_ref, w_ref,
                                 y_out_ref, st_out_ref, *, inv_count):
    """z = relu(bn1(y1)); y2 = im2col_3x3(z) @ w2 as ONE matmul; accumulate bn2 stats."""
    BT, H, W, Ci = y_in_ref.shape
    Co = w_ref.shape[1]
    scale, shift = _bn_scale_shift(st_in_ref, gb_ref, inv_count)
    z = jnp.maximum(y_in_ref[...].astype(jnp.float32) * scale.reshape(1, 1, 1, Ci)
                    + shift.reshape(1, 1, 1, Ci), 0.0)
    zb = z.astype(jnp.bfloat16)                     # single cast; taps built in bf16

    taps = []
    for dy in (-1, 0, 1):                           # order matches w2 (kh, kw, ci) reshape
        tdy = _shift_axis(zb, dy, axis=1)           # per-image H shift (batch dim ahead)
        for dx in (-1, 0, 1):
            taps.append(_shift_axis(tdy, dx, axis=2))
    patches = jnp.concatenate(taps, axis=-1).reshape(BT * H * W, 9 * Ci)
    y = jnp.dot(patches, w_ref[...], preferred_element_type=jnp.float32)
    y_out_ref[...] = y.reshape(BT, H, W, Co).astype(y_out_ref.dtype)
    _accum_stats(st_out_ref, y)


def bn_relu_conv1x1_stats_kernel(y_in_ref, st_in_ref, gb_ref, w_ref,
                                 y_out_ref, st_out_ref, *, inv_count):
    """z = relu(bn2(y2)); y3 = z @ w3; accumulate bn3 stats."""
    BT, H, W, Ci = y_in_ref.shape
    Co = w_ref.shape[1]
    scale, shift = _bn_scale_shift(st_in_ref, gb_ref, inv_count)
    z = jnp.maximum(y_in_ref[...].astype(jnp.float32) * scale.reshape(1, 1, 1, Ci)
                    + shift.reshape(1, 1, 1, Ci), 0.0)
    y = jnp.dot(z.reshape(BT * H * W, Ci).astype(jnp.bfloat16), w_ref[...],
                preferred_element_type=jnp.float32)
    y_out_ref[...] = y.reshape(BT, H, W, Co).astype(y_out_ref.dtype)
    _accum_stats(st_out_ref, y)


def bn_residual_relu_kernel(y_in_ref, st_in_ref, gb_ref, x_ref, o_ref, *, inv_count):
    """out = relu(bn3(y3) + x) — lane-dense full-block f32 store."""
    _, _, _, C = y_in_ref.shape
    scale, shift = _bn_scale_shift(st_in_ref, gb_ref, inv_count)
    y = (y_in_ref[...].astype(jnp.float32) * scale.reshape(1, 1, 1, C)
         + shift.reshape(1, 1, 1, C))
    o_ref[...] = jnp.maximum(y + x_ref[...], 0.0)


# --------------------------------- wrapper -----------------------------------

def _pick_batch_tile(n, h, w, max_c, budget_bytes=2 << 20):
    """Largest divisor of N whose (BT,H,W,Cmax) f32 tile stays under ~2 MiB."""
    for bt in range(n, 0, -1):
        if n % bt == 0 and bt * h * w * max_c * 4 <= budget_bytes:
            return bt
    return 1


def _vmem_limit_bytes(bt, h, w, pm):
    hw = bt * h * w
    # call 2 dominates: double-buffered bf16 activation blocks in/out, the resident
    # (9*Pm, Pm) bf16 weight, the f32 bn temp and the bf16 im2col patches.
    need = (2 * 2 * hw * pm * 2 + 9 * pm * pm * 2 + hw * pm * 4 + hw * 9 * pm * 2)
    # TODO(synk): cap at <=48 MiB when targeting v7x (64 MiB physical VMEM).
    return int(min(96 << 20, max(32 << 20, 2 * need)))


def _pack_gb(g, b, c):
    """Pack gamma/beta into one (8, C) f32 array (rows 0/1); padded channels stay 0."""
    a = jnp.zeros((8, c), jnp.float32)
    a = a.at[0, :g.size].set(g.reshape(-1))
    a = a.at[1, :b.size].set(b.reshape(-1))
    return a


@jax.jit
def bottleneck_forward(x_nchw, params):
    """NCHW in / NCHW out wrapper (kernels run channels-last, channels padded to 128)."""
    w1, g1, b1, w2, g2, b2, w3, g3, b3 = params
    x = jnp.transpose(x_nchw, (0, 2, 3, 1)).astype(jnp.float32)       # NCHW -> NHWC
    N, H, W, Cin = x.shape
    P = w1.shape[1]
    Cout = w3.shape[1]
    assert Cin == Cout, "residual path needs inplanes == planes * 4 (downsample=None)"

    Cp, Pm, Co = _round_up(Cin), _round_up(P), _round_up(Cout)
    BT = _pick_batch_tile(N, H, W, max(Cp, Pm, Co))
    inv_count = 1.0 / float(N * H * W)                                # N*H*W per channel
    grid = (N // BT,)
    vmem = _vmem_limit_bytes(BT, H, W, Pm)

    # lane-dense layout: zero-pad channel dims; padded channels carry gamma=beta=0.
    xp = jnp.pad(x, ((0, 0), (0, 0), (0, 0), (0, Cp - Cin)))
    w1p = jnp.pad(w1, ((0, Cp - Cin), (0, Pm - P))).astype(jnp.bfloat16)
    w2p = jnp.pad(w2, ((0, 0), (0, 0), (0, Pm - P), (0, Pm - P)))
    w2p = w2p.reshape(9 * Pm, Pm).astype(jnp.bfloat16)                # im2col weight
    w3p = jnp.pad(w3, ((0, Pm - P), (0, Co - Cout))).astype(jnp.bfloat16)
    gb1, gb2, gb3 = _pack_gb(g1, b1, Pm), _pack_gb(g2, b2, Pm), _pack_gb(g3, b3, Co)

    act = lambda b: (b, 0, 0, 0)
    const = lambda b: (0, 0)
    act_spec = lambda c: pl.BlockSpec((BT, H, W, c), act)
    # TODO(synk): constant operands could be single-buffered (pipeline_mode=pl.Buffered(1))
    # to shave a w2-sized VMEM copy; left at the default for maximum compatibility.
    const_spec = lambda shape: pl.BlockSpec(shape, const)

    # BN batch stats couple all batch tiles through the resident stats output -> "arbitrary".
    reduce_params = pltpu.CompilerParams(dimension_semantics=("arbitrary",),
                                         vmem_limit_bytes=vmem)

    # --- call 1: conv1 (1x1) + bn1 statistics ---------------------------------
    y1, st1 = pl.pallas_call(
        conv1x1_stats_kernel,
        out_shape=(jax.ShapeDtypeStruct((N, H, W, Pm), jnp.bfloat16),
                   jax.ShapeDtypeStruct((8, Pm), jnp.float32)),
        grid_spec=pltpu.PrefetchScalarGridSpec(
            num_scalar_prefetch=0, grid=grid,
            in_specs=[act_spec(Cp), const_spec((Cp, Pm))],
            out_specs=(act_spec(Pm), const_spec((8, Pm)))),
        compiler_params=reduce_params,
    )(xp, w1p)

    # --- call 2: bn1 + relu + conv2 (3x3 im2col) + bn2 statistics -------------
    y2, st2 = pl.pallas_call(
        functools.partial(bn_relu_conv3x3_stats_kernel, inv_count=inv_count),
        out_shape=(jax.ShapeDtypeStruct((N, H, W, Pm), jnp.bfloat16),
                   jax.ShapeDtypeStruct((8, Pm), jnp.float32)),
        grid_spec=pltpu.PrefetchScalarGridSpec(
            num_scalar_prefetch=0, grid=grid,
            in_specs=[act_spec(Pm), const_spec((8, Pm)), const_spec((8, Pm)),
                      const_spec((9 * Pm, Pm))],
            out_specs=(act_spec(Pm), const_spec((8, Pm)))),
        compiler_params=reduce_params,
    )(y1, st1, gb1, w2p)

    # --- call 3: bn2 + relu + conv3 (1x1) + bn3 statistics ---------------------
    y3, st3 = pl.pallas_call(
        functools.partial(bn_relu_conv1x1_stats_kernel, inv_count=inv_count),
        out_shape=(jax.ShapeDtypeStruct((N, H, W, Co), jnp.bfloat16),
                   jax.ShapeDtypeStruct((8, Co), jnp.float32)),
        grid_spec=pltpu.PrefetchScalarGridSpec(
            num_scalar_prefetch=0, grid=grid,
            in_specs=[act_spec(Pm), const_spec((8, Pm)), const_spec((8, Pm)),
                      const_spec((Pm, Co))],
            out_specs=(act_spec(Co), const_spec((8, Co)))),
        compiler_params=reduce_params,
    )(y2, st2, gb2, w3p)

    # --- call 4: bn3 + residual + relu (no stats -> batch axis is parallel) ----
    out = pl.pallas_call(
        functools.partial(bn_residual_relu_kernel, inv_count=inv_count),
        out_shape=jax.ShapeDtypeStruct((N, H, W, Co), jnp.float32),
        grid_spec=pltpu.PrefetchScalarGridSpec(
            num_scalar_prefetch=0, grid=grid,
            in_specs=[act_spec(Co), const_spec((8, Co)), const_spec((8, Co)),
                      act_spec(Cp)],
            out_specs=act_spec(Co)),
        compiler_params=pltpu.CompilerParams(dimension_semantics=("parallel",),
                                             vmem_limit_bytes=vmem),
    )(y3, st3, gb3, xp)

    return jnp.transpose(out[..., :Cout], (0, 3, 1, 2))               # NHWC -> NCHW


# ------------------------------ reference & test ------------------------------

def ref_bottleneck(x_nchw, params, matmul_dtype=jnp.float32, inter_dtype=jnp.float32):
    """Pure-JAX reference. matmul_dtype mirrors the kernel's bf16 MXU operands;
    inter_dtype mirrors the bf16 HBM staging of conv outputs (stats stay f32)."""
    w1, g1, b1, w2, g2, b2, w3, g3, b3 = params
    x = jnp.transpose(x_nchw, (0, 2, 3, 1)).astype(jnp.float32)

    def conv(y, w, padding):
        return jax.lax.conv_general_dilated(
            y.astype(matmul_dtype), w.astype(matmul_dtype), (1, 1), padding,
            dimension_numbers=('NHWC', 'HWIO', 'NHWC'),
            preferred_element_type=jnp.float32,
            precision=jax.lax.Precision.HIGHEST)

    def bn_stage(y, g, b, relu):
        mean = jnp.mean(y, axis=(0, 1, 2), keepdims=True)
        var = jnp.mean(jnp.square(y - mean), axis=(0, 1, 2), keepdims=True)
        yr = y.astype(inter_dtype).astype(jnp.float32)   # staged-intermediate rounding
        z = (yr - mean) * jax.lax.rsqrt(var + EPS) * g.reshape(1, 1, 1, -1) \
            + b.reshape(1, 1, 1, -1)
        return jnp.maximum(z, 0.0) if relu else z

    o = bn_stage(conv(x, w1.reshape(1, 1, *w1.shape), 'VALID'), g1, b1, True)
    o = bn_stage(conv(o, w2, ((1, 1), (1, 1))), g2, b2, True)
    o = bn_stage(conv(o, w3.reshape(1, 1, *w3.shape), 'VALID'), g3, b3, False)
    o = jnp.maximum(o + x, 0.0)
    return jnp.transpose(o, (0, 3, 1, 2))


def init_params(key, inplanes, planes):
    expansion = 4
    ks = jax.random.split(key, 9)
    # kernel-friendly layouts: w1 (Cin,P), w2 (3,3,P,P) HWIO, w3 (P,4P)
    w1 = 0.2 * jax.random.normal(ks[0], (inplanes, planes), jnp.float32)
    w2 = 0.2 * jax.random.normal(ks[1], (3, 3, planes, planes), jnp.float32)
    w3 = 0.2 * jax.random.normal(ks[2], (planes, planes * expansion), jnp.float32)
    g1 = 1.0 + 0.1 * jax.random.normal(ks[3], (1, planes), jnp.float32)
    b1 = 0.1 * jax.random.normal(ks[4], (1, planes), jnp.float32)
    g2 = 1.0 + 0.1 * jax.random.normal(ks[5], (1, planes), jnp.float32)
    b2 = 0.1 * jax.random.normal(ks[6], (1, planes), jnp.float32)
    g3 = 1.0 + 0.1 * jax.random.normal(ks[7], (1, planes * expansion), jnp.float32)
    b3 = 0.1 * jax.random.normal(ks[8], (1, planes * expansion), jnp.float32)
    return (w1, g1, b1, w2, g2, b2, w3, g3, b3)


if __name__ == "__main__":
    key = jax.random.PRNGKey(0)
    k_x, k_p = jax.random.split(key)

    inplanes, planes = 16, 4          # inplanes == planes * 4 (no downsample branch)
    N, H, W = 2, 16, 16
    x = jax.random.normal(k_x, (N, inplanes, H, W), jnp.float32)      # NCHW like PyTorch
    params = init_params(k_p, inplanes, planes)

    out = jax.block_until_ready(bottleneck_forward(x, params))
    assert out.shape == (N, planes * 4, H, W)

    # primary check: reference that rounds matmul operands AND staged intermediates to
    # bf16 exactly like the kernel (f32 accumulation, f32 BN stats) -> validates logic.
    ref_matched = jax.block_until_ready(
        ref_bottleneck(x, params, matmul_dtype=jnp.bfloat16, inter_dtype=jnp.bfloat16))
    err = float(jnp.max(jnp.abs(out - ref_matched)))
    assert err < 1e-2, f"mismatch vs bf16-matched reference: {err}"

    # loose sanity check vs full-f32 module semantics (kernel uses bf16 MXU / staging).
    ref_f32 = jax.block_until_ready(ref_bottleneck(x, params))
    err32 = float(jnp.max(jnp.abs(out - ref_f32)))
    assert err32 < 3e-1, f"mismatch vs f32 reference: {err32}"

    print("KERNEL_OK")
</pallas_src>

<mosaic_0001>
module attributes {stable_mosaic.version = 11 : i64} {
  func.func @conv1x1_stats_kernel(%arg0: i32, %arg1: memref<2x16x16x128xf32, #tpu.memory_space<vmem>>, %arg2: memref<128x128xbf16, #tpu.memory_space<vmem>>, %arg3: memref<2x16x16x128xbf16, #tpu.memory_space<vmem>>, %arg4: memref<8x128xf32, #tpu.memory_space<vmem>>) attributes {dimension_semantics = [#tpu.dimension_semantics<arbitrary>], iteration_bounds = array<i64: 1>, scalar_prefetch = 0 : i64, scratch_operands = 0 : i64, tpu.core_type = #tpu.core_type<tc>, window_params = [{transform_indices = @transform_0, window_bounds = array<i64: 2, 16, 16, 128>}, {pipeline_mode = #tpu.pipeline_mode<synchronous>, transform_indices = @transform_1, window_bounds = array<i64: 128, 128>}, {transform_indices = @transform_2, window_bounds = array<i64: 2, 16, 16, 128>}, {pipeline_mode = #tpu.pipeline_mode<synchronous>, transform_indices = @transform_3, window_bounds = array<i64: 8, 128>}]} {
    %c0 = arith.constant 0 : index
    %c0_0 = arith.constant 0 : index
    %c0_1 = arith.constant 0 : index
    %c0_2 = arith.constant 0 : index
    %0 = vector.load %arg1[%c0, %c0_0, %c0_1, %c0_2] : memref<2x16x16x128xf32, #tpu.memory_space<vmem>>, vector<2x16x16x128xf32>
    %1 = vector.shape_cast %0 : vector<2x16x16x128xf32> to vector<512x128xf32>
    %2 = arith.truncf %1 : vector<512x128xf32> to vector<512x128xbf16>
    %c0_3 = arith.constant 0 : index
    %c0_4 = arith.constant 0 : index
    %3 = vector.load %arg2[%c0_3, %c0_4] : memref<128x128xbf16, #tpu.memory_space<vmem>>, vector<128x128xbf16>
    %cst = arith.constant dense<0.000000e+00> : vector<512x128xf32>
    %4 = tpu.matmul %2, %3, %cst {dimension_numbers = #tpu.dot_dimension_numbers<[1], [0], [0], [1], [0, 0, 1, 1], [], []>} : vector<512x128xbf16>, vector<128x128xbf16>, vector<512x128xf32> -> vector<512x128xf32>
    %5 = vector.shape_cast %4 : vector<512x128xf32> to vector<2x16x16x128xf32>
    %6 = arith.truncf %5 : vector<2x16x16x128xf32> to vector<2x16x16x128xbf16>
    %c0_5 = arith.constant 0 : index
    %c0_6 = arith.constant 0 : index
    %c0_7 = arith.constant 0 : index
    %c0_8 = arith.constant 0 : index
    %7 = vector.load %arg3[%c0_5, %c0_6, %c0_7, %c0_8] : memref<2x16x16x128xbf16, #tpu.memory_space<vmem>>, vector<2x16x16x128xbf16>
    tpu.vector_store %arg3[%c0_5, %c0_6, %c0_7, %c0_8], %6 {strides = array<i32>} : memref<2x16x16x128xbf16, #tpu.memory_space<vmem>>, vector<2x16x16x128xbf16>,
    %c0_i32 = arith.constant 0 : i32
    %8 = arith.cmpi eq, %arg0, %c0_i32 : i32
    %9 = arith.extui %8 : i1 to i32
    %c0_i32_9 = arith.constant 0 : i32
    %10 = arith.cmpi ne, %9, %c0_i32_9 : i32
    scf.if %10 {
      %cst_19 = arith.constant 0.000000e+00 : f32
      %22 = vector.broadcast %cst_19 : f32 to vector<8x128xf32>
      %c0_20 = arith.constant 0 : index
      %c0_21 = arith.constant 0 : index
      %23 = vector.load %arg4[%c0_20, %c0_21] : memref<8x128xf32, #tpu.memory_space<vmem>>, vector<8x128xf32>
      tpu.vector_store %arg4[%c0_20, %c0_21], %22 {strides = array<i32>} : memref<8x128xf32, #tpu.memory_space<vmem>>, vector<8x128xf32>,
    } else {
    }
    %c0_10 = arith.constant 0 : index
    %c0_11 = arith.constant 0 : index
    %11 = vector.load %arg4[%c0_10, %c0_11] : memref<8x128xf32, #tpu.memory_space<vmem>>, vector<1x128xf32>
    %cst_12 = arith.constant dense<0.000000e+00> : vector<128xf32>
    %12 = vector.multi_reduction <add>, %4, %cst_12 [0] : vector<512x128xf32> to vector<128xf32>
    %13 = vector.shape_cast %12 : vector<128xf32> to vector<1x128xf32>
    %14 = arith.addf %11, %13 : vector<1x128xf32>
    %c0_13 = arith.constant 0 : index
    %c0_14 = arith.constant 0 : index
    %15 = vector.load %arg4[%c0_13, %c0_14] : memref<8x128xf32, #tpu.memory_space<vmem>>, vector<1x128xf32>
    tpu.vector_store %arg4[%c0_13, %c0_14], %14 {strides = array<i32>} : memref<8x128xf32, #tpu.memory_space<vmem>>, vector<1x128xf32>,
    %c1 = arith.constant 1 : index
    %c0_15 = arith.constant 0 : index
    %16 = vector.load %arg4[%c1, %c0_15] : memref<8x128xf32, #tpu.memory_space<vmem>>, vector<1x128xf32>
    %17 = arith.mulf %4, %4 : vector<512x128xf32>
    %cst_16 = arith.constant dense<0.000000e+00> : vector<128xf32>
    %18 = vector.multi_reduction <add>, %17, %cst_16 [0] : vector<512x128xf32> to vector<128xf32>
    %19 = vector.shape_cast %18 : vector<128xf32> to vector<1x128xf32>
    %20 = arith.addf %16, %19 : vector<1x128xf32>
    %c1_17 = arith.constant 1 : index
    %c0_18 = arith.constant 0 : index
    %21 = vector.load %arg4[%c1_17, %c0_18] : memref<8x128xf32, #tpu.memory_space<vmem>>, vector<1x128xf32>
    tpu.vector_store %arg4[%c1_17, %c0_18], %20 {strides = array<i32>} : memref<8x128xf32, #tpu.memory_space<vmem>>, vector<1x128xf32>,
    return
  }
  func.func @transform_0(%arg0: i32) -> (i32, i32, i32, i32) {
    %c0_i32 = arith.constant 0 : i32
    %c0_i32_0 = arith.constant 0 : i32
    %c0_i32_1 = arith.constant 0 : i32
    %c0_i32_2 = arith.constant 0 : i32
    return %arg0, %c0_i32, %c0_i32_0, %c0_i32_1 : i32, i32, i32, i32
  }
  func.func @transform_1(%arg0: i32) -> (i32, i32) {
    %c0_i32 = arith.constant 0 : i32
    %c0_i32_0 = arith.constant 0 : i32
    %c0_i32_1 = arith.constant 0 : i32
    return %c0_i32, %c0_i32_0 : i32, i32
  }
  func.func @transform_2(%arg0: i32) -> (i32, i32, i32, i32) {
    %c0_i32 = arith.constant 0 : i32
    %c0_i32_0 = arith.constant 0 : i32
    %c0_i32_1 = arith.constant 0 : i32
    %c0_i32_2 = arith.constant 0 : i32
    return %arg0, %c0_i32, %c0_i32_0, %c0_i32_1 : i32, i32, i32, i32
  }
  func.func @transform_3(%arg0: i32) -> (i32, i32) {
    %c0_i32 = arith.constant 0 : i32
    %c0_i32_0 = arith.constant 0 : i32
    %c0_i32_1 = arith.constant 0 : i32
    return %c0_i32, %c0_i32_0 : i32, i32
  }
}

module attributes {stable_mosaic.version = 11 : i64} {
  func.func @bn_relu_conv3x3_stats_kernel(%arg0: i32, %arg1: memref<2x16x16x128xbf16, #tpu.memory_space<vmem>>, %arg2: memref<8x128xf32, #tpu.memory_space<vmem>>, %arg3: memref<8x128xf32, #tpu.memory_space<vmem>>, %arg4: memref<1152x128xbf16, #tpu.memory_space<vmem>>, %arg5: memref<2x16x16x128xbf16, #tpu.memory_space<vmem>>, %arg6: memref<8x128xf32, #tpu.memory_space<vmem>>) attributes {dimension_semantics = [#tpu.dimension_semantics<arbitrary>], iteration_bounds = array<i64: 1>, scalar_prefetch = 0 : i64, scratch_operands = 0 : i64, tpu.core_type = #tpu.core_type<tc>, window_params = [{transform_indices = @transform_0, window_bounds = array<i64: 2, 16, 16, 128>}, {pipeline_mode = #tpu.pipeline_mode<synchronous>, transform_indices = @transform_1, window_bounds = array<i64: 8, 128>}, {pipeline_mode = #tpu.pipeline_mode<synchronous>, transform_indices = @transform_2, window_bounds = array<i64: 8, 128>}, {pipeline_mode = #tpu.pipeline_mode<synchronous>, transform_indices = @transform_3, window_bounds = array<i64: 1152, 128>}, {transform_indices = @transform_4, window_bounds = array<i64: 2, 16, 16, 128>}, {pipeline_mode = #tpu.pipeline_mode<synchronous>, transform_indices = @transform_5, window_bounds = array<i64: 8, 128>}]} {
    %c0 = arith.constant 0 : index
    %c0_0 = arith.constant 0 : index
    %0 = vector.load %arg2[%c0, %c0_0] : memref<8x128xf32, #tpu.memory_space<vmem>>, vector<1x128xf32>
    %cst = arith.constant 0.001953125 : f32
    %1 = vector.broadcast %cst : f32 to vector<1x128xf32>
    %2 = arith.mulf %0, %1 : vector<1x128xf32>
    %c1 = arith.constant 1 : index
    %c0_1 = arith.constant 0 : index
    %3 = vector.load %arg2[%c1, %c0_1] : memref<8x128xf32, #tpu.memory_space<vmem>>, vector<1x128xf32>
    %cst_2 = arith.constant 0.001953125 : f32
    %4 = vector.broadcast %cst_2 : f32 to vector<1x128xf32>
    %5 = arith.mulf %3, %4 : vector<1x128xf32>
    %6 = arith.mulf %2, %2 : vector<1x128xf32>
    %7 = arith.subf %5, %6 : vector<1x128xf32>
    %cst_3 = arith.constant 0.000000e+00 : f32
    %8 = vector.broadcast %cst_3 : f32 to vector<1x128xf32>
    %9 = arith.maximumf %7, %8 : vector<1x128xf32>
    %cst_4 = arith.constant 9.99999974E-6 : f32
    %10 = vector.broadcast %cst_4 : f32 to vector<1x128xf32>
    %11 = arith.addf %9, %10 : vector<1x128xf32>
    %12 = math.rsqrt %11 : vector<1x128xf32>
    %c0_5 = arith.constant 0 : index
    %c0_6 = arith.constant 0 : index
    %13 = vector.load %arg3[%c0_5, %c0_6] : memref<8x128xf32, #tpu.memory_space<vmem>>, vector<1x128xf32>
    %14 = arith.mulf %12, %13 : vector<1x128xf32>
    %c1_7 = arith.constant 1 : index
    %c0_8 = arith.constant 0 : index
    %15 = vector.load %arg3[%c1_7, %c0_8] : memref<8x128xf32, #tpu.memory_space<vmem>>, vector<1x128xf32>
    %16 = arith.mulf %2, %14 : vector<1x128xf32>
    %17 = arith.subf %15, %16 : vector<1x128xf32>
    %c0_9 = arith.constant 0 : index
    %c0_10 = arith.constant 0 : index
    %c0_11 = arith.constant 0 : index
    %c0_12 = arith.constant 0 : index
    %18 = vector.load %arg1[%c0_9, %c0_10, %c0_11, %c0_12] : memref<2x16x16x128xbf16, #tpu.memory_space<vmem>>, vector<2x16x16x128xbf16>
    %19 = arith.extf %18 : vector<2x16x16x128xbf16> to vector<2x16x16x128xf32>
    %20 = vector.shape_cast %14 : vector<1x128xf32> to vector<1x1x1x128xf32>
    %21 = vector.broadcast %20 : vector<1x1x1x128xf32> to vector<2x16x16x128xf32>
    %22 = arith.mulf %19, %21 : vector<2x16x16x128xf32>
    %23 = vector.shape_cast %17 : vector<1x128xf32> to vector<1x1x1x128xf32>
    %24 = vector.broadcast %23 : vector<1x1x1x128xf32> to vector<2x16x16x128xf32>
    %25 = arith.addf %22, %24 : vector<2x16x16x128xf32>
    %cst_13 = arith.constant 0.000000e+00 : f32
    %26 = vector.broadcast %cst_13 : f32 to vector<2x16x16x128xf32>
    %27 = arith.maximumf %25, %26 : vector<2x16x16x128xf32>
    %28 = arith.truncf %27 : vector<2x16x16x128xf32> to vector<2x16x16x128xbf16>
    %cst_14 = arith.constant 0.000000e+00 : bf16
    %29 = vector.broadcast %cst_14 : bf16 to vector<2x1x16x128xbf16>
    %30 = vector.extract_strided_slice %28 {offsets = [0, 0, 0, 0], sizes = [2, 15, 16, 128], strides = [1, 1, 1, 1]} : vector<2x16x16x128xbf16> to vector<2x15x16x128xbf16>
    %31 = tpu.concatenate %29, %30 in 1 : vector<2x1x16x128xbf16>, vector<2x15x16x128xbf16> -> vector<2x16x16x128xbf16>
    %cst_15 = arith.constant 0.000000e+00 : bf16
    %32 = vector.broadcast %cst_15 : bf16 to vector<2x16x1x128xbf16>
    %33 = vector.extract_strided_slice %31 {offsets = [0, 0, 0, 0], sizes = [2, 16, 15, 128], strides = [1, 1, 1, 1]} : vector<2x16x16x128xbf16> to vector<2x16x15x128xbf16>
    %34 = tpu.concatenate %32, %33 in 2 : vector<2x16x1x128xbf16>, vector<2x16x15x128xbf16> -> vector<2x16x16x128xbf16>
    %cst_16 = arith.constant 0.000000e+00 : bf16
    %35 = vector.broadcast %cst_16 : bf16 to vector<2x16x1x128xbf16>
    %36 = vector.extract_strided_slice %31 {offsets = [0, 0, 1, 0], sizes = [2, 16, 15, 128], strides = [1, 1, 1, 1]} : vector<2x16x16x128xbf16> to vector<2x16x15x128xbf16>
    %37 = tpu.concatenate %36, %35 in 2 : vector<2x16x15x128xbf16>, vector<2x16x1x128xbf16> -> vector<2x16x16x128xbf16>
    %cst_17 = arith.constant 0.000000e+00 : bf16
    %38 = vector.broadcast %cst_17 : bf16 to vector<2x16x1x128xbf16>
    %39 = vector.extract_strided_slice %28 {offsets = [0, 0, 0, 0], sizes = [2, 16, 15, 128], strides = [1, 1, 1, 1]} : vector<2x16x16x128xbf16> to vector<2x16x15x128xbf16>
    %40 = tpu.concatenate %38, %39 in 2 : vector<2x16x1x128xbf16>, vector<2x16x15x128xbf16> -> vector<2x16x16x128xbf16>
    %cst_18 = arith.constant 0.000000e+00 : bf16
    %41 = vector.broadcast %cst_18 : bf16 to vector<2x16x1x128xbf16>
    %42 = vector.extract_strided_slice %28 {offsets = [0, 0, 1, 0], sizes = [2, 16, 15, 128], strides = [1, 1, 1, 1]} : vector<2x16x16x128xbf16> to vector<2x16x15x128xbf16>
    %43 = tpu.concatenate %42, %41 in 2 : vector<2x16x15x128xbf16>, vector<2x16x1x128xbf16> -> vector<2x16x16x128xbf16>
    %cst_19 = arith.constant 0.000000e+00 : bf16
    %44 = vector.broadcast %cst_19 : bf16 to vector<2x1x16x128xbf16>
    %45 = vector.extract_strided_slice %28 {offsets = [0, 1, 0, 0], sizes = [2, 15, 16, 128], strides = [1, 1, 1, 1]} : vector<2x16x16x128xbf16> to vector<2x15x16x128xbf16>
    %46 = tpu.concatenate %45, %44 in 1 : vector<2x15x16x128xbf16>, vector<2x1x16x128xbf16> -> vector<2x16x16x128xbf16>
    %cst_20 = arith.constant 0.000000e+00 : bf16
    %47 = vector.broadcast %cst_20 : bf16 to vector<2x16x1x128xbf16>
    %48 = vector.extract_strided_slice %46 {offsets = [0, 0, 0, 0], sizes = [2, 16, 15, 128], strides = [1, 1, 1, 1]} : vector<2x16x16x128xbf16> to vector<2x16x15x128xbf16>
    %49 = tpu.concatenate %47, %48 in 2 : vector<2x16x1x128xbf16>, vector<2x16x15x128xbf16> -> vector<2x16x16x128xbf16>
    %cst_21 = arith.constant 0.000000e+00 : bf16
    %50 = vector.broadcast %cst_21 : bf16 to vector<2x16x1x128xbf16>
    %51 = vector.extract_strided_slice %46 {offsets = [0, 0, 1, 0], sizes = [2, 16, 15, 128], strides = [1, 1, 1, 1]} : vector<2x16x16x128xbf16> to vector<2x16x15x128xbf16>
    %52 = tpu.concatenate %51, %50 in 2 : vector<2x16x15x128xbf16>, vector<2x16x1x128xbf16> -> vector<2x16x16x128xbf16>
    %53 = tpu.concatenate %34, %31, %37, %40, %28, %43, %49, %46, %52 in 3 : vector<2x16x16x128xbf16>, vector<2x16x16x128xbf16>, vector<2x16x16x128xbf16>, vector<2x16x16x128xbf16>, vector<2x16x16x128xbf16>, vector<2x16x16x128xbf16>, vector<2x16x16x128xbf16>, vector<2x16x16x128xbf16>, vector<2x16x16x128xbf16> -> vector<2x16x16x1152xbf16>
    %54 = vector.shape_cast %53 : vector<2x16x16x1152xbf16> to vector<512x1152xbf16>
    %c0_22 = arith.constant 0 : index
    %c0_23 = arith.constant 0 : index
    %55 = vector.load %arg4[%c0_22, %c0_23] : memref<1152x128xbf16, #tpu.memory_space<vmem>>, vector<1152x128xbf16>
    %cst_24 = arith.constant dense<0.000000e+00> : vector<512x128xf32>
    %56 = tpu.matmul %54, %55, %cst_24 {dimension_numbers = #tpu.dot_dimension_numbers<[1], [0], [0], [1], [0, 0, 1, 1], [], []>} : vector<512x1152xbf16>, vector<1152x128xbf16>, vector<512x128xf32> -> vector<512x128xf32>
    %57 = vector.shape_cast %56 : vector<512x128xf32> to vector<2x16x16x128xf32>
    %58 = arith.truncf %57 : vector<2x16x16x128xf32> to vector<2x16x16x128xbf16>
    %c0_25 = arith.constant 0 : index
    %c0_26 = arith.constant 0 : index
    %c0_27 = arith.constant 0 : index
    %c0_28 = arith.constant 0 : index
    %59 = vector.load %arg5[%c0_25, %c0_26, %c0_27, %c0_28] : memref<2x16x16x128xbf16, #tpu.memory_space<vmem>>, vector<2x16x16x128xbf16>
    tpu.vector_store %arg5[%c0_25, %c0_26, %c0_27, %c0_28], %58 {strides = array<i32>} : memref<2x16x16x128xbf16, #tpu.memory_space<vmem>>, vector<2x16x16x128xbf16>,
    %c0_i32 = arith.constant 0 : i32
    %60 = arith.cmpi eq, %arg0, %c0_i32 : i32
    %61 = arith.extui %60 : i1 to i32
    %c0_i32_29 = arith.constant 0 : i32
    %62 = arith.cmpi ne, %61, %c0_i32_29 : i32
    scf.if %62 {
      %cst_40 = arith.constant 0.000000e+00 : f32
      %74 = vector.broadcast %cst_40 : f32 to vector<8x128xf32>
      %c0_41 = arith.constant 0 : index
      %c0_42 = arith.constant 0 : index
      %75 = vector.load %arg6[%c0_41, %c0_42] : memref<8x128xf32, #tpu.memory_space<vmem>>, vector<8x128xf32>
      tpu.vector_store %arg6[%c0_41, %c0_42], %74 {strides = array<i32>} : memref<8x128xf32, #tpu.memory_space<vmem>>, vector<8x128xf32>,
    } else {
    }
    %c0_30 = arith.constant 0 : index
    %c0_31 = arith.constant 0 : index
    %63 = vector.load %arg6[%c0_30, %c0_31] : memref<8x128xf32, #tpu.memory_space<vmem>>, vector<1x128xf32>
    %cst_32 = arith.constant dense<0.000000e+00> : vector<128xf32>
    %64 = vector.multi_reduction <add>, %56, %cst_32 [0] : vector<512x128xf32> to vector<128xf32>
    %65 = vector.shape_cast %64 : vector<128xf32> to vector<1x128xf32>
    %66 = arith.addf %63, %65 : vector<1x128xf32>
    %c0_33 = arith.constant 0 : index
    %c0_34 = arith.constant 0 : index
    %67 = vector.load %arg6[%c0_33, %c0_34] : memref<8x128xf32, #tpu.memory_space<vmem>>, vector<1x128xf32>
    tpu.vector_store %arg6[%c0_33, %c0_34], %66 {strides = array<i32>} : memref<8x128xf32, #tpu.memory_space<vmem>>, vector<1x128xf32>,
    %c1_35 = arith.constant 1 : index
    %c0_36 = arith.constant 0 : index
    %68 = vector.load %arg6[%c1_35, %c0_36] : memref<8x128xf32, #tpu.memory_space<vmem>>, vector<1x128xf32>
    %69 = arith.mulf %56, %56 : vector<512x128xf32>
    %cst_37 = arith.constant dense<0.000000e+00> : vector<128xf32>
    %70 = vector.multi_reduction <add>, %69, %cst_37 [0] : vector<512x128xf32> to vector<128xf32>
    %71 = vector.shape_cast %70 : vector<128xf32> to vector<1x128xf32>
    %72 = arith.addf %68, %71 : vector<1x128xf32>
    %c1_38 = arith.constant 1 : index
    %c0_39 = arith.constant 0 : index
    %73 = vector.load %arg6[%c1_38, %c0_39] : memref<8x128xf32, #tpu.memory_space<vmem>>, vector<1x128xf32>
    tpu.vector_store %arg6[%c1_38, %c0_39], %72 {strides = array<i32>} : memref<8x128xf32, #tpu.memory_space<vmem>>, vector<1x128xf32>,
    return
  }
  func.func @transform_0(%arg0: i32) -> (i32, i32, i32, i32) {
    %c0_i32 = arith.constant 0 : i32
    %c0_i32_0 = arith.constant 0 : i32
    %c0_i32_1 = arith.constant 0 : i32
    %c0_i32_2 = arith.constant 0 : i32
    return %arg0, %c0_i32, %c0_i32_0, %c0_i32_1 : i32, i32, i32, i32
  }
  func.func @transform_1(%arg0: i32) -> (i32, i32) {
    %c0_i32 = arith.constant 0 : i32
    %c0_i32_0 = arith.constant 0 : i32
    %c0_i32_1 = arith.constant 0 : i32
    return %c0_i32, %c0_i32_0 : i32, i32
  }
  func.func @transform_2(%arg0: i32) -> (i32, i32) {
    %c0_i32 = arith.constant 0 : i32
    %c0_i32_0 = arith.constant 0 : i32
    %c0_i32_1 = arith.constant 0 : i32
    return %c0_i32, %c0_i32_0 : i32, i32
  }
  func.func @transform_3(%arg0: i32) -> (i32, i32) {
    %c0_i32 = arith.constant 0 : i32
    %c0_i32_0 = arith.constant 0 : i32
    %c0_i32_1 = arith.constant 0 : i32
    return %c0_i32, %c0_i32_0 : i32, i32
  }
  func.func @transform_4(%arg0: i32) -> (i32, i32, i32, i32) {
    %c0_i32 = arith.constant 0 : i32
    %c0_i32_0 = arith.constant 0 : i32
    %c0_i32_1 = arith.constant 0 : i32
    %c0_i32_2 = arith.constant 0 : i32
    return %arg0, %c0_i32, %c0_i32_0, %c0_i32_1 : i32, i32, i32, i32
  }
  func.func @transform_5(%arg0: i32) -> (i32, i32) {
    %c0_i32 = arith.constant 0 : i32
    %c0_i32_0 = arith.constant 0 : i32
    %c0_i32_1 = arith.constant 0 : i32
    return %c0_i32, %c0_i32_0 : i32, i32
  }
}

module attributes {stable_mosaic.version = 11 : i64} {
  func.func @bn_relu_conv1x1_stats_kernel(%arg0: i32, %arg1: memref<2x16x16x128xbf16, #tpu.memory_space<vmem>>, %arg2: memref<8x128xf32, #tpu.memory_space<vmem>>, %arg3: memref<8x128xf32, #tpu.memory_space<vmem>>, %arg4: memref<128x128xbf16, #tpu.memory_space<vmem>>, %arg5: memref<2x16x16x128xbf16, #tpu.memory_space<vmem>>, %arg6: memref<8x128xf32, #tpu.memory_space<vmem>>) attributes {dimension_semantics = [#tpu.dimension_semantics<arbitrary>], iteration_bounds = array<i64: 1>, scalar_prefetch = 0 : i64, scratch_operands = 0 : i64, tpu.core_type = #tpu.core_type<tc>, window_params = [{transform_indices = @transform_0, window_bounds = array<i64: 2, 16, 16, 128>}, {pipeline_mode = #tpu.pipeline_mode<synchronous>, transform_indices = @transform_1, window_bounds = array<i64: 8, 128>}, {pipeline_mode = #tpu.pipeline_mode<synchronous>, transform_indices = @transform_2, window_bounds = array<i64: 8, 128>}, {pipeline_mode = #tpu.pipeline_mode<synchronous>, transform_indices = @transform_3, window_bounds = array<i64: 128, 128>}, {transform_indices = @transform_4, window_bounds = array<i64: 2, 16, 16, 128>}, {pipeline_mode = #tpu.pipeline_mode<synchronous>, transform_indices = @transform_5, window_bounds = array<i64: 8, 128>}]} {
    %c0 = arith.constant 0 : index
    %c0_0 = arith.constant 0 : index
    %0 = vector.load %arg2[%c0, %c0_0] : memref<8x128xf32, #tpu.memory_space<vmem>>, vector<1x128xf32>
    %cst = arith.constant 0.001953125 : f32
    %1 = vector.broadcast %cst : f32 to vector<1x128xf32>
    %2 = arith.mulf %0, %1 : vector<1x128xf32>
    %c1 = arith.constant 1 : index
    %c0_1 = arith.constant 0 : index
    %3 = vector.load %arg2[%c1, %c0_1] : memref<8x128xf32, #tpu.memory_space<vmem>>, vector<1x128xf32>
    %cst_2 = arith.constant 0.001953125 : f32
    %4 = vector.broadcast %cst_2 : f32 to vector<1x128xf32>
    %5 = arith.mulf %3, %4 : vector<1x128xf32>
    %6 = arith.mulf %2, %2 : vector<1x128xf32>
    %7 = arith.subf %5, %6 : vector<1x128xf32>
    %cst_3 = arith.constant 0.000000e+00 : f32
    %8 = vector.broadcast %cst_3 : f32 to vector<1x128xf32>
    %9 = arith.maximumf %7, %8 : vector<1x128xf32>
    %cst_4 = arith.constant 9.99999974E-6 : f32
    %10 = vector.broadcast %cst_4 : f32 to vector<1x128xf32>
    %11 = arith.addf %9, %10 : vector<1x128xf32>
    %12 = math.rsqrt %11 : vector<1x128xf32>
    %c0_5 = arith.constant 0 : index
    %c0_6 = arith.constant 0 : index
    %13 = vector.load %arg3[%c0_5, %c0_6] : memref<8x128xf32, #tpu.memory_space<vmem>>, vector<1x128xf32>
    %14 = arith.mulf %12, %13 : vector<1x128xf32>
    %c1_7 = arith.constant 1 : index
    %c0_8 = arith.constant 0 : index
    %15 = vector.load %arg3[%c1_7, %c0_8] : memref<8x128xf32, #tpu.memory_space<vmem>>, vector<1x128xf32>
    %16 = arith.mulf %2, %14 : vector<1x128xf32>
    %17 = arith.subf %15, %16 : vector<1x128xf32>
    %c0_9 = arith.constant 0 : index
    %c0_10 = arith.constant 0 : index
    %c0_11 = arith.constant 0 : index
    %c0_12 = arith.constant 0 : index
    %18 = vector.load %arg1[%c0_9, %c0_10, %c0_11, %c0_12] : memref<2x16x16x128xbf16, #tpu.memory_space<vmem>>, vector<2x16x16x128xbf16>
    %19 = arith.extf %18 : vector<2x16x16x128xbf16> to vector<2x16x16x128xf32>
    %20 = vector.shape_cast %14 : vector<1x128xf32> to vector<1x1x1x128xf32>
    %21 = vector.broadcast %20 : vector<1x1x1x128xf32> to vector<2x16x16x128xf32>
    %22 = arith.mulf %19, %21 : vector<2x16x16x128xf32>
    %23 = vector.shape_cast %17 : vector<1x128xf32> to vector<1x1x1x128xf32>
    %24 = vector.broadcast %23 : vector<1x1x1x128xf32> to vector<2x16x16x128xf32>
    %25 = arith.addf %22, %24 : vector<2x16x16x128xf32>
    %cst_13 = arith.constant 0.000000e+00 : f32
    %26 = vector.broadcast %cst_13 : f32 to vector<2x16x16x128xf32>
    %27 = arith.maximumf %25, %26 : vector<2x16x16x128xf32>
    %28 = vector.shape_cast %27 : vector<2x16x16x128xf32> to vector<512x128xf32>
    %29 = arith.truncf %28 : vector<512x128xf32> to vector<512x128xbf16>
    %c0_14 = arith.constant 0 : index
    %c0_15 = arith.constant 0 : index
    %30 = vector.load %arg4[%c0_14, %c0_15] : memref<128x128xbf16, #tpu.memory_space<vmem>>, vector<128x128xbf16>
    %cst_16 = arith.constant dense<0.000000e+00> : vector<512x128xf32>
    %31 = tpu.matmul %29, %30, %cst_16 {dimension_numbers = #tpu.dot_dimension_numbers<[1], [0], [0], [1], [0, 0, 1, 1], [], []>} : vector<512x128xbf16>, vector<128x128xbf16>, vector<512x128xf32> -> vector<512x128xf32>
    %32 = vector.shape_cast %31 : vector<512x128xf32> to vector<2x16x16x128xf32>
    %33 = arith.truncf %32 : vector<2x16x16x128xf32> to vector<2x16x16x128xbf16>
    %c0_17 = arith.constant 0 : index
    %c0_18 = arith.constant 0 : index
    %c0_19 = arith.constant 0 : index
    %c0_20 = arith.constant 0 : index
    %34 = vector.load %arg5[%c0_17, %c0_18, %c0_19, %c0_20] : memref<2x16x16x128xbf16, #tpu.memory_space<vmem>>, vector<2x16x16x128xbf16>
    tpu.vector_store %arg5[%c0_17, %c0_18, %c0_19, %c0_20], %33 {strides = array<i32>} : memref<2x16x16x128xbf16, #tpu.memory_space<vmem>>, vector<2x16x16x128xbf16>,
    %c0_i32 = arith.constant 0 : i32
    %35 = arith.cmpi eq, %arg0, %c0_i32 : i32
    %36 = arith.extui %35 : i1 to i32
    %c0_i32_21 = arith.constant 0 : i32
    %37 = arith.cmpi ne, %36, %c0_i32_21 : i32
    scf.if %37 {
      %cst_32 = arith.constant 0.000000e+00 : f32
      %49 = vector.broadcast %cst_32 : f32 to vector<8x128xf32>
      %c0_33 = arith.constant 0 : index
      %c0_34 = arith.constant 0 : index
      %50 = vector.load %arg6[%c0_33, %c0_34] : memref<8x128xf32, #tpu.memory_space<vmem>>, vector<8x128xf32>
      tpu.vector_store %arg6[%c0_33, %c0_34], %49 {strides = array<i32>} : memref<8x128xf32, #tpu.memory_space<vmem>>, vector<8x128xf32>,
    } else {
    }
    %c0_22 = arith.constant 0 : index
    %c0_23 = arith.constant 0 : index
    %38 = vector.load %arg6[%c0_22, %c0_23] : memref<8x128xf32, #tpu.memory_space<vmem>>, vector<1x128xf32>
    %cst_24 = arith.constant dense<0.000000e+00> : vector<128xf32>
    %39 = vector.multi_reduction <add>, %31, %cst_24 [0] : vector<512x128xf32> to vector<128xf32>
    %40 = vector.shape_cast %39 : vector<128xf32> to vector<1x128xf32>
    %41 = arith.addf %38, %40 : vector<1x128xf32>
    %c0_25 = arith.constant 0 : index
    %c0_26 = arith.constant 0 : index
    %42 = vector.load %arg6[%c0_25, %c0_26] : memref<8x128xf32, #tpu.memory_space<vmem>>, vector<1x128xf32>
    tpu.vector_store %arg6[%c0_25, %c0_26], %41 {strides = array<i32>} : memref<8x128xf32, #tpu.memory_space<vmem>>, vector<1x128xf32>,
    %c1_27 = arith.constant 1 : index
    %c0_28 = arith.constant 0 : index
    %43 = vector.load %arg6[%c1_27, %c0_28] : memref<8x128xf32, #tpu.memory_space<vmem>>, vector<1x128xf32>
    %44 = arith.mulf %31, %31 : vector<512x128xf32>
    %cst_29 = arith.constant dense<0.000000e+00> : vector<128xf32>
    %45 = vector.multi_reduction <add>, %44, %cst_29 [0] : vector<512x128xf32> to vector<128xf32>
    %46 = vector.shape_cast %45 : vector<128xf32> to vector<1x128xf32>
    %47 = arith.addf %43, %46 : vector<1x128xf32>
    %c1_30 = arith.constant 1 : index
    %c0_31 = arith.constant 0 : index
    %48 = vector.load %arg6[%c1_30, %c0_31] : memref<8x128xf32, #tpu.memory_space<vmem>>, vector<1x128xf32>
    tpu.vector_store %arg6[%c1_30, %c0_31], %47 {strides = array<i32>} : memref<8x128xf32, #tpu.memory_space<vmem>>, vector<1x128xf32>,
    return
  }
  func.func @transform_0(%arg0: i32) -> (i32, i32, i32, i32) {
    %c0_i32 = arith.constant 0 : i32
    %c0_i32_0 = arith.constant 0 : i32
    %c0_i32_1 = arith.constant 0 : i32
    %c0_i32_2 = arith.constant 0 : i32
    return %arg0, %c0_i32, %c0_i32_0, %c0_i32_1 : i32, i32, i32, i32
  }
  func.func @transform_1(%arg0: i32) -> (i32, i32) {
    %c0_i32 = arith.constant 0 : i32
    %c0_i32_0 = arith.constant 0 : i32
    %c0_i32_1 = arith.constant 0 : i32
    return %c0_i32, %c0_i32_0 : i32, i32
  }
  func.func @transform_2(%arg0: i32) -> (i32, i32) {
    %c0_i32 = arith.constant 0 : i32
    %c0_i32_0 = arith.constant 0 : i32
    %c0_i32_1 = arith.constant 0 : i32
    return %c0_i32, %c0_i32_0 : i32, i32
  }
  func.func @transform_3(%arg0: i32) -> (i32, i32) {
    %c0_i32 = arith.constant 0 : i32
    %c0_i32_0 = arith.constant 0 : i32
    %c0_i32_1 = arith.constant 0 : i32
    return %c0_i32, %c0_i32_0 : i32, i32
  }
  func.func @transform_4(%arg0: i32) -> (i32, i32, i32, i32) {
    %c0_i32 = arith.constant 0 : i32
    %c0_i32_0 = arith.constant 0 : i32
    %c0_i32_1 = arith.constant 0 : i32
    %c0_i32_2 = arith.constant 0 : i32
    return %arg0, %c0_i32, %c0_i32_0, %c0_i32_1 : i32, i32, i32, i32
  }
  func.func @transform_5(%arg0: i32) -> (i32, i32) {
    %c0_i32 = arith.constant 0 : i32
    %c0_i32_0 = arith.constant 0 : i32
    %c0_i32_1 = arith.constant 0 : i32
    return %c0_i32, %c0_i32_0 : i32, i32
  }
}

module attributes {stable_mosaic.version = 11 : i64} {
  func.func @bn_residual_relu_kernel(%arg0: i32, %arg1: memref<2x16x16x128xbf16, #tpu.memory_space<vmem>>, %arg2: memref<8x128xf32, #tpu.memory_space<vmem>>, %arg3: memref<8x128xf32, #tpu.memory_space<vmem>>, %arg4: memref<2x16x16x128xf32, #tpu.memory_space<vmem>>, %arg5: memref<2x16x16x128xf32, #tpu.memory_space<vmem>>) attributes {dimension_semantics = [#tpu.dimension_semantics<parallel>], iteration_bounds = array<i64: 1>, scalar_prefetch = 0 : i64, scratch_operands = 0 : i64, tpu.core_type = #tpu.core_type<tc>, window_params = [{transform_indices = @transform_0, window_bounds = array<i64: 2, 16, 16, 128>}, {pipeline_mode = #tpu.pipeline_mode<synchronous>, transform_indices = @transform_1, window_bounds = array<i64: 8, 128>}, {pipeline_mode = #tpu.pipeline_mode<synchronous>, transform_indices = @transform_2, window_bounds = array<i64: 8, 128>}, {transform_indices = @transform_3, window_bounds = array<i64: 2, 16, 16, 128>}, {transform_indices = @transform_4, window_bounds = array<i64: 2, 16, 16, 128>}]} {
    %c0 = arith.constant 0 : index
    %c0_0 = arith.constant 0 : index
    %0 = vector.load %arg2[%c0, %c0_0] : memref<8x128xf32, #tpu.memory_space<vmem>>, vector<1x128xf32>
    %cst = arith.constant 0.001953125 : f32
    %1 = vector.broadcast %cst : f32 to vector<1x128xf32>
    %2 = arith.mulf %0, %1 : vector<1x128xf32>
    %c1 = arith.constant 1 : index
    %c0_1 = arith.constant 0 : index
    %3 = vector.load %arg2[%c1, %c0_1] : memref<8x128xf32, #tpu.memory_space<vmem>>, vector<1x128xf32>
    %cst_2 = arith.constant 0.001953125 : f32
    %4 = vector.broadcast %cst_2 : f32 to vector<1x128xf32>
    %5 = arith.mulf %3, %4 : vector<1x128xf32>
    %6 = arith.mulf %2, %2 : vector<1x128xf32>
    %7 = arith.subf %5, %6 : vector<1x128xf32>
    %cst_3 = arith.constant 0.000000e+00 : f32
    %8 = vector.broadcast %cst_3 : f32 to vector<1x128xf32>
    %9 = arith.maximumf %7, %8 : vector<1x128xf32>
    %cst_4 = arith.constant 9.99999974E-6 : f32
    %10 = vector.broadcast %cst_4 : f32 to vector<1x128xf32>
    %11 = arith.addf %9, %10 : vector<1x128xf32>
    %12 = math.rsqrt %11 : vector<1x128xf32>
    %c0_5 = arith.constant 0 : index
    %c0_6 = arith.constant 0 : index
    %13 = vector.load %arg3[%c0_5, %c0_6] : memref<8x128xf32, #tpu.memory_space<vmem>>, vector<1x128xf32>
    %14 = arith.mulf %12, %13 : vector<1x128xf32>
    %c1_7 = arith.constant 1 : index
    %c0_8 = arith.constant 0 : index
    %15 = vector.load %arg3[%c1_7, %c0_8] : memref<8x128xf32, #tpu.memory_space<vmem>>, vector<1x128xf32>
    %16 = arith.mulf %2, %14 : vector<1x128xf32>
    %17 = arith.subf %15, %16 : vector<1x128xf32>
    %c0_9 = arith.constant 0 : index
    %c0_10 = arith.constant 0 : index
    %c0_11 = arith.constant 0 : index
    %c0_12 = arith.constant 0 : index
    %18 = vector.load %arg1[%c0_9, %c0_10, %c0_11, %c0_12] : memref<2x16x16x128xbf16, #tpu.memory_space<vmem>>, vector<2x16x16x128xbf16>
    %19 = arith.extf %18 : vector<2x16x16x128xbf16> to vector<2x16x16x128xf32>
    %20 = vector.shape_cast %14 : vector<1x128xf32> to vector<1x1x1x128xf32>
    %21 = vector.broadcast %20 : vector<1x1x1x128xf32> to vector<2x16x16x128xf32>
    %22 = arith.mulf %19, %21 : vector<2x16x16x128xf32>
    %23 = vector.shape_cast %17 : vector<1x128xf32> to vector<1x1x1x128xf32>
    %24 = vector.broadcast %23 : vector<1x1x1x128xf32> to vector<2x16x16x128xf32>
    %25 = arith.addf %22, %24 : vector<2x16x16x128xf32>
    %c0_13 = arith.constant 0 : index
    %c0_14 = arith.constant 0 : index
    %c0_15 = arith.constant 0 : index
    %c0_16 = arith.constant 0 : index
    %26 = vector.load %arg4[%c0_13, %c0_14, %c0_15, %c0_16] : memref<2x16x16x128xf32, #tpu.memory_space<vmem>>, vector<2x16x16x128xf32>
    %27 = arith.addf %25, %26 : vector<2x16x16x128xf32>
    %cst_17 = arith.constant 0.000000e+00 : f32
    %28 = vector.broadcast %cst_17 : f32 to vector<2x16x16x128xf32>
    %29 = arith.maximumf %27, %28 : vector<2x16x16x128xf32>
    %c0_18 = arith.constant 0 : index
    %c0_19 = arith.constant 0 : index
    %c0_20 = arith.constant 0 : index
    %c0_21 = arith.constant 0 : index
    %30 = vector.load %arg5[%c0_18, %c0_19, %c0_20, %c0_21] : memref<2x16x16x128xf32, #tpu.memory_space<vmem>>, vector<2x16x16x128xf32>
    tpu.vector_store %arg5[%c0_18, %c0_19, %c0_20, %c0_21], %29 {strides = array<i32>} : memref<2x16x16x128xf32, #tpu.memory_space<vmem>>, vector<2x16x16x128xf32>,
    return
  }
  func.func @transform_0(%arg0: i32) -> (i32, i32, i32, i32) {
    %c0_i32 = arith.constant 0 : i32
    %c0_i32_0 = arith.constant 0 : i32
    %c0_i32_1 = arith.constant 0 : i32
    %c0_i32_2 = arith.constant 0 : i32
    return %arg0, %c0_i32, %c0_i32_0, %c0_i32_1 : i32, i32, i32, i32
  }
  func.func @transform_1(%arg0: i32) -> (i32, i32) {
    %c0_i32 = arith.constant 0 : i32
    %c0_i32_0 = arith.constant 0 : i32
    %c0_i32_1 = arith.constant 0 : i32
    return %c0_i32, %c0_i32_0 : i32, i32
  }
  func.func @transform_2(%arg0: i32) -> (i32, i32) {
    %c0_i32 = arith.constant 0 : i32
    %c0_i32_0 = arith.constant 0 : i32
    %c0_i32_1 = arith.constant 0 : i32
    return %c0_i32, %c0_i32_0 : i32, i32
  }
  func.func @transform_3(%arg0: i32) -> (i32, i32, i32, i32) {
    %c0_i32 = arith.constant 0 : i32
    %c0_i32_0 = arith.constant 0 : i32
    %c0_i32_1 = arith.constant 0 : i32
    %c0_i32_2 = arith.constant 0 : i32
    return %arg0, %c0_i32, %c0_i32_0, %c0_i32_1 : i32, i32, i32, i32
  }
  func.func @transform_4(%arg0: i32) -> (i32, i32, i32, i32) {
    %c0_i32 = arith.constant 0 : i32
    %c0_i32_0 = arith.constant 0 : i32
    %c0_i32_1 = arith.constant 0 : i32
    %c0_i32_2 = arith.constant 0 : i32
    return %arg0, %c0_i32, %c0_i32_0, %c0_i32_1 : i32, i32, i32, i32
  }
}

</mosaic_0001>

<bundles_post_ra>
// kernel: bottleneck_forward.4
= control target key start
LH: loop header
LB: loop body
LE: loop exit
PB: predicated region body
PF: predicated region fallthrough
CT: control target
= control target key end

     0   :  { %s2016_s1 = inlined_call_operand.vmem [shape: bf16[128,128], index: 1, kind: input, shape index: {}]   ;;  %s2017_s0 = inlined_call_operand.vmem [shape: f32[2,16,16,128], index: 0, kind: input, shape index: {}]   ;;  %s2018_s3 = inlined_call_operand.vmem [shape: f32[8,128], index: 3, kind: output, shape index: {1}]   ;;  %s2019_s2 = inlined_call_operand.vmem [shape: bf16[2,16,16,128], index: 2, kind: output, shape index: {0}]  }
   0x1   :  { %v1468_v0 = vld [vmem:[%s2016_s1] sm:$0xff]   ;;  %v1469_v1 = vld [vmem:[%s2016_s1 + $0x8] sm:$0xff]   ;;  %v1470_v2 = vld [vmem:[%s2016_s1 + $0x10] sm:$0xff]  }
   0x2   :  { %1371 = vmatprep.subr.bf16.mxu0 %v1468_v0  ;;  %1451 = vmatprep.subr.bf16.mxu1 %v1468_v0  ;;  %v1471_v3 = vld [vmem:[%s2016_s1 + $0x18] sm:$0xff]   ;;  %v14_v4 = vld [vmem:[%s2017_s0] sm:$0xff]  ;;  %v15_v5 = vld [vmem:[%s2017_s0 + $0x8] sm:$0xff] }
   0x3   :  { %1372 = vmatpush3.bf16.msra.mxu0 %v1468_v0  ;;  %1459 = vmatpush3.bf16.msra.mxu1 %v1468_v0  ;;  %v78_v6 = vpack.c.bf16 %v15_v5, %v14_v4  ;;  %v1472_v7 = vld [vmem:[%s2016_s1 + $0x20] sm:$0xff]   ;;  %v1473_v8 = vld [vmem:[%s2016_s1 + $0x28] sm:$0xff]   ;;  %v1474_v11 = vld [vmem:[%s2016_s1 + $0x30] sm:$0xff]  }
   0x4   :  { %1373 = vmatprep.subr.bf16.mxu0 %v1469_v1  ;;  %1452 = vmatprep.subr.bf16.mxu1 %v1469_v1  ;;  %v46_v9 = vld [vmem:[%s2017_s0 + $0x100] sm:$0xff]  ;;  %v47_v10 = vld [vmem:[%s2017_s0 + $0x108] sm:$0xff]  ;;  %v1475_v13 = vld [vmem:[%s2016_s1 + $0x38] sm:$0xff]  }
   0x5   :  { %1387 = vmatprep.mubr.bf16.mxu0 %v78_v6  ;;  %v94_v12 = vpack.c.bf16 %v47_v10, %v46_v9  ;;  %v16_v14 = vld [vmem:[%s2017_s0 + $0x10] sm:$0xff]  ;;  %v17_v15 = vld [vmem:[%s2017_s0 + $0x18] sm:$0xff]  ;;  %v18_v16 = vld [vmem:[%s2017_s0 + $0x20] sm:$0xff] }
   0x6   :  { %v19_v17 = vld [vmem:[%s2017_s0 + $0x28] sm:$0xff]  ;;  %v48_v18 = vld [vmem:[%s2017_s0 + $0x110] sm:$0xff]  ;;  %v49_v19 = vld [vmem:[%s2017_s0 + $0x118] sm:$0xff]  ;;  %v79_v22 = vpack.c.bf16 %v17_v15, %v16_v14 }
   0x7   :  { %1374 = vmatpush3.bf16.msra.mxu0 %v1469_v1  ;;  %1460 = vmatpush3.bf16.msra.mxu1 %v1469_v1  ;;  %v50_v20 = vld [vmem:[%s2017_s0 + $0x120] sm:$0xff]  ;;  %v51_v21 = vld [vmem:[%s2017_s0 + $0x128] sm:$0xff]  ;;  %v80_v23 = vpack.c.bf16 %v19_v17, %v18_v16  ;;  %v95_v24 = vpack.c.bf16 %v49_v19, %v48_v18  ;;  %v20_v26 = vld [vmem:[%s2017_s0 + $0x30] sm:$0xff] }
   0x8   :  { %1375 = vmatprep.subr.bf16.mxu0 %v1470_v2  ;;  %1453 = vmatprep.subr.bf16.mxu1 %v1470_v2  ;;  %v96_v25 = vpack.c.bf16 %v51_v21, %v50_v20  ;;  %v21_v27 = vld [vmem:[%s2017_s0 + $0x38] sm:$0xff]  ;;  %v22_v28 = vld [vmem:[%s2017_s0 + $0x40] sm:$0xff]  ;;  %v23_v29 = vld [vmem:[%s2017_s0 + $0x48] sm:$0xff] }
   0x9   :  { %1419 = vmatprep.mubr.bf16.mxu1 %v94_v12  ;;  %v52_v30 = vld [vmem:[%s2017_s0 + $0x130] sm:$0xff]  ;;  %v53_v31 = vld [vmem:[%s2017_s0 + $0x138] sm:$0xff]  ;;  %v54_v32 = vld [vmem:[%s2017_s0 + $0x140] sm:$0xff]  ;;  %v81_v34 = vpack.c.bf16 %v21_v27, %v20_v26  ;;  %v82_v35 = vpack.c.bf16 %v23_v29, %v22_v28 }
   0xa   :  { %v55_v33 = vld [vmem:[%s2017_s0 + $0x148] sm:$0xff]  ;;  %v97_v36 = vpack.c.bf16 %v53_v31, %v52_v30  ;;  %v24_v38 = vld [vmem:[%s2017_s0 + $0x50] sm:$0xff]  ;;  %v25_v39 = vld [vmem:[%s2017_s0 + $0x58] sm:$0xff] }
   0xb   :  { %1376 = vmatpush3.bf16.msra.mxu0 %v1470_v2  ;;  %1461 = vmatpush3.bf16.msra.mxu1 %v1470_v2  ;;  %v98_v37 = vpack.c.bf16 %v55_v33, %v54_v32  ;;  %v26_v40 = vld [vmem:[%s2017_s0 + $0x60] sm:$0xff]  ;;  %v27_v41 = vld [vmem:[%s2017_s0 + $0x68] sm:$0xff]  ;;  %v56_v42 = vld [vmem:[%s2017_s0 + $0x150] sm:$0xff]  ;;  %v83_v46 = vpack.c.bf16 %v25_v39, %v24_v38 }
   0xc   :  { %1377 = vmatprep.subr.bf16.mxu0 %v1471_v3  ;;  %1454 = vmatprep.subr.bf16.mxu1 %v1471_v3  ;;  %v57_v43 = vld [vmem:[%s2017_s0 + $0x158] sm:$0xff]  ;;  %v58_v44 = vld [vmem:[%s2017_s0 + $0x160] sm:$0xff]  ;;  %v59_v45 = vld [vmem:[%s2017_s0 + $0x168] sm:$0xff]  ;;  %v84_v47 = vpack.c.bf16 %v27_v41, %v26_v40  ;;  %v1476_v40 = vmov 0.0  }
   0xd   :  { %v99_v48 = vpack.c.bf16 %v57_v43, %v56_v42  ;;  %v100_v49 = vpack.c.bf16 %v59_v45, %v58_v44  ;;  %v28_v50 = vld [vmem:[%s2017_s0 + $0x70] sm:$0xff]  ;;  %v29_v51 = vld [vmem:[%s2017_s0 + $0x78] sm:$0xff]  ;;  %v30_v52 = vld [vmem:[%s2017_s0 + $0x80] sm:$0xff]  ;;  %787 = vst [vmem:[%s2018_s3] sm:$0xff] %v1476_v40 }
   0xe   :  { %v31_v53 = vld [vmem:[%s2017_s0 + $0x88] sm:$0xff]  ;;  %v60_v54 = vld [vmem:[%s2017_s0 + $0x170] sm:$0xff]  ;;  %v61_v55 = vld [vmem:[%s2017_s0 + $0x178] sm:$0xff]  ;;  %v85_v58 = vpack.c.bf16 %v29_v51, %v28_v50 }
   0xf   :  { %1378 = vmatpush3.bf16.msra.mxu0 %v1471_v3  ;;  %1462 = vmatpush3.bf16.msra.mxu1 %v1471_v3  ;;  %v62_v56 = vld [vmem:[%s2017_s0 + $0x180] sm:$0xff]  ;;  %v63_v57 = vld [vmem:[%s2017_s0 + $0x188] sm:$0xff]  ;;  %v86_v59 = vpack.c.bf16 %v31_v53, %v30_v52  ;;  %v101_v60 = vpack.c.bf16 %v61_v55, %v60_v54  ;;  %v32_v62 = vld [vmem:[%s2017_s0 + $0x90] sm:$0xff] }
  0x10   :  { %1379 = vmatprep.subr.bf16.mxu0 %v1472_v7  ;;  %1455 = vmatprep.subr.bf16.mxu1 %v1472_v7  ;;  %v102_v61 = vpack.c.bf16 %v63_v57, %v62_v56  ;;  %v33_v63 = vld [vmem:[%s2017_s0 + $0x98] sm:$0xff]  ;;  %v34_v0 = vld [vmem:[%s2017_s0 + $0xa0] sm:$0xff]  ;;  %v35_v1 = vld [vmem:[%s2017_s0 + $0xa8] sm:$0xff] }
  0x11   :  { %v64_v2 = vld [vmem:[%s2017_s0 + $0x190] sm:$0xff]  ;;  %v65_v3 = vld [vmem:[%s2017_s0 + $0x198] sm:$0xff]  ;;  %v66_v4 = vld [vmem:[%s2017_s0 + $0x1a0] sm:$0xff]  ;;  %v87_v6 = vpack.c.bf16 %v33_v63, %v32_v62 }
  0x12   :  { %v67_v5 = vld [vmem:[%s2017_s0 + $0x1a8] sm:$0xff]  ;;  %v36_v10 = vld [vmem:[%s2017_s0 + $0xb0] sm:$0xff]  ;;  %v38_v12 = vld [vmem:[%s2017_s0 + $0xc0] sm:$0xff] }
  0x13   :  { %1380 = vmatpush3.bf16.msra.mxu0 %v1472_v7  ;;  %1463 = vmatpush3.bf16.msra.mxu1 %v1472_v7  ;;  %v88_v7 = vpack.c.bf16 %v35_v1, %v34_v0  ;;  %v104_v9 = vpack.c.bf16 %v67_v5, %v66_v4  ;;  %v68_v14 = vld [vmem:[%s2017_s0 + $0x1b0] sm:$0xff]  ;;  %v69_v15 = vld [vmem:[%s2017_s0 + $0x1b8] sm:$0xff]  ;;  %v70_v16 = vld [vmem:[%s2017_s0 + $0x1c0] sm:$0xff] }
  0x14   :  { %1381 = vmatprep.subr.bf16.mxu0 %v1473_v8  ;;  %1456 = vmatprep.subr.bf16.mxu1 %v1473_v8  ;;  %v71_v17 = vld [vmem:[%s2017_s0 + $0x1c8] sm:$0xff]  ;;  %v105_v20 = vpack.c.bf16 %v69_v15, %v68_v14  ;;  %v72_v26 = vld [vmem:[%s2017_s0 + $0x1d0] sm:$0xff]  ;;  %v73_v27 = vld [vmem:[%s2017_s0 + $0x1d8] sm:$0xff] }
  0x15   :  { %v106_v21 = vpack.c.bf16 %v71_v17, %v70_v16  ;;  %v74_v28 = vld [vmem:[%s2017_s0 + $0x1e0] sm:$0xff]  ;;  %v75_v29 = vld [vmem:[%s2017_s0 + $0x1e8] sm:$0xff]  ;;  %v107_v32 = vpack.c.bf16 %v73_v27, %v72_v26 }
  0x16   :  { %v108_v33 = vpack.c.bf16 %v75_v29, %v74_v28 }
  0x17   :  { %1382 = vmatpush3.bf16.msra.mxu0 %v1473_v8  ;;  %1464 = vmatpush3.bf16.msra.mxu1 %v1473_v8  ;;  %v103_v8 = vpack.c.bf16 %v65_v3, %v64_v2 }
  0x18   :  { %1383 = vmatprep.subr.bf16.mxu0 %v1474_v11  ;;  %1457 = vmatprep.subr.bf16.mxu1 %v1474_v11 }
  0x1b   :  { %1384 = vmatpush3.bf16.msra.mxu0 %v1474_v11  ;;  %1465 = vmatpush3.bf16.msra.mxu1 %v1474_v11  ;;  %v37_v11 = vld [vmem:[%s2017_s0 + $0xb8] sm:$0xff] }
  0x1c   :  { %1385 = vmatprep.subr.bf16.mxu0 %v1475_v13  ;;  %1458 = vmatprep.subr.bf16.mxu1 %v1475_v13  ;;  %v89_v18 = vpack.c.bf16 %v37_v11, %v36_v10 }
  0x1f   :  { %1386 = vmatpush3.bf16.msra.mxu0 %v1475_v13  ;;  %1466 = vmatpush3.bf16.msra.mxu1 %v1475_v13  ;;  %v39_v13 = vld [vmem:[%s2017_s0 + $0xc8] sm:$0xff] }
  0x20   :  { %v90_v19 = vpack.c.bf16 %v39_v13, %v38_v12 }
  0x22   :  { %1388 = vmatmul.mubr.bf16.vlgmr.msra.gmra.mrb[0].mxu0 %v79_v22  ;;  %1420 = vmatmul.mubr.bf16.vlgmr.msra.gmra.mrb[0].mxu1 %v95_v24  ;;  %v40_v22 = vld [vmem:[%s2017_s0 + $0xd0] sm:$0xff]  ;;  %v42_v24 = vld [vmem:[%s2017_s0 + $0xe0] sm:$0xff] }
  0x23   :  { %1391 = vmatprep.mubr.bf16.mxu0 %v80_v23  ;;  %1423 = vmatprep.mubr.bf16.mxu1 %v96_v25  ;;  %v41_v23 = vld [vmem:[%s2017_s0 + $0xd8] sm:$0xff]  ;;  %v43_v25 = vld [vmem:[%s2017_s0 + $0xe8] sm:$0xff] }
  0x24   :  { %v91_v30 = vpack.c.bf16 %v41_v23, %v40_v22  ;;  %v92_v31 = vpack.c.bf16 %v43_v25, %v42_v24 }
  0x2a   :  { %1392 = vmatmul.mubr.bf16.gmra.mrb[4].mxu0 %v81_v34  ;;  %1424 = vmatmul.mubr.bf16.gmra.mrb[4].mxu1 %v97_v36  ;;  %v44_v34 = vld [vmem:[%s2017_s0 + $0xf0] sm:$0xff] }
  0x2b   :  { %1395 = vmatprep.mubr.bf16.mxu0 %v82_v35  ;;  %1427 = vmatprep.mubr.bf16.mxu1 %v98_v37  ;;  %v45_v35 = vld [vmem:[%s2017_s0 + $0xf8] sm:$0xff]  ;;  %v76_v36 = vld [vmem:[%s2017_s0 + $0x1f0] sm:$0xff] }
  0x2c   :  { %v77_v37 = vld [vmem:[%s2017_s0 + $0x1f8] sm:$0xff]  ;;  %v93_v38 = vpack.c.bf16 %v45_v35, %v44_v34 }
  0x2d   :  { %v109_v39 = vpack.c.bf16 %v77_v37, %v76_v36 }
  0x32   :  { %1396 = vmatmul.mubr.bf16.gmra.mrb[8].mxu0 %v83_v46  ;;  %1428 = vmatmul.mubr.bf16.gmra.mrb[8].mxu1 %v99_v48 }
  0x33   :  { %1399 = vmatprep.mubr.bf16.mxu0 %v84_v47  ;;  %1431 = vmatprep.mubr.bf16.mxu1 %v100_v49 }
  0x3a   :  { %1400 = vmatmul.mubr.bf16.gmra.mrb[12].mxu0 %v85_v58  ;;  %1432 = vmatmul.mubr.bf16.gmra.mrb[12].mxu1 %v101_v60 }
  0x3b   :  { %1403 = vmatprep.mubr.bf16.mxu0 %v86_v59  ;;  %1435 = vmatprep.mubr.bf16.mxu1 %v102_v61 }
  0x42   :  { %1404 = vmatmul.mubr.bf16.gmra.mrb[16].mxu0 %v87_v6  ;;  %1436 = vmatmul.mubr.bf16.gmra.mrb[16].mxu1 %v103_v8 }
  0x43   :  { %1407 = vmatprep.mubr.bf16.mxu0 %v88_v7  ;;  %1439 = vmatprep.mubr.bf16.mxu1 %v104_v9 }
  0x4a   :  { %1408 = vmatmul.mubr.bf16.gmra.mrb[20].mxu0 %v89_v18  ;;  %1440 = vmatmul.mubr.bf16.gmra.mrb[20].mxu1 %v105_v20 }
  0x4b   :  { %1411 = vmatprep.mubr.bf16.mxu0 %v90_v19  ;;  %1443 = vmatprep.mubr.bf16.mxu1 %v106_v21 }
  0x52   :  { %1412 = vmatmul.mubr.bf16.gmra.mrb[24].mxu0 %v91_v30  ;;  %1444 = vmatmul.mubr.bf16.gmra.mrb[24].mxu1 %v107_v32 }
  0x53   :  { %1415 = vmatprep.mubr.bf16.mxu0 %v92_v31  ;;  %1447 = vmatprep.mubr.bf16.mxu1 %v108_v33 }
  0x5a   :  { %1416 = vmatmul.mubr.bf16.gmra.mrb[28].mxu0 %v93_v38  ;;  %1448 = vmatmul.mubr.bf16.gmra.mrb[28].mxu1 %v109_v39 }
  0xf5   :  { %v1389_v41 = vpop.f32.mrb[0].mxu0  ;;  %v1716_v43 = vpop.f32.mrb[0].mxu1 }
  0xf6   :  { %v208_v42 = vpop.f32.mrb[1].mxu0  ;;  %v1718_v45 = vpop.f32.mrb[1].mxu1  ;;  %v863_v56 = vmul.f32 %v1389_v41, %v1389_v41 }
  0xf7   :  { %v1390_v44 = vpop.f32.mrb[2].mxu0  ;;  %v861_v46 = vmul.f32 %v208_v42, %v208_v42  ;;  %v1720_v49 = vpop.f32.mrb[2].mxu1 }
  0xf8   :  { %v1148_v47 = vpack.c.bf16 %v1390_v44, %v1389_v41  ;;  %v211_v48 = vpop.f32.mrb[3].mxu0  ;;  %v1228_v53 = vpack.c.bf16 %v1720_v49, %v1716_v43  ;;  %v1724_v54 = vpop.f32.mrb[3].mxu1  ;;  %v864_v59 = vmul.f32 %v1390_v44, %v1390_v44 }
  0xf9   :  { %v1143_v50 = vpack.c.bf16 %v211_v48, %v208_v42  ;;  %v789_v51 = vadd.f32 %v211_v48, %v208_v42  ;;  %v862_v52 = vmul.f32 %v211_v48, %v211_v48  ;;  %v1223_v55 = vpack.c.bf16 %v1724_v54, %v1718_v45 }
  0xfa   :  { %1300 = vst [vmem:[%s2019_s2 + $0x8] sm:$0xff] %v1148_v47   ;;  %1316 = vst [vmem:[%s2019_s2 + $0x88] sm:$0xff] %v1228_v53  }
  0xfb   :  { %1144 = vst [vmem:[%s2019_s2] sm:$0xff] %v1143_v50   ;;  %v790_v57 = vadd.f32 %v1389_v41, %v789_v51  ;;  %v925_v58 = vadd.f32 %v862_v52, %v861_v46  ;;  %1315 = vst [vmem:[%s2019_s2 + $0x80] sm:$0xff] %v1223_v55  }
  0xfd   :  { %v926_v60 = vadd.f32 %v925_v58, %v863_v56  ;;  %v1393_v61 = vpop.f32.mrb[4].mxu0  ;;  %v791_v62 = vadd.f32 %v1390_v44, %v790_v57  ;;  %v1740_v0 = vpop.f32.mrb[4].mxu1 }
  0xfe   :  { %v224_v63 = vpop.f32.mrb[5].mxu0  ;;  %v1742_v5 = vpop.f32.mrb[5].mxu1  ;;  %v867_v16 = vmul.f32 %v1393_v61, %v1393_v61 }
  0xff   :  { %v792_v1 = vadd.f32 %v791_v62, %v224_v63  ;;  %v865_v2 = vmul.f32 %v224_v63, %v224_v63  ;;  %v927_v3 = vadd.f32 %v926_v60, %v864_v59  ;;  %v1394_v4 = vpop.f32.mrb[6].mxu0  ;;  %v1744_v8 = vpop.f32.mrb[6].mxu1 }
 0x100   :  { %v1158_v6 = vpack.c.bf16 %v1394_v4, %v1393_v61  ;;  %v227_v7 = vpop.f32.mrb[7].mxu0  ;;  %v1746_v13 = vpop.f32.mrb[7].mxu1  ;;  %v1238_v14 = vpack.c.bf16 %v1744_v8, %v1740_v0  ;;  %v868_v19 = vmul.f32 %v1394_v4, %v1394_v4 }
 0x101   :  { %v928_v9 = vadd.f32 %v927_v3, %v865_v2  ;;  %v1153_v10 = vpack.c.bf16 %v227_v7, %v224_v63  ;;  %v793_v11 = vadd.f32 %v792_v1, %v227_v7  ;;  %v866_v12 = vmul.f32 %v227_v7, %v227_v7 }
 0x102   :  { %1302 = vst [vmem:[%s2019_s2 + $0x18] sm:$0xff] %v1158_v6   ;;  %v1233_v15 = vpack.c.bf16 %v1746_v13, %v1742_v5  ;;  %1318 = vst [vmem:[%s2019_s2 + $0x98] sm:$0xff] %v1238_v14  }
 0x103   :  { %1301 = vst [vmem:[%s2019_s2 + $0x10] sm:$0xff] %v1153_v10   ;;  %v794_v17 = vadd.f32 %v1393_v61, %v793_v11  ;;  %v929_v18 = vadd.f32 %v928_v9, %v866_v12 }
 0x104   :  { %1317 = vst [vmem:[%s2019_s2 + $0x90] sm:$0xff] %v1233_v15  }
 0x105   :  { %v930_v20 = vadd.f32 %v929_v18, %v867_v16  ;;  %v1397_v21 = vpop.f32.mrb[8].mxu0  ;;  %v795_v22 = vadd.f32 %v1394_v4, %v794_v17  ;;  %v1764_v24 = vpop.f32.mrb[8].mxu1 }
 0x106   :  { %v240_v23 = vpop.f32.mrb[9].mxu0  ;;  %v1766_v29 = vpop.f32.mrb[9].mxu1  ;;  %v871_v40 = vmul.f32 %v1397_v21, %v1397_v21 }
 0x107   :  { %v796_v25 = vadd.f32 %v795_v22, %v240_v23  ;;  %v869_v26 = vmul.f32 %v240_v23, %v240_v23  ;;  %v931_v27 = vadd.f32 %v930_v20, %v868_v19  ;;  %v1398_v28 = vpop.f32.mrb[10].mxu0  ;;  %v1768_v32 = vpop.f32.mrb[10].mxu1 }
 0x108   :  { %v1168_v30 = vpack.c.bf16 %v1398_v28, %v1397_v21  ;;  %v243_v31 = vpop.f32.mrb[11].mxu0  ;;  %v1770_v37 = vpop.f32.mrb[11].mxu1  ;;  %v1248_v38 = vpack.c.bf16 %v1768_v32, %v1764_v24  ;;  %v872_v44 = vmul.f32 %v1398_v28, %v1398_v28 }
 0x109   :  { %v932_v33 = vadd.f32 %v931_v27, %v869_v26  ;;  %v1163_v34 = vpack.c.bf16 %v243_v31, %v240_v23  ;;  %v797_v35 = vadd.f32 %v796_v25, %v243_v31  ;;  %v870_v36 = vmul.f32 %v243_v31, %v243_v31 }
 0x10a   :  { %1304 = vst [vmem:[%s2019_s2 + $0x28] sm:$0xff] %v1168_v30   ;;  %v1243_v39 = vpack.c.bf16 %v1770_v37, %v1766_v29  ;;  %1320 = vst [vmem:[%s2019_s2 + $0xa8] sm:$0xff] %v1248_v38  }
 0x10b   :  { %1303 = vst [vmem:[%s2019_s2 + $0x20] sm:$0xff] %v1163_v34   ;;  %v798_v41 = vadd.f32 %v1397_v21, %v797_v35  ;;  %v933_v42 = vadd.f32 %v932_v33, %v870_v36 }
 0x10c   :  { %1319 = vst [vmem:[%s2019_s2 + $0xa0] sm:$0xff] %v1243_v39  }
 0x10d   :  { %v934_v46 = vadd.f32 %v933_v42, %v871_v40  ;;  %v1401_v47 = vpop.f32.mrb[12].mxu0  ;;  %v799_v48 = vadd.f32 %v1398_v28, %v798_v41  ;;  %v1788_v51 = vpop.f32.mrb[12].mxu1 }
 0x10e   :  { %v256_v50 = vpop.f32.mrb[13].mxu0  ;;  %v1790_v57 = vpop.f32.mrb[13].mxu1  ;;  %v875_v6 = vmul.f32 %v1401_v47, %v1401_v47 }
 0x10f   :  { %v800_v52 = vadd.f32 %v799_v48, %v256_v50  ;;  %v873_v53 = vmul.f32 %v256_v50, %v256_v50  ;;  %v935_v55 = vadd.f32 %v934_v46, %v872_v44  ;;  %v1402_v56 = vpop.f32.mrb[14].mxu0  ;;  %v1792_v60 = vpop.f32.mrb[14].mxu1 }
 0x110   :  { %v1178_v58 = vpack.c.bf16 %v1402_v56, %v1401_v47  ;;  %v259_v59 = vpop.f32.mrb[15].mxu0  ;;  %v1794_v2 = vpop.f32.mrb[15].mxu1  ;;  %v1258_v3 = vpack.c.bf16 %v1792_v60, %v1788_v51  ;;  %v876_v10 = vmul.f32 %v1402_v56, %v1402_v56 }
 0x111   :  { %v936_v61 = vadd.f32 %v935_v55, %v873_v53  ;;  %v1173_v62 = vpack.c.bf16 %v259_v59, %v256_v50  ;;  %v801_v63 = vadd.f32 %v800_v52, %v259_v59  ;;  %v874_v1 = vmul.f32 %v259_v59, %v259_v59 }
 0x112   :  { %1306 = vst [vmem:[%s2019_s2 + $0x38] sm:$0xff] %v1178_v58   ;;  %v1253_v4 = vpack.c.bf16 %v1794_v2, %v1790_v57  ;;  %1322 = vst [vmem:[%s2019_s2 + $0xb8] sm:$0xff] %v1258_v3  }
 0x113   :  { %1305 = vst [vmem:[%s2019_s2 + $0x30] sm:$0xff] %v1173_v62   ;;  %v802_v7 = vadd.f32 %v1401_v47, %v801_v63  ;;  %v937_v9 = vadd.f32 %v936_v61, %v874_v1 }
 0x114   :  { %1321 = vst [vmem:[%s2019_s2 + $0xb0] sm:$0xff] %v1253_v4  }
 0x115   :  { %v938_v11 = vadd.f32 %v937_v9, %v875_v6  ;;  %v1405_v12 = vpop.f32.mrb[16].mxu0  ;;  %v803_v14 = vadd.f32 %v1402_v56, %v802_v7  ;;  %v1812_v16 = vpop.f32.mrb[16].mxu1 }
 0x116   :  { %v272_v15 = vpop.f32.mrb[17].mxu0  ;;  %v1814_v21 = vpop.f32.mrb[17].mxu1  ;;  %v879_v35 = vmul.f32 %v1405_v12, %v1405_v12 }
 0x117   :  { %v804_v17 = vadd.f32 %v803_v14, %v272_v15  ;;  %v877_v18 = vmul.f32 %v272_v15, %v272_v15  ;;  %v939_v19 = vadd.f32 %v938_v11, %v876_v10  ;;  %v1406_v20 = vpop.f32.mrb[18].mxu0  ;;  %v1816_v25 = vpop.f32.mrb[18].mxu1 }
 0x118   :  { %v1188_v22 = vpack.c.bf16 %v1406_v20, %v1405_v12  ;;  %v275_v23 = vpop.f32.mrb[19].mxu0  ;;  %v1818_v31 = vpop.f32.mrb[19].mxu1  ;;  %v1268_v33 = vpack.c.bf16 %v1816_v25, %v1812_v16  ;;  %v880_v39 = vmul.f32 %v1406_v20, %v1406_v20 }
 0x119   :  { %v940_v26 = vadd.f32 %v939_v19, %v877_v18  ;;  %v1183_v27 = vpack.c.bf16 %v275_v23, %v272_v15  ;;  %v805_v28 = vadd.f32 %v804_v17, %v275_v23  ;;  %v878_v30 = vmul.f32 %v275_v23, %v275_v23 }
 0x11a   :  { %1308 = vst [vmem:[%s2019_s2 + $0x48] sm:$0xff] %v1188_v22   ;;  %v1263_v34 = vpack.c.bf16 %v1818_v31, %v1814_v21  ;;  %1324 = vst [vmem:[%s2019_s2 + $0xc8] sm:$0xff] %v1268_v33  }
 0x11b   :  { %1307 = vst [vmem:[%s2019_s2 + $0x40] sm:$0xff] %v1183_v27   ;;  %v806_v36 = vadd.f32 %v1405_v12, %v805_v28  ;;  %v941_v38 = vadd.f32 %v940_v26, %v878_v30 }
 0x11c   :  { %1323 = vst [vmem:[%s2019_s2 + $0xc0] sm:$0xff] %v1263_v34  }
 0x11d   :  { %v942_v40 = vadd.f32 %v941_v38, %v879_v35  ;;  %v1409_v41 = vpop.f32.mrb[20].mxu0  ;;  %v807_v42 = vadd.f32 %v1406_v20, %v806_v36  ;;  %v1836_v46 = vpop.f32.mrb[20].mxu1 }
 0x11e   :  { %v288_v44 = vpop.f32.mrb[21].mxu0  ;;  %v1838_v53 = vpop.f32.mrb[21].mxu1  ;;  %v883_v6 = vmul.f32 %v1409_v41, %v1409_v41 }
 0x11f   :  { %v808_v47 = vadd.f32 %v807_v42, %v288_v44  ;;  %v881_v48 = vmul.f32 %v288_v44, %v288_v44  ;;  %v943_v50 = vadd.f32 %v942_v40, %v880_v39  ;;  %v1410_v52 = vpop.f32.mrb[22].mxu0  ;;  %v1840_v58 = vpop.f32.mrb[22].mxu1 }
 0x120   :  { %v1198_v55 = vpack.c.bf16 %v1410_v52, %v1409_v41  ;;  %v291_v56 = vpop.f32.mrb[23].mxu0  ;;  %v1842_v1 = vpop.f32.mrb[23].mxu1  ;;  %v1278_v3 = vpack.c.bf16 %v1840_v58, %v1836_v46  ;;  %v884_v10 = vmul.f32 %v1410_v52, %v1410_v52 }
 0x121   :  { %v944_v59 = vadd.f32 %v943_v50, %v881_v48  ;;  %v1193_v61 = vpack.c.bf16 %v291_v56, %v288_v44  ;;  %v809_v62 = vadd.f32 %v808_v47, %v291_v56  ;;  %v882_v63 = vmul.f32 %v291_v56, %v291_v56 }
 0x122   :  { %1310 = vst [vmem:[%s2019_s2 + $0x58] sm:$0xff] %v1198_v55   ;;  %v1273_v4 = vpack.c.bf16 %v1842_v1, %v1838_v53  ;;  %1326 = vst [vmem:[%s2019_s2 + $0xd8] sm:$0xff] %v1278_v3  }
 0x123   :  { %1309 = vst [vmem:[%s2019_s2 + $0x50] sm:$0xff] %v1193_v61   ;;  %v810_v7 = vadd.f32 %v1409_v41, %v809_v62  ;;  %v945_v9 = vadd.f32 %v944_v59, %v882_v63 }
 0x124   :  { %1325 = vst [vmem:[%s2019_s2 + $0xd0] sm:$0xff] %v1273_v4  }
 0x125   :  { %v946_v11 = vadd.f32 %v945_v9, %v883_v6  ;;  %v1413_v12 = vpop.f32.mrb[24].mxu0  ;;  %v811_v14 = vadd.f32 %v1410_v52, %v810_v7  ;;  %v1860_v17 = vpop.f32.mrb[24].mxu1 }
 0x126   :  { %v304_v15 = vpop.f32.mrb[25].mxu0  ;;  %v1862_v23 = vpop.f32.mrb[25].mxu1  ;;  %v887_v40 = vmul.f32 %v1413_v12, %v1413_v12 }
 0x127   :  { %v812_v18 = vadd.f32 %v811_v14, %v304_v15  ;;  %v885_v19 = vmul.f32 %v304_v15, %v304_v15  ;;  %v947_v20 = vadd.f32 %v946_v11, %v884_v10  ;;  %v1414_v22 = vpop.f32.mrb[26].mxu0  ;;  %v1864_v28 = vpop.f32.mrb[26].mxu1 }
 0x128   :  { %v1208_v26 = vpack.c.bf16 %v1414_v22, %v1413_v12  ;;  %v307_v27 = vpop.f32.mrb[27].mxu0  ;;  %v1866_v36 = vpop.f32.mrb[27].mxu1  ;;  %v1288_v38 = vpack.c.bf16 %v1864_v28, %v1860_v17  ;;  %v888_v44 = vmul.f32 %v1414_v22, %v1414_v22 }
 0x129   :  { %v948_v30 = vadd.f32 %v947_v20, %v885_v19  ;;  %v1203_v33 = vpack.c.bf16 %v307_v27, %v304_v15  ;;  %v813_v34 = vadd.f32 %v812_v18, %v307_v27  ;;  %v886_v35 = vmul.f32 %v307_v27, %v307_v27 }
 0x12a   :  { %1312 = vst [vmem:[%s2019_s2 + $0x68] sm:$0xff] %v1208_v26   ;;  %v1283_v39 = vpack.c.bf16 %v1866_v36, %v1862_v23  ;;  %1328 = vst [vmem:[%s2019_s2 + $0xe8] sm:$0xff] %v1288_v38  }
 0x12b   :  { %1311 = vst [vmem:[%s2019_s2 + $0x60] sm:$0xff] %v1203_v33   ;;  %v814_v41 = vadd.f32 %v1413_v12, %v813_v34  ;;  %v949_v42 = vadd.f32 %v948_v30, %v886_v35  ;;  %v893_v30 = vmul.f32 %v1718_v45, %v1718_v45 }
 0x12c   :  { %1327 = vst [vmem:[%s2019_s2 + $0xe0] sm:$0xff] %v1283_v39   ;;  %v894_v39 = vmul.f32 %v1724_v54, %v1724_v54 }
 0x12d   :  { %v950_v47 = vadd.f32 %v949_v42, %v887_v40  ;;  %v1417_v48 = vpop.f32.mrb[28].mxu0  ;;  %v815_v50 = vadd.f32 %v1414_v22, %v814_v41  ;;  %v1884_v55 = vpop.f32.mrb[28].mxu1  ;;  %v895_v40 = vmul.f32 %v1716_v43, %v1716_v43 }
 0x12e   :  { %v320_v52 = vpop.f32.mrb[29].mxu0  ;;  %v1886_v63 = vpop.f32.mrb[29].mxu1  ;;  %v891_v18 = vmul.f32 %v1417_v48, %v1417_v48 }
 0x12f   :  { %v816_v56 = vadd.f32 %v815_v50, %v320_v52  ;;  %v889_v59 = vmul.f32 %v320_v52, %v320_v52  ;;  %v951_v61 = vadd.f32 %v950_v47, %v888_v44  ;;  %v1418_v62 = vpop.f32.mrb[30].mxu0  ;;  %v1888_v6 = vpop.f32.mrb[30].mxu1  ;;  %v896_v44 = vmul.f32 %v1720_v49, %v1720_v49 }
 0x130   :  { %v1218_v3 = vpack.c.bf16 %v1418_v62, %v1417_v48  ;;  %v323_v4 = vpop.f32.mrb[31].mxu0  ;;  %v1890_v12 = vpop.f32.mrb[31].mxu1  ;;  %v1298_v14 = vpack.c.bf16 %v1888_v6, %v1884_v55  ;;  %v892_v22 = vmul.f32 %v1418_v62, %v1418_v62 }
 0x131   :  { %v952_v7 = vadd.f32 %v951_v61, %v889_v59  ;;  %v1213_v9 = vpack.c.bf16 %v323_v4, %v320_v52  ;;  %v817_v10 = vadd.f32 %v816_v56, %v323_v4  ;;  %v890_v11 = vmul.f32 %v323_v4, %v323_v4 }
 0x132   :  { %1314 = vst [vmem:[%s2019_s2 + $0x78] sm:$0xff] %v1218_v3   ;;  %v1293_v15 = vpack.c.bf16 %v1890_v12, %v1886_v63  ;;  %1330 = vst [vmem:[%s2019_s2 + $0xf8] sm:$0xff] %v1298_v14   ;;  %v898_v59 = vmul.f32 %v1746_v13, %v1746_v13 }
 0x133   :  { %1313 = vst [vmem:[%s2019_s2 + $0x70] sm:$0xff] %v1213_v9   ;;  %v818_v19 = vadd.f32 %v1417_v48, %v817_v10  ;;  %v953_v20 = vadd.f32 %v952_v7, %v890_v11  ;;  %v902_v11 = vmul.f32 %v1770_v37, %v1770_v37 }
 0x134   :  { %1329 = vst [vmem:[%s2019_s2 + $0xf0] sm:$0xff] %v1293_v15  }
 0x135   :  { %v954_v26 = vadd.f32 %v953_v20, %v891_v18  ;;  %v819_v27 = vadd.f32 %v1418_v62, %v818_v19 }
 0x137   :  { %v820_v33 = vadd.f32 %v819_v27, %v1718_v45  ;;  %v955_v34 = vadd.f32 %v954_v26, %v892_v22  ;;  %v897_v45 = vmul.f32 %v1742_v5, %v1742_v5  ;;  %v906_v27 = vmul.f32 %v1794_v2, %v1794_v2 }
 0x139   :  { %v956_v35 = vadd.f32 %v955_v34, %v893_v30  ;;  %v821_v38 = vadd.f32 %v820_v33, %v1724_v54 }
 0x13b   :  { %v822_v41 = vadd.f32 %v1716_v43, %v821_v38  ;;  %v957_v42 = vadd.f32 %v956_v35, %v894_v39  ;;  %v899_v43 = vmul.f32 %v1740_v0, %v1740_v0 }
 0x13d   :  { %v958_v47 = vadd.f32 %v957_v42, %v895_v40  ;;  %v823_v48 = vadd.f32 %v1720_v49, %v822_v41  ;;  %v900_v49 = vmul.f32 %v1744_v8, %v1744_v8  ;;  %v910_v41 = vmul.f32 %v1818_v31, %v1818_v31 }
 0x13f   :  { %v824_v50 = vadd.f32 %v823_v48, %v1742_v5  ;;  %v959_v52 = vadd.f32 %v958_v47, %v896_v44  ;;  %v901_v5 = vmul.f32 %v1766_v29, %v1766_v29 }
 0x141   :  { %v960_v56 = vadd.f32 %v959_v52, %v897_v45  ;;  %v825_v54 = vadd.f32 %v824_v50, %v1746_v13 }
 0x143   :  { %v826_v61 = vadd.f32 %v1740_v0, %v825_v54  ;;  %v961_v62 = vadd.f32 %v960_v56, %v898_v59  ;;  %v903_v0 = vmul.f32 %v1764_v24, %v1764_v24  ;;  %v914_v56 = vmul.f32 %v1842_v1, %v1842_v1 }
 0x145   :  { %v962_v3 = vadd.f32 %v961_v62, %v899_v43  ;;  %v827_v4 = vadd.f32 %v1744_v8, %v826_v61  ;;  %v904_v8 = vmul.f32 %v1768_v32, %v1768_v32 }
 0x147   :  { %v828_v7 = vadd.f32 %v827_v4, %v1766_v29  ;;  %v963_v9 = vadd.f32 %v962_v3, %v900_v49  ;;  %v905_v29 = vmul.f32 %v1790_v57, %v1790_v57  ;;  %v918_v4 = vmul.f32 %v1866_v36, %v1866_v36 }
 0x149   :  { %v964_v10 = vadd.f32 %v963_v9, %v901_v5  ;;  %v829_v13 = vadd.f32 %v828_v7, %v1770_v37 }
 0x14b   :  { %v830_v14 = vadd.f32 %v1764_v24, %v829_v13  ;;  %v965_v15 = vadd.f32 %v964_v10, %v902_v11  ;;  %v907_v24 = vmul.f32 %v1788_v51, %v1788_v51 }
 0x14d   :  { %v966_v18 = vadd.f32 %v965_v15, %v903_v0  ;;  %v831_v19 = vadd.f32 %v1768_v32, %v830_v14  ;;  %v908_v32 = vmul.f32 %v1792_v60, %v1792_v60  ;;  %v922_v14 = vmul.f32 %v1890_v12, %v1890_v12 }
 0x14f   :  { %v832_v20 = vadd.f32 %v831_v19, %v1790_v57  ;;  %v967_v22 = vadd.f32 %v966_v18, %v904_v8  ;;  %v909_v57 = vmul.f32 %v1814_v21, %v1814_v21 }
 0x151   :  { %v968_v26 = vadd.f32 %v967_v22, %v905_v29  ;;  %v833_v37 = vadd.f32 %v832_v20, %v1794_v2 }
 0x153   :  { %v834_v30 = vadd.f32 %v1788_v51, %v833_v37  ;;  %v969_v33 = vadd.f32 %v968_v26, %v906_v27  ;;  %v911_v51 = vmul.f32 %v1812_v16, %v1812_v16 }
 0x155   :  { %v970_v34 = vadd.f32 %v969_v33, %v907_v24  ;;  %v835_v35 = vadd.f32 %v1792_v60, %v834_v30  ;;  %v912_v60 = vmul.f32 %v1816_v25, %v1816_v25 }
 0x157   :  { %v836_v38 = vadd.f32 %v835_v35, %v1814_v21  ;;  %v971_v39 = vadd.f32 %v970_v34, %v908_v32  ;;  %v913_v21 = vmul.f32 %v1838_v53, %v1838_v53 }
 0x159   :  { %v972_v40 = vadd.f32 %v971_v39, %v909_v57  ;;  %v837_v2 = vadd.f32 %v836_v38, %v1818_v31 }
 0x15b   :  { %v838_v42 = vadd.f32 %v1812_v16, %v837_v2  ;;  %v973_v44 = vadd.f32 %v972_v40, %v910_v41  ;;  %v915_v16 = vmul.f32 %v1836_v46, %v1836_v46 }
 0x15d   :  { %v974_v47 = vadd.f32 %v973_v44, %v911_v51  ;;  %v839_v48 = vadd.f32 %v1816_v25, %v838_v42  ;;  %v916_v25 = vmul.f32 %v1840_v58, %v1840_v58 }
 0x15f   :  { %v840_v45 = vadd.f32 %v839_v48, %v1838_v53  ;;  %v975_v50 = vadd.f32 %v974_v47, %v912_v60  ;;  %v917_v53 = vmul.f32 %v1862_v23, %v1862_v23 }
 0x161   :  { %v976_v52 = vadd.f32 %v975_v50, %v913_v21  ;;  %v841_v31 = vadd.f32 %v840_v45, %v1842_v1 }
 0x163   :  { %v842_v54 = vadd.f32 %v1836_v46, %v841_v31  ;;  %v977_v59 = vadd.f32 %v976_v52, %v914_v56  ;;  %v919_v46 = vmul.f32 %v1860_v17, %v1860_v17 }
 0x165   :  { %v978_v43 = vadd.f32 %v977_v59, %v915_v16  ;;  %v843_v61 = vadd.f32 %v1840_v58, %v842_v54  ;;  %v920_v58 = vmul.f32 %v1864_v28, %v1864_v28 }
 0x167   :  { %v844_v62 = vadd.f32 %v843_v61, %v1862_v23  ;;  %v979_v49 = vadd.f32 %v978_v43, %v916_v25  ;;  %v921_v23 = vmul.f32 %v1886_v63, %v1886_v63 }
 0x169   :  { %v980_v3 = vadd.f32 %v979_v49, %v917_v53  ;;  %v845_v1 = vadd.f32 %v844_v62, %v1866_v36 }
 0x16b   :  { %v846_v5 = vadd.f32 %v1860_v17, %v845_v1  ;;  %v981_v7 = vadd.f32 %v980_v3, %v918_v4  ;;  %v923_v17 = vmul.f32 %v1884_v55, %v1884_v55 }
 0x16d   :  { %v982_v9 = vadd.f32 %v981_v7, %v919_v46  ;;  %v847_v10 = vadd.f32 %v1864_v28, %v846_v5  ;;  %v924_v28 = vmul.f32 %v1888_v6, %v1888_v6 }
 0x16f   :  { %v848_v13 = vadd.f32 %v847_v10, %v1886_v63  ;;  %v983_v11 = vadd.f32 %v982_v9, %v920_v58 }
 0x171   :  { %v984_v0 = vadd.f32 %v983_v11, %v921_v23  ;;  %v849_v36 = vadd.f32 %v848_v13, %v1890_v12 }
 0x173   :  { %v850_v15 = vadd.f32 %v1884_v55, %v849_v36  ;;  %v985_v8 = vadd.f32 %v984_v0, %v922_v14  ;;  %v788_v55 = vld [vmem:[%s2018_s3] sm:$0x1] }
 0x175   :  { %v851_v18 = vadd.f32 %v1888_v6, %v850_v15  ;;  %v986_v19 = vadd.f32 %v985_v8, %v923_v17  ;;  %v860_v6 = vld [vmem:[%s2018_s3 + $0x1] sm:$0x1] }
 0x177   :  { %v852_v63 = vrot.slane %v851_v18, 4  ;;  %v987_v29 = vadd.f32 %v986_v19, %v924_v28 }
 0x179   :  { %v853_v20 = vadd.f32 %v852_v63, %v851_v18  ;;  %v988_v22 = vrot.slane %v987_v29, 4 }
 0x17b   :  { %v854_v26 = vrot.slane %v853_v20, 2  ;;  %v989_v37 = vadd.f32 %v988_v22, %v987_v29 }
 0x17d   :  { %v855_v27 = vadd.f32 %v854_v26, %v853_v20  ;;  %v990_v12 = vrot.slane %v989_v37, 2 }
 0x17f   :  { %v856_v24 = vrot.slane %v855_v27, 1  ;;  %v991_v30 = vadd.f32 %v990_v12, %v989_v37 }
 0x181   :  { %v857_v33 = vadd.f32 %v856_v24, %v855_v27  ;;  %v992_v32 = vrot.slane %v991_v30, 1 }
 0x183   :  { %v858_v34 = vadd.f32 %v857_v33, %v788_v55  ;;  %v993_v35 = vadd.f32 %v992_v32, %v991_v30 }
 0x185   :  { %859 = vst [vmem:[%s2018_s3] sm:$0x1] %v858_v34  ;;  %v994_v57 = vadd.f32 %v993_v35, %v860_v6 }
 0x187   :  { %995 = vst [vmem:[%s2018_s3 + $0x1] sm:$0x1] %v994_v57 }

// kernel: bottleneck_forward.6
= control target key start
LH: loop header
LB: loop body
LE: loop exit
PB: predicated region body
PF: predicated region fallthrough
CT: control target
= control target key end

     0   :  { %v162_v11 = vlaneseq  ;;  %s2826_s3 = inlined_call_operand.vmem [shape: bf16[128,128], index: 3, kind: input, shape index: {}]   ;;  %s2827_s1 = inlined_call_operand.vmem [shape: f32[8,128], index: 1, kind: input, shape index: {}]   ;;  %s2828_s0 = inlined_call_operand.vmem [shape: bf16[2,16,16,128], index: 0, kind: input, shape index: {}]   ;;  %s2829_s2 = inlined_call_operand.vmem [shape: f32[8,128], index: 2, kind: input, shape index: {}]   ;;  %s2830_s5 = inlined_call_operand.vmem [shape: f32[8,128], index: 5, kind: output, shape index: {1}]   ;;  %s2831_s4 = inlined_call_operand.vmem [shape: bf16[2,16,16,128], index: 4, kind: output, shape index: {0}]  }
   0x1   :  { %v1911_v0 = vld [vmem:[%s2826_s3] sm:$0xff]   ;;  %v1912_v1 = vld [vmem:[%s2826_s3 + $0x8] sm:$0xff]   ;;  %v1913_v2 = vld [vmem:[%s2826_s3 + $0x10] sm:$0xff]  }
   0x2   :  { %1814 = vmatprep.subr.bf16.mxu0 %v1911_v0  ;;  %1894 = vmatprep.subr.bf16.mxu1 %v1911_v0  ;;  %v1914_v3 = vld [vmem:[%s2826_s3 + $0x18] sm:$0xff]   ;;  %v20_v4 = vld [vmem:[%s2827_s1] sm:$0x1]  ;;  %v22_v5 = vld [vmem:[%s2827_s1 + $0x1] sm:$0x1]  ;;  %v1980_v15 = vshrl.u32 %v162_v11, 7 }
   0x3   :  { %1815 = vmatpush3.bf16.msra.mxu0 %v1911_v0  ;;  %1902 = vmatpush3.bf16.msra.mxu1 %v1911_v0  ;;  %v1970_v6 = vmul.f32 0.001953125, %v20_v4  ;;  %v23_v7 = vmul.f32 0.001953125, %v22_v5  ;;  %v1915_v9 = vld [vmem:[%s2826_s3 + $0x20] sm:$0xff]   ;;  %v1916_v13 = vld [vmem:[%s2826_s3 + $0x28] sm:$0xff]   ;;  %v1995_v18 = vld [vmem:[%s2828_s0 + $0x10] sm:$0xff]  }
   0x4   :  { %1816 = vmatprep.subr.bf16.mxu0 %v1912_v1  ;;  %1895 = vmatprep.subr.bf16.mxu1 %v1912_v1  ;;  %v1985_v16 = vld [vmem:[%s2828_s0] sm:$0xff]   ;;  %v1990_v17 = vld [vmem:[%s2828_s0 + $0x8] sm:$0xff]   ;;  %v2000_v19 = vld [vmem:[%s2828_s0 + $0x18] sm:$0xff]   ;;  %v164_v25 = vsub.s32 0, %v1980_v15  ;;  %v1434_v30 = vunpack.c.l.bf16 %v1995_v18  ;;  %v1435_v31 = vunpack.c.h.bf16 %v1995_v18 }
   0x5   :  { %v24_v8 = vmul.f32 %v1970_v6, %v1970_v6  ;;  %v1917_v20 = vld [vmem:[%s2826_s3 + $0x30] sm:$0xff]   ;;  %v2008_v21 = vld [vmem:[%s2828_s0 + $0x20] sm:$0xff]   ;;  %v2013_v22 = vld [vmem:[%s2828_s0 + $0x28] sm:$0xff]   ;;  %v1426_v23 = vunpack.c.l.bf16 %v1985_v16  ;;  %v1427_v24 = vunpack.c.h.bf16 %v1985_v16  ;;  %v1430_v26 = vunpack.c.l.bf16 %v1990_v17 }
   0x6   :  { %v2022_v27 = vld [vmem:[%s2828_s0 + $0x30] sm:$0xff]   ;;  %v2027_v28 = vld [vmem:[%s2828_s0 + $0x38] sm:$0xff]   ;;  %v1431_v29 = vunpack.c.h.bf16 %v1990_v17  ;;  %v1438_v32 = vunpack.c.l.bf16 %v2000_v19  ;;  %v2036_v33 = vld [vmem:[%s2828_s0 + $0x40] sm:$0xff]   ;;  %v1439_v35 = vunpack.c.h.bf16 %v2000_v19  ;;  %v1442_v36 = vunpack.c.l.bf16 %v2008_v21 }
   0x7   :  { %1817 = vmatpush3.bf16.msra.mxu0 %v1912_v1  ;;  %1903 = vmatpush3.bf16.msra.mxu1 %v1912_v1  ;;  %v25_v10 = vsub.f32 %v23_v7, %v24_v8  ;;  %v2041_v34 = vld [vmem:[%s2828_s0 + $0x48] sm:$0xff]   ;;  %v1443_v37 = vunpack.c.h.bf16 %v2008_v21  ;;  %v1446_v38 = vunpack.c.l.bf16 %v2013_v22  ;;  %v2050_v39 = vld [vmem:[%s2828_s0 + $0x50] sm:$0xff]   ;;  %v2055_v40 = vld [vmem:[%s2828_s0 + $0x58] sm:$0xff]   ;;  %v1447_v42 = vunpack.c.h.bf16 %v2013_v22 }
   0x8   :  { %1818 = vmatprep.subr.bf16.mxu0 %v1913_v2  ;;  %1896 = vmatprep.subr.bf16.mxu1 %v1913_v2  ;;  %v1918_v41 = vld [vmem:[%s2826_s3 + $0x38] sm:$0xff]   ;;  %v1450_v43 = vunpack.c.l.bf16 %v2022_v27  ;;  %v1451_v44 = vunpack.c.h.bf16 %v2022_v27  ;;  %v1454_v45 = vunpack.c.l.bf16 %v2027_v28  ;;  %v2067_v46 = vld [vmem:[%s2828_s0 + $0x60] sm:$0xff]   ;;  %v2072_v47 = vld [vmem:[%s2828_s0 + $0x68] sm:$0xff]   ;;  %v1455_v48 = vunpack.c.h.bf16 %v2027_v28 }
   0x9   :  { %v26_v12 = vmax.f32 %v25_v10, 0.0  ;;  %v1458_v49 = vunpack.c.l.bf16 %v2036_v33  ;;  %v1459_v50 = vunpack.c.h.bf16 %v2036_v33  ;;  %v1462_v51 = vunpack.c.l.bf16 %v2041_v34  ;;  %v2081_v52 = vld [vmem:[%s2828_s0 + $0x70] sm:$0xff]   ;;  %v2086_v53 = vld [vmem:[%s2828_s0 + $0x78] sm:$0xff]   ;;  %v2095_v58 = vld [vmem:[%s2828_s0 + $0x80] sm:$0xff]  }
   0xa   :  { %v1463_v54 = vunpack.c.h.bf16 %v2041_v34  ;;  %v1466_v55 = vunpack.c.l.bf16 %v2050_v39  ;;  %v1467_v56 = vunpack.c.h.bf16 %v2050_v39  ;;  %v1470_v57 = vunpack.c.l.bf16 %v2055_v40  ;;  %v2100_v59 = vld [vmem:[%s2828_s0 + $0x88] sm:$0xff]   ;;  %v29_v60 = vld [vmem:[%s2829_s2] sm:$0x1]  ;;  %v2112_v1 = vld [vmem:[%s2828_s0 + $0x90] sm:$0xff]  }
   0xb   :  { %1819 = vmatpush3.bf16.msra.mxu0 %v1913_v2  ;;  %1904 = vmatpush3.bf16.msra.mxu1 %v1913_v2  ;;  %v27_v14 = vadd.f32 1e-05, %v26_v12  ;;  %v1471_v61 = vunpack.c.h.bf16 %v2055_v40  ;;  %v1474_v62 = vunpack.c.l.bf16 %v2067_v46  ;;  %v1475_v63 = vunpack.c.h.bf16 %v2067_v46  ;;  %v2121_v7 = vld [vmem:[%s2828_s0 + $0x98] sm:$0xff]   ;;  %v2126_v8 = vld [vmem:[%s2828_s0 + $0xa0] sm:$0xff]   ;;  %v2143_v10 = vld [vmem:[%s2828_s0 + $0xb0] sm:$0xff]  }
   0xc   :  { %1820 = vmatprep.subr.bf16.mxu0 %v1914_v3  ;;  %1897 = vmatprep.subr.bf16.mxu1 %v1914_v3  ;;  %v2185_v4 = vld [vmem:[%s2828_s0 + $0xc8] sm:$0xff]   ;;  %v2289_v33 = vld [vmem:[%s2828_s0 + $0xf0] sm:$0xff]   ;;  %v2832_v46 = vunpack.c.l.bf16 %v2072_v47 }
   0xd   :  { %1919 = vrsqrt.f32 %v27_v14  ;;  %v2135_v14 = vld [vmem:[%s2828_s0 + $0xa8] sm:$0xff]  }
   0xe   :  { %v1510_v2 = vunpack.c.l.bf16 %v2135_v14 }
   0xf   :  { %1821 = vmatpush3.bf16.msra.mxu0 %v1914_v3  ;;  %1905 = vmatpush3.bf16.msra.mxu1 %v1914_v3 }
  0x10   :  { %1822 = vmatprep.subr.bf16.mxu0 %v1915_v9  ;;  %1898 = vmatprep.subr.bf16.mxu1 %v1915_v9 }
  0x13   :  { %1823 = vmatpush3.bf16.msra.mxu0 %v1915_v9  ;;  %1906 = vmatpush3.bf16.msra.mxu1 %v1915_v9 }
  0x14   :  { %1824 = vmatprep.subr.bf16.mxu0 %v1916_v13  ;;  %1899 = vmatprep.subr.bf16.mxu1 %v1916_v13 }
  0x17   :  { %1825 = vmatpush3.bf16.msra.mxu0 %v1916_v13  ;;  %1907 = vmatpush3.bf16.msra.mxu1 %v1916_v13  ;;  %v1920_v9 = vpop.eup %1919  ;;  %v2148_v13 = vld [vmem:[%s2828_s0 + $0xb8] sm:$0xff]  }
  0x18   :  { %1826 = vmatprep.subr.bf16.mxu0 %v1917_v20  ;;  %1900 = vmatprep.subr.bf16.mxu1 %v1917_v20 }
  0x1b   :  { %1827 = vmatpush3.bf16.msra.mxu0 %v1917_v20  ;;  %1908 = vmatpush3.bf16.msra.mxu1 %v1917_v20  ;;  %v30_v20 = vmul.f32 %v1920_v9, %v29_v60  ;;  %v31_v60 = vld [vmem:[%s2829_s2 + $0x1] sm:$0x1] }
  0x1c   :  { %1828 = vmatprep.subr.bf16.mxu0 %v1918_v41  ;;  %1901 = vmatprep.subr.bf16.mxu1 %v1918_v41 }
  0x1d   :  { %v32_v12 = vmul.f32 %v30_v20, %v1970_v6  ;;  %v2160_v11 = vrot.slane %v30_v20, %v164_v25  ;;  %v2171_v6 = vld [vmem:[%s2828_s0 + $0xc0] sm:$0xff]  }
  0x1f   :  { %1829 = vmatpush3.bf16.msra.mxu0 %v1918_v41  ;;  %1909 = vmatpush3.bf16.msra.mxu1 %v1918_v41  ;;  %v33_v5 = vsub.f32 %v31_v60, %v32_v12  ;;  %v166_v20 = vmul.f32 %v1426_v23, %v2160_v11  ;;  %v167_v41 = vmul.f32 %v1427_v24, %v2160_v11 }
  0x20   :  { %v168_v3 = vmul.f32 %v1430_v26, %v2160_v11  ;;  %v169_v12 = vmul.f32 %v1431_v29, %v2160_v11  ;;  %v170_v23 = vmul.f32 %v1434_v30, %v2160_v11  ;;  %v171_v16 = vmul.f32 %v1435_v31, %v2160_v11 }
  0x21   :  { %v172_v24 = vmul.f32 %v1438_v32, %v2160_v11  ;;  %v2201_v26 = vrot.slane %v33_v5, %v164_v25  ;;  %v173_v17 = vmul.f32 %v1439_v35, %v2160_v11  ;;  %v174_v18 = vmul.f32 %v1442_v36, %v2160_v11  ;;  %v2223_v36 = vld [vmem:[%s2828_s0 + $0xd0] sm:$0xff]  }
  0x22   :  { %v175_v31 = vmul.f32 %v1443_v37, %v2160_v11  ;;  %v1530_v9 = vunpack.c.l.bf16 %v2223_v36  ;;  %v179_v22 = vmul.f32 %v1451_v44, %v2160_v11  ;;  %v183_v27 = vmul.f32 %v1459_v50, %v2160_v11 }
  0x23   :  { %v234_v32 = vadd.f32 %v2201_v26, %v166_v20  ;;  %v235_v19 = vadd.f32 %v2201_v26, %v167_v41  ;;  %v236_v35 = vadd.f32 %v2201_v26, %v168_v3  ;;  %v237_v5 = vadd.f32 %v2201_v26, %v169_v12  ;;  %v2232_v3 = vld [vmem:[%s2828_s0 + $0xd8] sm:$0xff]  }
  0x24   :  { %v238_v21 = vadd.f32 %v2201_v26, %v170_v23  ;;  %v239_v37 = vadd.f32 %v2201_v26, %v171_v16  ;;  %v240_v60 = vadd.f32 %v2201_v26, %v172_v24  ;;  %v241_v25 = vadd.f32 %v2201_v26, %v173_v17  ;;  %v2239_v16 = vld [vmem:[%s2828_s0 + $0xe0] sm:$0xff]  }
  0x25   :  { %v298_v20 = vmax.f32 %v234_v32, 0.0  ;;  %v299_v15 = vmax.f32 %v235_v19, 0.0  ;;  %v300_v41 = vmax.f32 %v236_v35, 0.0  ;;  %v301_v30 = vmax.f32 %v237_v5, 0.0 }
  0x26   :  { %v302_v12 = vmax.f32 %v238_v21, 0.0  ;;  %v303_v29 = vmax.f32 %v239_v37, 0.0  ;;  %v242_v32 = vadd.f32 %v2201_v26, %v174_v18  ;;  %v243_v19 = vadd.f32 %v2201_v26, %v175_v31 }
  0x27   :  { %v362_v24 = vpack.c.bf16 %v299_v15, %v298_v20  ;;  %v363_v17 = vpack.c.bf16 %v301_v30, %v300_v41  ;;  %v304_v5 = vmax.f32 %v240_v60, 0.0  ;;  %v305_v0 = vmax.f32 %v241_v25, 0.0 }
  0x28   :  { %v364_v35 = vpack.c.bf16 %v303_v29, %v302_v12  ;;  %v1534_v21 = vunpack.c.l.bf16 %v2232_v3  ;;  %v176_v37 = vmul.f32 %v1446_v38, %v2160_v11  ;;  %v177_v23 = vmul.f32 %v1447_v42, %v2160_v11  ;;  %v2255_v29 = vld [vmem:[%s2828_s0 + $0xe8] sm:$0xff]  }
  0x29   :  { %1830 = vmatprep.mubr.bf16.mxu0 %v362_v24  ;;  %v1535_v30 = vunpack.c.h.bf16 %v2232_v3  ;;  %v1538_v18 = vunpack.c.l.bf16 %v2239_v16  ;;  %v306_v31 = vmax.f32 %v242_v32, 0.0  ;;  %v307_v15 = vmax.f32 %v243_v19, 0.0 }
  0x2a   :  { %1831 = vmatmul.mubr.bf16.vlgmr.msra.gmra.mrb[0].mxu0 %v363_v17  ;;  %v178_v38 = vmul.f32 %v1450_v43, %v2160_v11  ;;  %v180_v42 = vmul.f32 %v1454_v45, %v2160_v11  ;;  %v181_v25 = vmul.f32 %v1455_v48, %v2160_v11  ;;  %v182_v60 = vmul.f32 %v1458_v49, %v2160_v11 }
  0x2b   :  { %1834 = vmatprep.mubr.bf16.mxu0 %v364_v35  ;;  %v1539_v20 = vunpack.c.h.bf16 %v2239_v16  ;;  %v365_v43 = vpack.c.bf16 %v305_v0, %v304_v5  ;;  %v1542_v44 = vunpack.c.l.bf16 %v2255_v29  ;;  %v1543_v41 = vunpack.c.h.bf16 %v2255_v29 }
  0x2c   :  { %v244_v45 = vadd.f32 %v2201_v26, %v176_v37  ;;  %v245_v28 = vadd.f32 %v2201_v26, %v177_v23  ;;  %v184_v48 = vmul.f32 %v1462_v51, %v2160_v11  ;;  %v185_v49 = vmul.f32 %v1463_v54, %v2160_v11 }
  0x2d   :  { %v366_v50 = vpack.c.bf16 %v307_v15, %v306_v31  ;;  %v246_v0 = vadd.f32 %v2201_v26, %v178_v38  ;;  %v247_v12 = vadd.f32 %v2201_v26, %v179_v22  ;;  %v186_v23 = vmul.f32 %v1466_v55, %v2160_v11 }
  0x2e   :  { %v248_v51 = vadd.f32 %v2201_v26, %v180_v42  ;;  %v249_v24 = vadd.f32 %v2201_v26, %v181_v25  ;;  %v250_v34 = vadd.f32 %v2201_v26, %v182_v60  ;;  %v187_v54 = vmul.f32 %v1467_v56, %v2160_v11 }
  0x2f   :  { %v251_v17 = vadd.f32 %v2201_v26, %v183_v27  ;;  %v252_v32 = vadd.f32 %v2201_v26, %v184_v48  ;;  %v253_v19 = vadd.f32 %v2201_v26, %v185_v49  ;;  %v1546_v35 = vunpack.c.l.bf16 %v2289_v33 }
  0x30   :  { %v254_v55 = vadd.f32 %v2201_v26, %v186_v23  ;;  %v255_v5 = vadd.f32 %v2201_v26, %v187_v54  ;;  %v188_v37 = vmul.f32 %v1470_v57, %v2160_v11  ;;  %v189_v39 = vmul.f32 %v1471_v61, %v2160_v11  ;;  %v2323_v61 = vld [vmem:[%s2828_s0 + $0xf8] sm:$0xff]  }
  0x31   :  { %v308_v56 = vmax.f32 %v244_v45, 0.0  ;;  %v309_v31 = vmax.f32 %v245_v28, 0.0  ;;  %v310_v15 = vmax.f32 %v246_v0, 0.0  ;;  %v190_v38 = vmul.f32 %v1474_v62, %v2160_v11 }
  0x32   :  { %1835 = vmatmul.mubr.bf16.gmra.mrb[4].mxu0 %v365_v43  ;;  %v311_v22 = vmax.f32 %v247_v12, 0.0  ;;  %v312_v42 = vmax.f32 %v248_v51, 0.0  ;;  %v313_v25 = vmax.f32 %v249_v24, 0.0  ;;  %v314_v60 = vmax.f32 %v250_v34, 0.0 }
  0x33   :  { %1838 = vmatprep.mubr.bf16.mxu0 %v366_v50  ;;  %v315_v27 = vmax.f32 %v251_v17, 0.0  ;;  %v316_v48 = vmax.f32 %v252_v32, 0.0  ;;  %v317_v57 = vmax.f32 %v253_v19, 0.0  ;;  %v191_v40 = vmul.f32 %v1475_v63, %v2160_v11 }
  0x34   :  { %v318_v43 = vmax.f32 %v254_v55, 0.0  ;;  %v319_v45 = vmax.f32 %v255_v5, 0.0  ;;  %v2326_v62 = vadd.f32 %v2201_v26, %v188_v37  ;;  %v2329_v28 = vadd.f32 %v2201_v26, %v189_v39 }
  0x35   :  { %v367_v49 = vpack.c.bf16 %v309_v31, %v308_v56  ;;  %v2332_v50 = vadd.f32 %v2201_v26, %v190_v38  ;;  %v192_v63 = vmul.f32 %v2832_v46, %v2160_v11  ;;  %v1547_v0 = vunpack.c.h.bf16 %v2289_v33 }
  0x36   :  { %v368_v12 = vpack.c.bf16 %v311_v22, %v310_v15  ;;  %v2833_v23 = vunpack.c.h.bf16 %v2072_v47  ;;  %v1550_v24 = vunpack.c.l.bf16 %v2323_v61  ;;  %v1551_v34 = vunpack.c.h.bf16 %v2323_v61 }
  0x37   :  { %v369_v54 = vpack.c.bf16 %v313_v25, %v312_v42  ;;  %v370_v17 = vpack.c.bf16 %v315_v27, %v314_v60  ;;  %v2343_v32 = vpack.c.bf16 %v317_v57, %v316_v48  ;;  %v2346_v19 = vadd.f32 %v2201_v26, %v191_v40 }
  0x38   :  { %v193_v51 = vmul.f32 %v2833_v23, %v2160_v11  ;;  %v2348_v55 = vpack.c.bf16 %v319_v45, %v318_v43  ;;  %v320_v5 = vmax.f32 %v2326_v62, 0.0  ;;  %v321_v37 = vmax.f32 %v2329_v28, 0.0 }
  0x39   :  { %v2834_v47 = vunpack.c.l.bf16 %v2095_v58  ;;  %v322_v56 = vmax.f32 %v2332_v50, 0.0  ;;  %v2357_v31 = vadd.f32 %v2201_v26, %v192_v63  ;;  %v2835_v15 = vunpack.c.l.bf16 %v2081_v52 }
  0x3a   :  { %1839 = vmatmul.mubr.bf16.gmra.mrb[8].mxu0 %v367_v49  ;;  %v2836_v22 = vunpack.c.h.bf16 %v2095_v58  ;;  %v2366_v25 = vadd.f32 %v2201_v26, %v193_v51  ;;  %v2837_v27 = vunpack.c.l.bf16 %v2100_v59  ;;  %v2838_v57 = vunpack.c.h.bf16 %v2100_v59 }
  0x3b   :  { %v198_v39 = vmul.f32 %v2834_v47, %v2160_v11  ;;  %v194_v38 = vmul.f32 %v2835_v15, %v2160_v11  ;;  %1842 = vmatprep.mubr.bf16.mxu0 %v368_v12  ;;  %v323_v43 = vmax.f32 %v2346_v19, 0.0  ;;  %v2839_v58 = vunpack.c.h.bf16 %v2081_v52 }
  0x3c   :  { %v199_v42 = vmul.f32 %v2836_v22, %v2160_v11  ;;  %v200_v48 = vmul.f32 %v2837_v27, %v2160_v11  ;;  %v201_v40 = vmul.f32 %v2838_v57, %v2160_v11  ;;  %v2840_v46 = vunpack.c.l.bf16 %v2112_v1 }
  0x3d   :  { %v266_v60 = vadd.f32 %v2201_v26, %v198_v39  ;;  %v195_v45 = vmul.f32 %v2839_v58, %v2160_v11  ;;  %v2841_v59 = vunpack.c.h.bf16 %v2112_v1  ;;  %v2389_v19 = vadd.f32 %v2201_v26, %v194_v38 }
  0x3e   :  { %v267_v49 = vadd.f32 %v2201_v26, %v199_v42  ;;  %v202_v63 = vmul.f32 %v2840_v46, %v2160_v11  ;;  %v268_v23 = vadd.f32 %v2201_v26, %v200_v48  ;;  %v269_v51 = vadd.f32 %v2201_v26, %v201_v40 }
  0x3f   :  { %v330_v12 = vmax.f32 %v266_v60, 0.0  ;;  %v203_v47 = vmul.f32 %v2841_v59, %v2160_v11  ;;  %v2842_v15 = vunpack.c.l.bf16 %v2121_v7  ;;  %v2843_v48 = vunpack.c.h.bf16 %v2121_v7 }
  0x40   :  { %v331_v52 = vmax.f32 %v267_v49, 0.0  ;;  %v270_v39 = vadd.f32 %v2201_v26, %v202_v63  ;;  %v332_v42 = vmax.f32 %v268_v23, 0.0  ;;  %v333_v60 = vmax.f32 %v269_v51, 0.0 }
  0x41   :  { %v204_v22 = vmul.f32 %v2842_v15, %v2160_v11  ;;  %v271_v27 = vadd.f32 %v2201_v26, %v203_v47  ;;  %v205_v57 = vmul.f32 %v2843_v48, %v2160_v11  ;;  %v2844_v58 = vunpack.c.l.bf16 %v2126_v8 }
  0x42   :  { %v378_v1 = vpack.c.bf16 %v331_v52, %v330_v12  ;;  %v334_v40 = vmax.f32 %v270_v39, 0.0  ;;  %v379_v46 = vpack.c.bf16 %v333_v60, %v332_v42  ;;  %v2845_v23 = vunpack.c.h.bf16 %v2126_v8  ;;  %1843 = vmatmul.mubr.bf16.gmra.mrb[12].mxu0 %v369_v54 }
  0x43   :  { %v272_v38 = vadd.f32 %v2201_v26, %v204_v22  ;;  %v206_v49 = vmul.f32 %v2844_v58, %v2160_v11  ;;  %v335_v63 = vmax.f32 %v271_v27, 0.0  ;;  %v273_v59 = vadd.f32 %v2201_v26, %v205_v57  ;;  %1846 = vmatprep.mubr.bf16.mxu0 %v370_v17 }
  0x44   :  { %v207_v51 = vmul.f32 %v2845_v23, %v2160_v11  ;;  %1862 = vmatprep.mubr.bf16.mxu1 %v378_v1  ;;  %v208_v47 = vmul.f32 %v1510_v2, %v2160_v11  ;;  %v2846_v52 = vunpack.c.h.bf16 %v2135_v14  ;;  %v2847_v54 = vunpack.c.l.bf16 %v2143_v10 }
  0x45   :  { %v336_v7 = vmax.f32 %v272_v38, 0.0  ;;  %v274_v12 = vadd.f32 %v2201_v26, %v206_v49  ;;  %1863 = vmatmul.mubr.bf16.vlgmr.msra.gmra.mrb[0].mxu1 %v379_v46  ;;  %v380_v15 = vpack.c.bf16 %v335_v63, %v334_v40  ;;  %v337_v22 = vmax.f32 %v273_v59, 0.0 }
  0x46   :  { %v209_v39 = vmul.f32 %v2846_v52, %v2160_v11  ;;  %v275_v8 = vadd.f32 %v2201_v26, %v207_v51  ;;  %v210_v42 = vmul.f32 %v2847_v54, %v2160_v11  ;;  %v276_v27 = vadd.f32 %v2201_v26, %v208_v47 }
  0x47   :  { %v338_v60 = vmax.f32 %v274_v12, 0.0  ;;  %v2848_v2 = vunpack.c.h.bf16 %v2143_v10  ;;  %v2849_v17 = vunpack.c.l.bf16 %v2086_v53  ;;  %1866 = vmatprep.mubr.bf16.mxu1 %v380_v15  ;;  %v2850_v38 = vunpack.c.l.bf16 %v2148_v13 }
  0x48   :  { %v277_v48 = vadd.f32 %v2201_v26, %v209_v39  ;;  %v339_v1 = vmax.f32 %v275_v8, 0.0  ;;  %v278_v40 = vadd.f32 %v2201_v26, %v210_v42  ;;  %v324_v49 = vmax.f32 %v2357_v31, 0.0 }
  0x49   :  { %v211_v14 = vmul.f32 %v2848_v2, %v2160_v11  ;;  %v196_v57 = vmul.f32 %v2849_v17, %v2160_v11  ;;  %v212_v58 = vmul.f32 %v2850_v38, %v2160_v11  ;;  %v325_v46 = vmax.f32 %v2366_v25, 0.0 }
  0x4a   :  { %v2851_v10 = vunpack.c.h.bf16 %v2148_v13  ;;  %v2437_v23 = vadd.f32 %v2201_v26, %v195_v45  ;;  %v2852_v51 = vunpack.c.h.bf16 %v2086_v53  ;;  %v381_v47 = vpack.c.bf16 %v337_v22, %v336_v7  ;;  %1847 = vmatmul.mubr.bf16.gmra.mrb[16].mxu0 %v2343_v32 }
  0x4b   :  { %v279_v63 = vadd.f32 %v2201_v26, %v211_v14  ;;  %v2853_v52 = vunpack.c.l.bf16 %v2171_v6  ;;  %v382_v39 = vpack.c.bf16 %v339_v1, %v338_v60  ;;  %v340_v25 = vmax.f32 %v276_v27, 0.0  ;;  %1850 = vmatprep.mubr.bf16.mxu0 %v2348_v55 }
  0x4c   :  { %v213_v59 = vmul.f32 %v2851_v10, %v2160_v11  ;;  %v197_v12 = vmul.f32 %v2852_v51, %v2160_v11  ;;  %v341_v15 = vmax.f32 %v277_v48, 0.0  ;;  %v2446_v8 = vadd.f32 %v2201_v26, %v212_v58 }
  0x4d   :  { %v214_v31 = vmul.f32 %v2853_v52, %v2160_v11  ;;  %v373_v13 = vpack.c.bf16 %v321_v37, %v320_v5  ;;  %v342_v45 = vmax.f32 %v278_v40, 0.0  ;;  %v343_v54 = vmax.f32 %v279_v63, 0.0  ;;  %1867 = vmatmul.mubr.bf16.gmra.mrb[4].mxu1 %v381_v47 }
  0x4e   :  { %v2854_v53 = vunpack.c.h.bf16 %v2171_v6  ;;  %v374_v22 = vpack.c.bf16 %v323_v43, %v322_v56  ;;  %v326_v42 = vmax.f32 %v2389_v19, 0.0  ;;  %v2460_v60 = vadd.f32 %v2201_v26, %v196_v57  ;;  %1870 = vmatprep.mubr.bf16.mxu1 %v382_v39 }
  0x4f   :  { %v281_v62 = vadd.f32 %v2201_v26, %v213_v59  ;;  %v375_v28 = vpack.c.bf16 %v325_v46, %v324_v49  ;;  %v327_v5 = vmax.f32 %v2437_v23, 0.0  ;;  %v2466_v6 = vadd.f32 %v2201_v26, %v197_v12 }
  0x50   :  { %v215_v7 = vmul.f32 %v2854_v53, %v2160_v11  ;;  %v282_v32 = vadd.f32 %v2201_v26, %v214_v31  ;;  %v383_v50 = vpack.c.bf16 %v341_v15, %v340_v25  ;;  %v344_v37 = vmax.f32 %v2446_v8, 0.0 }
  0x51   :  { %v2855_v56 = vunpack.c.l.bf16 %v2185_v4  ;;  %v220_v55 = vmul.f32 %v1534_v21, %v2160_v11  ;;  %v384_v19 = vpack.c.bf16 %v343_v54, %v342_v45  ;;  %v2856_v48 = vunpack.c.h.bf16 %v2185_v4 }
  0x52   :  { %v283_v27 = vadd.f32 %v2201_v26, %v215_v7  ;;  %v221_v14 = vmul.f32 %v1535_v30, %v2160_v11  ;;  %v345_v17 = vmax.f32 %v281_v62, 0.0  ;;  %v218_v57 = vmul.f32 %v1530_v9, %v2160_v11  ;;  %1851 = vmatmul.mubr.bf16.gmra.mrb[20].mxu0 %v373_v13 }
  0x53   :  { %v216_v43 = vmul.f32 %v2855_v56, %v2160_v11  ;;  %v217_v2 = vmul.f32 %v2856_v48, %v2160_v11  ;;  %v288_v1 = vadd.f32 %v2201_v26, %v220_v55  ;;  %v222_v21 = vmul.f32 %v1538_v18, %v2160_v11  ;;  %1854 = vmatprep.mubr.bf16.mxu0 %v374_v22 }
  0x54   :  { %v346_v40 = vmax.f32 %v282_v32, 0.0  ;;  %v2857_v4 = vunpack.c.h.bf16 %v2223_v36  ;;  %v289_v58 = vadd.f32 %v2201_v26, %v221_v14  ;;  %v223_v3 = vmul.f32 %v1539_v20, %v2160_v11 }
  0x55   :  { %v352_v30 = vmax.f32 %v288_v1, 0.0  ;;  %v290_v9 = vadd.f32 %v2201_v26, %v222_v21  ;;  %v224_v49 = vmul.f32 %v1542_v44, %v2160_v11  ;;  %v225_v18 = vmul.f32 %v1543_v41, %v2160_v11  ;;  %1871 = vmatmul.mubr.bf16.gmra.mrb[8].mxu1 %v383_v50 }
  0x56   :  { %v219_v38 = vmul.f32 %v2857_v4, %v2160_v11  ;;  %v347_v46 = vmax.f32 %v283_v27, 0.0  ;;  %v353_v36 = vmax.f32 %v289_v58, 0.0  ;;  %v291_v63 = vadd.f32 %v2201_v26, %v223_v3  ;;  %1874 = vmatprep.mubr.bf16.mxu1 %v384_v19 }
  0x57   :  { %v226_v16 = vmul.f32 %v1546_v35, %v2160_v11  ;;  %v354_v20 = vmax.f32 %v290_v9, 0.0  ;;  %v292_v10 = vadd.f32 %v2201_v26, %v224_v49  ;;  %v293_v59 = vadd.f32 %v2201_v26, %v225_v18 }
  0x58   :  { %v227_v44 = vmul.f32 %v1547_v0, %v2160_v11  ;;  %v389_v29 = vpack.c.bf16 %v353_v36, %v352_v30  ;;  %v355_v41 = vmax.f32 %v291_v63, 0.0  ;;  %v228_v35 = vmul.f32 %v1550_v24, %v2160_v11 }
  0x59   :  { %v294_v23 = vadd.f32 %v2201_v26, %v226_v16  ;;  %v356_v51 = vmax.f32 %v292_v10, 0.0  ;;  %v357_v12 = vmax.f32 %v293_v59, 0.0  ;;  %v229_v33 = vmul.f32 %v1551_v34, %v2160_v11 }
  0x5a   :  { %v295_v47 = vadd.f32 %v2201_v26, %v227_v44  ;;  %v376_v0 = vpack.c.bf16 %v327_v5, %v326_v42  ;;  %v390_v52 = vpack.c.bf16 %v355_v41, %v354_v20  ;;  %v296_v39 = vadd.f32 %v2201_v26, %v228_v35  ;;  %1855 = vmatmul.mubr.bf16.gmra.mrb[24].mxu0 %v375_v28 }
  0x5b   :  { %v358_v31 = vmax.f32 %v294_v23, 0.0  ;;  %v284_v25 = vadd.f32 %v2201_v26, %v216_v43  ;;  %v391_v15 = vpack.c.bf16 %v357_v12, %v356_v51  ;;  %v297_v24 = vadd.f32 %v2201_v26, %v229_v33 }
  0x5c   :  { %v359_v8 = vmax.f32 %v295_v47, 0.0  ;;  %v385_v13 = vpack.c.bf16 %v345_v17, %v344_v37  ;;  %v285_v45 = vadd.f32 %v2201_v26, %v217_v2  ;;  %v286_v54 = vadd.f32 %v2201_v26, %v218_v57  ;;  %1858 = vmatprep.mubr.bf16.mxu0 %v376_v0 }
  0x5d   :  { %v360_v53 = vmax.f32 %v296_v39, 0.0  ;;  %v386_v7 = vpack.c.bf16 %v347_v46, %v346_v40  ;;  %v287_v11 = vadd.f32 %v2201_v26, %v219_v38  ;;  %v361_v34 = vmax.f32 %v297_v24, 0.0 }
  0x5e   :  { %v392_v61 = vpack.c.bf16 %v359_v8, %v358_v31  ;;  %v328_v22 = vmax.f32 %v2460_v60, 0.0  ;;  %v329_v42 = vmax.f32 %v2466_v6, 0.0  ;;  %1875 = vmatmul.mubr.bf16.gmra.mrb[12].mxu1 %v385_v13  ;;  %v348_v5 = vmax.f32 %v284_v25, 0.0 }
  0x5f   :  { %v393_v62 = vpack.c.bf16 %v361_v34, %v360_v53  ;;  %v349_v32 = vmax.f32 %v285_v45, 0.0  ;;  %1878 = vmatprep.mubr.bf16.mxu1 %v386_v7  ;;  %v350_v50 = vmax.f32 %v286_v54, 0.0  ;;  %v351_v37 = vmax.f32 %v287_v11, 0.0 }
  0x60   :  { %v377_v56 = vpack.c.bf16 %v329_v42, %v328_v22  ;;  %v1921_v26 = vmov 0.0  }
  0x61   :  { %v387_v43 = vpack.c.bf16 %v349_v32, %v348_v5  ;;  %v388_v55 = vpack.c.bf16 %v351_v37, %v350_v50  ;;  %1071 = vst [vmem:[%s2830_s5] sm:$0xff] %v1921_v26 }
  0x62   :  { %1859 = vmatmul.mubr.bf16.gmra.mrb[28].mxu0 %v377_v56 }
  0x66   :  { %1879 = vmatmul.mubr.bf16.gmra.mrb[16].mxu1 %v387_v43 }
  0x67   :  { %1882 = vmatprep.mubr.bf16.mxu1 %v388_v55 }
  0x6e   :  { %1883 = vmatmul.mubr.bf16.gmra.mrb[20].mxu1 %v389_v29 }
  0x6f   :  { %1886 = vmatprep.mubr.bf16.mxu1 %v390_v52 }
  0x76   :  { %1887 = vmatmul.mubr.bf16.gmra.mrb[24].mxu1 %v391_v15 }
  0x77   :  { %1890 = vmatprep.mubr.bf16.mxu1 %v392_v61 }
  0x7e   :  { %1891 = vmatmul.mubr.bf16.gmra.mrb[28].mxu1 %v393_v62 }
  0xfd   :  { %v1832_v60 = vpop.f32.mrb[0].mxu0 }
  0xfe   :  { %v492_v28 = vpop.f32.mrb[1].mxu0  ;;  %v1147_v57 = vmul.f32 %v1832_v60, %v1832_v60 }
  0xff   :  { %v1833_v6 = vpop.f32.mrb[2].mxu0  ;;  %v1145_v48 = vmul.f32 %v492_v28, %v492_v28 }
 0x100   :  { %v1560_v19 = vpack.c.bf16 %v1833_v6, %v1832_v60  ;;  %v495_v27 = vpop.f32.mrb[3].mxu0  ;;  %v1148_v40 = vmul.f32 %v1833_v6, %v1833_v6 }
 0x101   :  { %v1555_v2 = vpack.c.bf16 %v495_v27, %v492_v28  ;;  %v1073_v14 = vadd.f32 %v495_v27, %v492_v28  ;;  %v1146_v17 = vmul.f32 %v495_v27, %v495_v27 }
 0x102   :  { %1743 = vst [vmem:[%s2831_s4 + $0x8] sm:$0xff] %v1560_v19  }
 0x103   :  { %1556 = vst [vmem:[%s2831_s4] sm:$0xff] %v1555_v2   ;;  %v1074_v1 = vadd.f32 %v1832_v60, %v1073_v14  ;;  %v1209_v21 = vadd.f32 %v1146_v17, %v1145_v48 }
 0x105   :  { %v1210_v4 = vadd.f32 %v1209_v21, %v1147_v57  ;;  %v1836_v38 = vpop.f32.mrb[4].mxu0  ;;  %v1075_v58 = vadd.f32 %v1833_v6, %v1074_v1 }
 0x106   :  { %v508_v3 = vpop.f32.mrb[5].mxu0  ;;  %v1151_v59 = vmul.f32 %v1836_v38, %v1836_v38 }
 0x107   :  { %v1076_v30 = vadd.f32 %v1075_v58, %v508_v3  ;;  %v1149_v9 = vmul.f32 %v508_v3, %v508_v3  ;;  %v1211_v49 = vadd.f32 %v1210_v4, %v1148_v40  ;;  %v1837_v18 = vpop.f32.mrb[6].mxu0 }
 0x108   :  { %v1570_v46 = vpack.c.bf16 %v1837_v18, %v1836_v38  ;;  %v511_v36 = vpop.f32.mrb[7].mxu0  ;;  %v1152_v41 = vmul.f32 %v1837_v18, %v1837_v18 }
 0x109   :  { %v1212_v63 = vadd.f32 %v1211_v49, %v1149_v9  ;;  %v1565_v16 = vpack.c.bf16 %v511_v36, %v508_v3  ;;  %v1077_v20 = vadd.f32 %v1076_v30, %v511_v36  ;;  %v1150_v10 = vmul.f32 %v511_v36, %v511_v36 }
 0x10a   :  { %1745 = vst [vmem:[%s2831_s4 + $0x18] sm:$0xff] %v1570_v46  }
 0x10b   :  { %1744 = vst [vmem:[%s2831_s4 + $0x10] sm:$0xff] %v1565_v16   ;;  %v1078_v44 = vadd.f32 %v1836_v38, %v1077_v20  ;;  %v1213_v29 = vadd.f32 %v1212_v63, %v1150_v10 }
 0x10d   :  { %v1214_v23 = vadd.f32 %v1213_v29, %v1151_v59  ;;  %v1840_v35 = vpop.f32.mrb[8].mxu0  ;;  %v1079_v51 = vadd.f32 %v1837_v18, %v1078_v44 }
 0x10e   :  { %v524_v12 = vpop.f32.mrb[9].mxu0  ;;  %v1155_v13 = vmul.f32 %v1840_v35, %v1840_v35 }
 0x10f   :  { %v1080_v47 = vadd.f32 %v1079_v51, %v524_v12  ;;  %v1153_v33 = vmul.f32 %v524_v12, %v524_v12  ;;  %v1215_v0 = vadd.f32 %v1214_v23, %v1152_v41  ;;  %v1841_v52 = vpop.f32.mrb[10].mxu0 }
 0x110   :  { %v1580_v31 = vpack.c.bf16 %v1841_v52, %v1840_v35  ;;  %v527_v39 = vpop.f32.mrb[11].mxu0  ;;  %v1156_v53 = vmul.f32 %v1841_v52, %v1841_v52 }
 0x111   :  { %v1216_v25 = vadd.f32 %v1215_v0, %v1153_v33  ;;  %v1575_v15 = vpack.c.bf16 %v527_v39, %v524_v12  ;;  %v1081_v8 = vadd.f32 %v1080_v47, %v527_v39  ;;  %v1154_v24 = vmul.f32 %v527_v39, %v527_v39 }
 0x112   :  { %1747 = vst [vmem:[%s2831_s4 + $0x28] sm:$0xff] %v1580_v31  }
 0x113   :  { %1746 = vst [vmem:[%s2831_s4 + $0x20] sm:$0xff] %v1575_v15   ;;  %v1082_v45 = vadd.f32 %v1840_v35, %v1081_v8  ;;  %v1217_v54 = vadd.f32 %v1216_v25, %v1154_v24 }
 0x115   :  { %v1218_v7 = vadd.f32 %v1217_v54, %v1155_v13  ;;  %v1844_v11 = vpop.f32.mrb[12].mxu0  ;;  %v1083_v61 = vadd.f32 %v1841_v52, %v1082_v45 }
 0x116   :  { %v540_v34 = vpop.f32.mrb[13].mxu0  ;;  %v1159_v48 = vmul.f32 %v1844_v11, %v1844_v11 }
 0x117   :  { %v1084_v42 = vadd.f32 %v1083_v61, %v540_v34  ;;  %v1157_v62 = vmul.f32 %v540_v34, %v540_v34  ;;  %v1219_v5 = vadd.f32 %v1218_v7, %v1156_v53  ;;  %v1845_v32 = vpop.f32.mrb[14].mxu0 }
 0x118   :  { %v2550_v22 = vpop.f32.mrb[0].mxu1  ;;  %v1590_v37 = vpack.c.bf16 %v1845_v32, %v1844_v11  ;;  %v543_v56 = vpop.f32.mrb[15].mxu0  ;;  %v1160_v17 = vmul.f32 %v1845_v32, %v1845_v32 }
 0x119   :  { %v2552_v50 = vpop.f32.mrb[1].mxu1  ;;  %v1220_v55 = vadd.f32 %v1219_v5, %v1157_v62  ;;  %v1585_v26 = vpack.c.bf16 %v543_v56, %v540_v34  ;;  %v1085_v60 = vadd.f32 %v1084_v42, %v543_v56  ;;  %v1158_v28 = vmul.f32 %v543_v56, %v543_v56 }
 0x11a   :  { %v2554_v43 = vpop.f32.mrb[2].mxu1  ;;  %1749 = vst [vmem:[%s2831_s4 + $0x38] sm:$0xff] %v1590_v37  }
 0x11b   :  { %v2556_v6 = vpop.f32.mrb[3].mxu1  ;;  %v1640_v19 = vpack.c.bf16 %v2554_v43, %v2550_v22  ;;  %1748 = vst [vmem:[%s2831_s4 + $0x30] sm:$0xff] %v1585_v26   ;;  %v1086_v2 = vadd.f32 %v1844_v11, %v1085_v60  ;;  %v1221_v14 = vadd.f32 %v1220_v55, %v1158_v28 }
 0x11c   :  { %v1635_v27 = vpack.c.bf16 %v2556_v6, %v2552_v50 }
 0x11d   :  { %1759 = vst [vmem:[%s2831_s4 + $0x88] sm:$0xff] %v1640_v19   ;;  %v1222_v57 = vadd.f32 %v1221_v14, %v1159_v48  ;;  %v1848_v1 = vpop.f32.mrb[16].mxu0  ;;  %v1087_v21 = vadd.f32 %v1845_v32, %v1086_v2 }
 0x11e   :  { %1758 = vst [vmem:[%s2831_s4 + $0x80] sm:$0xff] %v1635_v27   ;;  %v556_v40 = vpop.f32.mrb[17].mxu0  ;;  %v1163_v29 = vmul.f32 %v1848_v1, %v1848_v1 }
 0x11f   :  { %v1088_v38 = vadd.f32 %v1087_v21, %v556_v40  ;;  %v1161_v58 = vmul.f32 %v556_v40, %v556_v40  ;;  %v1223_v3 = vadd.f32 %v1222_v57, %v1160_v17  ;;  %v1849_v30 = vpop.f32.mrb[18].mxu0 }
 0x120   :  { %v2574_v4 = vpop.f32.mrb[4].mxu1  ;;  %v1600_v49 = vpack.c.bf16 %v1849_v30, %v1848_v1  ;;  %v559_v18 = vpop.f32.mrb[19].mxu0  ;;  %v1164_v35 = vmul.f32 %v1849_v30, %v1849_v30 }
 0x121   :  { %v2576_v9 = vpop.f32.mrb[5].mxu1  ;;  %v1224_v36 = vadd.f32 %v1223_v3, %v1161_v58  ;;  %v1595_v63 = vpack.c.bf16 %v559_v18, %v556_v40  ;;  %v1089_v16 = vadd.f32 %v1088_v38, %v559_v18  ;;  %v1162_v20 = vmul.f32 %v559_v18, %v559_v18 }
 0x122   :  { %v2578_v46 = vpop.f32.mrb[6].mxu1  ;;  %1751 = vst [vmem:[%s2831_s4 + $0x48] sm:$0xff] %v1600_v49  }
 0x123   :  { %v2580_v10 = vpop.f32.mrb[7].mxu1  ;;  %v1650_v59 = vpack.c.bf16 %v2578_v46, %v2574_v4  ;;  %1750 = vst [vmem:[%s2831_s4 + $0x40] sm:$0xff] %v1595_v63   ;;  %v1090_v41 = vadd.f32 %v1848_v1, %v1089_v16  ;;  %v1225_v23 = vadd.f32 %v1224_v36, %v1162_v20 }
 0x124   :  { %v1645_v44 = vpack.c.bf16 %v2580_v10, %v2576_v9 }
 0x125   :  { %1761 = vst [vmem:[%s2831_s4 + $0x98] sm:$0xff] %v1650_v59   ;;  %v1226_v51 = vadd.f32 %v1225_v23, %v1163_v29  ;;  %v1852_v12 = vpop.f32.mrb[20].mxu0  ;;  %v1091_v47 = vadd.f32 %v1849_v30, %v1090_v41 }
 0x126   :  { %1760 = vst [vmem:[%s2831_s4 + $0x90] sm:$0xff] %v1645_v44   ;;  %v572_v33 = vpop.f32.mrb[21].mxu0  ;;  %v1167_v42 = vmul.f32 %v1852_v12, %v1852_v12 }
 0x127   :  { %v1092_v52 = vadd.f32 %v1091_v47, %v572_v33  ;;  %v1165_v31 = vmul.f32 %v572_v33, %v572_v33  ;;  %v1227_v39 = vadd.f32 %v1226_v51, %v1164_v35  ;;  %v1853_v25 = vpop.f32.mrb[22].mxu0 }
 0x128   :  { %v2598_v0 = vpop.f32.mrb[8].mxu1  ;;  %v1610_v8 = vpack.c.bf16 %v1853_v25, %v1852_v12  ;;  %v575_v24 = vpop.f32.mrb[23].mxu0  ;;  %v1168_v32 = vmul.f32 %v1853_v25, %v1853_v25 }
 0x129   :  { %v2600_v15 = vpop.f32.mrb[9].mxu1  ;;  %v1228_v45 = vadd.f32 %v1227_v39, %v1165_v31  ;;  %v1605_v54 = vpack.c.bf16 %v575_v24, %v572_v33  ;;  %v1093_v53 = vadd.f32 %v1092_v52, %v575_v24  ;;  %v1166_v7 = vmul.f32 %v575_v24, %v575_v24 }
 0x12a   :  { %v2602_v13 = vpop.f32.mrb[10].mxu1  ;;  %1753 = vst [vmem:[%s2831_s4 + $0x58] sm:$0xff] %v1610_v8  }
 0x12b   :  { %v2604_v11 = vpop.f32.mrb[11].mxu1  ;;  %v1660_v61 = vpack.c.bf16 %v2602_v13, %v2598_v0  ;;  %1752 = vst [vmem:[%s2831_s4 + $0x50] sm:$0xff] %v1605_v54   ;;  %v1094_v62 = vadd.f32 %v1852_v12, %v1093_v53  ;;  %v1229_v5 = vadd.f32 %v1228_v45, %v1166_v7 }
 0x12c   :  { %v1655_v34 = vpack.c.bf16 %v2604_v11, %v2600_v15 }
 0x12d   :  { %1763 = vst [vmem:[%s2831_s4 + $0xa8] sm:$0xff] %v1660_v61   ;;  %v1230_v37 = vadd.f32 %v1229_v5, %v1167_v42  ;;  %v1856_v56 = vpop.f32.mrb[24].mxu0  ;;  %v1095_v55 = vadd.f32 %v1853_v25, %v1094_v62  ;;  %v1177_v5 = vmul.f32 %v2552_v50, %v2552_v50 }
 0x12e   :  { %1762 = vst [vmem:[%s2831_s4 + $0xa0] sm:$0xff] %v1655_v34   ;;  %v588_v26 = vpop.f32.mrb[25].mxu0  ;;  %v1171_v49 = vmul.f32 %v1856_v56, %v1856_v56 }
 0x12f   :  { %v1096_v28 = vadd.f32 %v1095_v55, %v588_v26  ;;  %v1169_v19 = vmul.f32 %v588_v26, %v588_v26  ;;  %v1231_v27 = vadd.f32 %v1230_v37, %v1168_v32  ;;  %v1857_v48 = vpop.f32.mrb[26].mxu0 }
 0x130   :  { %v1620_v14 = vpack.c.bf16 %v1857_v48, %v1856_v56  ;;  %v591_v17 = vpop.f32.mrb[27].mxu0  ;;  %v1172_v63 = vmul.f32 %v1857_v48, %v1857_v48 }
 0x131   :  { %v2622_v60 = vpop.f32.mrb[12].mxu1  ;;  %v1232_v1 = vadd.f32 %v1231_v27, %v1169_v19  ;;  %v1615_v21 = vpack.c.bf16 %v591_v17, %v588_v26  ;;  %v1097_v40 = vadd.f32 %v1096_v28, %v591_v17  ;;  %v1170_v38 = vmul.f32 %v591_v17, %v591_v17 }
 0x132   :  { %v2624_v2 = vpop.f32.mrb[13].mxu1  ;;  %1755 = vst [vmem:[%s2831_s4 + $0x68] sm:$0xff] %v1620_v14   ;;  %v1178_v27 = vmul.f32 %v2556_v6, %v2556_v6 }
 0x133   :  { %v2626_v57 = vpop.f32.mrb[14].mxu1  ;;  %1754 = vst [vmem:[%s2831_s4 + $0x60] sm:$0xff] %v1615_v21   ;;  %v1098_v18 = vadd.f32 %v1856_v56, %v1097_v40  ;;  %v1233_v36 = vadd.f32 %v1232_v1, %v1170_v38 }
 0x134   :  { %v2628_v58 = vpop.f32.mrb[15].mxu1  ;;  %v1670_v3 = vpack.c.bf16 %v2626_v57, %v2622_v60 }
 0x135   :  { %v1665_v30 = vpack.c.bf16 %v2628_v58, %v2624_v2  ;;  %v1234_v16 = vadd.f32 %v1233_v36, %v1171_v49  ;;  %v1860_v20 = vpop.f32.mrb[28].mxu0  ;;  %v1099_v59 = vadd.f32 %v1857_v48, %v1098_v18 }
 0x136   :  { %1765 = vst [vmem:[%s2831_s4 + $0xb8] sm:$0xff] %v1670_v3   ;;  %v604_v44 = vpop.f32.mrb[29].mxu0  ;;  %v1175_v53 = vmul.f32 %v1860_v20, %v1860_v20  ;;  %v1181_v3 = vmul.f32 %v2576_v9, %v2576_v9 }
 0x137   :  { %1764 = vst [vmem:[%s2831_s4 + $0xb0] sm:$0xff] %v1665_v30   ;;  %v1100_v41 = vadd.f32 %v1099_v59, %v604_v44  ;;  %v1173_v23 = vmul.f32 %v604_v44, %v604_v44  ;;  %v1235_v35 = vadd.f32 %v1234_v16, %v1172_v63  ;;  %v1861_v51 = vpop.f32.mrb[30].mxu0 }
 0x138   :  { %v1630_v47 = vpack.c.bf16 %v1861_v51, %v1860_v20  ;;  %v607_v33 = vpop.f32.mrb[31].mxu0  ;;  %v1176_v34 = vmul.f32 %v1861_v51, %v1861_v51 }
 0x139   :  { %v2646_v29 = vpop.f32.mrb[16].mxu1  ;;  %v1236_v31 = vadd.f32 %v1235_v35, %v1173_v23  ;;  %v1625_v39 = vpack.c.bf16 %v607_v33, %v604_v44  ;;  %v1101_v25 = vadd.f32 %v1100_v41, %v607_v33  ;;  %v1174_v8 = vmul.f32 %v607_v33, %v607_v33 }
 0x13a   :  { %v2648_v12 = vpop.f32.mrb[17].mxu1  ;;  %1757 = vst [vmem:[%s2831_s4 + $0x78] sm:$0xff] %v1630_v47   ;;  %v1185_v47 = vmul.f32 %v2600_v15, %v2600_v15 }
 0x13b   :  { %v2650_v52 = vpop.f32.mrb[18].mxu1  ;;  %1756 = vst [vmem:[%s2831_s4 + $0x70] sm:$0xff] %v1625_v39   ;;  %v1102_v7 = vadd.f32 %v1860_v20, %v1101_v25  ;;  %v1237_v61 = vadd.f32 %v1236_v31, %v1174_v8  ;;  %v1182_v20 = vmul.f32 %v2580_v10, %v2580_v10 }
 0x13c   :  { %v2652_v24 = vpop.f32.mrb[19].mxu1  ;;  %v1680_v45 = vpack.c.bf16 %v2650_v52, %v2646_v29 }
 0x13d   :  { %v1675_v54 = vpack.c.bf16 %v2652_v24, %v2648_v12  ;;  %v1238_v42 = vadd.f32 %v1237_v61, %v1175_v53  ;;  %v1103_v62 = vadd.f32 %v1861_v51, %v1102_v7 }
 0x13e   :  { %1767 = vst [vmem:[%s2831_s4 + $0xc8] sm:$0xff] %v1680_v45  }
 0x13f   :  { %1766 = vst [vmem:[%s2831_s4 + $0xc0] sm:$0xff] %v1675_v54   ;;  %v1104_v37 = vadd.f32 %v1103_v62, %v2552_v50  ;;  %v1239_v56 = vadd.f32 %v1238_v42, %v1176_v34  ;;  %v1179_v50 = vmul.f32 %v2550_v22, %v2550_v22  ;;  %v1186_v54 = vmul.f32 %v2604_v11, %v2604_v11 }
 0x141   :  { %v2672_v32 = vpop.f32.mrb[20].mxu1  ;;  %v1240_v28 = vadd.f32 %v1239_v56, %v1177_v5  ;;  %v1105_v19 = vadd.f32 %v1104_v37, %v2556_v6  ;;  %v1180_v6 = vmul.f32 %v2554_v43, %v2554_v43  ;;  %v1189_v5 = vmul.f32 %v2624_v2, %v2624_v2 }
 0x142   :  { %v2675_v55 = vpop.f32.mrb[21].mxu1 }
 0x143   :  { %v2677_v26 = vpop.f32.mrb[22].mxu1  ;;  %v1106_v1 = vadd.f32 %v2550_v22, %v1105_v19  ;;  %v1241_v21 = vadd.f32 %v1240_v28, %v1178_v27  ;;  %v1190_v19 = vmul.f32 %v2628_v58, %v2628_v58  ;;  %v1191_v27 = vmul.f32 %v2622_v60, %v2622_v60 }
 0x144   :  { %v1690_v48 = vpack.c.bf16 %v2677_v26, %v2672_v32  ;;  %v2684_v14 = vpop.f32.mrb[23].mxu1 }
 0x145   :  { %v1685_v17 = vpack.c.bf16 %v2684_v14, %v2675_v55  ;;  %v1242_v40 = vadd.f32 %v1241_v21, %v1179_v50  ;;  %v1107_v38 = vadd.f32 %v2554_v43, %v1106_v1 }
 0x146   :  { %1769 = vst [vmem:[%s2831_s4 + $0xd8] sm:$0xff] %v1690_v48  }
 0x147   :  { %1768 = vst [vmem:[%s2831_s4 + $0xd0] sm:$0xff] %v1685_v17   ;;  %v1108_v22 = vadd.f32 %v1107_v38, %v2576_v9  ;;  %v1243_v49 = vadd.f32 %v1242_v40, %v1180_v6  ;;  %v1183_v9 = vmul.f32 %v2574_v4, %v2574_v4  ;;  %v1194_v38 = vmul.f32 %v2652_v24, %v2652_v24 }
 0x149   :  { %v2702_v30 = vpop.f32.mrb[24].mxu1  ;;  %v1244_v63 = vadd.f32 %v1243_v49, %v1181_v3  ;;  %v1109_v16 = vadd.f32 %v1108_v22, %v2580_v10  ;;  %v1184_v10 = vmul.f32 %v2578_v46, %v2578_v46 }
 0x14a   :  { %v2705_v18 = vpop.f32.mrb[25].mxu1 }
 0x14b   :  { %v2707_v36 = vpop.f32.mrb[26].mxu1  ;;  %v1110_v41 = vadd.f32 %v2574_v4, %v1109_v16  ;;  %v1245_v23 = vadd.f32 %v1244_v63, %v1182_v20 }
 0x14c   :  { %v1700_v43 = vpack.c.bf16 %v2707_v36, %v2702_v30  ;;  %v2714_v59 = vpop.f32.mrb[27].mxu1 }
 0x14d   :  { %v1695_v44 = vpack.c.bf16 %v2714_v59, %v2705_v18  ;;  %v1246_v35 = vadd.f32 %v1245_v23, %v1183_v9  ;;  %v1111_v51 = vadd.f32 %v2578_v46, %v1110_v41 }
 0x14e   :  { %1771 = vst [vmem:[%s2831_s4 + $0xe8] sm:$0xff] %v1700_v43  }
 0x14f   :  { %1770 = vst [vmem:[%s2831_s4 + $0xe0] sm:$0xff] %v1695_v44   ;;  %v1112_v4 = vadd.f32 %v1111_v51, %v2600_v15  ;;  %v1247_v31 = vadd.f32 %v1246_v35, %v1184_v10  ;;  %v1187_v15 = vmul.f32 %v2598_v0, %v2598_v0  ;;  %v1198_v44 = vmul.f32 %v2684_v14, %v2684_v14 }
 0x151   :  { %v2732_v33 = vpop.f32.mrb[28].mxu1  ;;  %v1248_v8 = vadd.f32 %v1247_v31, %v1185_v47  ;;  %v1113_v45 = vadd.f32 %v1112_v4, %v2604_v11  ;;  %v1188_v11 = vmul.f32 %v2602_v13, %v2602_v13  ;;  %v1202_v4 = vmul.f32 %v2714_v59, %v2714_v59 }
 0x152   :  { %v2735_v39 = vpop.f32.mrb[29].mxu1 }
 0x153   :  { %v2737_v25 = vpop.f32.mrb[30].mxu1  ;;  %v1114_v61 = vadd.f32 %v2598_v0, %v1113_v45  ;;  %v1249_v34 = vadd.f32 %v1248_v8, %v1186_v54 }
 0x154   :  { %v1710_v46 = vpack.c.bf16 %v2737_v25, %v2732_v33  ;;  %v735_v53 = vpop.f32.mrb[31].mxu1 }
 0x155   :  { %v1705_v7 = vpack.c.bf16 %v735_v53, %v2735_v39  ;;  %v1250_v42 = vadd.f32 %v1249_v34, %v1187_v15  ;;  %v1115_v62 = vadd.f32 %v2602_v13, %v1114_v61  ;;  %v1192_v13 = vmul.f32 %v2626_v57, %v2626_v57 }
 0x156   :  { %1773 = vst [vmem:[%s2831_s4 + $0xf8] sm:$0xff] %v1710_v46   ;;  %v1206_v61 = vmul.f32 %v735_v53, %v735_v53  ;;  %v1207_v34 = vmul.f32 %v2732_v33, %v2732_v33 }
 0x157   :  { %1772 = vst [vmem:[%s2831_s4 + $0xf0] sm:$0xff] %v1705_v7   ;;  %v1116_v0 = vadd.f32 %v1115_v62, %v2624_v2  ;;  %v1251_v37 = vadd.f32 %v1250_v42, %v1188_v11  ;;  %v1193_v2 = vmul.f32 %v2648_v12, %v2648_v12  ;;  %v1208_v42 = vmul.f32 %v2737_v25, %v2737_v25 }
 0x159   :  { %v1252_v56 = vadd.f32 %v1251_v37, %v1189_v5  ;;  %v1117_v28 = vadd.f32 %v1116_v0, %v2628_v58 }
 0x15b   :  { %v1118_v48 = vadd.f32 %v2622_v60, %v1117_v28  ;;  %v1253_v17 = vadd.f32 %v1252_v56, %v1190_v19  ;;  %v1195_v60 = vmul.f32 %v2646_v29, %v2646_v29 }
 0x15d   :  { %v1254_v50 = vadd.f32 %v1253_v17, %v1191_v27  ;;  %v1119_v1 = vadd.f32 %v2626_v57, %v1118_v48  ;;  %v1196_v57 = vmul.f32 %v2650_v52, %v2650_v52 }
 0x15f   :  { %v1120_v21 = vadd.f32 %v1119_v1, %v2648_v12  ;;  %v1255_v6 = vadd.f32 %v1254_v50, %v1192_v13  ;;  %v1197_v12 = vmul.f32 %v2675_v55, %v2675_v55 }
 0x161   :  { %v1256_v40 = vadd.f32 %v1255_v6, %v1193_v2  ;;  %v1121_v58 = vadd.f32 %v1120_v21, %v2652_v24 }
 0x163   :  { %v1122_v3 = vadd.f32 %v2646_v29, %v1121_v58  ;;  %v1257_v22 = vadd.f32 %v1256_v40, %v1194_v38  ;;  %v1199_v29 = vmul.f32 %v2672_v32, %v2672_v32 }
 0x165   :  { %v1258_v49 = vadd.f32 %v1257_v22, %v1195_v60  ;;  %v1123_v63 = vadd.f32 %v2650_v52, %v1122_v3  ;;  %v1200_v52 = vmul.f32 %v2677_v26, %v2677_v26 }
 0x167   :  { %v1124_v16 = vadd.f32 %v1123_v63, %v2675_v55  ;;  %v1259_v20 = vadd.f32 %v1258_v49, %v1196_v57  ;;  %v1201_v55 = vmul.f32 %v2705_v18, %v2705_v18 }
 0x169   :  { %v1260_v43 = vadd.f32 %v1259_v20, %v1197_v12  ;;  %v1125_v24 = vadd.f32 %v1124_v16, %v2684_v14 }
 0x16b   :  { %v1126_v9 = vadd.f32 %v2672_v32, %v1125_v24  ;;  %v1261_v41 = vadd.f32 %v1260_v43, %v1198_v44  ;;  %v1203_v32 = vmul.f32 %v2702_v30, %v2702_v30 }
 0x16d   :  { %v1262_v23 = vadd.f32 %v1261_v41, %v1199_v29  ;;  %v1127_v10 = vadd.f32 %v2677_v26, %v1126_v9  ;;  %v1204_v26 = vmul.f32 %v2707_v36, %v2707_v36 }
 0x16f   :  { %v1128_v35 = vadd.f32 %v1127_v10, %v2705_v18  ;;  %v1263_v51 = vadd.f32 %v1262_v23, %v1200_v52  ;;  %v1205_v18 = vmul.f32 %v2735_v39, %v2735_v39 }
 0x171   :  { %v1264_v47 = vadd.f32 %v1263_v51, %v1201_v55  ;;  %v1129_v14 = vadd.f32 %v1128_v35, %v2714_v59 }
 0x173   :  { %v1130_v31 = vadd.f32 %v2702_v30, %v1129_v14  ;;  %v1265_v8 = vadd.f32 %v1264_v47, %v1202_v4 }
 0x175   :  { %v1266_v45 = vadd.f32 %v1265_v8, %v1203_v32  ;;  %v1131_v54 = vadd.f32 %v2707_v36, %v1130_v31 }
 0x177   :  { %v1132_v46 = vadd.f32 %v1131_v54, %v2735_v39  ;;  %v1267_v7 = vadd.f32 %v1266_v45, %v1204_v26 }
 0x179   :  { %v1268_v15 = vadd.f32 %v1267_v7, %v1205_v18  ;;  %v1133_v59 = vadd.f32 %v1132_v46, %v735_v53 }
 0x17b   :  { %v1134_v30 = vadd.f32 %v2732_v33, %v1133_v59  ;;  %v1269_v11 = vadd.f32 %v1268_v15, %v1206_v61  ;;  %v1072_v33 = vld [vmem:[%s2830_s5] sm:$0x1] }
 0x17d   :  { %v1135_v36 = vadd.f32 %v2737_v25, %v1134_v30  ;;  %v1270_v62 = vadd.f32 %v1269_v11, %v1207_v34  ;;  %v1144_v25 = vld [vmem:[%s2830_s5 + $0x1] sm:$0x1] }
 0x17f   :  { %v1136_v5 = vrot.slane %v1135_v36, 4  ;;  %v1271_v0 = vadd.f32 %v1270_v62, %v1208_v42 }
 0x181   :  { %v1137_v37 = vadd.f32 %v1136_v5, %v1135_v36  ;;  %v1272_v39 = vrot.slane %v1271_v0, 4 }
 0x183   :  { %v1138_v56 = vrot.slane %v1137_v37, 2  ;;  %v1273_v28 = vadd.f32 %v1272_v39, %v1271_v0 }
 0x185   :  { %v1139_v19 = vadd.f32 %v1138_v56, %v1137_v37  ;;  %v1274_v53 = vrot.slane %v1273_v28, 2 }
 0x187   :  { %v1140_v27 = vrot.slane %v1139_v19, 1  ;;  %v1275_v48 = vadd.f32 %v1274_v53, %v1273_v28 }
 0x189   :  { %v1141_v17 = vadd.f32 %v1140_v27, %v1139_v19  ;;  %v1276_v13 = vrot.slane %v1275_v48, 1 }
 0x18b   :  { %v1142_v50 = vadd.f32 %v1141_v17, %v1072_v33  ;;  %v1277_v1 = vadd.f32 %v1276_v13, %v1275_v48 }
 0x18d   :  { %1143 = vst [vmem:[%s2830_s5] sm:$0x1] %v1142_v50  ;;  %v1278_v2 = vadd.f32 %v1277_v1, %v1144_v25 }
 0x18f   :  { %1279 = vst [vmem:[%s2830_s5 + $0x1] sm:$0x1] %v1278_v2 }

// kernel: bottleneck_forward.7
= control target key start
LH: loop header
LB: loop body
LE: loop exit
PB: predicated region body
PF: predicated region fallthrough
CT: control target
= control target key end

     0   :  { %v159_v6 = vlaneseq  ;;  %s1569_s1 = inlined_call_operand.vmem [shape: f32[8,128], index: 1, kind: input, shape index: {}]   ;;  %s1570_s0 = inlined_call_operand.vmem [shape: bf16[2,16,16,128], index: 0, kind: input, shape index: {}]   ;;  %s1571_s2 = inlined_call_operand.vmem [shape: f32[8,128], index: 2, kind: input, shape index: {}]   ;;  %s1572_s3 = inlined_call_operand.vmem [shape: f32[2,16,16,128], index: 3, kind: input, shape index: {}]   ;;  %s1573_s4 = inlined_call_operand.vmem [shape: f32[2,16,16,128], index: 4, kind: output, shape index: {}]  }
   0x1   :  { %v17_v0 = vld [vmem:[%s1569_s1] sm:$0x1]  ;;  %v19_v1 = vld [vmem:[%s1569_s1 + $0x1] sm:$0x1]  ;;  %v761_v11 = vld [vmem:[%s1570_s0 + $0x8] sm:$0xff]  }
   0x2   :  { %v747_v2 = vmul.f32 0.001953125, %v17_v0  ;;  %v20_v3 = vmul.f32 0.001953125, %v19_v1  ;;  %v751_v9 = vshrl.u32 %v159_v6, 7  ;;  %v756_v10 = vld [vmem:[%s1570_s0] sm:$0xff]   ;;  %v766_v12 = vld [vmem:[%s1570_s0 + $0x10] sm:$0xff]   ;;  %v771_v13 = vld [vmem:[%s1570_s0 + $0x18] sm:$0xff]   ;;  %v561_v19 = vunpack.c.l.bf16 %v761_v11 }
   0x3   :  { %v776_v14 = vld [vmem:[%s1570_s0 + $0x20] sm:$0xff]   ;;  %v781_v15 = vld [vmem:[%s1570_s0 + $0x28] sm:$0xff]   ;;  %v557_v16 = vunpack.c.l.bf16 %v756_v10  ;;  %v558_v18 = vunpack.c.h.bf16 %v756_v10  ;;  %v790_v20 = vld [vmem:[%s1570_s0 + $0x30] sm:$0xff]   ;;  %v562_v22 = vunpack.c.h.bf16 %v761_v11  ;;  %v565_v23 = vunpack.c.l.bf16 %v766_v12 }
   0x4   :  { %v21_v4 = vmul.f32 %v747_v2, %v747_v2  ;;  %v161_v17 = vsub.s32 0, %v751_v9  ;;  %v795_v21 = vld [vmem:[%s1570_s0 + $0x38] sm:$0xff]   ;;  %v566_v24 = vunpack.c.h.bf16 %v766_v12  ;;  %v569_v25 = vunpack.c.l.bf16 %v771_v13  ;;  %v804_v26 = vld [vmem:[%s1570_s0 + $0x40] sm:$0xff]   ;;  %v809_v27 = vld [vmem:[%s1570_s0 + $0x48] sm:$0xff]  }
   0x5   :  { %v570_v28 = vunpack.c.h.bf16 %v771_v13  ;;  %v573_v29 = vunpack.c.l.bf16 %v776_v14  ;;  %v574_v30 = vunpack.c.h.bf16 %v776_v14  ;;  %v577_v31 = vunpack.c.l.bf16 %v781_v15  ;;  %v818_v32 = vld [vmem:[%s1570_s0 + $0x50] sm:$0xff]   ;;  %v823_v33 = vld [vmem:[%s1570_s0 + $0x58] sm:$0xff]   ;;  %v832_v38 = vld [vmem:[%s1570_s0 + $0x60] sm:$0xff]  }
   0x6   :  { %v22_v5 = vsub.f32 %v20_v3, %v21_v4  ;;  %v578_v34 = vunpack.c.h.bf16 %v781_v15  ;;  %v581_v35 = vunpack.c.l.bf16 %v790_v20  ;;  %v582_v36 = vunpack.c.h.bf16 %v790_v20  ;;  %v837_v39 = vld [vmem:[%s1570_s0 + $0x68] sm:$0xff]   ;;  %v846_v44 = vld [vmem:[%s1570_s0 + $0x70] sm:$0xff]   ;;  %v851_v45 = vld [vmem:[%s1570_s0 + $0x78] sm:$0xff]  }
   0x7   :  { %v585_v37 = vunpack.c.l.bf16 %v795_v21  ;;  %v586_v40 = vunpack.c.h.bf16 %v795_v21  ;;  %v589_v41 = vunpack.c.l.bf16 %v804_v26  ;;  %v590_v42 = vunpack.c.h.bf16 %v804_v26  ;;  %v860_v50 = vld [vmem:[%s1570_s0 + $0x80] sm:$0xff]   ;;  %v865_v51 = vld [vmem:[%s1570_s0 + $0x88] sm:$0xff]   ;;  %v877_v57 = vld [vmem:[%s1570_s0 + $0x90] sm:$0xff]  }
   0x8   :  { %v23_v7 = vmax.f32 %v22_v5, 0.0  ;;  %v593_v43 = vunpack.c.l.bf16 %v809_v27  ;;  %v594_v46 = vunpack.c.h.bf16 %v809_v27  ;;  %v597_v47 = vunpack.c.l.bf16 %v818_v32  ;;  %v26_v52 = vld [vmem:[%s1571_s2] sm:$0x1]  ;;  %v886_v62 = vld [vmem:[%s1570_s0 + $0x98] sm:$0xff]   ;;  %v903_v1 = vld [vmem:[%s1570_s0 + $0xa8] sm:$0xff]  }
   0x9   :  { %v895_v5 = vld [vmem:[%s1570_s0 + $0xa0] sm:$0xff]   ;;  %v915_v61 = vld [vmem:[%s1570_s0 + $0xb0] sm:$0xff]   ;;  %v300_v15 = vld [vmem:[%s1572_s3 + $0x28] sm:$0xff] }
   0xa   :  { %v24_v8 = vadd.f32 1e-05, %v23_v7  ;;  %v28_v4 = vld [vmem:[%s1571_s2 + $0x1] sm:$0x1]  ;;  %v302_v20 = vld [vmem:[%s1572_s3 + $0x38] sm:$0xff]  ;;  %v312_v26 = vld [vmem:[%s1572_s3 + $0x88] sm:$0xff] }
   0xb   :  { %v295_v11 = vld [vmem:[%s1572_s3] sm:$0xff]  ;;  %v314_v27 = vld [vmem:[%s1572_s3 + $0x98] sm:$0xff] }
   0xc   :  { %714 = vrsqrt.f32 %v24_v8  ;;  %v299_v13 = vld [vmem:[%s1572_s3 + $0x20] sm:$0xff] }
  0x16   :  { %v715_v63 = vpop.eup %714 }
  0x17   :  { %v27_v6 = vmul.f32 %v715_v63, %v26_v52  ;;  %v927_v52 = vld [vmem:[%s1570_s0 + $0xb8] sm:$0xff]  }
  0x19   :  { %v29_v8 = vmul.f32 %v27_v6, %v747_v2  ;;  %v920_v7 = vrot.slane %v27_v6, %v161_v17 }
  0x1b   :  { %v30_v58 = vsub.f32 %v28_v4, %v29_v8  ;;  %v163_v6 = vmul.f32 %v557_v16, %v920_v7  ;;  %v164_v3 = vmul.f32 %v558_v18, %v920_v7  ;;  %v165_v60 = vmul.f32 %v561_v19, %v920_v7  ;;  %v296_v19 = vld [vmem:[%s1572_s3 + $0x8] sm:$0xff] }
  0x1c   :  { %v166_v0 = vmul.f32 %v562_v22, %v920_v7  ;;  %v167_v4 = vmul.f32 %v565_v23, %v920_v7  ;;  %v168_v16 = vmul.f32 %v566_v24, %v920_v7  ;;  %v169_v10 = vmul.f32 %v569_v25, %v920_v7  ;;  %v298_v23 = vld [vmem:[%s1572_s3 + $0x18] sm:$0xff] }
  0x1d   :  { %v956_v18 = vrot.slane %v30_v58, %v161_v17  ;;  %v170_v12 = vmul.f32 %v570_v28, %v920_v7  ;;  %v171_v22 = vmul.f32 %v573_v29, %v920_v7  ;;  %v172_v9 = vmul.f32 %v574_v30, %v920_v7  ;;  %v297_v17 = vld [vmem:[%s1572_s3 + $0x10] sm:$0xff] }
  0x1e   :  { %v173_v24 = vmul.f32 %v577_v31, %v920_v7  ;;  %v174_v14 = vmul.f32 %v578_v34, %v920_v7  ;;  %v175_v25 = vmul.f32 %v581_v35, %v920_v7  ;;  %v176_v28 = vmul.f32 %v582_v36, %v920_v7  ;;  %v301_v34 = vld [vmem:[%s1572_s3 + $0x30] sm:$0xff] }
  0x1f   :  { %v231_v29 = vadd.f32 %v956_v18, %v163_v6  ;;  %v232_v30 = vadd.f32 %v956_v18, %v164_v3  ;;  %v233_v58 = vadd.f32 %v956_v18, %v165_v60  ;;  %v234_v31 = vadd.f32 %v956_v18, %v166_v0 }
  0x20   :  { %v235_v35 = vadd.f32 %v956_v18, %v167_v4  ;;  %v236_v36 = vadd.f32 %v956_v18, %v168_v16  ;;  %v237_v60 = vadd.f32 %v956_v18, %v169_v10  ;;  %v238_v0 = vadd.f32 %v956_v18, %v170_v12  ;;  %v303_v4 = vld [vmem:[%s1572_s3 + $0x40] sm:$0xff]  ;;  %v304_v16 = vld [vmem:[%s1572_s3 + $0x48] sm:$0xff] }
  0x21   :  { %v359_v3 = vadd.f32 %v295_v11, %v231_v29  ;;  %v360_v8 = vadd.f32 %v296_v19, %v232_v30  ;;  %v361_v6 = vadd.f32 %v297_v17, %v233_v58  ;;  %v362_v2 = vadd.f32 %v298_v23, %v234_v31  ;;  %v305_v17 = vld [vmem:[%s1572_s3 + $0x50] sm:$0xff] }
  0x22   :  { %v363_v59 = vadd.f32 %v299_v13, %v235_v35  ;;  %v364_v63 = vadd.f32 %v300_v15, %v236_v36  ;;  %v365_v56 = vadd.f32 %v301_v34, %v237_v60  ;;  %v366_v55 = vadd.f32 %v302_v20, %v238_v0  ;;  %v309_v29 = vld [vmem:[%s1572_s3 + $0x70] sm:$0xff]  ;;  %v311_v0 = vld [vmem:[%s1572_s3 + $0x80] sm:$0xff] }
  0x23   :  { %v423_v54 = vmax.f32 %v359_v3, 0.0  ;;  %v424_v53 = vmax.f32 %v360_v8, 0.0  ;;  %v425_v49 = vmax.f32 %v361_v6, 0.0  ;;  %v426_v48 = vmax.f32 %v362_v2, 0.0  ;;  %v306_v2 = vld [vmem:[%s1572_s3 + $0x58] sm:$0xff] }
  0x24   :  { %v427_v10 = vmax.f32 %v363_v59, 0.0  ;;  %v428_v11 = vmax.f32 %v364_v63, 0.0  ;;  %v429_v19 = vmax.f32 %v365_v56, 0.0  ;;  %v430_v12 = vmax.f32 %v366_v55, 0.0 }
  0x25   :  { %487 = vst [vmem:[%s1573_s4] sm:$0xff] %v423_v54  ;;  %488 = vst [vmem:[%s1573_s4 + $0x8] sm:$0xff] %v424_v53  ;;  %v239_v55 = vadd.f32 %v956_v18, %v171_v22  ;;  %v240_v56 = vadd.f32 %v956_v18, %v172_v9  ;;  %v241_v59 = vadd.f32 %v956_v18, %v173_v24  ;;  %v307_v53 = vld [vmem:[%s1572_s3 + $0x60] sm:$0xff] }
  0x26   :  { %489 = vst [vmem:[%s1573_s4 + $0x10] sm:$0xff] %v425_v49  ;;  %490 = vst [vmem:[%s1573_s4 + $0x18] sm:$0xff] %v426_v48  ;;  %v242_v54 = vadd.f32 %v956_v18, %v174_v14  ;;  %v308_v49 = vld [vmem:[%s1572_s3 + $0x68] sm:$0xff]  ;;  %v243_v48 = vadd.f32 %v956_v18, %v175_v25  ;;  %v244_v63 = vadd.f32 %v956_v18, %v176_v28  ;;  %v310_v25 = vld [vmem:[%s1572_s3 + $0x78] sm:$0xff] }
  0x27   :  { %491 = vst [vmem:[%s1573_s4 + $0x20] sm:$0xff] %v427_v10  ;;  %492 = vst [vmem:[%s1573_s4 + $0x28] sm:$0xff] %v428_v11  ;;  %v177_v22 = vmul.f32 %v585_v37, %v920_v7  ;;  %v178_v9 = vmul.f32 %v586_v40, %v920_v7  ;;  %v367_v23 = vadd.f32 %v303_v4, %v239_v55  ;;  %v1575_v55 = vunpack.c.l.bf16 %v823_v33 }
  0x28   :  { %493 = vst [vmem:[%s1573_s4 + $0x30] sm:$0xff] %v429_v19  ;;  %494 = vst [vmem:[%s1573_s4 + $0x38] sm:$0xff] %v430_v12  ;;  %v368_v13 = vadd.f32 %v304_v16, %v240_v56  ;;  %v369_v24 = vadd.f32 %v305_v17, %v241_v59  ;;  %v370_v14 = vadd.f32 %v306_v2, %v242_v54  ;;  %v315_v17 = vld [vmem:[%s1572_s3 + $0xa0] sm:$0xff]  ;;  %v1576_v59 = vunpack.c.h.bf16 %v823_v33 }
  0x29   :  { %v371_v28 = vadd.f32 %v307_v53, %v243_v48  ;;  %v372_v30 = vadd.f32 %v308_v49, %v244_v63  ;;  %v245_v37 = vadd.f32 %v956_v18, %v177_v22  ;;  %v246_v58 = vadd.f32 %v956_v18, %v178_v9  ;;  %v317_v22 = vld [vmem:[%s1572_s3 + $0xb0] sm:$0xff]  ;;  %v318_v9 = vld [vmem:[%s1572_s3 + $0xb8] sm:$0xff] }
  0x2a   :  { %v431_v21 = vmax.f32 %v367_v23, 0.0  ;;  %v432_v40 = vmax.f32 %v368_v13, 0.0  ;;  %v433_v31 = vmax.f32 %v369_v24, 0.0  ;;  %v434_v15 = vmax.f32 %v370_v14, 0.0 }
  0x2b   :  { %v435_v34 = vmax.f32 %v371_v28, 0.0  ;;  %v436_v20 = vmax.f32 %v372_v30, 0.0  ;;  %v373_v35 = vadd.f32 %v309_v29, %v245_v37  ;;  %v374_v36 = vadd.f32 %v310_v25, %v246_v58 }
  0x2c   :  { %495 = vst [vmem:[%s1573_s4 + $0x40] sm:$0xff] %v431_v21  ;;  %496 = vst [vmem:[%s1573_s4 + $0x48] sm:$0xff] %v432_v40  ;;  %v179_v60 = vmul.f32 %v589_v41, %v920_v7  ;;  %v180_v3 = vmul.f32 %v590_v42, %v920_v7  ;;  %v181_v8 = vmul.f32 %v593_v43, %v920_v7  ;;  %v313_v42 = vld [vmem:[%s1572_s3 + $0x90] sm:$0xff]  ;;  %v1577_v40 = vunpack.c.l.bf16 %v832_v38 }
  0x2d   :  { %497 = vst [vmem:[%s1573_s4 + $0x50] sm:$0xff] %v433_v31  ;;  %498 = vst [vmem:[%s1573_s4 + $0x58] sm:$0xff] %v434_v15  ;;  %v182_v6 = vmul.f32 %v594_v46, %v920_v7  ;;  %v437_v41 = vmax.f32 %v373_v35, 0.0  ;;  %v438_v4 = vmax.f32 %v374_v36, 0.0  ;;  %v183_v43 = vmul.f32 %v597_v47, %v920_v7  ;;  %v316_v47 = vld [vmem:[%s1572_s3 + $0xa8] sm:$0xff]  ;;  %v319_v15 = vld [vmem:[%s1572_s3 + $0xc0] sm:$0xff] }
  0x2e   :  { %499 = vst [vmem:[%s1573_s4 + $0x60] sm:$0xff] %v435_v34  ;;  %500 = vst [vmem:[%s1573_s4 + $0x68] sm:$0xff] %v436_v20  ;;  %v1574_v46 = vunpack.c.h.bf16 %v818_v32  ;;  %v247_v10 = vadd.f32 %v956_v18, %v179_v60  ;;  %v248_v11 = vadd.f32 %v956_v18, %v180_v3  ;;  %v249_v19 = vadd.f32 %v956_v18, %v181_v8 }
  0x2f   :  { %v250_v12 = vadd.f32 %v956_v18, %v182_v6  ;;  %501 = vst [vmem:[%s1573_s4 + $0x70] sm:$0xff] %v437_v41  ;;  %502 = vst [vmem:[%s1573_s4 + $0x78] sm:$0xff] %v438_v4  ;;  %v251_v32 = vadd.f32 %v956_v18, %v183_v43  ;;  %v185_v56 = vmul.f32 %v1575_v55, %v920_v7  ;;  %v1578_v34 = vunpack.c.h.bf16 %v832_v38  ;;  %v320_v38 = vld [vmem:[%s1572_s3 + $0xc8] sm:$0xff]  ;;  %v321_v6 = vld [vmem:[%s1572_s3 + $0xd0] sm:$0xff] }
  0x30   :  { %v184_v16 = vmul.f32 %v1574_v46, %v920_v7  ;;  %v186_v54 = vmul.f32 %v1576_v59, %v920_v7  ;;  %v375_v53 = vadd.f32 %v311_v0, %v247_v10  ;;  %v376_v49 = vadd.f32 %v312_v26, %v248_v11  ;;  %v323_v10 = vld [vmem:[%s1572_s3 + $0xe0] sm:$0xff]  ;;  %v324_v11 = vld [vmem:[%s1572_s3 + $0xe8] sm:$0xff] }
  0x31   :  { %v377_v48 = vadd.f32 %v313_v42, %v249_v19  ;;  %v378_v63 = vadd.f32 %v314_v27, %v250_v12  ;;  %v379_v23 = vadd.f32 %v315_v17, %v251_v32  ;;  %v253_v24 = vadd.f32 %v956_v18, %v185_v56 }
  0x32   :  { %v252_v2 = vadd.f32 %v956_v18, %v184_v16  ;;  %v254_v14 = vadd.f32 %v956_v18, %v186_v54  ;;  %v439_v33 = vmax.f32 %v375_v53, 0.0  ;;  %v440_v29 = vmax.f32 %v376_v49, 0.0  ;;  %v325_v54 = vld [vmem:[%s1572_s3 + $0xf0] sm:$0xff]  ;;  %v326_v53 = vld [vmem:[%s1572_s3 + $0xf8] sm:$0xff] }
  0x33   :  { %v441_v25 = vmax.f32 %v377_v48, 0.0  ;;  %v442_v28 = vmax.f32 %v378_v63, 0.0  ;;  %v443_v30 = vmax.f32 %v379_v23, 0.0  ;;  %v381_v58 = vadd.f32 %v317_v22, %v253_v24 }
  0x34   :  { %v380_v13 = vadd.f32 %v316_v47, %v252_v2  ;;  %v382_v21 = vadd.f32 %v318_v9, %v254_v14  ;;  %503 = vst [vmem:[%s1573_s4 + $0x80] sm:$0xff] %v439_v33  ;;  %504 = vst [vmem:[%s1573_s4 + $0x88] sm:$0xff] %v440_v29  ;;  %v187_v31 = vmul.f32 %v1577_v40, %v920_v7  ;;  %v1579_v35 = vunpack.c.l.bf16 %v837_v39 }
  0x35   :  { %505 = vst [vmem:[%s1573_s4 + $0x90] sm:$0xff] %v441_v25  ;;  %506 = vst [vmem:[%s1573_s4 + $0x98] sm:$0xff] %v442_v28  ;;  %v188_v20 = vmul.f32 %v1578_v34, %v920_v7  ;;  %v1580_v60 = vunpack.c.h.bf16 %v837_v39  ;;  %v445_v3 = vmax.f32 %v381_v58, 0.0  ;;  %v322_v39 = vld [vmem:[%s1572_s3 + $0xd8] sm:$0xff]  ;;  %v1581_v41 = vunpack.c.l.bf16 %v846_v44 }
  0x36   :  { %v444_v37 = vmax.f32 %v380_v13, 0.0  ;;  %v189_v36 = vmul.f32 %v1579_v35, %v920_v7  ;;  %507 = vst [vmem:[%s1573_s4 + $0xa0] sm:$0xff] %v443_v30  ;;  %v446_v8 = vmax.f32 %v382_v21, 0.0  ;;  %v1582_v26 = vunpack.c.h.bf16 %v846_v44  ;;  %v327_v30 = vld [vmem:[%s1572_s3 + $0x100] sm:$0xff]  ;;  %v329_v35 = vld [vmem:[%s1572_s3 + $0x110] sm:$0xff] }
  0x37   :  { %v190_v0 = vmul.f32 %v1580_v60, %v920_v7  ;;  %v191_v4 = vmul.f32 %v1581_v41, %v920_v7  ;;  %v255_v27 = vadd.f32 %v956_v18, %v187_v31  ;;  %v256_v43 = vadd.f32 %v956_v18, %v188_v20  ;;  %509 = vst [vmem:[%s1573_s4 + $0xb0] sm:$0xff] %v445_v3  ;;  %v331_v41 = vld [vmem:[%s1572_s3 + $0x120] sm:$0xff] }
  0x38   :  { %508 = vst [vmem:[%s1573_s4 + $0xa8] sm:$0xff] %v444_v37  ;;  %v192_v42 = vmul.f32 %v1582_v26, %v920_v7  ;;  %v257_v46 = vadd.f32 %v956_v18, %v189_v36  ;;  %510 = vst [vmem:[%s1573_s4 + $0xb8] sm:$0xff] %v446_v8  ;;  %v1583_v12 = vunpack.c.l.bf16 %v851_v45  ;;  %v1584_v47 = vunpack.c.h.bf16 %v851_v45 }
  0x39   :  { %v258_v16 = vadd.f32 %v956_v18, %v190_v0  ;;  %v259_v44 = vadd.f32 %v956_v18, %v191_v4  ;;  %v383_v2 = vadd.f32 %v319_v15, %v255_v27  ;;  %v384_v55 = vadd.f32 %v320_v38, %v256_v43  ;;  %v332_v4 = vld [vmem:[%s1572_s3 + $0x128] sm:$0xff] }
  0x3a   :  { %v260_v19 = vadd.f32 %v956_v18, %v192_v42  ;;  %v193_v17 = vmul.f32 %v1583_v12, %v920_v7  ;;  %v194_v32 = vmul.f32 %v1584_v47, %v920_v7  ;;  %v385_v56 = vadd.f32 %v321_v6, %v257_v46  ;;  %v334_v12 = vld [vmem:[%s1572_s3 + $0x138] sm:$0xff] }
  0x3b   :  { %v386_v59 = vadd.f32 %v322_v39, %v258_v16  ;;  %v387_v49 = vadd.f32 %v323_v10, %v259_v44  ;;  %v447_v45 = vmax.f32 %v383_v2, 0.0  ;;  %v448_v9 = vmax.f32 %v384_v55, 0.0 }
  0x3c   :  { %v388_v48 = vadd.f32 %v324_v11, %v260_v19  ;;  %v261_v63 = vadd.f32 %v956_v18, %v193_v17  ;;  %v262_v22 = vadd.f32 %v956_v18, %v194_v32  ;;  %v449_v23 = vmax.f32 %v385_v56, 0.0  ;;  %v333_v19 = vld [vmem:[%s1572_s3 + $0x130] sm:$0xff] }
  0x3d   :  { %v450_v13 = vmax.f32 %v386_v59, 0.0  ;;  %v451_v24 = vmax.f32 %v387_v49, 0.0  ;;  %511 = vst [vmem:[%s1573_s4 + $0xc0] sm:$0xff] %v447_v45  ;;  %512 = vst [vmem:[%s1573_s4 + $0xc8] sm:$0xff] %v448_v9  ;;  %v1585_v25 = vunpack.c.l.bf16 %v860_v50  ;;  %v1586_v37 = vunpack.c.h.bf16 %v860_v50  ;;  %v328_v50 = vld [vmem:[%s1572_s3 + $0x108] sm:$0xff]  ;;  %v335_v45 = vld [vmem:[%s1572_s3 + $0x140] sm:$0xff] }
  0x3e   :  { %v452_v14 = vmax.f32 %v388_v48, 0.0  ;;  %v389_v33 = vadd.f32 %v325_v54, %v261_v63  ;;  %v390_v29 = vadd.f32 %v326_v53, %v262_v22  ;;  %513 = vst [vmem:[%s1573_s4 + $0xd0] sm:$0xff] %v449_v23  ;;  %v1587_v21 = vunpack.c.l.bf16 %v865_v51 }
  0x3f   :  { %514 = vst [vmem:[%s1573_s4 + $0xd8] sm:$0xff] %v450_v13  ;;  %v195_v28 = vmul.f32 %v1585_v25, %v920_v7  ;;  %v196_v58 = vmul.f32 %v1586_v37, %v920_v7  ;;  %v1588_v31 = vunpack.c.h.bf16 %v865_v51  ;;  %515 = vst [vmem:[%s1573_s4 + $0xe0] sm:$0xff] %v451_v24  ;;  %v330_v51 = vld [vmem:[%s1572_s3 + $0x118] sm:$0xff]  ;;  %v1589_v36 = vunpack.c.l.bf16 %v877_v57 }
  0x40   :  { %v197_v40 = vmul.f32 %v1587_v21, %v920_v7  ;;  %516 = vst [vmem:[%s1573_s4 + $0xe8] sm:$0xff] %v452_v14  ;;  %v453_v34 = vmax.f32 %v389_v33, 0.0  ;;  %v454_v20 = vmax.f32 %v390_v29, 0.0  ;;  %v1590_v0 = vunpack.c.h.bf16 %v877_v57 }
  0x41   :  { %v198_v15 = vmul.f32 %v1588_v31, %v920_v7  ;;  %v199_v60 = vmul.f32 %v1589_v36, %v920_v7  ;;  %v263_v8 = vadd.f32 %v956_v18, %v195_v28  ;;  %v264_v38 = vadd.f32 %v956_v18, %v196_v58  ;;  %v337_v28 = vld [vmem:[%s1572_s3 + $0x150] sm:$0xff] }
  0x42   :  { %v200_v3 = vmul.f32 %v1590_v0, %v920_v7  ;;  %v265_v6 = vadd.f32 %v956_v18, %v197_v40  ;;  %517 = vst [vmem:[%s1573_s4 + $0xf0] sm:$0xff] %v453_v34  ;;  %518 = vst [vmem:[%s1573_s4 + $0xf8] sm:$0xff] %v454_v20  ;;  %v1591_v42 = vunpack.c.l.bf16 %v886_v62  ;;  %v1592_v43 = vunpack.c.h.bf16 %v886_v62  ;;  %v339_v20 = vld [vmem:[%s1572_s3 + $0x160] sm:$0xff] }
  0x43   :  { %v266_v39 = vadd.f32 %v956_v18, %v198_v15  ;;  %v267_v57 = vadd.f32 %v956_v18, %v199_v60  ;;  %v391_v16 = vadd.f32 %v327_v30, %v263_v8  ;;  %v392_v10 = vadd.f32 %v328_v50, %v264_v38  ;;  %v340_v50 = vld [vmem:[%s1572_s3 + $0x168] sm:$0xff] }
  0x44   :  { %v268_v26 = vadd.f32 %v956_v18, %v200_v3  ;;  %v201_v27 = vmul.f32 %v1591_v42, %v920_v7  ;;  %v202_v46 = vmul.f32 %v1592_v43, %v920_v7  ;;  %v393_v11 = vadd.f32 %v329_v35, %v265_v6 }
  0x45   :  { %v394_v44 = vadd.f32 %v330_v51, %v266_v39  ;;  %v395_v17 = vadd.f32 %v331_v41, %v267_v57  ;;  %v455_v62 = vmax.f32 %v391_v16, 0.0  ;;  %v456_v55 = vmax.f32 %v392_v10, 0.0  ;;  %v341_v39 = vld [vmem:[%s1572_s3 + $0x170] sm:$0xff]  ;;  %v342_v41 = vld [vmem:[%s1572_s3 + $0x178] sm:$0xff] }
  0x46   :  { %v396_v47 = vadd.f32 %v332_v4, %v268_v26  ;;  %v269_v32 = vadd.f32 %v956_v18, %v201_v27  ;;  %v270_v2 = vadd.f32 %v956_v18, %v202_v46  ;;  %v457_v56 = vmax.f32 %v393_v11, 0.0  ;;  %v707_v27 = vld [vmem:[%s1570_s0 + $0xc8] sm:$0xff]   ;;  %v708_v11 = vld [vmem:[%s1570_s0 + $0xd0] sm:$0xff]  }
  0x47   :  { %v458_v59 = vmax.f32 %v394_v44, 0.0  ;;  %v459_v54 = vmax.f32 %v395_v17, 0.0  ;;  %519 = vst [vmem:[%s1573_s4 + $0x100] sm:$0xff] %v455_v62  ;;  %520 = vst [vmem:[%s1573_s4 + $0x108] sm:$0xff] %v456_v55  ;;  %v1593_v63 = vunpack.c.l.bf16 %v895_v5  ;;  %v1594_v9 = vunpack.c.h.bf16 %v895_v5  ;;  %v336_v5 = vld [vmem:[%s1572_s3 + $0x148] sm:$0xff]  ;;  %v709_v55 = vld [vmem:[%s1570_s0 + $0xd8] sm:$0xff]  }
  0x48   :  { %v460_v53 = vmax.f32 %v396_v47, 0.0  ;;  %v397_v49 = vadd.f32 %v333_v19, %v269_v32  ;;  %v398_v48 = vadd.f32 %v334_v12, %v270_v2  ;;  %521 = vst [vmem:[%s1573_s4 + $0x110] sm:$0xff] %v457_v56  ;;  %v1595_v13 = vunpack.c.l.bf16 %v903_v1 }
  0x49   :  { %522 = vst [vmem:[%s1573_s4 + $0x118] sm:$0xff] %v458_v59  ;;  %v203_v22 = vmul.f32 %v1593_v63, %v920_v7  ;;  %v204_v23 = vmul.f32 %v1594_v9, %v920_v7  ;;  %v1596_v14 = vunpack.c.h.bf16 %v903_v1  ;;  %523 = vst [vmem:[%s1573_s4 + $0x120] sm:$0xff] %v459_v54  ;;  %v338_v1 = vld [vmem:[%s1572_s3 + $0x158] sm:$0xff]  ;;  %v1597_v30 = vunpack.c.l.bf16 %v915_v61  ;;  %v344_v9 = vld [vmem:[%s1572_s3 + $0x188] sm:$0xff] }
  0x4a   :  { %v205_v24 = vmul.f32 %v1595_v13, %v920_v7  ;;  %524 = vst [vmem:[%s1573_s4 + $0x128] sm:$0xff] %v460_v53  ;;  %v461_v29 = vmax.f32 %v397_v49, 0.0  ;;  %v462_v25 = vmax.f32 %v398_v48, 0.0  ;;  %v1598_v58 = vunpack.c.h.bf16 %v915_v61  ;;  %v343_v48 = vld [vmem:[%s1572_s3 + $0x180] sm:$0xff]  ;;  %v346_v13 = vld [vmem:[%s1572_s3 + $0x198] sm:$0xff] }
  0x4b   :  { %v206_v33 = vmul.f32 %v1596_v14, %v920_v7  ;;  %v207_v37 = vmul.f32 %v1597_v30, %v920_v7  ;;  %v271_v40 = vadd.f32 %v956_v18, %v203_v22  ;;  %v272_v31 = vadd.f32 %v956_v18, %v204_v23  ;;  %v345_v23 = vld [vmem:[%s1572_s3 + $0x190] sm:$0xff]  ;;  %v347_v30 = vld [vmem:[%s1572_s3 + $0x1a0] sm:$0xff] }
  0x4c   :  { %v208_v21 = vmul.f32 %v1598_v58, %v920_v7  ;;  %v273_v15 = vadd.f32 %v956_v18, %v205_v24  ;;  %525 = vst [vmem:[%s1573_s4 + $0x130] sm:$0xff] %v461_v29  ;;  %526 = vst [vmem:[%s1573_s4 + $0x138] sm:$0xff] %v462_v25  ;;  %v1599_v51 = vunpack.c.l.bf16 %v927_v52  ;;  %v1600_v60 = vunpack.c.h.bf16 %v927_v52  ;;  %v706_v52 = vld [vmem:[%s1570_s0 + $0xc0] sm:$0xff]  }
  0x4d   :  { %v274_v34 = vadd.f32 %v956_v18, %v206_v33  ;;  %v275_v61 = vadd.f32 %v956_v18, %v207_v37  ;;  %v399_v3 = vadd.f32 %v335_v45, %v271_v40  ;;  %v400_v8 = vadd.f32 %v336_v5, %v272_v31  ;;  %v348_v37 = vld [vmem:[%s1572_s3 + $0x1a8] sm:$0xff] }
  0x4e   :  { %v276_v35 = vadd.f32 %v956_v18, %v208_v21  ;;  %v209_v36 = vmul.f32 %v1599_v51, %v920_v7  ;;  %v210_v0 = vmul.f32 %v1600_v60, %v920_v7  ;;  %v401_v38 = vadd.f32 %v337_v28, %v273_v15 }
  0x4f   :  { %v402_v6 = vadd.f32 %v338_v1, %v274_v34  ;;  %v403_v4 = vadd.f32 %v339_v20, %v275_v61  ;;  %v463_v43 = vmax.f32 %v399_v3, 0.0  ;;  %v464_v46 = vmax.f32 %v400_v8, 0.0  ;;  %v349_v61 = vld [vmem:[%s1572_s3 + $0x1b0] sm:$0xff]  ;;  %v710_v3 = vld [vmem:[%s1570_s0 + $0xe0] sm:$0xff]   ;;  %v711_v8 = vld [vmem:[%s1570_s0 + $0xe8] sm:$0xff]  }
  0x50   :  { %v404_v57 = vadd.f32 %v340_v50, %v276_v35  ;;  %v277_v26 = vadd.f32 %v956_v18, %v209_v36  ;;  %v278_v42 = vadd.f32 %v956_v18, %v210_v0  ;;  %v465_v16 = vmax.f32 %v401_v38, 0.0  ;;  %v350_v35 = vld [vmem:[%s1572_s3 + $0x1b8] sm:$0xff] }
  0x51   :  { %v466_v10 = vmax.f32 %v402_v6, 0.0  ;;  %v467_v44 = vmax.f32 %v403_v4, 0.0  ;;  %527 = vst [vmem:[%s1573_s4 + $0x140] sm:$0xff] %v463_v43  ;;  %528 = vst [vmem:[%s1573_s4 + $0x148] sm:$0xff] %v464_v46  ;;  %v653_v47 = vunpack.c.l.bf16 %v706_v52  ;;  %v654_v32 = vunpack.c.h.bf16 %v706_v52  ;;  %v712_v4 = vld [vmem:[%s1570_s0 + $0xf0] sm:$0xff]  }
  0x52   :  { %v468_v19 = vmax.f32 %v404_v57, 0.0  ;;  %v405_v12 = vadd.f32 %v341_v39, %v277_v26  ;;  %v406_v17 = vadd.f32 %v342_v41, %v278_v42  ;;  %529 = vst [vmem:[%s1573_s4 + $0x150] sm:$0xff] %v465_v16  ;;  %v657_v2 = vunpack.c.l.bf16 %v707_v27 }
  0x53   :  { %530 = vst [vmem:[%s1573_s4 + $0x158] sm:$0xff] %v466_v10  ;;  %v658_v62 = vunpack.c.h.bf16 %v707_v27  ;;  %531 = vst [vmem:[%s1573_s4 + $0x160] sm:$0xff] %v467_v44  ;;  %v661_v54 = vunpack.c.l.bf16 %v708_v11  ;;  %v662_v53 = vunpack.c.h.bf16 %v708_v11  ;;  %v211_v49 = vmul.f32 %v653_v47, %v920_v7  ;;  %v713_v10 = vld [vmem:[%s1570_s0 + $0xf8] sm:$0xff]   ;;  %v351_v47 = vld [vmem:[%s1572_s3 + $0x1c0] sm:$0xff] }
  0x54   :  { %532 = vst [vmem:[%s1573_s4 + $0x168] sm:$0xff] %v468_v19  ;;  %v469_v56 = vmax.f32 %v405_v12, 0.0  ;;  %v470_v59 = vmax.f32 %v406_v17, 0.0  ;;  %v212_v63 = vmul.f32 %v654_v32, %v920_v7  ;;  %v213_v22 = vmul.f32 %v657_v2, %v920_v7 }
  0x55   :  { %v214_v45 = vmul.f32 %v658_v62, %v920_v7  ;;  %v215_v24 = vmul.f32 %v661_v54, %v920_v7  ;;  %v216_v14 = vmul.f32 %v662_v53, %v920_v7  ;;  %v665_v33 = vunpack.c.l.bf16 %v709_v55 }
  0x56   :  { %533 = vst [vmem:[%s1573_s4 + $0x170] sm:$0xff] %v469_v56  ;;  %534 = vst [vmem:[%s1573_s4 + $0x178] sm:$0xff] %v470_v59  ;;  %v666_v29 = vunpack.c.h.bf16 %v709_v55  ;;  %v279_v25 = vadd.f32 %v956_v18, %v211_v49  ;;  %v280_v5 = vadd.f32 %v956_v18, %v212_v63  ;;  %v281_v28 = vadd.f32 %v956_v18, %v213_v22  ;;  %v352_v55 = vld [vmem:[%s1572_s3 + $0x1c8] sm:$0xff]  ;;  %v353_v56 = vld [vmem:[%s1572_s3 + $0x1d0] sm:$0xff] }
  0x57   :  { %v282_v1 = vadd.f32 %v956_v18, %v214_v45  ;;  %v283_v58 = vadd.f32 %v956_v18, %v215_v24  ;;  %v284_v21 = vadd.f32 %v956_v18, %v216_v14  ;;  %v217_v40 = vmul.f32 %v665_v33, %v920_v7  ;;  %v354_v59 = vld [vmem:[%s1572_s3 + $0x1d8] sm:$0xff] }
  0x58   :  { %v218_v31 = vmul.f32 %v666_v29, %v920_v7  ;;  %v407_v15 = vadd.f32 %v343_v48, %v279_v25  ;;  %v408_v34 = vadd.f32 %v344_v9, %v280_v5  ;;  %v409_v20 = vadd.f32 %v345_v23, %v281_v28  ;;  %v355_v23 = vld [vmem:[%s1572_s3 + $0x1e0] sm:$0xff] }
  0x59   :  { %v410_v50 = vadd.f32 %v346_v13, %v282_v1  ;;  %v411_v51 = vadd.f32 %v347_v30, %v283_v58  ;;  %v412_v36 = vadd.f32 %v348_v37, %v284_v21  ;;  %v285_v60 = vadd.f32 %v956_v18, %v217_v40  ;;  %v356_v13 = vld [vmem:[%s1572_s3 + $0x1e8] sm:$0xff]  ;;  %v357_v30 = vld [vmem:[%s1572_s3 + $0x1f0] sm:$0xff]  ;;  %v358_v37 = vld [vmem:[%s1572_s3 + $0x1f8] sm:$0xff] }
  0x5a   :  { %v286_v0 = vadd.f32 %v956_v18, %v218_v31  ;;  %v471_v38 = vmax.f32 %v407_v15, 0.0  ;;  %v472_v6 = vmax.f32 %v408_v34, 0.0  ;;  %v473_v39 = vmax.f32 %v409_v20, 0.0 }
  0x5b   :  { %v474_v41 = vmax.f32 %v410_v50, 0.0  ;;  %v475_v57 = vmax.f32 %v411_v51, 0.0  ;;  %v476_v26 = vmax.f32 %v412_v36, 0.0  ;;  %v413_v42 = vadd.f32 %v349_v61, %v285_v60 }
  0x5c   :  { %v414_v52 = vadd.f32 %v350_v35, %v286_v0  ;;  %535 = vst [vmem:[%s1573_s4 + $0x180] sm:$0xff] %v471_v38  ;;  %536 = vst [vmem:[%s1573_s4 + $0x188] sm:$0xff] %v472_v6  ;;  %v669_v27 = vunpack.c.l.bf16 %v710_v3  ;;  %v670_v43 = vunpack.c.h.bf16 %v710_v3  ;;  %v673_v46 = vunpack.c.l.bf16 %v711_v8 }
  0x5d   :  { %537 = vst [vmem:[%s1573_s4 + $0x190] sm:$0xff] %v473_v39  ;;  %538 = vst [vmem:[%s1573_s4 + $0x198] sm:$0xff] %v474_v41  ;;  %v674_v16 = vunpack.c.h.bf16 %v711_v8  ;;  %v477_v11 = vmax.f32 %v413_v42, 0.0  ;;  %v677_v19 = vunpack.c.l.bf16 %v712_v4  ;;  %v678_v12 = vunpack.c.h.bf16 %v712_v4 }
  0x5e   :  { %539 = vst [vmem:[%s1573_s4 + $0x1a0] sm:$0xff] %v475_v57  ;;  %540 = vst [vmem:[%s1573_s4 + $0x1a8] sm:$0xff] %v476_v26  ;;  %v478_v44 = vmax.f32 %v414_v52, 0.0  ;;  %v219_v17 = vmul.f32 %v669_v27, %v920_v7  ;;  %v220_v32 = vmul.f32 %v670_v43, %v920_v7  ;;  %v221_v2 = vmul.f32 %v673_v46, %v920_v7 }
  0x5f   :  { %v222_v62 = vmul.f32 %v674_v16, %v920_v7  ;;  %541 = vst [vmem:[%s1573_s4 + $0x1b0] sm:$0xff] %v477_v11  ;;  %v223_v54 = vmul.f32 %v677_v19, %v920_v7  ;;  %v224_v53 = vmul.f32 %v678_v12, %v920_v7  ;;  %v681_v49 = vunpack.c.l.bf16 %v713_v10 }
  0x60   :  { %542 = vst [vmem:[%s1573_s4 + $0x1b8] sm:$0xff] %v478_v44  ;;  %v682_v48 = vunpack.c.h.bf16 %v713_v10  ;;  %v287_v63 = vadd.f32 %v956_v18, %v219_v17  ;;  %v288_v22 = vadd.f32 %v956_v18, %v220_v32  ;;  %v289_v45 = vadd.f32 %v956_v18, %v221_v2 }
  0x61   :  { %v290_v9 = vadd.f32 %v956_v18, %v222_v62  ;;  %v291_v24 = vadd.f32 %v956_v18, %v223_v54  ;;  %v292_v14 = vadd.f32 %v956_v18, %v224_v53  ;;  %v225_v33 = vmul.f32 %v681_v49, %v920_v7 }
  0x62   :  { %v226_v29 = vmul.f32 %v682_v48, %v920_v7  ;;  %v415_v25 = vadd.f32 %v351_v47, %v287_v63  ;;  %v416_v5 = vadd.f32 %v352_v55, %v288_v22  ;;  %v417_v28 = vadd.f32 %v353_v56, %v289_v45 }
  0x63   :  { %v418_v1 = vadd.f32 %v354_v59, %v290_v9  ;;  %v419_v58 = vadd.f32 %v355_v23, %v291_v24  ;;  %v420_v21 = vadd.f32 %v356_v13, %v292_v14  ;;  %v293_v40 = vadd.f32 %v956_v18, %v225_v33 }
  0x64   :  { %v294_v31 = vadd.f32 %v956_v18, %v226_v29  ;;  %v479_v15 = vmax.f32 %v415_v25, 0.0  ;;  %v480_v7 = vmax.f32 %v416_v5, 0.0  ;;  %v481_v34 = vmax.f32 %v417_v28, 0.0 }
  0x65   :  { %v482_v20 = vmax.f32 %v418_v1, 0.0  ;;  %v483_v50 = vmax.f32 %v419_v58, 0.0  ;;  %v484_v61 = vmax.f32 %v420_v21, 0.0  ;;  %v421_v35 = vadd.f32 %v357_v30, %v293_v40 }
  0x66   :  { %v422_v51 = vadd.f32 %v358_v37, %v294_v31  ;;  %543 = vst [vmem:[%s1573_s4 + $0x1c0] sm:$0xff] %v479_v15  ;;  %544 = vst [vmem:[%s1573_s4 + $0x1c8] sm:$0xff] %v480_v7 }
  0x67   :  { %545 = vst [vmem:[%s1573_s4 + $0x1d0] sm:$0xff] %v481_v34  ;;  %546 = vst [vmem:[%s1573_s4 + $0x1d8] sm:$0xff] %v482_v20  ;;  %v485_v18 = vmax.f32 %v421_v35, 0.0 }
  0x68   :  { %547 = vst [vmem:[%s1573_s4 + $0x1e0] sm:$0xff] %v483_v50  ;;  %548 = vst [vmem:[%s1573_s4 + $0x1e8] sm:$0xff] %v484_v61  ;;  %v486_v36 = vmax.f32 %v422_v51, 0.0 }
  0x69   :  { %549 = vst [vmem:[%s1573_s4 + $0x1f0] sm:$0xff] %v485_v18 }
  0x6a   :  { %550 = vst [vmem:[%s1573_s4 + $0x1f8] sm:$0xff] %v486_v36 }

// kernel: bottleneck_forward.5
= control target key start
LH: loop header
LB: loop body
LE: loop exit
PB: predicated region body
PF: predicated region fallthrough
CT: control target
= control target key end

     0   :  { %v6518_v0 = vmov 0   ;;  %v162_v33 = vlaneseq  ;;  %vm642_vm0 = vcmask 1040384   ;;  %vm643_vm1 = vsmask.f32 256  ;;  %s6500_s3 = inlined_call_operand.vmem [shape: bf16[1152,128], index: 3, kind: input, shape index: {}]   ;;  %s6501_s1 = inlined_call_operand.vmem [shape: f32[8,128], index: 1, kind: input, shape index: {}]   ;;  %s6502_s0 = inlined_call_operand.vmem [shape: bf16[2,16,16,128], index: 0, kind: input, shape index: {}]   ;;  %s6503_s2 = inlined_call_operand.vmem [shape: f32[8,128], index: 2, kind: input, shape index: {}]   ;;  %s6504_s4 = inlined_call_operand.vmem [shape: bf16[2,16,16,128], index: 4, kind: output, shape index: {0}]   ;;  %s6505_s5 = inlined_call_operand.vmem [shape: f32[8,128], index: 5, kind: output, shape index: {1}]  }
   0x1   :  { %1405 = vmatprep.subr.bf16.mxu1 %v6518_v0  ;;  %1694 = vmatprep.subr.bf16.mxu0 %v6518_v0  ;;  %v4415_v1 = vld [vmem:[%s6500_s3] sm:$0xff]   ;;  %v4417_v3 = vld [vmem:[%s6500_s3 + $0x8] sm:$0xff]   ;;  %v4419_v5 = vld [vmem:[%s6500_s3 + $0x10] sm:$0xff]   ;;  %v397_v58 = vrot.slane %v6518_v0, 7  ;;  %vm769_vm3 = vcmask 1047552  }
   0x2   :  { %v4529_v2 = vld [vmem:[%s6500_s3 + $0x80] sm:$0xff]   ;;  %1437 = vmatprep.mubr.bf16.mxu1 %v6518_v0  ;;  %1406 = vmatpush1.bf16.msra.mxu1 %v4415_v1  ;;  %v4540_v4 = vld [vmem:[%s6500_s3 + $0x88] sm:$0xff]   ;;  %v4551_v6 = vld [vmem:[%s6500_s3 + $0x90] sm:$0xff]   ;;  %v163_v37 = vshrl.u32 %v162_v33, 7  ;;  %vm770_vm4 = vsmask.f32 7424 }
   0x3   :  { %1695 = vmatpush1.bf16.msra.mxu0 %v4529_v2  ;;  %1407 = vmatprep.subr.bf16.mxu1 %v6518_v0  ;;  %v4421_v7 = vld [vmem:[%s6500_s3 + $0x18] sm:$0xff]   ;;  %v4423_v9 = vld [vmem:[%s6500_s3 + $0x20] sm:$0xff]   ;;  %v4425_v11 = vld [vmem:[%s6500_s3 + $0x28] sm:$0xff]  }
   0x4   :  { %1696 = vmatprep.subr.bf16.mxu0 %v6518_v0  ;;  %v4562_v8 = vld [vmem:[%s6500_s3 + $0x98] sm:$0xff]   ;;  %v4573_v10 = vld [vmem:[%s6500_s3 + $0xa0] sm:$0xff]   ;;  %v4584_v12 = vld [vmem:[%s6500_s3 + $0xa8] sm:$0xff]   ;;  %v164_v42 = vsub.s32 0, %v163_v37 }
   0x5   :  { %v4427_v13 = vld [vmem:[%s6500_s3 + $0x30] sm:$0xff]   ;;  %v4429_v15 = vld [vmem:[%s6500_s3 + $0x38] sm:$0xff]   ;;  %v4431_v17 = vld [vmem:[%s6500_s3 + $0x40] sm:$0xff]  }
   0x6   :  { %1408 = vmatpush1.bf16.msra.mxu1 %v4417_v3  ;;  %v4595_v14 = vld [vmem:[%s6500_s3 + $0xb0] sm:$0xff]   ;;  %v4606_v16 = vld [vmem:[%s6500_s3 + $0xb8] sm:$0xff]   ;;  %v4617_v18 = vld [vmem:[%s6500_s3 + $0xc0] sm:$0xff]  }
   0x7   :  { %1697 = vmatpush1.bf16.msra.mxu0 %v4540_v4  ;;  %1409 = vmatprep.subr.bf16.mxu1 %v6518_v0  ;;  %v20_v19 = vld [vmem:[%s6501_s1] sm:$0x1]  ;;  %v22_v20 = vld [vmem:[%s6501_s1 + $0x1] sm:$0x1]  ;;  %v4433_v23 = vld [vmem:[%s6500_s3 + $0x48] sm:$0xff]  }
   0x8   :  { %1698 = vmatprep.subr.bf16.mxu0 %v6518_v0  ;;  %v4626_v21 = vmul.f32 0.001953125, %v20_v19  ;;  %v23_v22 = vmul.f32 0.001953125, %v22_v20  ;;  %v4636_v24 = vld [vmem:[%s6500_s3 + $0xc8] sm:$0xff]   ;;  %v4435_v27 = vld [vmem:[%s6500_s3 + $0x50] sm:$0xff]   ;;  %v4437_v31 = vld [vmem:[%s6500_s3 + $0x58] sm:$0xff]  }
   0x9   :  { %v4649_v28 = vld [vmem:[%s6500_s3 + $0xd0] sm:$0xff]   ;;  %v4660_v32 = vld [vmem:[%s6500_s3 + $0xd8] sm:$0xff]   ;;  %v4439_v34 = vld [vmem:[%s6500_s3 + $0x60] sm:$0xff]  }
   0xa   :  { %1410 = vmatpush1.bf16.msra.mxu1 %v4419_v5  ;;  %v24_v25 = vmul.f32 %v4626_v21, %v4626_v21  ;;  %v4671_v35 = vld [vmem:[%s6500_s3 + $0xe0] sm:$0xff]   ;;  %v4441_v36 = vld [vmem:[%s6500_s3 + $0x68] sm:$0xff]   ;;  %v3880_v43 = vld [vmem:[%s6502_s0 + $0x10] sm:$0xff]  }
   0xb   :  { %1699 = vmatpush1.bf16.msra.mxu0 %v4551_v6  ;;  %1411 = vmatprep.subr.bf16.mxu1 %v6518_v0  ;;  %v4680_v38 = vld [vmem:[%s6500_s3 + $0xe8] sm:$0xff]   ;;  %v29_v39 = vld [vmem:[%s6503_s2] sm:$0x1]  ;;  %v4443_v45 = vld [vmem:[%s6500_s3 + $0x70] sm:$0xff]   ;;  %v3601_v54 = vunpack.c.l.bf16 %v3880_v43  ;;  %v3602_v55 = vunpack.c.h.bf16 %v3880_v43 }
   0xc   :  { %1700 = vmatprep.subr.bf16.mxu0 %v6518_v0  ;;  %v25_v26 = vsub.f32 %v23_v22, %v24_v25  ;;  %v3592_v40 = vld [vmem:[%s6502_s0] sm:$0xff]   ;;  %v3879_v41 = vld [vmem:[%s6502_s0 + $0x8] sm:$0xff]   ;;  %v3881_v50 = vld [vmem:[%s6502_s0 + $0x18] sm:$0xff]  }
   0xd   :  { %v3593_v47 = vunpack.c.l.bf16 %v3592_v40  ;;  %v3594_v48 = vunpack.c.h.bf16 %v3592_v40  ;;  %v3597_v49 = vunpack.c.l.bf16 %v3879_v41  ;;  %v4708_v51 = vld [vmem:[%s6500_s3 + $0xf0] sm:$0xff]   ;;  %v31_v52 = vld [vmem:[%s6503_s2 + $0x1] sm:$0x1]  ;;  %v3598_v53 = vunpack.c.h.bf16 %v3879_v41  ;;  %v4445_v59 = vld [vmem:[%s6500_s3 + $0x78] sm:$0xff]  }
   0xe   :  { %1412 = vmatpush1.bf16.msra.mxu1 %v4421_v7  ;;  %v26_v29 = vmax.f32 %v25_v26, 0.0  ;;  %vm4723_vm2 = vmand %vm642_vm0, %vm643_vm1  ;;  %v3605_v61 = vunpack.c.l.bf16 %v3881_v50  ;;  %v3606_v62 = vunpack.c.h.bf16 %v3881_v50  ;;  %v4730_v63 = vld [vmem:[%s6500_s3 + $0xf8] sm:$0xff]   ;;  %v3882_v19 = vld [vmem:[%s6502_s0 + $0x20] sm:$0xff]  }
   0xf   :  { %1701 = vmatpush1.bf16.msra.mxu0 %v4562_v8  ;;  %1413 = vmatprep.subr.bf16.mxu1 %v6518_v0  ;;  %vm4777_vm5 = vmand %vm769_vm3, %vm770_vm4 }
  0x10   :  { %1702 = vmatprep.subr.bf16.mxu0 %v6518_v0  ;;  %v27_v30 = vadd.f32 1e-05, %v26_v29 }
  0x12   :  { %1414 = vmatpush1.bf16.msra.mxu1 %v4423_v9  ;;  %4487 = vrsqrt.f32 %v27_v30  ;;  %v3609_v30 = vunpack.c.l.bf16 %v3882_v19 }
  0x13   :  { %1703 = vmatpush1.bf16.msra.mxu0 %v4573_v10  ;;  %1415 = vmatprep.subr.bf16.mxu1 %v6518_v0 }
  0x14   :  { %1704 = vmatprep.subr.bf16.mxu0 %v6518_v0 }
  0x16   :  { %1416 = vmatpush1.bf16.msra.mxu1 %v4425_v11 }
  0x17   :  { %1705 = vmatpush1.bf16.msra.mxu0 %v4584_v12  ;;  %1417 = vmatprep.subr.bf16.mxu1 %v6518_v0 }
  0x18   :  { %1706 = vmatprep.subr.bf16.mxu0 %v6518_v0 }
  0x1a   :  { %1418 = vmatpush1.bf16.msra.mxu1 %v4427_v13 }
  0x1b   :  { %1707 = vmatpush1.bf16.msra.mxu0 %v4595_v14  ;;  %1419 = vmatprep.subr.bf16.mxu1 %v6518_v0 }
  0x1c   :  { %1708 = vmatprep.subr.bf16.mxu0 %v6518_v0  ;;  %v4488_v44 = vpop.eup %4487 }
  0x1d   :  { %v30_v46 = vmul.f32 %v4488_v44, %v29_v39 }
  0x1e   :  { %1420 = vmatpush1.bf16.msra.mxu1 %v4429_v15 }
  0x1f   :  { %1709 = vmatpush1.bf16.msra.mxu0 %v4606_v16  ;;  %1421 = vmatprep.subr.bf16.mxu1 %v6518_v0  ;;  %v32_v56 = vmul.f32 %v30_v46, %v4626_v21  ;;  %v4715_v57 = vrot.slane %v30_v46, %v164_v42 }
  0x20   :  { %1710 = vmatprep.subr.bf16.mxu0 %v6518_v0 }
  0x21   :  { %v33_v1 = vsub.f32 %v31_v52, %v32_v56  ;;  %v166_v3 = vmul.f32 %v3593_v47, %v4715_v57  ;;  %v167_v5 = vmul.f32 %v3594_v48, %v4715_v57  ;;  %v168_v7 = vmul.f32 %v3597_v49, %v4715_v57  ;;  %v3883_v56 = vld [vmem:[%s6502_s0 + $0x28] sm:$0xff]  }
  0x22   :  { %1422 = vmatpush1.bf16.msra.mxu1 %v4431_v17  ;;  %v169_v9 = vmul.f32 %v3598_v53, %v4715_v57  ;;  %v170_v11 = vmul.f32 %v3601_v54, %v4715_v57  ;;  %v171_v13 = vmul.f32 %v3602_v55, %v4715_v57  ;;  %v4745_v17 = vsel %vm4723_vm2, 0, %v397_v58 }
  0x23   :  { %1711 = vmatpush1.bf16.msra.mxu0 %v4617_v18  ;;  %1423 = vmatprep.subr.bf16.mxu1 %v6518_v0  ;;  %v4741_v15 = vrot.slane %v33_v1, %v164_v42  ;;  %6594 = vst [vmem:[#allocation2_spill] sm:$0xff] %v4745_v17  ;;  %v172_v20 = vmul.f32 %v3605_v61, %v4715_v57 }
  0x24   :  { %1712 = vmatprep.subr.bf16.mxu0 %v6518_v0  ;;  %v173_v21 = vmul.f32 %v3606_v62, %v4715_v57  ;;  %v174_v54 = vmul.f32 %v3609_v30, %v4715_v57 }
  0x25   :  { %v234_v22 = vadd.f32 %v4741_v15, %v166_v3  ;;  %v236_v25 = vadd.f32 %v4741_v15, %v168_v7  ;;  %v237_v26 = vadd.f32 %v4741_v15, %v169_v9  ;;  %v239_v29 = vadd.f32 %v4741_v15, %v171_v13  ;;  %v4447_v9 = vld [vmem:[%s6500_s3 + $0x100] sm:$0xff]  }
  0x26   :  { %1424 = vmatpush1.bf16.msra.mxu1 %v4433_v23  ;;  %v235_v23 = vadd.f32 %v4741_v15, %v167_v5  ;;  %v240_v41 = vadd.f32 %v4741_v15, %v172_v20  ;;  %v241_v42 = vadd.f32 %v4741_v15, %v173_v21  ;;  %v3613_v5 = vunpack.c.l.bf16 %v3883_v56 }
  0x27   :  { %1713 = vmatpush1.bf16.msra.mxu0 %v4636_v24  ;;  %1425 = vmatprep.subr.bf16.mxu1 %v6518_v0  ;;  %v298_v33 = vmax.f32 %v234_v22, 0.0  ;;  %v301_v37 = vmax.f32 %v237_v26, 0.0  ;;  %v303_v40 = vmax.f32 %v239_v29, 0.0  ;;  %v3614_v7 = vunpack.c.h.bf16 %v3883_v56  ;;  %v3885_v56 = vld [vmem:[%s6502_s0 + $0x38] sm:$0xff]  }
  0x28   :  { %1714 = vmatprep.subr.bf16.mxu0 %v6518_v0  ;;  %v304_v52 = vmax.f32 %v240_v41, 0.0  ;;  %v305_v53 = vmax.f32 %v241_v42, 0.0 }
  0x2a   :  { %1426 = vmatpush1.bf16.msra.mxu1 %v4435_v27  ;;  %v238_v27 = vadd.f32 %v4741_v15, %v170_v11  ;;  %v4801_v13 = vpack.c.bf16 %v305_v53, %v304_v52  ;;  %v4450_v52 = vld [vmem:[%s6500_s3 + $0x118] sm:$0xff]   ;;  %v6725_v60 = vld [vmem:[#allocation2_spill] sm:$0xff] }
  0x2b   :  { %1715 = vmatpush1.bf16.msra.mxu0 %v4649_v28  ;;  %1427 = vmatprep.subr.bf16.mxu1 %v6518_v0 }
  0x2c   :  { %1716 = vmatprep.subr.bf16.mxu0 %v6518_v0  ;;  %v302_v39 = vmax.f32 %v238_v27, 0.0  ;;  %v423_v27 = vshrl.u32 %v4801_v13, 16 }
  0x2e   :  { %1428 = vmatpush1.bf16.msra.mxu1 %v4437_v31  ;;  %v3610_v31 = vunpack.c.h.bf16 %v3882_v19  ;;  %v4770_v46 = vpack.c.bf16 %v303_v40, %v302_v39  ;;  %v242_v19 = vadd.f32 %v4741_v15, %v174_v54  ;;  %v426_v39 = vshll.u32 %v4801_v13, 16 }
  0x2f   :  { %1717 = vmatpush1.bf16.msra.mxu0 %v4660_v32  ;;  %1429 = vmatprep.subr.bf16.mxu1 %v6518_v0  ;;  %v425_v41 = vrot.slane %v423_v27, 7 }
  0x30   :  { %1718 = vmatprep.subr.bf16.mxu0 %v6518_v0  ;;  %v175_v55 = vmul.f32 %v3610_v31, %v4715_v57  ;;  %v416_v61 = vshrl.u32 %v4770_v46, 16  ;;  %v306_v29 = vmax.f32 %v242_v19, 0.0 }
  0x31   :  { %v428_v54 = vor.u32 %v426_v39, %v425_v41 }
  0x32   :  { %1430 = vmatpush1.bf16.msra.mxu1 %v4439_v34  ;;  %v299_v34 = vmax.f32 %v235_v23, 0.0  ;;  %v418_v22 = vrot.slane %v416_v61, 7  ;;  %v419_v23 = vshll.u32 %v4770_v46, 16 }
  0x33   :  { %1719 = vmatpush1.bf16.msra.mxu0 %v4671_v35  ;;  %1431 = vmatprep.subr.bf16.mxu1 %v6518_v0 }
  0x34   :  { %1720 = vmatprep.subr.bf16.mxu0 %v6518_v0  ;;  %v4764_v43 = vpack.c.bf16 %v299_v34, %v298_v33  ;;  %v421_v31 = vor.u32 %v419_v23, %v418_v22  ;;  %v176_v33 = vmul.f32 %v3613_v5, %v4715_v57  ;;  %v177_v34 = vmul.f32 %v3614_v7, %v4715_v57 }
  0x35   :  { %v3622_v5 = vunpack.c.h.bf16 %v3885_v56  ;;  %v682_v19 = vrot.slane %v419_v23, 1  ;;  %v4452_v23 = vld [vmem:[%s6500_s3 + $0x128] sm:$0xff]  }
  0x36   :  { %1432 = vmatpush1.bf16.msra.mxu1 %v4441_v36  ;;  %v300_v36 = vmax.f32 %v236_v25, 0.0  ;;  %v402_v47 = vshrl.u32 %v4764_v43, 16  ;;  %v405_v48 = vshll.u32 %v4764_v43, 16  ;;  %v4448_v25 = vld [vmem:[%s6500_s3 + $0x108] sm:$0xff]  }
  0x37   :  { %1721 = vmatpush1.bf16.msra.mxu0 %v4680_v38  ;;  %1433 = vmatprep.subr.bf16.mxu1 %v6518_v0 }
  0x38   :  { %1722 = vmatprep.subr.bf16.mxu0 %v6518_v0  ;;  %v4767_v44 = vpack.c.bf16 %v301_v37, %v300_v36  ;;  %v404_v58 = vrot.slane %v402_v47, 7  ;;  %v678_v11 = vrot.slane %v405_v48, 1  ;;  %v4449_v36 = vld [vmem:[%s6500_s3 + $0x110] sm:$0xff]  }
  0x3a   :  { %1434 = vmatpush1.bf16.msra.mxu1 %v4443_v45  ;;  %v676_v45 = vrot.slane %v6518_v0, 1  ;;  %v412_v50 = vshll.u32 %v4767_v44, 16  ;;  %v407_v1 = vor.u32 %v405_v48, %v404_v58  ;;  %v679_v26 = vor.u32 %v678_v11, %v402_v47 }
  0x3b   :  { %1723 = vmatpush1.bf16.msra.mxu0 %v4708_v51  ;;  %1435 = vmatprep.subr.bf16.mxu1 %v6518_v0  ;;  %v244_v48 = vadd.f32 %v4741_v15, %v176_v33  ;;  %v4877_v11 = vsel %vm4723_vm2, 0, %v428_v54  ;;  %v181_v33 = vmul.f32 %v3622_v5, %v4715_v57 }
  0x3c   :  { %1724 = vmatprep.subr.bf16.mxu0 %v6518_v0  ;;  %v4795_v62 = vsel %vm4777_vm5, %v676_v45, 0  ;;  %v646_v20 = vsel %vm4723_vm2, 0, %v407_v1  ;;  %v680_v37 = vrot.slane %v412_v50, 1  ;;  %v4837_v40 = vsel %vm4777_vm5, %v679_v26, 0 }
  0x3d   :  { %1726 = vmatprep.mubr.bf16.mxu0 %v646_v20  ;;  %v683_v26 = vor.u32 %v682_v19, %v416_v61  ;;  %v4453_v61 = vld [vmem:[%s6500_s3 + $0x130] sm:$0xff]  }
  0x3e   :  { %1436 = vmatpush1.bf16.msra.mxu1 %v4445_v59 }
  0x3f   :  { %1725 = vmatpush1.bf16.msra.mxu0 %v4730_v63  ;;  %4061 = vmatprep.subr.bf16.mxu1 %v6518_v0 }
  0x40   :  { %1983 = vmatprep.subr.bf16.mxu0 %v6518_v0 }
  0x41   :  { %1438 = vmatmul.mubr.bf16.vlgmr.msra.gmra.mrb[0].mxu1 %v4745_v17 }
  0x42   :  { %4077 = vmatpush1.bf16.msra.mxu1 %v4529_v2  ;;  %1445 = vmatprep.mubr.bf16.mxu1 %v4764_v43  ;;  %v409_v2 = vshrl.u32 %v4767_v44, 16 }
  0x43   :  { %4062 = vmatprep.subr.bf16.mxu1 %v6518_v0  ;;  %1727 = vmatmul.mubr.bf16.vlgmr.msra.gmra.mrb[0].mxu0 %v4795_v62 }
  0x44   :  { %v411_v59 = vrot.slane %v409_v2, 7  ;;  %1984 = vmatpush1.bf16.msra.mxu0 %v4447_v9  ;;  %v681_v53 = vor.u32 %v680_v37, %v409_v2  ;;  %v3621_v2 = vunpack.c.l.bf16 %v3885_v56  ;;  %v4451_v9 = vld [vmem:[%s6500_s3 + $0x120] sm:$0xff]  }
  0x45   :  { %1985 = vmatprep.subr.bf16.mxu0 %v6518_v0 }
  0x46   :  { %4078 = vmatpush1.bf16.msra.mxu1 %v4540_v4  ;;  %v414_v3 = vor.u32 %v412_v50, %v411_v59  ;;  %v243_v4 = vadd.f32 %v4741_v15, %v175_v55  ;;  %v245_v50 = vadd.f32 %v4741_v15, %v177_v34  ;;  %v308_v59 = vmax.f32 %v244_v48, 0.0 }
  0x47   :  { %4063 = vmatprep.subr.bf16.mxu1 %v6518_v0  ;;  %v4870_v7 = vsel %vm4777_vm5, %v681_v53, 0  ;;  %v4906_v34 = vsel %vm4777_vm5, %v683_v26, 0  ;;  %v249_v48 = vadd.f32 %v4741_v15, %v181_v33 }
  0x48   :  { %v4809_v21 = vsel %vm4723_vm2, 0, %v414_v3  ;;  %v307_v30 = vmax.f32 %v243_v4, 0.0  ;;  %1986 = vmatpush1.bf16.msra.mxu0 %v4448_v25  ;;  %v309_v1 = vmax.f32 %v245_v50, 0.0  ;;  %6598 = vst [vmem:[#allocation4_spill] sm:$0xff] %v4870_v7  ;;  %6600 = vst [vmem:[#allocation6_spill] sm:$0xff] %v4906_v34 }
  0x49   :  { %1446 = vmatmul.mubr.bf16.gmra.mrb[4].mxu1 %v646_v20  ;;  %1734 = vmatprep.mubr.bf16.mxu0 %v4809_v21 }
  0x4a   :  { %4079 = vmatpush1.bf16.msra.mxu1 %v4551_v6  ;;  %1453 = vmatprep.mubr.bf16.mxu1 %v4767_v44  ;;  %v3884_v6 = vld [vmem:[%s6502_s0 + $0x30] sm:$0xff]   ;;  %v4846_v47 = vpack.c.bf16 %v307_v30, %v306_v29  ;;  %v4884_v22 = vpack.c.bf16 %v309_v1, %v308_v59  ;;  %v4455_v1 = vld [vmem:[%s6500_s3 + $0x140] sm:$0xff]  }
  0x4b   :  { %4064 = vmatprep.subr.bf16.mxu1 %v6518_v0  ;;  %v3617_v42 = vunpack.c.l.bf16 %v3884_v6  ;;  %v3618_v45 = vunpack.c.h.bf16 %v3884_v6  ;;  %1987 = vmatprep.subr.bf16.mxu0 %v6518_v0 }
  0x4c   :  { %6597 = vst [vmem:[#allocation3_spill] sm:$0xff] %v4846_v47  ;;  %1735 = vmatmul.mubr.bf16.gmra.mrb[4].mxu0 %v4837_v40  ;;  %v430_v58 = vshrl.u32 %v4846_v47, 16  ;;  %v433_v20 = vshll.u32 %v4846_v47, 16  ;;  %6599 = vst [vmem:[#allocation5_spill] sm:$0xff] %v4884_v22  ;;  %v437_v6 = vshrl.u32 %v4884_v22, 16  ;;  %v440_v37 = vshll.u32 %v4884_v22, 16 }
  0x4d   :  { %1988 = vmatpush1.bf16.msra.mxu0 %v4449_v36  ;;  %v178_v55 = vmul.f32 %v3617_v42, %v4715_v57  ;;  %v179_v3 = vmul.f32 %v3618_v45, %v4715_v57  ;;  %v684_v36 = vrot.slane %v426_v39, 1  ;;  %v4454_v39 = vld [vmem:[%s6500_s3 + $0x138] sm:$0xff]  }
  0x4e   :  { %4080 = vmatpush1.bf16.msra.mxu1 %v4562_v8  ;;  %v4844_v8 = vsel %vm4723_vm2, 0, %v421_v31  ;;  %1989 = vmatprep.subr.bf16.mxu0 %v6518_v0  ;;  %v432_v4 = vrot.slane %v430_v58, 7  ;;  %v439_v42 = vrot.slane %v437_v6, 7  ;;  %v688_v33 = vrot.slane %v440_v37, 1 }
  0x4f   :  { %4065 = vmatprep.subr.bf16.mxu1 %v6518_v0  ;;  %1742 = vmatprep.mubr.bf16.mxu0 %v4844_v8  ;;  %v247_v25 = vadd.f32 %v4741_v15, %v179_v3  ;;  %v685_v50 = vor.u32 %v684_v36, %v423_v27  ;;  %v686_v3 = vrot.slane %v433_v20, 1 }
  0x50   :  { %v435_v30 = vor.u32 %v433_v20, %v432_v4  ;;  %v4456_v4 = vld [vmem:[%s6500_s3 + $0x148] sm:$0xff]  }
  0x51   :  { %1454 = vmatmul.mubr.bf16.gmra.mrb[8].mxu1 %v4809_v21  ;;  %1990 = vmatpush1.bf16.msra.mxu0 %v4450_v52  ;;  %v311_v31 = vmax.f32 %v247_v25, 0.0  ;;  %v442_v52 = vor.u32 %v440_v37, %v439_v42  ;;  %v4943_v27 = vsel %vm4777_vm5, %v685_v50, 0  ;;  %v3887_v20 = vld [vmem:[%s6502_s0 + $0x48] sm:$0xff]   ;;  %v689_v50 = vor.u32 %v688_v33, %v437_v6 }
  0x52   :  { %1461 = vmatprep.mubr.bf16.mxu1 %v4770_v46  ;;  %4081 = vmatpush1.bf16.msra.mxu1 %v4573_v10  ;;  %v246_v10 = vadd.f32 %v4741_v15, %v178_v55  ;;  %v313_v55 = vmax.f32 %v249_v48, 0.0  ;;  %6603 = vst [vmem:[#allocation9_spill] sm:$0xff] %v4943_v27 }
  0x53   :  { %4066 = vmatprep.subr.bf16.mxu1 %v6518_v0  ;;  %1991 = vmatprep.subr.bf16.mxu0 %v6518_v0  ;;  %v5022_v6 = vsel %vm4777_vm5, %v689_v50, 0  ;;  %v6701_v49 = vld [vmem:[#allocation3_spill] sm:$0xff] }
  0x54   :  { %1743 = vmatmul.mubr.bf16.gmra.mrb[8].mxu0 %v4870_v7  ;;  %v310_v29 = vmax.f32 %v246_v10, 0.0  ;;  %6609 = vst [vmem:[#allocation15_spill] sm:$0xff] %v5022_v6 }
  0x55   :  { %1992 = vmatpush1.bf16.msra.mxu0 %v4451_v9  ;;  %1750 = vmatprep.mubr.bf16.mxu0 %v4877_v11 }
  0x56   :  { %4082 = vmatpush1.bf16.msra.mxu1 %v4584_v12  ;;  %v180_v12 = vmul.f32 %v3621_v2, %v4715_v57  ;;  %1993 = vmatprep.subr.bf16.mxu0 %v6518_v0  ;;  %v4920_v45 = vpack.c.bf16 %v311_v31, %v310_v29  ;;  %v4951_v2 = vsel %vm4723_vm2, 0, %v442_v52  ;;  %v4457_v31 = vld [vmem:[%s6500_s3 + $0x150] sm:$0xff]  }
  0x57   :  { %4067 = vmatprep.subr.bf16.mxu1 %v6518_v0  ;;  %6604 = vst [vmem:[#allocation10_spill] sm:$0xff] %v4951_v2 }
  0x58   :  { %v248_v41 = vadd.f32 %v4741_v15, %v180_v12  ;;  %6602 = vst [vmem:[#allocation8_spill] sm:$0xff] %v4920_v45  ;;  %v444_v53 = vshrl.u32 %v4920_v45, 16  ;;  %v447_v5 = vshll.u32 %v4920_v45, 16  ;;  %v3629_v12 = vunpack.c.l.bf16 %v3887_v20 }
  0x59   :  { %1462 = vmatmul.mubr.bf16.gmra.mrb[12].mxu1 %v4844_v8  ;;  %1994 = vmatpush1.bf16.msra.mxu0 %v4452_v23 }
  0x5a   :  { %1469 = vmatprep.mubr.bf16.mxu1 %v4801_v13  ;;  %4083 = vmatpush1.bf16.msra.mxu1 %v4595_v14  ;;  %v4916_v14 = vsel %vm4723_vm2, 0, %v435_v30  ;;  %v312_v54 = vmax.f32 %v248_v41, 0.0  ;;  %v3630_v30 = vunpack.c.h.bf16 %v3887_v20  ;;  %v184_v42 = vmul.f32 %v3629_v12, %v4715_v57 }
  0x5b   :  { %4068 = vmatprep.subr.bf16.mxu1 %v6518_v0  ;;  %1995 = vmatprep.subr.bf16.mxu0 %v6518_v0  ;;  %6601 = vst [vmem:[#allocation7_spill] sm:$0xff] %v4916_v14 }
  0x5c   :  { %1751 = vmatmul.mubr.bf16.gmra.mrb[12].mxu0 %v4906_v34  ;;  %v4956_v9 = vpack.c.bf16 %v313_v55, %v312_v54  ;;  %v185_v48 = vmul.f32 %v3630_v30, %v4715_v57  ;;  %v252_v55 = vadd.f32 %v4741_v15, %v184_v42 }
  0x5d   :  { %1996 = vmatpush1.bf16.msra.mxu0 %v4453_v61  ;;  %1758 = vmatprep.mubr.bf16.mxu0 %v4916_v14 }
  0x5e   :  { %4084 = vmatpush1.bf16.msra.mxu1 %v4606_v16  ;;  %v3886_v16 = vld [vmem:[%s6502_s0 + $0x40] sm:$0xff]   ;;  %1997 = vmatprep.subr.bf16.mxu0 %v6518_v0  ;;  %6605 = vst [vmem:[#allocation11_spill] sm:$0xff] %v4956_v9  ;;  %v451_v23 = vshrl.u32 %v4956_v9, 16  ;;  %v454_v36 = vshll.u32 %v4956_v9, 16 }
  0x5f   :  { %4069 = vmatprep.subr.bf16.mxu1 %v6518_v0  ;;  %v3625_v56 = vunpack.c.l.bf16 %v3886_v16  ;;  %v3626_v59 = vunpack.c.h.bf16 %v3886_v16 }
  0x60   :  { %v453_v61 = vrot.slane %v451_v23, 7 }
  0x61   :  { %1470 = vmatmul.mubr.bf16.gmra.mrb[16].mxu1 %v4877_v11  ;;  %1998 = vmatpush1.bf16.msra.mxu0 %v4454_v39  ;;  %v182_v19 = vmul.f32 %v3625_v56, %v4715_v57  ;;  %v183_v10 = vmul.f32 %v3626_v59, %v4715_v57  ;;  %v3888_v39 = vld [vmem:[%s6502_s0 + $0x50] sm:$0xff]   ;;  %v253_v56 = vadd.f32 %v4741_v15, %v185_v48 }
  0x62   :  { %1477 = vmatprep.mubr.bf16.mxu1 %v4846_v47  ;;  %4085 = vmatpush1.bf16.msra.mxu1 %v4617_v18  ;;  %v446_v18 = vrot.slane %v444_v53, 7  ;;  %v456_v16 = vor.u32 %v454_v36, %v453_v61  ;;  %v3633_v52 = vunpack.c.l.bf16 %v3888_v39  ;;  %v3634_v59 = vunpack.c.h.bf16 %v3888_v39 }
  0x63   :  { %4070 = vmatprep.subr.bf16.mxu1 %v6518_v0  ;;  %1999 = vmatprep.subr.bf16.mxu0 %v6518_v0  ;;  %v250_v26 = vadd.f32 %v4741_v15, %v182_v19  ;;  %v251_v29 = vadd.f32 %v4741_v15, %v183_v10  ;;  %v316_v19 = vmax.f32 %v252_v55, 0.0  ;;  %v317_v10 = vmax.f32 %v253_v56, 0.0 }
  0x64   :  { %1759 = vmatmul.mubr.bf16.gmra.mrb[16].mxu0 %v4943_v27  ;;  %v449_v25 = vor.u32 %v447_v5, %v446_v18  ;;  %v186_v18 = vmul.f32 %v3633_v52, %v4715_v57 }
  0x65   :  { %2000 = vmatpush1.bf16.msra.mxu0 %v4455_v1  ;;  %1766 = vmatprep.mubr.bf16.mxu0 %v4951_v2  ;;  %v314_v37 = vmax.f32 %v250_v26, 0.0  ;;  %v315_v41 = vmax.f32 %v251_v29, 0.0  ;;  %v4459_v1 = vld [vmem:[%s6500_s3 + $0x160] sm:$0xff]  }
  0x66   :  { %4086 = vmatpush1.bf16.msra.mxu1 %v4636_v24  ;;  %v687_v24 = vor.u32 %v686_v3, %v430_v58  ;;  %2001 = vmatprep.subr.bf16.mxu0 %v6518_v0  ;;  %v5030_v3 = vsel %vm4723_vm2, 0, %v456_v16 }
  0x67   :  { %4071 = vmatprep.subr.bf16.mxu1 %v6518_v0  ;;  %v5016_v54 = vpack.c.bf16 %v315_v41, %v314_v37  ;;  %6610 = vst [vmem:[#allocation16_spill] sm:$0xff] %v5030_v3 }
  0x68   :  { %v4982_v58 = vsel %vm4777_vm5, %v687_v24, 0  ;;  %v4460_v24 = vld [vmem:[%s6500_s3 + $0x168] sm:$0xff]  }
  0x69   :  { %1478 = vmatmul.mubr.bf16.gmra.mrb[20].mxu1 %v4916_v14  ;;  %2002 = vmatpush1.bf16.msra.mxu0 %v4456_v4  ;;  %6606 = vst [vmem:[#allocation12_spill] sm:$0xff] %v4982_v58  ;;  %6608 = vst [vmem:[#allocation14_spill] sm:$0xff] %v5016_v54  ;;  %v187_v4 = vmul.f32 %v3634_v59, %v4715_v57  ;;  %v461_v30 = vshll.u32 %v5016_v54, 16 }
  0x6a   :  { %1485 = vmatprep.mubr.bf16.mxu1 %v4884_v22  ;;  %4087 = vmatpush1.bf16.msra.mxu1 %v4649_v28  ;;  %v4990_v28 = vsel %vm4723_vm2, 0, %v449_v25  ;;  %v254_v25 = vadd.f32 %v4741_v15, %v186_v18 }
  0x6b   :  { %4072 = vmatprep.subr.bf16.mxu1 %v6518_v0  ;;  %2003 = vmatprep.subr.bf16.mxu0 %v6518_v0  ;;  %6607 = vst [vmem:[#allocation13_spill] sm:$0xff] %v4990_v28  ;;  %v255_v33 = vadd.f32 %v4741_v15, %v187_v4 }
  0x6c   :  { %1767 = vmatmul.mubr.bf16.gmra.mrb[20].mxu0 %v4982_v58  ;;  %v318_v48 = vmax.f32 %v254_v25, 0.0 }
  0x6d   :  { %2004 = vmatpush1.bf16.msra.mxu0 %v4457_v31  ;;  %1774 = vmatprep.mubr.bf16.mxu0 %v4990_v28  ;;  %v5056_v31 = vpack.c.bf16 %v317_v10, %v316_v19  ;;  %v319_v39 = vmax.f32 %v255_v33, 0.0 }
  0x6e   :  { %4088 = vmatpush1.bf16.msra.mxu1 %v4660_v32  ;;  %v4458_v32 = vld [vmem:[%s6500_s3 + $0x158] sm:$0xff]   ;;  %2005 = vmatprep.subr.bf16.mxu0 %v6518_v0 }
  0x6f   :  { %4073 = vmatprep.subr.bf16.mxu1 %v6518_v0  ;;  %6611 = vst [vmem:[#allocation17_spill] sm:$0xff] %v5056_v31  ;;  %v465_v42 = vshrl.u32 %v5056_v31, 16 }
  0x71   :  { %1486 = vmatmul.mubr.bf16.gmra.mrb[24].mxu1 %v4951_v2  ;;  %2006 = vmatpush1.bf16.msra.mxu0 %v4458_v32  ;;  %v4462_v32 = vld [vmem:[%s6500_s3 + $0x178] sm:$0xff]   ;;  %v467_v59 = vrot.slane %v465_v42, 7 }
  0x72   :  { %1493 = vmatprep.mubr.bf16.mxu1 %v4920_v45  ;;  %4089 = vmatpush1.bf16.msra.mxu1 %v4671_v35  ;;  %v690_v35 = vrot.slane %v447_v5, 1  ;;  %v458_v5 = vshrl.u32 %v5016_v54, 16 }
  0x73   :  { %4074 = vmatprep.subr.bf16.mxu1 %v6518_v0  ;;  %2007 = vmatprep.subr.bf16.mxu0 %v6518_v0 }
  0x74   :  { %1775 = vmatmul.mubr.bf16.gmra.mrb[24].mxu0 %v5022_v6  ;;  %v691_v20 = vor.u32 %v690_v35, %v444_v53  ;;  %v460_v12 = vrot.slane %v458_v5, 7  ;;  %v5093_v35 = vpack.c.bf16 %v319_v39, %v318_v48 }
  0x75   :  { %2008 = vmatpush1.bf16.msra.mxu0 %v4459_v1  ;;  %1782 = vmatprep.mubr.bf16.mxu0 %v5030_v3  ;;  %v468_v1 = vshll.u32 %v5056_v31, 16 }
  0x76   :  { %4090 = vmatpush1.bf16.msra.mxu1 %v4680_v38  ;;  %v3889_v38 = vld [vmem:[%s6502_s0 + $0x58] sm:$0xff]   ;;  %2009 = vmatprep.subr.bf16.mxu0 %v6518_v0  ;;  %v5061_v53 = vsel %vm4777_vm5, %v691_v20, 0  ;;  %v463_v41 = vor.u32 %v461_v30, %v460_v12  ;;  %6613 = vst [vmem:[#allocation19_spill] sm:$0xff] %v5093_v35  ;;  %v6514_v4 = vshrl.u32 %v5093_v35, 16  ;;  %v3891_v20 = vld [vmem:[%s6502_s0 + $0x68] sm:$0xff]   ;;  %v475_v25 = vshll.u32 %v5093_v35, 16 }
  0x77   :  { %4075 = vmatprep.subr.bf16.mxu1 %v6518_v0  ;;  %v3637_v26 = vunpack.c.l.bf16 %v3889_v38  ;;  %v3638_v29 = vunpack.c.h.bf16 %v3889_v38  ;;  %6612 = vst [vmem:[#allocation18_spill] sm:$0xff] %v5061_v53  ;;  %v470_v10 = vor.u32 %v468_v1, %v467_v59  ;;  %v3646_v12 = vunpack.c.h.bf16 %v3891_v20 }
  0x78   :  { %v5088_v56 = vsel %vm4723_vm2, 0, %v463_v41  ;;  %v4465_v41 = vld [vmem:[%s6500_s3 + $0x190] sm:$0xff]  }
  0x79   :  { %1494 = vmatmul.mubr.bf16.gmra.mrb[28].mxu1 %v4990_v28  ;;  %2010 = vmatpush1.bf16.msra.mxu0 %v4460_v24  ;;  %v188_v61 = vmul.f32 %v3637_v26, %v4715_v57  ;;  %v189_v37 = vmul.f32 %v3638_v29, %v4715_v57  ;;  %v3645_v29 = vunpack.c.l.bf16 %v3891_v20  ;;  %v5120_v33 = vsel %vm4723_vm2, 0, %v470_v10 }
  0x7a   :  { %1501 = vmatprep.mubr.bf16.mxu1 %v4956_v9  ;;  %4091 = vmatpush1.bf16.msra.mxu1 %v4708_v51  ;;  %v4461_v51 = vld [vmem:[%s6500_s3 + $0x170] sm:$0xff]  }
  0x7b   :  { %4076 = vmatprep.subr.bf16.mxu1 %v6518_v0  ;;  %2011 = vmatprep.subr.bf16.mxu0 %v6518_v0  ;;  %v256_v50 = vadd.f32 %v4741_v15, %v188_v61  ;;  %v257_v16 = vadd.f32 %v4741_v15, %v189_v37  ;;  %v192_v39 = vmul.f32 %v3645_v29, %v4715_v57 }
  0x7c   :  { %1783 = vmatmul.mubr.bf16.gmra.mrb[28].mxu0 %v5061_v53 }
  0x7d   :  { %2012 = vmatpush1.bf16.msra.mxu0 %v4461_v51  ;;  %2015 = vmatprep.mubr.bf16.mxu0 %v4837_v40  ;;  %v4463_v40 = vld [vmem:[%s6500_s3 + $0x180] sm:$0xff]   ;;  %v320_v18 = vmax.f32 %v256_v50, 0.0  ;;  %v321_v19 = vmax.f32 %v257_v16, 0.0  ;;  %v474_v51 = vrot.slane %v6514_v4, 7 }
  0x7e   :  { %4092 = vmatpush1.bf16.msra.mxu1 %v4730_v63  ;;  %v3890_v63 = vld [vmem:[%s6502_s0 + $0x60] sm:$0xff]   ;;  %2013 = vmatprep.subr.bf16.mxu0 %v6518_v0 }
  0x7f   :  { %v3641_v52 = vunpack.c.l.bf16 %v3890_v63  ;;  %v3642_v55 = vunpack.c.h.bf16 %v3890_v63  ;;  %v5116_v26 = vpack.c.bf16 %v321_v19, %v320_v18  ;;  %v193_v63 = vmul.f32 %v3646_v12, %v4715_v57 }
  0x80   :  { %v260_v18 = vadd.f32 %v4741_v15, %v192_v39  ;;  %v4468_v39 = vld [vmem:[%s6500_s3 + $0x1a8] sm:$0xff]  }
  0x81   :  { %1502 = vmatmul.mubr.bf16.gmra.mrb[32].mxu1 %v5030_v3  ;;  %2014 = vmatpush1.bf16.msra.mxu0 %v4462_v32  ;;  %v190_v38 = vmul.f32 %v3641_v52, %v4715_v57  ;;  %v191_v24 = vmul.f32 %v3642_v55, %v4715_v57  ;;  %6614 = vst [vmem:[#allocation20_spill] sm:$0xff] %v5116_v26  ;;  %v6511_v48 = vshrl.u32 %v5116_v26, 16  ;;  %v4466_v52 = vld [vmem:[%s6500_s3 + $0x198] sm:$0xff]   ;;  %v3892_v55 = vld [vmem:[%s6502_s0 + $0x70] sm:$0xff]  }
  0x82   :  { %1509 = vmatprep.mubr.bf16.mxu1 %v5016_v54  ;;  %2272 = vmatprep.subr.bf16.mxu0 %v6518_v0  ;;  %v477_v32 = vor.u32 %v475_v25, %v474_v51  ;;  %v261_v19 = vadd.f32 %v4741_v15, %v193_v63  ;;  %v3650_v20 = vunpack.c.h.bf16 %v3892_v55  ;;  %v324_v29 = vmax.f32 %v260_v18, 0.0 }
  0x83   :  { %v258_v61 = vadd.f32 %v4741_v15, %v190_v38  ;;  %v259_v37 = vadd.f32 %v4741_v15, %v191_v24  ;;  %v481_v59 = vrot.slane %v6511_v48, 7  ;;  %v3649_v24 = vunpack.c.l.bf16 %v3892_v55 }
  0x84   :  { %2016 = vmatmul.mubr.bf16.vlgmr.msra.gmra.mrb[0].mxu0 %v4764_v43  ;;  %v4464_v43 = vld [vmem:[%s6500_s3 + $0x188] sm:$0xff]   ;;  %v5153_v10 = vsel %vm4723_vm2, 0, %v477_v32  ;;  %v325_v12 = vmax.f32 %v261_v19, 0.0 }
  0x85   :  { %2273 = vmatpush1.bf16.msra.mxu0 %v4463_v40  ;;  %2023 = vmatprep.mubr.bf16.mxu0 %v4870_v7  ;;  %v322_v50 = vmax.f32 %v258_v61, 0.0  ;;  %v323_v16 = vmax.f32 %v259_v37, 0.0  ;;  %v6513_v40 = vshll.u32 %v5116_v26, 16  ;;  %v194_v37 = vmul.f32 %v3649_v24, %v4715_v57 }
  0x86   :  { %2274 = vmatprep.subr.bf16.mxu0 %v6518_v0  ;;  %v5175_v32 = vpack.c.bf16 %v325_v12, %v324_v29  ;;  %v4470_v29 = vld [vmem:[%s6500_s3 + $0x1b8] sm:$0xff]  }
  0x87   :  { %v5155_v38 = vpack.c.bf16 %v323_v16, %v322_v50  ;;  %v484_v51 = vor.u32 %v6513_v40, %v481_v59  ;;  %v4469_v59 = vld [vmem:[%s6500_s3 + $0x1b0] sm:$0xff]  }
  0x88   :  { %6616 = vst [vmem:[#allocation22_spill] sm:$0xff] %v5175_v32  ;;  %v6506_v19 = vshrl.u32 %v5175_v32, 16  ;;  %v6507_v12 = vshll.u32 %v5175_v32, 16 }
  0x89   :  { %1510 = vmatmul.mubr.bf16.gmra.mrb[36].mxu1 %v5088_v56  ;;  %2275 = vmatpush1.bf16.msra.mxu0 %v4464_v43  ;;  %6615 = vst [vmem:[#allocation21_spill] sm:$0xff] %v5155_v38  ;;  %v4467_v43 = vld [vmem:[%s6500_s3 + $0x1a0] sm:$0xff]   ;;  %v6508_v61 = vshrl.u32 %v5155_v38, 16  ;;  %v6509_v63 = vshll.u32 %v5155_v38, 16  ;;  %v5179_v50 = vsel %vm4723_vm2, 0, %v484_v51 }
  0x8a   :  { %1517 = vmatprep.mubr.bf16.mxu1 %v5056_v31  ;;  %2276 = vmatprep.subr.bf16.mxu0 %v6518_v0 }
  0x8b   :  { %v488_v16 = vrot.slane %v6508_v61, 7  ;;  %v4473_v61 = vld [vmem:[%s6500_s3 + $0x1d0] sm:$0xff]  }
  0x8c   :  { %2024 = vmatmul.mubr.bf16.gmra.mrb[4].mxu0 %v4767_v44 }
  0x8d   :  { %2031 = vmatprep.mubr.bf16.mxu0 %v4906_v34  ;;  %2277 = vmatpush1.bf16.msra.mxu0 %v4465_v41  ;;  %v195_v41 = vmul.f32 %v3650_v20, %v4715_v57  ;;  %v491_v18 = vor.u32 %v6509_v63, %v488_v16  ;;  %v692_v63 = vrot.slane %v454_v36, 1  ;;  %v3896_v36 = vld [vmem:[%s6502_s0 + $0x90] sm:$0xff]  }
  0x8e   :  { %2278 = vmatprep.subr.bf16.mxu0 %v6518_v0  ;;  %v3666_v48 = vunpack.c.h.bf16 %v3896_v36 }
  0x8f   :  { %v263_v55 = vadd.f32 %v4741_v15, %v195_v41  ;;  %v495_v41 = vrot.slane %v6506_v19, 7 }
  0x91   :  { %1518 = vmatmul.mubr.bf16.gmra.mrb[40].mxu1 %v5120_v33  ;;  %2279 = vmatpush1.bf16.msra.mxu0 %v4466_v52  ;;  %v262_v52 = vadd.f32 %v4741_v15, %v194_v37  ;;  %v327_v20 = vmax.f32 %v263_v55, 0.0  ;;  %v5206_v37 = vsel %vm4723_vm2, 0, %v491_v18 }
  0x92   :  { %1525 = vmatprep.mubr.bf16.mxu1 %v5093_v35  ;;  %2280 = vmatprep.subr.bf16.mxu0 %v6518_v0 }
  0x93   :  { %v326_v24 = vmax.f32 %v262_v52, 0.0  ;;  %v4471_v52 = vld [vmem:[%s6500_s3 + $0x1c0] sm:$0xff]  }
  0x94   :  { %2032 = vmatmul.mubr.bf16.gmra.mrb[8].mxu0 %v4770_v46 }
  0x95   :  { %2039 = vmatprep.mubr.bf16.mxu0 %v4943_v27  ;;  %2281 = vmatpush1.bf16.msra.mxu0 %v4467_v43  ;;  %v3894_v43 = vld [vmem:[%s6502_s0 + $0x80] sm:$0xff]  }
  0x96   :  { %2282 = vmatprep.subr.bf16.mxu0 %v6518_v0  ;;  %v3657_v51 = vunpack.c.l.bf16 %v3894_v43  ;;  %v3658_v16 = vunpack.c.h.bf16 %v3894_v43  ;;  %v4472_v43 = vld [vmem:[%s6500_s3 + $0x1c8] sm:$0xff]  }
  0x98   :  { %v198_v55 = vmul.f32 %v3657_v51, %v4715_v57 }
  0x99   :  { %1526 = vmatmul.mubr.bf16.gmra.mrb[44].mxu1 %v5153_v10  ;;  %2283 = vmatpush1.bf16.msra.mxu0 %v4468_v39  ;;  %v5210_v39 = vpack.c.bf16 %v327_v20, %v326_v24  ;;  %v199_v24 = vmul.f32 %v3658_v16, %v4715_v57  ;;  %v3895_v20 = vld [vmem:[%s6502_s0 + $0x88] sm:$0xff]  }
  0x9a   :  { %1533 = vmatprep.mubr.bf16.mxu1 %v5116_v26  ;;  %2284 = vmatprep.subr.bf16.mxu0 %v6518_v0  ;;  %v266_v51 = vadd.f32 %v4741_v15, %v198_v55 }
  0x9b   :  { %6617 = vst [vmem:[#allocation23_spill] sm:$0xff] %v5210_v39  ;;  %v6510_v18 = vshrl.u32 %v5210_v39, 16 }
  0x9c   :  { %2040 = vmatmul.mubr.bf16.gmra.mrb[12].mxu0 %v4801_v13 }
  0x9d   :  { %2047 = vmatprep.mubr.bf16.mxu0 %v4982_v58  ;;  %2285 = vmatpush1.bf16.msra.mxu0 %v4469_v59  ;;  %v498_v59 = vor.u32 %v6507_v12, %v495_v41  ;;  %v3661_v41 = vunpack.c.l.bf16 %v3895_v20  ;;  %v502_v19 = vrot.slane %v6510_v18, 7  ;;  %v3662_v12 = vunpack.c.h.bf16 %v3895_v20 }
  0x9e   :  { %2286 = vmatprep.subr.bf16.mxu0 %v6518_v0  ;;  %v3665_v18 = vunpack.c.l.bf16 %v3896_v36 }
  0x9f   :  { %v5236_v16 = vsel %vm4723_vm2, 0, %v498_v59  ;;  %v200_v55 = vmul.f32 %v3661_v41, %v4715_v57  ;;  %v693_v41 = vor.u32 %v692_v63, %v451_v23  ;;  %v694_v23 = vrot.slane %v461_v30, 1  ;;  %v3897_v30 = vld [vmem:[%s6502_s0 + $0x98] sm:$0xff]  }
  0xa0   :  { %v202_v63 = vmul.f32 %v3665_v18, %v4715_v57  ;;  %v3670_v40 = vunpack.c.h.bf16 %v3897_v30 }
  0xa1   :  { %1534 = vmatmul.mubr.bf16.gmra.mrb[48].mxu1 %v5179_v50  ;;  %2287 = vmatpush1.bf16.msra.mxu0 %v4470_v29  ;;  %v6512_v29 = vshll.u32 %v5210_v39, 16 }
  0xa2   :  { %1541 = vmatprep.mubr.bf16.mxu1 %v5155_v38  ;;  %2288 = vmatprep.subr.bf16.mxu0 %v6518_v0  ;;  %v270_v36 = vadd.f32 %v4741_v15, %v202_v63 }
  0xa3   :  { %v505_v59 = vor.u32 %v6512_v29, %v502_v19  ;;  %v3669_v29 = vunpack.c.l.bf16 %v3897_v30 }
  0xa4   :  { %2048 = vmatmul.mubr.bf16.gmra.mrb[16].mxu0 %v4846_v47 }
  0xa5   :  { %2055 = vmatprep.mubr.bf16.mxu0 %v5022_v6  ;;  %2289 = vmatpush1.bf16.msra.mxu0 %v4471_v52  ;;  %v267_v52 = vadd.f32 %v4741_v15, %v199_v24  ;;  %v330_v24 = vmax.f32 %v266_v51, 0.0  ;;  %v5263_v19 = vsel %vm4723_vm2, 0, %v505_v59  ;;  %v203_v59 = vmul.f32 %v3666_v48, %v4715_v57 }
  0xa6   :  { %2290 = vmatprep.subr.bf16.mxu0 %v6518_v0  ;;  %v695_v48 = vor.u32 %v694_v23, %v458_v5  ;;  %v696_v5 = vrot.slane %v468_v1, 1  ;;  %v334_v23 = vmax.f32 %v270_v36, 0.0  ;;  %v3898_v1 = vld [vmem:[%s6502_s0 + $0xa0] sm:$0xff]  }
  0xa7   :  { %v331_v20 = vmax.f32 %v267_v52, 0.0 }
  0xa8   :  { %v5300_v4 = vsel %vm4777_vm5, %v695_v48, 0  ;;  %v697_v30 = vor.u32 %v696_v5, %v465_v42  ;;  %v698_v5 = vrot.slane %v475_v25, 1 }
  0xa9   :  { %1542 = vmatmul.mubr.bf16.gmra.mrb[52].mxu1 %v5206_v37  ;;  %2291 = vmatpush1.bf16.msra.mxu0 %v4472_v43  ;;  %v201_v43 = vmul.f32 %v3662_v12, %v4715_v57  ;;  %v5265_v51 = vpack.c.bf16 %v331_v20, %v330_v24  ;;  %v268_v12 = vadd.f32 %v4741_v15, %v200_v55 }
  0xaa   :  { %1549 = vmatprep.mubr.bf16.mxu1 %v5175_v32  ;;  %2292 = vmatprep.subr.bf16.mxu0 %v6518_v0  ;;  %v5331_v42 = vsel %vm4777_vm5, %v697_v30, 0  ;;  %v5349_v30 = vld [vmem:[%s6500_s3 + $0x200] sm:$0xff]  }
  0xab   :  { %v269_v52 = vadd.f32 %v4741_v15, %v201_v43  ;;  %v6515_v55 = vshrl.u32 %v5265_v51, 16  ;;  %v332_v24 = vmax.f32 %v268_v12, 0.0  ;;  %v4474_v43 = vld [vmem:[%s6500_s3 + $0x1d8] sm:$0xff]   ;;  %v6516_v18 = vshll.u32 %v5265_v51, 16  ;;  %3981 = vmatprep.subr.bf16.mxu1 %v5349_v30 }
  0xac   :  { %2056 = vmatmul.mubr.bf16.gmra.mrb[20].mxu0 %v4884_v22 }
  0xad   :  { %2063 = vmatprep.mubr.bf16.mxu0 %v5061_v53  ;;  %2293 = vmatpush1.bf16.msra.mxu0 %v4473_v61  ;;  %v5271_v61 = vsel %vm4777_vm5, %v693_v41, 0  ;;  %v333_v20 = vmax.f32 %v269_v52, 0.0  ;;  %v271_v41 = vadd.f32 %v4741_v15, %v203_v59  ;;  %v509_v12 = vrot.slane %v6515_v55, 7 }
  0xae   :  { %2294 = vmatprep.subr.bf16.mxu0 %v6518_v0 }
  0xaf   :  { %v5296_v52 = vpack.c.bf16 %v333_v20, %v332_v24  ;;  %v335_v63 = vmax.f32 %v271_v41, 0.0  ;;  %v512_v59 = vor.u32 %v6516_v18, %v509_v12  ;;  %v204_v20 = vmul.f32 %v3669_v29, %v4715_v57 }
  0xb0   :  { %v3673_v41 = vunpack.c.l.bf16 %v3898_v1  ;;  %v3674_v12 = vunpack.c.h.bf16 %v3898_v1 }
  0xb1   :  { %1550 = vmatmul.mubr.bf16.gmra.mrb[56].mxu1 %v5236_v16  ;;  %2295 = vmatpush1.bf16.msra.mxu0 %v4474_v43  ;;  %6618 = vst [vmem:[#allocation24_spill] sm:$0xff] %v5296_v52  ;;  %v6517_v24 = vshrl.u32 %v5296_v52, 16  ;;  %v205_v43 = vmul.f32 %v3670_v40, %v4715_v57  ;;  %v6520_v48 = vshll.u32 %v5296_v52, 16  ;;  %v5319_v36 = vpack.c.bf16 %v335_v63, %v334_v23 }
  0xb2   :  { %1557 = vmatprep.mubr.bf16.mxu1 %v5210_v39  ;;  %2296 = vmatprep.subr.bf16.mxu0 %v6518_v0  ;;  %v5323_v29 = vsel %vm4723_vm2, 0, %v512_v59  ;;  %v272_v55 = vadd.f32 %v4741_v15, %v204_v20  ;;  %v206_v23 = vmul.f32 %v3673_v41, %v4715_v57  ;;  %v207_v63 = vmul.f32 %v3674_v12, %v4715_v57  ;;  %v3899_v59 = vld [vmem:[%s6502_s0 + $0xa8] sm:$0xff]   ;;  %v4476_v41 = vld [vmem:[%s6500_s3 + $0x1e0] sm:$0xff]  }
  0xb3   :  { %6619 = vst [vmem:[#allocation25_spill] sm:$0xff] %v5319_v36  ;;  %v516_v40 = vrot.slane %v6517_v24, 7  ;;  %v273_v18 = vadd.f32 %v4741_v15, %v205_v43  ;;  %v6620_v12 = vshrl.u32 %v5093_v35, 16  ;;  %v6622_v53 = vshrl.u32 %v5319_v36, 16 }
  0xb4   :  { %2064 = vmatmul.mubr.bf16.gmra.mrb[24].mxu0 %v4920_v45  ;;  %v336_v25 = vmax.f32 %v272_v55, 0.0  ;;  %v274_v55 = vadd.f32 %v4741_v15, %v206_v23 }
  0xb5   :  { %2071 = vmatprep.mubr.bf16.mxu0 %v5271_v61  ;;  %v519_v20 = vor.u32 %v6520_v48, %v516_v40  ;;  %v337_v1 = vmax.f32 %v273_v18, 0.0  ;;  %v699_v24 = vor.u32 %v698_v5, %v6620_v12  ;;  %2297 = vmatpush1.bf16.msra.mxu0 %v4476_v41  ;;  %v275_v18 = vadd.f32 %v4741_v15, %v207_v63 }
  0xb6   :  { %v3678_v40 = vunpack.c.h.bf16 %v3899_v59  ;;  %v6621_v48 = vmov 0   ;;  %v523_v6 = vrot.slane %v6622_v53, 7  ;;  %v6527_v5 = vshll.u32 %v5319_v36, 16 }
  0xb7   :  { %2298 = vmatprep.subr.bf16.mxu0 %v6621_v48  ;;  %v5363_v43 = vsel %vm4723_vm2, 0, %v519_v20  ;;  %v5368_v12 = vpack.c.bf16 %v337_v1, %v336_v25  ;;  %v6623_v41 = vshll.u32 %v5116_v26, 16  ;;  %v5374_v23 = vsel %vm4777_vm5, %v699_v24, 0  ;;  %v3900_v24 = vld [vmem:[%s6502_s0 + $0xb0] sm:$0xff]  }
  0xb8   :  { %6624 = vst [vmem:[#allocation26_spill] sm:$0xff] %v5374_v23  ;;  %v339_v20 = vmax.f32 %v275_v18, 0.0  ;;  %v209_v27 = vmul.f32 %v3678_v40, %v4715_v57  ;;  %v526_v53 = vor.u32 %v6527_v5, %v523_v6  ;;  %v3893_v6 = vld [vmem:[%s6502_s0 + $0x78] sm:$0xff]  }
  0xb9   :  { %1558 = vmatmul.mubr.bf16.gmra.mrb[60].mxu1 %v5263_v19  ;;  %v700_v58 = vrot.slane %v6623_v41, 1  ;;  %v6531_v25 = vshrl.u32 %v5368_v12, 16  ;;  %v3681_v41 = vunpack.c.l.bf16 %v3900_v24 }
  0xba   :  { %1565 = vmatprep.mubr.bf16.mxu1 %v6518_v0  ;;  %v3677_v0 = vunpack.c.l.bf16 %v3899_v59  ;;  %v338_v59 = vmax.f32 %v274_v55, 0.0  ;;  %v277_v40 = vadd.f32 %v4741_v15, %v209_v27  ;;  %v5399_v5 = vsel %vm4723_vm2, 0, %v526_v53 }
  0xbb   :  { %v530_v34 = vrot.slane %v6531_v25, 7  ;;  %v6627_v27 = vshll.u32 %v5155_v38, 16 }
  0xbc   :  { %2072 = vmatmul.mubr.bf16.gmra.mrb[28].mxu0 %v4956_v9  ;;  %v208_v63 = vmul.f32 %v3677_v0, %v4715_v57  ;;  %v6625_v0 = vshrl.u32 %v5116_v26, 16  ;;  %v5391_v18 = vpack.c.bf16 %v339_v20, %v338_v59  ;;  %v341_v7 = vmax.f32 %v277_v40, 0.0  ;;  %v3901_v40 = vld [vmem:[%s6502_s0 + $0xb8] sm:$0xff]  }
  0xbd   :  { %2079 = vmatprep.mubr.bf16.mxu0 %v5300_v4  ;;  %v702_v59 = vrot.slane %v6627_v27, 1 }
  0xbe   :  { %v701_v1 = vor.u32 %v700_v58, %v6625_v0  ;;  %v276_v55 = vadd.f32 %v4741_v15, %v208_v63  ;;  %6626 = vst [vmem:[#allocation27_spill] sm:$0xff] %v5391_v18  ;;  %v6532_v58 = vshll.u32 %v5368_v12, 16  ;;  %v3654_v0 = vunpack.c.h.bf16 %v3893_v6 }
  0xc0   :  { %v5406_v63 = vsel %vm4777_vm5, %v701_v1, 0  ;;  %v340_v20 = vmax.f32 %v276_v55, 0.0  ;;  %v533_v1 = vor.u32 %v6532_v58, %v530_v34  ;;  %v4477_v55 = vld [vmem:[%s6500_s3 + $0x1e8] sm:$0xff]   ;;  %v197_v53 = vmul.f32 %v3654_v0, %v4715_v57 }
  0xc1   :  { %1566 = vmatmul.mubr.bf16.gmra.mrb[64].mxu1 %v4745_v17  ;;  %v3682_v17 = vunpack.c.h.bf16 %v3900_v24  ;;  %v3653_v24 = vunpack.c.l.bf16 %v3893_v6  ;;  %v6536_v6 = vshll.u32 %v5391_v18, 16  ;;  %2299 = vmatpush1.bf16.msra.mxu0 %v4477_v55  ;;  %v6629_v34 = vshrl.u32 %v5391_v18, 16 }
  0xc2   :  { %1573 = vmatprep.mubr.bf16.mxu1 %v5265_v51  ;;  %2300 = vmatprep.subr.bf16.mxu0 %v6621_v48  ;;  %v6631_v55 = vshll.u32 %v5175_v32, 16 }
  0xc3   :  { %v211_v25 = vmul.f32 %v3682_v17, %v4715_v57  ;;  %v196_v27 = vmul.f32 %v3653_v24, %v4715_v57  ;;  %v537_v58 = vrot.slane %v6629_v34, 7  ;;  %v3686_v24 = vunpack.c.h.bf16 %v3901_v40 }
  0xc4   :  { %2080 = vmatmul.mubr.bf16.gmra.mrb[32].mxu0 %v5016_v54 }
  0xc5   :  { %2087 = vmatprep.mubr.bf16.mxu0 %v5331_v42  ;;  %v279_v3 = vadd.f32 %v4741_v15, %v211_v25  ;;  %v540_v25 = vor.u32 %v6536_v6, %v537_v58  ;;  %v6632_v58 = vshrl.u32 %v5175_v32, 16 }
  0xc9   :  { %1574 = vmatmul.mubr.bf16.gmra.mrb[68].mxu1 %v5323_v29 }
  0xca   :  { %1581 = vmatprep.mubr.bf16.mxu1 %v5296_v52 }
  0xcc   :  { %2088 = vmatmul.mubr.bf16.gmra.mrb[36].mxu0 %v5056_v31  ;;  %v210_v31 = vmul.f32 %v3681_v41, %v4715_v57  ;;  %v6628_v41 = vshrl.u32 %v5155_v38, 16 }
  0xcd   :  { %2095 = vmatprep.mubr.bf16.mxu0 %v5374_v23 }
  0xce   :  { %v703_v17 = vor.u32 %v702_v59, %v6628_v41  ;;  %v278_v54 = vadd.f32 %v4741_v15, %v210_v31  ;;  %v5439_v59 = vsel %vm4723_vm2, 0, %v533_v1  ;;  %v3685_v41 = vunpack.c.l.bf16 %v3901_v40 }
  0xcf   :  { %v265_v31 = vadd.f32 %v4741_v15, %v197_v53  ;;  %v343_v40 = vmax.f32 %v279_v3, 0.0  ;;  %v3902_v53 = vld [vmem:[%s6502_s0 + $0xc0] sm:$0xff]   ;;  %v5465_v3 = vsel %vm4723_vm2, 0, %v540_v25 }
  0xd0   :  { %v5443_v0 = vsel %vm4777_vm5, %v703_v17, 0  ;;  %v342_v34 = vmax.f32 %v278_v54, 0.0  ;;  %v212_v17 = vmul.f32 %v3685_v41, %v4715_v57  ;;  %6633 = vst [vmem:[#allocation29_spill] sm:$0xff] %v5465_v3  ;;  %v3689_v45 = vunpack.c.l.bf16 %v3902_v53 }
  0xd1   :  { %1582 = vmatmul.mubr.bf16.gmra.mrb[72].mxu1 %v5363_v43  ;;  %v329_v54 = vmax.f32 %v265_v31, 0.0  ;;  %v3690_v2 = vunpack.c.h.bf16 %v3902_v53 }
  0xd2   :  { %1589 = vmatprep.mubr.bf16.mxu1 %v5319_v36  ;;  %v280_v9 = vadd.f32 %v4741_v15, %v212_v17  ;;  %v214_v53 = vmul.f32 %v3689_v45, %v4715_v57 }
  0xd4   :  { %2096 = vmatmul.mubr.bf16.gmra.mrb[40].mxu0 %v5093_v35  ;;  %v5432_v35 = vpack.c.bf16 %v341_v7, %v340_v20  ;;  %v704_v7 = vrot.slane %v6631_v55, 1  ;;  %v264_v20 = vadd.f32 %v4741_v15, %v196_v27  ;;  %v213_v55 = vmul.f32 %v3686_v24, %v4715_v57 }
  0xd5   :  { %2103 = vmatprep.mubr.bf16.mxu0 %v5406_v63  ;;  %v344_v17 = vmax.f32 %v280_v9, 0.0 }
  0xd6   :  { %6630 = vst [vmem:[#allocation28_spill] sm:$0xff] %v5432_v35  ;;  %v6542_v1 = vshrl.u32 %v5432_v35, 16  ;;  %v705_v27 = vor.u32 %v704_v7, %v6632_v58  ;;  %v328_v6 = vmax.f32 %v264_v20, 0.0  ;;  %v6543_v24 = vshll.u32 %v5432_v35, 16 }
  0xd7   :  { %v281_v28 = vadd.f32 %v4741_v15, %v213_v55  ;;  %v6635_v20 = vshll.u32 %v5210_v39, 16  ;;  %v215_v58 = vmul.f32 %v3690_v2, %v4715_v57 }
  0xd8   :  { %v544_v41 = vrot.slane %v6542_v1, 7  ;;  %v5476_v7 = vsel %vm4777_vm5, %v705_v27, 0  ;;  %v5480_v25 = vpack.c.bf16 %v329_v54, %v328_v6  ;;  %v3903_v6 = vld [vmem:[%s6502_s0 + $0xc8] sm:$0xff]   ;;  %v4479_v27 = vld [vmem:[%s6500_s3 + $0x1f0] sm:$0xff]   ;;  %v6636_v54 = vshrl.u32 %v5210_v39, 16 }
  0xd9   :  { %1590 = vmatmul.mubr.bf16.gmra.mrb[76].mxu1 %v5399_v5  ;;  %v706_v31 = vrot.slane %v6635_v20, 1  ;;  %v345_v55 = vmax.f32 %v281_v28, 0.0  ;;  %2301 = vmatpush1.bf16.msra.mxu0 %v4479_v27  ;;  %v3693_v20 = vunpack.c.l.bf16 %v3903_v6 }
  0xda   :  { %1597 = vmatprep.mubr.bf16.mxu1 %v5368_v12  ;;  %v6545_v9 = vshll.u32 %v5480_v25, 16  ;;  %2302 = vmatprep.subr.bf16.mxu0 %v6621_v48 }
  0xdb   :  { %v5508_v1 = vpack.c.bf16 %v345_v55, %v344_v17  ;;  %v216_v55 = vmul.f32 %v3693_v20, %v4715_v57 }
  0xdc   :  { %2104 = vmatmul.mubr.bf16.gmra.mrb[44].mxu0 %v5116_v26  ;;  %v5470_v26 = vpack.c.bf16 %v343_v40, %v342_v34  ;;  %v547_v34 = vor.u32 %v6543_v24, %v544_v41  ;;  %v707_v41 = vor.u32 %v706_v31, %v6636_v54  ;;  %v282_v24 = vadd.f32 %v4741_v15, %v214_v53  ;;  %v3904_v53 = vld [vmem:[%s6502_s0 + $0xd0] sm:$0xff]  }
  0xdd   :  { %2111 = vmatprep.mubr.bf16.mxu0 %v5443_v0  ;;  %6638 = vst [vmem:[#allocation32_spill] sm:$0xff] %v5508_v1  ;;  %v283_v31 = vadd.f32 %v4741_v15, %v215_v58  ;;  %v3694_v54 = vunpack.c.h.bf16 %v3903_v6  ;;  %v6551_v58 = vshrl.u32 %v5508_v1, 16  ;;  %v3697_v20 = vunpack.c.l.bf16 %v3904_v53 }
  0xde   :  { %6634 = vst [vmem:[#allocation30_spill] sm:$0xff] %v5470_v26  ;;  %v6544_v40 = vshrl.u32 %v5470_v26, 16  ;;  %v5502_v45 = vsel %vm4723_vm2, 0, %v547_v34  ;;  %v6546_v28 = vshll.u32 %v5470_v26, 16  ;;  %v5514_v27 = vsel %vm4777_vm5, %v707_v41, 0 }
  0xdf   :  { %6637 = vst [vmem:[#allocation31_spill] sm:$0xff] %v5502_v45  ;;  %v6550_v34 = vshrl.u32 %v5480_v25, 16  ;;  %v346_v6 = vmax.f32 %v282_v24, 0.0  ;;  %v347_v41 = vmax.f32 %v283_v31, 0.0  ;;  %v284_v31 = vadd.f32 %v4741_v15, %v216_v55 }
  0xe0   :  { %v551_v2 = vrot.slane %v6544_v40, 7  ;;  %v821_v40 = vrot.slane %v6545_v9, 1  ;;  %v217_v9 = vmul.f32 %v3694_v54, %v4715_v57  ;;  %v6643_v55 = vshll.u32 %v5508_v1, 16 }
  0xe1   :  { %1598 = vmatmul.mubr.bf16.gmra.mrb[80].mxu1 %v5439_v59  ;;  %v5540_v24 = vpack.c.bf16 %v347_v41, %v346_v6  ;;  %v348_v41 = vmax.f32 %v284_v31, 0.0 }
  0xe2   :  { %1605 = vmatprep.mubr.bf16.mxu1 %v5391_v18  ;;  %v554_v17 = vor.u32 %v6546_v28, %v551_v2  ;;  %v822_v2 = vor.u32 %v821_v40, %v6550_v34  ;;  %v3698_v28 = vunpack.c.h.bf16 %v3904_v53  ;;  %v285_v54 = vadd.f32 %v4741_v15, %v217_v9 }
  0xe3   :  { %6640 = vst [vmem:[#allocation34_spill] sm:$0xff] %v5540_v24  ;;  %v6642_v53 = vshll.u32 %v5265_v51, 16  ;;  %v6557_v6 = vshrl.u32 %v5540_v24, 16  ;;  %v6560_v22 = vshll.u32 %v5540_v24, 16 }
  0xe4   :  { %2112 = vmatmul.mubr.bf16.gmra.mrb[48].mxu0 %v5155_v38  ;;  %v5535_v48 = vsel %vm4723_vm2, 0, %v554_v17  ;;  %v558_v38 = vrot.slane %v6551_v58, 7  ;;  %v5546_v40 = vsel %vm4777_vm5, %v822_v2, 0  ;;  %v218_v17 = vmul.f32 %v3697_v20, %v4715_v57 }
  0xe5   :  { %2119 = vmatprep.mubr.bf16.mxu0 %v5476_v7  ;;  %6639 = vst [vmem:[#allocation33_spill] sm:$0xff] %v5535_v48  ;;  %6641 = vst [vmem:[#allocation35_spill] sm:$0xff] %v5546_v40  ;;  %v708_v34 = vrot.slane %v6642_v53, 1  ;;  %v349_v2 = vmax.f32 %v285_v54, 0.0  ;;  %v3905_v53 = vld [vmem:[%s6502_s0 + $0xd8] sm:$0xff]   ;;  %v6644_v20 = vshrl.u32 %v5265_v51, 16 }
  0xe6   :  { %v561_v9 = vor.u32 %v6643_v55, %v558_v38  ;;  %v3701_v31 = vunpack.c.l.bf16 %v3905_v53  ;;  %v3702_v54 = vunpack.c.h.bf16 %v3905_v53 }
  0xe7   :  { %v709_v58 = vor.u32 %v708_v34, %v6644_v20 }
  0xe8   :  { %v5571_v55 = vsel %vm4723_vm2, 0, %v561_v9  ;;  %v220_v9 = vmul.f32 %v3701_v31, %v4715_v57  ;;  %v221_v20 = vmul.f32 %v3702_v54, %v4715_v57 }
  0xe9   :  { %1606 = vmatmul.mubr.bf16.gmra.mrb[84].mxu1 %v5465_v3  ;;  %6645 = vst [vmem:[#allocation36_spill] sm:$0xff] %v5571_v55  ;;  %v5580_v34 = vsel %vm4777_vm5, %v709_v58, 0 }
  0xea   :  { %1613 = vmatprep.mubr.bf16.mxu1 %v5432_v35  ;;  %v288_v54 = vadd.f32 %v4741_v15, %v220_v9 }
  0xec   :  { %2120 = vmatmul.mubr.bf16.gmra.mrb[52].mxu0 %v5175_v32  ;;  %v219_v32 = vmul.f32 %v3698_v28, %v4715_v57  ;;  %v4481_v28 = vld [vmem:[%s6500_s3 + $0x1f8] sm:$0xff]  }
  0xed   :  { %2127 = vmatprep.mubr.bf16.mxu0 %v5514_v27  ;;  %2303 = vmatpush1.bf16.msra.mxu0 %v4481_v28 }
  0xee   :  { %v287_v38 = vadd.f32 %v4741_v15, %v219_v32  ;;  %v6647_v32 = vshll.u32 %v5296_v52, 16 }
  0xf0   :  { %v351_v53 = vmax.f32 %v287_v38, 0.0 }
  0xf1   :  { %1614 = vmatmul.mubr.bf16.gmra.mrb[88].mxu1 %v5502_v45 }
  0xf2   :  { %1621 = vmatprep.mubr.bf16.mxu1 %v5470_v26 }
  0xf4   :  { %2128 = vmatmul.mubr.bf16.gmra.mrb[56].mxu0 %v5210_v39  ;;  %v286_v39 = vadd.f32 %v4741_v15, %v218_v17  ;;  %v710_v17 = vrot.slane %v6647_v32, 1  ;;  %v289_v32 = vadd.f32 %v4741_v15, %v221_v20  ;;  %v352_v20 = vmax.f32 %v288_v54, 0.0 }
  0xf5   :  { %2135 = vmatprep.mubr.bf16.mxu0 %v5546_v40  ;;  %v5576_v40 = vpack.c.bf16 %v349_v2, %v348_v41  ;;  %v6648_v2 = vshrl.u32 %v5296_v52, 16  ;;  %v6652_v54 = vshrl.u32 %v5319_v36, 16 }
  0xf6   :  { %v350_v28 = vmax.f32 %v286_v39, 0.0  ;;  %v3906_v39 = vld [vmem:[%s6502_s0 + $0xe0] sm:$0xff]  }
  0xf7   :  { %6646 = vst [vmem:[#allocation37_spill] sm:$0xff] %v5576_v40  ;;  %v6563_v58 = vshrl.u32 %v5576_v40, 16  ;;  %v711_v38 = vor.u32 %v710_v17, %v6648_v2  ;;  %v6564_v45 = vshll.u32 %v5576_v40, 16 }
  0xf8   :  { %v5598_v31 = vpack.c.bf16 %v351_v53, %v350_v28  ;;  %v6651_v28 = vshll.u32 %v5319_v36, 16 }
  0xf9   :  { %1622 = vmatmul.mubr.bf16.gmra.mrb[92].mxu1 %v5535_v48  ;;  %v565_v48 = vrot.slane %v6557_v6, 7  ;;  %v3705_v6 = vunpack.c.l.bf16 %v3906_v39  ;;  %v5611_v17 = vsel %vm4777_vm5, %v711_v38, 0 }
  0xfa   :  { %1629 = vmatprep.mubr.bf16.mxu1 %v5508_v1  ;;  %6649 = vst [vmem:[#allocation38_spill] sm:$0xff] %v5598_v31  ;;  %v712_v53 = vrot.slane %v6651_v28, 1  ;;  %v6568_v9 = vshrl.u32 %v5598_v31, 16  ;;  %v3907_v28 = vld [vmem:[%s6502_s0 + $0xe8] sm:$0xff]  }
  0xfb   :  { %v568_v41 = vor.u32 %v6560_v22, %v565_v48  ;;  %v572_v22 = vrot.slane %v6563_v58, 7  ;;  %v3710_v14 = vunpack.c.h.bf16 %v3907_v28 }
  0xfc   :  { %2136 = vmatmul.mubr.bf16.gmra.mrb[60].mxu0 %v5480_v25 }
  0xfd   :  { %2143 = vmatprep.mubr.bf16.mxu0 %v5580_v34  ;;  %v5604_v48 = vsel %vm4723_vm2, 0, %v568_v41  ;;  %v222_v41 = vmul.f32 %v3705_v6, %v4715_v57  ;;  %v575_v38 = vor.u32 %v6564_v45, %v572_v22 }
  0xfe   :  { %6650 = vst [vmem:[#allocation39_spill] sm:$0xff] %v5604_v48 }
  0xff   :  { %v290_v58 = vadd.f32 %v4741_v15, %v222_v41  ;;  %v5638_v45 = vsel %vm4723_vm2, 0, %v575_v38 }
 0x100   :  { %6653 = vst [vmem:[#allocation40_spill] sm:$0xff] %v5638_v45 }
 0x101   :  { %1630 = vmatmul.mubr.bf16.gmra.mrb[96].mxu1 %v5571_v55  ;;  %v3706_v55 = vunpack.c.h.bf16 %v3906_v39  ;;  %v353_v39 = vmax.f32 %v289_v32, 0.0  ;;  %v713_v32 = vor.u32 %v712_v53, %v6652_v54  ;;  %v6654_v54 = vshll.u32 %v5368_v12, 16 }
 0x102   :  { %1637 = vmatprep.mubr.bf16.mxu1 %v5540_v24 }
 0x103   :  { %v223_v2 = vmul.f32 %v3706_v55, %v4715_v57  ;;  %v579_v55 = vrot.slane %v6568_v9, 7  ;;  %v5642_v53 = vsel %vm4777_vm5, %v713_v32, 0  ;;  %v714_v6 = vrot.slane %v6654_v54, 1 }
 0x104   :  { %2144 = vmatmul.mubr.bf16.gmra.mrb[64].mxu0 %v5265_v51  ;;  %v5632_v51 = vpack.c.bf16 %v353_v39, %v352_v20  ;;  %v6655_v20 = vshll.u32 %v5598_v31, 16  ;;  %v225_v32 = vmul.f32 %v3710_v14, %v4715_v57 }
 0x105   :  { %2151 = vmatprep.mubr.bf16.mxu0 %v5611_v17  ;;  %v291_v22 = vadd.f32 %v4741_v15, %v223_v2  ;;  %v354_v2 = vmax.f32 %v290_v58, 0.0  ;;  %v6658_v58 = vshrl.u32 %v5368_v12, 16 }
 0x106   :  { %v582_v39 = vor.u32 %v6655_v20, %v579_v55  ;;  %v3908_v55 = vld [vmem:[%s6502_s0 + $0xf0] sm:$0xff]   ;;  %v293_v47 = vadd.f32 %v4741_v15, %v225_v32 }
 0x107   :  { %v355_v9 = vmax.f32 %v291_v22, 0.0  ;;  %v715_v22 = vor.u32 %v714_v6, %v6658_v58  ;;  %v3714_v3 = vunpack.c.h.bf16 %v3908_v55 }
 0x109   :  { %1638 = vmatmul.mubr.bf16.gmra.mrb[100].mxu1 %v5604_v48  ;;  %v3709_v48 = vunpack.c.l.bf16 %v3907_v28  ;;  %v5677_v6 = vsel %vm4777_vm5, %v715_v22, 0 }
 0x10a   :  { %1645 = vmatprep.mubr.bf16.mxu1 %v5576_v40 }
 0x10b   :  { %v224_v28 = vmul.f32 %v3709_v48, %v4715_v57  ;;  %v6660_v48 = vshrl.u32 %v5632_v51, 16 }
 0x10c   :  { %2152 = vmatmul.mubr.bf16.gmra.mrb[68].mxu0 %v5296_v52  ;;  %v6575_v52 = vshll.u32 %v5632_v51, 16 }
 0x10d   :  { %2159 = vmatprep.mubr.bf16.mxu0 %v5642_v53  ;;  %v586_v14 = vrot.slane %v6660_v48, 7  ;;  %v6663_v48 = vshrl.u32 %v5391_v18, 16 }
 0x10f   :  { %v589_v58 = vor.u32 %v6575_v52, %v586_v14 }
 0x111   :  { %1646 = vmatmul.mubr.bf16.gmra.mrb[104].mxu1 %v5638_v45  ;;  %v292_v45 = vadd.f32 %v4741_v15, %v224_v28  ;;  %v357_v28 = vmax.f32 %v293_v47, 0.0  ;;  %v5696_v52 = vsel %vm4723_vm2, 0, %v589_v58  ;;  %v6666_v58 = vshll.u32 %v5432_v35, 16 }
 0x112   :  { %1653 = vmatprep.mubr.bf16.mxu1 %v5598_v31 }
 0x114   :  { %v5651_v38 = vpop.f32.mrb[0].mxu1  ;;  %2160 = vmatmul.mubr.bf16.gmra.mrb[72].mxu0 %v5319_v36 }
 0x115   :  { %6656 = vst [vmem:[#allocation41_spill] sm:$0xff] %v5651_v38  ;;  %v1441_v54 = vpop.f32.mrb[1].mxu1  ;;  %v5666_v38 = vsel %vm4723_vm2, 0, %v582_v39  ;;  %v6661_v39 = vshll.u32 %v5391_v18, 16  ;;  %2167 = vmatprep.mubr.bf16.mxu0 %v5677_v6 }
 0x116   :  { %v5660_v20 = vpop.f32.mrb[2].mxu1  ;;  %6659 = vst [vmem:[#allocation43_spill] sm:$0xff] %v5666_v38  ;;  %v5671_v54 = vpack.c.bf16 %v355_v9, %v354_v2  ;;  %v356_v2 = vmax.f32 %v292_v45, 0.0 }
 0x117   :  { %6657 = vst [vmem:[#allocation42_spill] sm:$0xff] %v5660_v20  ;;  %v1444_v41 = vpop.f32.mrb[3].mxu1  ;;  %v3713_v20 = vunpack.c.l.bf16 %v3908_v55  ;;  %v227_v55 = vmul.f32 %v3714_v3, %v4715_v57 }
 0x118   :  { %v716_v41 = vrot.slane %v6661_v39, 1  ;;  %v6579_v9 = vshll.u32 %v5671_v54, 16  ;;  %v6665_v47 = vshrl.u32 %v5671_v54, 16  ;;  %v5703_v3 = vpack.c.bf16 %v357_v28, %v356_v2 }
 0x119   :  { %1654 = vmatmul.mubr.bf16.gmra.mrb[108].mxu1 %v5666_v38  ;;  %v226_v32 = vmul.f32 %v3713_v20, %v4715_v57 }
 0x11a   :  { %1661 = vmatprep.mubr.bf16.mxu1 %v5632_v51  ;;  %v717_v39 = vor.u32 %v716_v41, %v6663_v48  ;;  %v593_v20 = vrot.slane %v6665_v47, 7  ;;  %v718_v48 = vrot.slane %v6666_v58, 1  ;;  %v6580_v28 = vshrl.u32 %v5703_v3, 16 }
 0x11b   :  { %v294_v36 = vadd.f32 %v4741_v15, %v226_v32 }
 0x11c   :  { %v5690_v22 = vpop.f32.mrb[4].mxu1  ;;  %v5709_v41 = vsel %vm4777_vm5, %v717_v39, 0  ;;  %2168 = vmatmul.mubr.bf16.gmra.mrb[76].mxu0 %v5368_v12  ;;  %v596_v2 = vor.u32 %v6579_v9, %v593_v20  ;;  %v6668_v39 = vshrl.u32 %v5432_v35, 16  ;;  %v600_v20 = vrot.slane %v6580_v28, 7 }
 0x11d   :  { %6662 = vst [vmem:[#allocation44_spill] sm:$0xff] %v5690_v22  ;;  %v1449_v14 = vpop.f32.mrb[5].mxu1  ;;  %v295_v22 = vadd.f32 %v4741_v15, %v227_v55  ;;  %v358_v32 = vmax.f32 %v294_v36, 0.0  ;;  %2175 = vmatprep.mubr.bf16.mxu0 %v5709_v41  ;;  %v6581_v36 = vshll.u32 %v5703_v3, 16 }
 0x11e   :  { %v5699_v45 = vpop.f32.mrb[6].mxu1  ;;  %v719_v14 = vor.u32 %v718_v48, %v6668_v39  ;;  %v6670_v48 = vshll.u32 %v5470_v26, 16 }
 0x11f   :  { %6664 = vst [vmem:[#allocation45_spill] sm:$0xff] %v5699_v45  ;;  %v1452_v38 = vpop.f32.mrb[7].mxu1  ;;  %v5728_v45 = vsel %vm4723_vm2, 0, %v596_v2  ;;  %v603_v2 = vor.u32 %v6581_v36, %v600_v20 }
 0x120   :  { %v359_v38 = vmax.f32 %v295_v22, 0.0  ;;  %v720_v39 = vrot.slane %v6670_v48, 1 }
 0x121   :  { %1662 = vmatmul.mubr.bf16.gmra.mrb[112].mxu1 %v5696_v52  ;;  %v5756_v28 = vsel %vm4723_vm2, 0, %v603_v2 }
 0x122   :  { %1669 = vmatprep.mubr.bf16.mxu1 %v5671_v54  ;;  %v5733_v22 = vpack.c.bf16 %v359_v38, %v358_v32  ;;  %v6672_v38 = vshrl.u32 %v5470_v26, 16 }
 0x124   :  { %v5720_v55 = vpop.f32.mrb[8].mxu1  ;;  %2176 = vmatmul.mubr.bf16.gmra.mrb[80].mxu0 %v5391_v18  ;;  %v6583_v32 = vshrl.u32 %v5733_v22, 16  ;;  %v6585_v20 = vshll.u32 %v5733_v22, 16 }
 0x125   :  { %6667 = vst [vmem:[#allocation46_spill] sm:$0xff] %v5720_v55  ;;  %v1457_v47 = vpop.f32.mrb[9].mxu1  ;;  %v5737_v55 = vsel %vm4777_vm5, %v719_v14, 0  ;;  %v721_v14 = vor.u32 %v720_v39, %v6672_v38 }
 0x126   :  { %v5724_v58 = vpop.f32.mrb[10].mxu1  ;;  %2183 = vmatprep.mubr.bf16.mxu0 %v5737_v55 }
 0x127   :  { %6669 = vst [vmem:[#allocation47_spill] sm:$0xff] %v5724_v58  ;;  %v1460_v9 = vpop.f32.mrb[11].mxu1  ;;  %v607_v58 = vrot.slane %v6583_v32, 7  ;;  %v5763_v18 = vsel %vm4777_vm5, %v721_v14, 0 }
 0x129   :  { %1670 = vmatmul.mubr.bf16.gmra.mrb[116].mxu1 %v5728_v45  ;;  %v610_v2 = vor.u32 %v6585_v20, %v607_v58  ;;  %v6678_v58 = vshll.u32 %v5540_v24, 16 }
 0x12a   :  { %1677 = vmatprep.mubr.bf16.mxu1 %v5703_v3 }
 0x12b   :  { %v724_v20 = vrot.slane %v6678_v58, 1 }
 0x12c   :  { %v5748_v9 = vpop.f32.mrb[12].mxu1  ;;  %2184 = vmatmul.mubr.bf16.gmra.mrb[84].mxu0 %v5432_v35 }
 0x12d   :  { %6671 = vst [vmem:[#allocation48_spill] sm:$0xff] %v5748_v9  ;;  %v1465_v47 = vpop.f32.mrb[13].mxu1  ;;  %v6674_v9 = vshll.u32 %v5508_v1, 16  ;;  %2191 = vmatprep.mubr.bf16.mxu0 %v5763_v18 }
 0x12e   :  { %v5752_v48 = vpop.f32.mrb[14].mxu1 }
 0x12f   :  { %6673 = vst [vmem:[#allocation49_spill] sm:$0xff] %v5752_v48  ;;  %v1468_v36 = vpop.f32.mrb[15].mxu1  ;;  %v722_v39 = vrot.slane %v6674_v9, 1  ;;  %v5781_v9 = vsel %vm4723_vm2, 0, %v610_v2  ;;  %v6680_v2 = vshrl.u32 %v5540_v24, 16 }
 0x130   :  { %v6676_v36 = vshrl.u32 %v5508_v1, 16 }
 0x131   :  { %1678 = vmatmul.mubr.bf16.gmra.mrb[120].mxu1 %v5756_v28 }
 0x132   :  { %1685 = vmatprep.mubr.bf16.mxu1 %v5733_v22  ;;  %v723_v14 = vor.u32 %v722_v39, %v6676_v36 }
 0x134   :  { %v5773_v38 = vpop.f32.mrb[16].mxu1  ;;  %v5785_v35 = vsel %vm4777_vm5, %v723_v14, 0  ;;  %2192 = vmatmul.mubr.bf16.gmra.mrb[88].mxu0 %v5470_v26  ;;  %v4478_v26 = vld [vmem:[%s6500_s3 + $0x208] sm:$0xff]  }
 0x135   :  { %6675 = vst [vmem:[#allocation50_spill] sm:$0xff] %v5773_v38  ;;  %v1473_v47 = vpop.f32.mrb[17].mxu1  ;;  %2199 = vmatprep.mubr.bf16.mxu0 %v5785_v35 }
 0x136   :  { %v5777_v32 = vpop.f32.mrb[18].mxu1 }
 0x137   :  { %6677 = vst [vmem:[#allocation51_spill] sm:$0xff] %v5777_v32  ;;  %v1476_v48 = vpop.f32.mrb[19].mxu1  ;;  %v6682_v32 = vshll.u32 %v5576_v40, 16 }
 0x138   :  { %v725_v48 = vor.u32 %v724_v20, %v6680_v2  ;;  %v4480_v20 = vld [vmem:[%s6500_s3 + $0x210] sm:$0xff]  }
 0x139   :  { %1686 = vmatmul.mubr.bf16.gmra.mrb[124].mxu1 %v5781_v9  ;;  %v726_v38 = vrot.slane %v6682_v32, 1  ;;  %v6684_v32 = vshrl.u32 %v5576_v40, 16 }
 0x13a   :  { %1790 = vmatprep.mubr.bf16.mxu1 %v5088_v56  ;;  %v5801_v58 = vsel %vm4777_vm5, %v725_v48, 0 }
 0x13b   :  { %v727_v48 = vor.u32 %v726_v38, %v6684_v32  ;;  %v6688_v38 = vshrl.u32 %v5598_v31, 16 }
 0x13c   :  { %v5793_v39 = vpop.f32.mrb[20].mxu1  ;;  %2200 = vmatmul.mubr.bf16.gmra.mrb[92].mxu0 %v5508_v1 }
 0x13d   :  { %6679 = vst [vmem:[#allocation52_spill] sm:$0xff] %v5793_v39  ;;  %v1481_v36 = vpop.f32.mrb[21].mxu1  ;;  %2207 = vmatprep.mubr.bf16.mxu0 %v5801_v58  ;;  %v6686_v39 = vshll.u32 %v5598_v31, 16 }
 0x13e   :  { %v5797_v47 = vpop.f32.mrb[22].mxu1 }
 0x13f   :  { %6681 = vst [vmem:[#allocation53_spill] sm:$0xff] %v5797_v47  ;;  %v1484_v14 = vpop.f32.mrb[23].mxu1  ;;  %v728_v1 = vrot.slane %v6686_v39, 1  ;;  %v4483_v39 = vld [vmem:[%s6500_s3 + $0x220] sm:$0xff]  }
 0x141   :  { %1791 = vmatmul.mubr.bf16.vlgmr.msra.gmra.mrb[32].mxu1 %v5271_v61 }
 0x142   :  { %3982 = vmatpush3.bf16.msra.mxu1 %v5349_v30  ;;  %1798 = vmatprep.mubr.bf16.mxu1 %v5120_v33  ;;  %v5824_v30 = vsel %vm4777_vm5, %v727_v48, 0 }
 0x143   :  { %3983 = vmatprep.subr.bf16.mxu1 %v4478_v26 }
 0x144   :  { %v5816_v2 = vpop.f32.mrb[24].mxu1  ;;  %2208 = vmatmul.mubr.bf16.gmra.mrb[96].mxu0 %v5540_v24 }
 0x145   :  { %6683 = vst [vmem:[#allocation54_spill] sm:$0xff] %v5816_v2  ;;  %v1489_v36 = vpop.f32.mrb[25].mxu1  ;;  %v4482_v2 = vld [vmem:[%s6500_s3 + $0x218] sm:$0xff]   ;;  %2215 = vmatprep.mubr.bf16.mxu0 %v5824_v30 }
 0x146   :  { %v5820_v14 = vpop.f32.mrb[26].mxu1  ;;  %3984 = vmatpush3.bf16.msra.mxu1 %v4478_v26 }
 0x147   :  { %6685 = vst [vmem:[#allocation55_spill] sm:$0xff] %v5820_v14  ;;  %v1492_v47 = vpop.f32.mrb[27].mxu1  ;;  %3985 = vmatprep.subr.bf16.mxu1 %v4480_v20 }
 0x148   :  { %v729_v47 = vor.u32 %v728_v1, %v6688_v38  ;;  %v4484_v1 = vld [vmem:[%s6500_s3 + $0x228] sm:$0xff]  }
 0x149   :  { %1799 = vmatmul.mubr.bf16.gmra.mrb[36].mxu1 %v5300_v4 }
 0x14a   :  { %1806 = vmatprep.mubr.bf16.mxu1 %v5153_v10  ;;  %3986 = vmatpush3.bf16.msra.mxu1 %v4480_v20  ;;  %v5846_v14 = vsel %vm4777_vm5, %v729_v47, 0  ;;  %v6690_v20 = vshll.u32 %v5632_v51, 16  ;;  %v3909_v47 = vld [vmem:[%s6502_s0 + $0xf8] sm:$0xff]  }
 0x14b   :  { %3987 = vmatprep.subr.bf16.mxu1 %v4482_v2 }
 0x14c   :  { %v5835_v26 = vpop.f32.mrb[28].mxu1  ;;  %2216 = vmatmul.mubr.bf16.gmra.mrb[100].mxu0 %v5576_v40  ;;  %v3718_v40 = vunpack.c.h.bf16 %v3909_v47 }
 0x14d   :  { %6687 = vst [vmem:[#allocation56_spill] sm:$0xff] %v5835_v26  ;;  %v1497_v32 = vpop.f32.mrb[29].mxu1  ;;  %v730_v26 = vrot.slane %v6690_v20, 1  ;;  %2223 = vmatprep.mubr.bf16.mxu0 %v5846_v14 }
 0x14e   :  { %v5842_v48 = vpop.f32.mrb[30].mxu1  ;;  %3988 = vmatpush3.bf16.msra.mxu1 %v4482_v2  ;;  %v6691_v2 = vshrl.u32 %v5632_v51, 16 }
 0x14f   :  { %6689 = vst [vmem:[#allocation57_spill] sm:$0xff] %v5842_v48  ;;  %v1500_v36 = vpop.f32.mrb[31].mxu1  ;;  %3989 = vmatprep.subr.bf16.mxu1 %v4483_v39  ;;  %v3717_v48 = vunpack.c.l.bf16 %v3909_v47 }
 0x150   :  { %v731_v38 = vor.u32 %v730_v26, %v6691_v2  ;;  %v6692_v36 = vshll.u32 %v5671_v54, 16  ;;  %v4485_v26 = vld [vmem:[%s6500_s3 + $0x230] sm:$0xff]  }
 0x151   :  { %1807 = vmatmul.mubr.bf16.gmra.mrb[40].mxu1 %v5331_v42  ;;  %v228_v2 = vmul.f32 %v3717_v48, %v4715_v57 }
 0x152   :  { %1814 = vmatprep.mubr.bf16.mxu1 %v5179_v50  ;;  %3990 = vmatpush3.bf16.msra.mxu1 %v4483_v39  ;;  %v5864_v32 = vsel %vm4777_vm5, %v731_v38, 0  ;;  %v732_v20 = vrot.slane %v6692_v36, 1  ;;  %v6693_v39 = vshrl.u32 %v5671_v54, 16  ;;  %v229_v38 = vmul.f32 %v3718_v40, %v4715_v57 }
 0x153   :  { %3991 = vmatprep.subr.bf16.mxu1 %v4484_v1  ;;  %v6694_v36 = vshll.u32 %v5703_v3, 16  ;;  %v296_v24 = vadd.f32 %v4741_v15, %v228_v2  ;;  %v6695_v57 = vshrl.u32 %v5703_v3, 16 }
 0x154   :  { %2224 = vmatmul.mubr.bf16.gmra.mrb[104].mxu0 %v5598_v31 }
 0x155   :  { %2231 = vmatprep.mubr.bf16.mxu0 %v5864_v32  ;;  %v734_v31 = vrot.slane %v6694_v36, 1  ;;  %v360_v48 = vmax.f32 %v296_v24, 0.0 }
 0x156   :  { %3992 = vmatpush3.bf16.msra.mxu1 %v4484_v1  ;;  %v733_v1 = vor.u32 %v732_v20, %v6693_v39 }
 0x157   :  { %3993 = vmatprep.subr.bf16.mxu1 %v4485_v26  ;;  %v735_v40 = vor.u32 %v734_v31, %v6695_v57  ;;  %v6699_v31 = vshrl.u32 %v5733_v22, 16 }
 0x158   :  { %v5881_v47 = vsel %vm4777_vm5, %v733_v1, 0 }
 0x159   :  { %1815 = vmatmul.mubr.bf16.gmra.mrb[44].mxu1 %v5374_v23  ;;  %v297_v23 = vadd.f32 %v4741_v15, %v229_v38  ;;  %v5897_v1 = vsel %vm4777_vm5, %v735_v40, 0  ;;  %v6697_v15 = vshll.u32 %v5733_v22, 16 }
 0x15a   :  { %1822 = vmatprep.mubr.bf16.mxu1 %v5206_v37  ;;  %3994 = vmatpush3.bf16.msra.mxu1 %v4485_v26  ;;  %v6696_v26 = vshrl.u32 %v5480_v25, 16 }
 0x15b   :  { %v361_v20 = vmax.f32 %v297_v23, 0.0  ;;  %v736_v2 = vrot.slane %v6697_v15, 1  ;;  %v6698_v23 = vshll.u32 %v5480_v25, 16 }
 0x15c   :  { %2232 = vmatmul.mubr.bf16.gmra.mrb[108].mxu0 %v5632_v51  ;;  %v806_v39 = vrot.slane %v6696_v26, 7 }
 0x15d   :  { %2239 = vmatprep.mubr.bf16.mxu0 %v5881_v47  ;;  %v5901_v38 = vpack.c.bf16 %v361_v20, %v360_v48  ;;  %v737_v36 = vor.u32 %v736_v2, %v6699_v31  ;;  %v6711_v31 = vld [vmem:[#allocation16_spill] sm:$0xff] }
 0x15e   :  { %v809_v24 = vor.u32 %v6698_v23, %v806_v39  ;;  %v4486_v39 = vld [vmem:[%s6500_s3 + $0x238] sm:$0xff]   ;;  %v6709_v23 = vld [vmem:[#allocation36_spill] sm:$0xff] }
 0x15f   :  { %v814_v57 = vshll.u32 %v5901_v38, 16  ;;  %v5918_v48 = vsel %vm4777_vm5, %v737_v36, 0  ;;  %v811_v20 = vshrl.u32 %v5901_v38, 16  ;;  %3995 = vmatprep.subr.bf16.mxu1 %v4486_v39  ;;  %v6712_v36 = vld [vmem:[#allocation39_spill] sm:$0xff] }
 0x160   :  { %v5914_v40 = vsel %vm4723_vm2, 0, %v809_v24  ;;  %3996 = vmatpush3.bf16.msra.mxu1 %v4486_v39  ;;  %v6710_v24 = vld [vmem:[#allocation11_spill] sm:$0xff]  ;;  %v6714_v39 = vld [vmem:[#allocation40_spill] sm:$0xff] }
 0x161   :  { %1823 = vmatmul.mubr.bf16.gmra.mrb[48].mxu1 %v5406_v63  ;;  %v823_v26 = vrot.slane %v814_v57, 1 }
 0x162   :  { %1830 = vmatprep.mubr.bf16.mxu1 %v5236_v16 }
 0x163   :  { %v824_v15 = vor.u32 %v823_v26, %v811_v20  ;;  %v6713_v26 = vld [vmem:[#allocation14_spill] sm:$0xff] }
 0x164   :  { %2240 = vmatmul.mubr.bf16.gmra.mrb[112].mxu0 %v5671_v54 }
 0x165   :  { %2247 = vmatprep.mubr.bf16.mxu0 %v5897_v1  ;;  %v5934_v2 = vsel %vm4777_vm5, %v824_v15, 0  ;;  %v6715_v15 = vld [vmem:[#allocation17_spill] sm:$0xff] }
 0x169   :  { %1831 = vmatmul.mubr.bf16.gmra.mrb[52].mxu1 %v5443_v0 }
 0x16a   :  { %1838 = vmatprep.mubr.bf16.mxu1 %v5263_v19 }
 0x16c   :  { %2248 = vmatmul.mubr.bf16.gmra.mrb[116].mxu0 %v5703_v3 }
 0x16d   :  { %2255 = vmatprep.mubr.bf16.mxu0 %v5918_v48 }
 0x171   :  { %1839 = vmatmul.mubr.bf16.gmra.mrb[56].mxu1 %v5476_v7 }
 0x172   :  { %1846 = vmatprep.mubr.bf16.mxu1 %v5914_v40 }
 0x174   :  { %2256 = vmatmul.mubr.bf16.gmra.mrb[120].mxu0 %v5733_v22 }
 0x175   :  { %2263 = vmatprep.mubr.bf16.mxu0 %v5934_v2 }
 0x179   :  { %1847 = vmatmul.mubr.bf16.gmra.mrb[60].mxu1 %v5514_v27 }
 0x17a   :  { %1854 = vmatprep.mubr.bf16.mxu1 %v5323_v29  ;;  %v6704_v29 = vld [vmem:[#allocation5_spill] sm:$0xff] }
 0x17c   :  { %2264 = vmatmul.mubr.bf16.gmra.mrb[124].mxu0 %v5901_v38 }
 0x17d   :  { %2304 = vmatprep.mubr.bf16.mxu0 %v4767_v44  ;;  %v6700_v44 = vld [vmem:[#allocation29_spill] sm:$0xff] }
 0x181   :  { %1855 = vmatmul.mubr.bf16.gmra.mrb[64].mxu1 %v4795_v62 }
 0x182   :  { %1862 = vmatprep.mubr.bf16.mxu1 %v5363_v43 }
 0x184   :  { %2305 = vmatmul.mubr.bf16.vlgmr.msra.gmra.mrb[0].mxu0 %v4809_v21  ;;  %v6702_v21 = vld [vmem:[#allocation7_spill] sm:$0xff] }
 0x185   :  { %2312 = vmatprep.mubr.bf16.mxu0 %v4770_v46  ;;  %v6703_v46 = vld [vmem:[#allocation31_spill] sm:$0xff] }
 0x189   :  { %1863 = vmatmul.mubr.bf16.gmra.mrb[68].mxu1 %v5580_v34  ;;  %v6707_v34 = vld [vmem:[#allocation8_spill] sm:$0xff] }
 0x18a   :  { %1870 = vmatprep.mubr.bf16.mxu1 %v5399_v5 }
 0x18c   :  { %2313 = vmatmul.mubr.bf16.gmra.mrb[4].mxu0 %v4844_v8  ;;  %v6705_v8 = vld [vmem:[#allocation10_spill] sm:$0xff] }
 0x18d   :  { %2320 = vmatprep.mubr.bf16.mxu0 %v4801_v13  ;;  %v6706_v13 = vld [vmem:[#allocation33_spill] sm:$0xff] }
 0x191   :  { %1871 = vmatmul.mubr.bf16.gmra.mrb[72].mxu1 %v5611_v17 }
 0x192   :  { %1878 = vmatprep.mubr.bf16.mxu1 %v5439_v59 }
 0x194   :  { %2321 = vmatmul.mubr.bf16.gmra.mrb[8].mxu0 %v4877_v11  ;;  %v6708_v11 = vld [vmem:[#allocation13_spill] sm:$0xff] }
 0x195   :  { %2328 = vmatprep.mubr.bf16.mxu0 %v6701_v49  ;;  %v6716_v49 = vld [vmem:[#allocation43_spill] sm:$0xff] }
 0x199   :  { %1879 = vmatmul.mubr.bf16.gmra.mrb[76].mxu1 %v5642_v53 }
 0x19a   :  { %1886 = vmatprep.mubr.bf16.mxu1 %v6700_v44 }
 0x19c   :  { %2329 = vmatmul.mubr.bf16.gmra.mrb[12].mxu0 %v6702_v21  ;;  %v6717_v21 = vld [vmem:[#allocation19_spill] sm:$0xff] }
 0x19d   :  { %2336 = vmatprep.mubr.bf16.mxu0 %v6704_v29  ;;  %v6718_v29 = vld [vmem:[#allocation20_spill] sm:$0xff] }
 0x1a1   :  { %1887 = vmatmul.mubr.bf16.gmra.mrb[80].mxu1 %v5677_v6 }
 0x1a2   :  { %1894 = vmatprep.mubr.bf16.mxu1 %v6703_v46 }
 0x1a4   :  { %2337 = vmatmul.mubr.bf16.gmra.mrb[16].mxu0 %v6705_v8 }
 0x1a5   :  { %2344 = vmatprep.mubr.bf16.mxu0 %v6707_v34  ;;  %v6726_v34 = vld [vmem:[#allocation9_spill] sm:$0xff] }
 0x1a9   :  { %1895 = vmatmul.mubr.bf16.gmra.mrb[84].mxu1 %v5709_v41 }
 0x1aa   :  { %1902 = vmatprep.mubr.bf16.mxu1 %v6706_v13 }
 0x1ac   :  { %2345 = vmatmul.mubr.bf16.gmra.mrb[20].mxu0 %v6708_v11  ;;  %v6727_v11 = vld [vmem:[#allocation24_spill] sm:$0xff] }
 0x1ad   :  { %2352 = vmatprep.mubr.bf16.mxu0 %v6710_v24  ;;  %v6730_v24 = vld [vmem:[#allocation25_spill] sm:$0xff] }
 0x1b1   :  { %1903 = vmatmul.mubr.bf16.gmra.mrb[88].mxu1 %v5737_v55 }
 0x1b2   :  { %1910 = vmatprep.mubr.bf16.mxu1 %v6709_v23 }
 0x1b4   :  { %2353 = vmatmul.mubr.bf16.gmra.mrb[24].mxu0 %v6711_v31 }
 0x1b5   :  { %2360 = vmatprep.mubr.bf16.mxu0 %v6713_v26 }
 0x1b9   :  { %1911 = vmatmul.mubr.bf16.gmra.mrb[92].mxu1 %v5763_v18 }
 0x1ba   :  { %1918 = vmatprep.mubr.bf16.mxu1 %v6712_v36 }
 0x1bc   :  { %2361 = vmatmul.mubr.bf16.gmra.mrb[28].mxu0 %v5088_v56  ;;  %v6719_v56 = vld [vmem:[#allocation21_spill] sm:$0xff] }
 0x1bd   :  { %2368 = vmatprep.mubr.bf16.mxu0 %v6715_v15 }
 0x1c1   :  { %1919 = vmatmul.mubr.bf16.gmra.mrb[96].mxu1 %v5785_v35 }
 0x1c2   :  { %1926 = vmatprep.mubr.bf16.mxu1 %v6714_v39 }
 0x1c4   :  { %2369 = vmatmul.mubr.bf16.gmra.mrb[32].mxu0 %v5120_v33  ;;  %v6720_v33 = vld [vmem:[#allocation22_spill] sm:$0xff] }
 0x1c5   :  { %2376 = vmatprep.mubr.bf16.mxu0 %v6717_v21 }
 0x1c9   :  { %1927 = vmatmul.mubr.bf16.gmra.mrb[100].mxu1 %v5801_v58 }
 0x1ca   :  { %1934 = vmatprep.mubr.bf16.mxu1 %v6716_v49 }
 0x1cc   :  { %2377 = vmatmul.mubr.bf16.gmra.mrb[36].mxu0 %v5153_v10  ;;  %v813_v10 = vrot.slane %v811_v20, 7  ;;  %v6723_v20 = vmov 0  }
 0x1cd   :  { %2384 = vmatprep.mubr.bf16.mxu0 %v6718_v29 }
 0x1ce   :  { %v816_v8 = vor.u32 %v814_v57, %v813_v10  ;;  %v6724_v57 = vld [vmem:[#allocation6_spill] sm:$0xff] }
 0x1d1   :  { %1935 = vmatmul.mubr.bf16.gmra.mrb[104].mxu1 %v5824_v30 }
 0x1d2   :  { %1942 = vmatprep.mubr.bf16.mxu1 %v5696_v52 }
 0x1d4   :  { %2385 = vmatmul.mubr.bf16.gmra.mrb[40].mxu0 %v5179_v50  ;;  %v6721_v50 = vld [vmem:[#allocation23_spill] sm:$0xff] }
 0x1d5   :  { %2392 = vmatprep.mubr.bf16.mxu0 %v6719_v56  ;;  %v6733_v56 = vld [vmem:[#allocation26_spill] sm:$0xff] }
 0x1d9   :  { %1943 = vmatmul.mubr.bf16.gmra.mrb[108].mxu1 %v5846_v14 }
 0x1da   :  { %1950 = vmatprep.mubr.bf16.mxu1 %v5728_v45 }
 0x1dc   :  { %2393 = vmatmul.mubr.bf16.gmra.mrb[44].mxu0 %v5206_v37  ;;  %v6002_v37 = vsel %vm4723_vm2, 0, %v816_v8 }
 0x1dd   :  { %2400 = vmatprep.mubr.bf16.mxu0 %v6720_v33  ;;  %v6734_v33 = vld [vmem:[#allocation28_spill] sm:$0xff] }
 0x1e1   :  { %1951 = vmatmul.mubr.bf16.gmra.mrb[112].mxu1 %v5864_v32 }
 0x1e2   :  { %1958 = vmatprep.mubr.bf16.mxu1 %v5756_v28 }
 0x1e4   :  { %2401 = vmatmul.mubr.bf16.gmra.mrb[48].mxu0 %v5236_v16  ;;  %v6722_v16 = vld [vmem:[#allocation4_spill] sm:$0xff] }
 0x1e5   :  { %2408 = vmatprep.mubr.bf16.mxu0 %v6721_v50  ;;  %v6735_v50 = vld [vmem:[#allocation30_spill] sm:$0xff] }
 0x1e9   :  { %1959 = vmatmul.mubr.bf16.gmra.mrb[116].mxu1 %v5881_v47 }
 0x1ea   :  { %1966 = vmatprep.mubr.bf16.mxu1 %v5781_v9 }
 0x1ec   :  { %2409 = vmatmul.mubr.bf16.gmra.mrb[52].mxu0 %v5263_v19  ;;  %v6728_v19 = vld [vmem:[#allocation12_spill] sm:$0xff] }
 0x1ed   :  { %2416 = vmatprep.mubr.bf16.mxu0 %v5480_v25  ;;  %v6729_v25 = vld [vmem:[#allocation15_spill] sm:$0xff] }
 0x1f1   :  { %1967 = vmatmul.mubr.bf16.gmra.mrb[120].mxu1 %v5897_v1 }
 0x1f2   :  { %1974 = vmatprep.mubr.bf16.mxu1 %v6002_v37 }
 0x1f4   :  { %2417 = vmatmul.mubr.bf16.gmra.mrb[56].mxu0 %v5914_v40  ;;  %v6731_v40 = vld [vmem:[#allocation18_spill] sm:$0xff] }
 0x1f5   :  { %2424 = vmatprep.mubr.bf16.mxu0 %v6723_v20 }
 0x1f9   :  { %1975 = vmatmul.mubr.bf16.gmra.mrb[124].mxu1 %v5918_v48 }
 0x1fa   :  { %3997 = vmatprep.mubr.bf16.mxu1 %v6722_v16 }
 0x1fc   :  { %2425 = vmatmul.mubr.bf16.gmra.mrb[60].mxu0 %v6725_v60 }
 0x1fd   :  { %2432 = vmatprep.mubr.bf16.mxu0 %v6727_v11 }
 0x201   :  { %3998 = vmatmul.mubr.bf16.vlgmr.msra.gmra.mrb[128].mxu1 %v6724_v57  ;;  %v6736_v57 = vld [vmem:[#allocation35_spill] sm:$0xff] }
 0x202   :  { %4001 = vmatprep.mubr.bf16.mxu1 %v6726_v34  ;;  %v6737_v34 = vld [vmem:[#allocation32_spill] sm:$0xff] }
 0x204   :  { %2433 = vmatmul.mubr.bf16.gmra.mrb[64].mxu0 %v5363_v43  ;;  %v6732_v43 = vld [vmem:[#allocation27_spill] sm:$0xff] }
 0x205   :  { %2440 = vmatprep.mubr.bf16.mxu0 %v6730_v24 }
 0x209   :  { %4002 = vmatmul.mubr.bf16.gmra.mrb[132].mxu1 %v6728_v19  ;;  %v6738_v19 = vld [vmem:[#allocation34_spill] sm:$0xff] }
 0x20a   :  { %4005 = vmatprep.mubr.bf16.mxu1 %v6729_v25 }
 0x20c   :  { %2441 = vmatmul.mubr.bf16.gmra.mrb[68].mxu0 %v5399_v5 }
 0x20d   :  { %2448 = vmatprep.mubr.bf16.mxu0 %v5368_v12 }
 0x211   :  { %4006 = vmatmul.mubr.bf16.gmra.mrb[136].mxu1 %v6731_v40  ;;  %v6739_v40 = vld [vmem:[#allocation37_spill] sm:$0xff] }
 0x212   :  { %4009 = vmatprep.mubr.bf16.mxu1 %v5271_v61 }
 0x214   :  { %v6024_v31 = vpop.f32.mrb[32].mxu1  ;;  %2449 = vmatmul.mubr.bf16.gmra.mrb[72].mxu0 %v5439_v59 }
 0x215   :  { %v1794_v26 = vpop.f32.mrb[33].mxu1  ;;  %2456 = vmatprep.mubr.bf16.mxu0 %v6732_v43  ;;  %v6740_v43 = vld [vmem:[#allocation38_spill] sm:$0xff] }
 0x216   :  { %v6026_v15 = vpop.f32.mrb[34].mxu1 }
 0x217   :  { %v1797_v21 = vpop.f32.mrb[35].mxu1 }
 0x219   :  { %4010 = vmatmul.mubr.bf16.gmra.mrb[140].mxu1 %v5300_v4 }
 0x21a   :  { %4013 = vmatprep.mubr.bf16.mxu1 %v5331_v42 }
 0x21c   :  { %v6032_v29 = vpop.f32.mrb[36].mxu1  ;;  %2457 = vmatmul.mubr.bf16.gmra.mrb[76].mxu0 %v6700_v44 }
 0x21d   :  { %v1802_v5 = vpop.f32.mrb[37].mxu1  ;;  %2464 = vmatprep.mubr.bf16.mxu0 %v6734_v33 }
 0x21e   :  { %v6034_v61 = vpop.f32.mrb[38].mxu1 }
 0x21f   :  { %v1805_v12 = vpop.f32.mrb[39].mxu1 }
 0x221   :  { %4014 = vmatmul.mubr.bf16.gmra.mrb[144].mxu1 %v6733_v56  ;;  %v6741_v56 = vld [vmem:[#allocation41_spill] sm:$0xff] }
 0x222   :  { %4017 = vmatprep.mubr.bf16.mxu1 %v5406_v63 }
 0x224   :  { %v6040_v4 = vpop.f32.mrb[40].mxu1  ;;  %2465 = vmatmul.mubr.bf16.gmra.mrb[80].mxu0 %v6703_v46 }
 0x225   :  { %v1810_v59 = vpop.f32.mrb[41].mxu1  ;;  %2472 = vmatprep.mubr.bf16.mxu0 %v6735_v50 }
 0x226   :  { %v6042_v42 = vpop.f32.mrb[42].mxu1 }
 0x227   :  { %v1813_v10 = vpop.f32.mrb[43].mxu1 }
 0x229   :  { %4018 = vmatmul.mubr.bf16.gmra.mrb[148].mxu1 %v5443_v0 }
 0x22a   :  { %4021 = vmatprep.mubr.bf16.mxu1 %v5476_v7 }
 0x22c   :  { %v6048_v8 = vpop.f32.mrb[44].mxu1  ;;  %2473 = vmatmul.mubr.bf16.gmra.mrb[84].mxu0 %v6706_v13 }
 0x22d   :  { %v1818_v44 = vpop.f32.mrb[45].mxu1  ;;  %2480 = vmatprep.mubr.bf16.mxu0 %v6737_v34 }
 0x22e   :  { %v6050_v63 = vpop.f32.mrb[46].mxu1  ;;  %v6742_v44 = vld [vmem:[#allocation42_spill] sm:$0xff] }
 0x22f   :  { %v1821_v16 = vpop.f32.mrb[47].mxu1 }
 0x231   :  { %4022 = vmatmul.mubr.bf16.gmra.mrb[152].mxu1 %v5514_v27 }
 0x232   :  { %4025 = vmatprep.mubr.bf16.mxu1 %v6736_v57  ;;  %v6743_v57 = vld [vmem:[#allocation44_spill] sm:$0xff] }
 0x234   :  { %v6056_v0 = vpop.f32.mrb[48].mxu1  ;;  %2481 = vmatmul.mubr.bf16.gmra.mrb[88].mxu0 %v6709_v23 }
 0x235   :  { %v1826_v46 = vpop.f32.mrb[49].mxu1  ;;  %2488 = vmatprep.mubr.bf16.mxu0 %v6738_v19 }
 0x236   :  { %v6058_v7 = vpop.f32.mrb[50].mxu1 }
 0x237   :  { %v1829_v11 = vpop.f32.mrb[51].mxu1 }
 0x239   :  { %4026 = vmatmul.mubr.bf16.gmra.mrb[156].mxu1 %v4795_v62 }
 0x23a   :  { %4029 = vmatprep.mubr.bf16.mxu1 %v5611_v17 }
 0x23c   :  { %v6064_v27 = vpop.f32.mrb[52].mxu1  ;;  %2489 = vmatmul.mubr.bf16.gmra.mrb[92].mxu0 %v6712_v36 }
 0x23d   :  { %v1834_v13 = vpop.f32.mrb[53].mxu1  ;;  %2496 = vmatprep.mubr.bf16.mxu0 %v6739_v40 }
 0x23e   :  { %v6066_v25 = vpop.f32.mrb[54].mxu1 }
 0x23f   :  { %v1837_v24 = vpop.f32.mrb[55].mxu1 }
 0x240   :  { %v6744_v24 = vld [vmem:[#allocation45_spill] sm:$0xff] }
 0x241   :  { %4030 = vmatmul.mubr.bf16.gmra.mrb[160].mxu1 %v5642_v53 }
 0x242   :  { %4033 = vmatprep.mubr.bf16.mxu1 %v5677_v6 }
 0x244   :  { %v6072_v26 = vpop.f32.mrb[56].mxu1  ;;  %2497 = vmatmul.mubr.bf16.gmra.mrb[96].mxu0 %v6714_v39 }
 0x245   :  { %v1842_v23 = vpop.f32.mrb[57].mxu1  ;;  %2504 = vmatprep.mubr.bf16.mxu0 %v6740_v43 }
 0x246   :  { %v6074_v17 = vpop.f32.mrb[58].mxu1  ;;  %v6745_v23 = vld [vmem:[#allocation46_spill] sm:$0xff] }
 0x247   :  { %v1845_v21 = vpop.f32.mrb[59].mxu1 }
 0x249   :  { %4034 = vmatmul.mubr.bf16.gmra.mrb[164].mxu1 %v5709_v41 }
 0x24a   :  { %4037 = vmatprep.mubr.bf16.mxu1 %v5737_v55 }
 0x24c   :  { %v6080_v53 = vpop.f32.mrb[60].mxu1  ;;  %2505 = vmatmul.mubr.bf16.gmra.mrb[100].mxu0 %v6716_v49 }
 0x24d   :  { %v1850_v36 = vpop.f32.mrb[61].mxu1  ;;  %2512 = vmatprep.mubr.bf16.mxu0 %v5632_v51 }
 0x24e   :  { %v6082_v6 = vpop.f32.mrb[62].mxu1 }
 0x24f   :  { %v1853_v5 = vpop.f32.mrb[63].mxu1 }
 0x251   :  { %4038 = vmatmul.mubr.bf16.gmra.mrb[168].mxu1 %v5763_v18 }
 0x252   :  { %4041 = vmatprep.mubr.bf16.mxu1 %v5785_v35 }
 0x254   :  { %v6088_v41 = vpop.f32.mrb[64].mxu1  ;;  %2513 = vmatmul.mubr.bf16.gmra.mrb[104].mxu0 %v5696_v52 }
 0x255   :  { %v1858_v39 = vpop.f32.mrb[65].mxu1  ;;  %2520 = vmatprep.mubr.bf16.mxu0 %v5671_v54 }
 0x256   :  { %v6090_v55 = vpop.f32.mrb[66].mxu1 }
 0x257   :  { %v1861_v12 = vpop.f32.mrb[67].mxu1  ;;  %v2306_v49 = vpop.f32.mrb[0].mxu0 }
 0x258   :  { %v6099_v51 = vadd.f32 %v2306_v49, %v6741_v56  ;;  %v2308_v33 = vpop.f32.mrb[1].mxu0  ;;  %v6746_v12 = vld [vmem:[#allocation47_spill] sm:$0xff] }
 0x259   :  { %4042 = vmatmul.mubr.bf16.gmra.mrb[172].mxu1 %v5801_v58  ;;  %v2309_v10 = vpop.f32.mrb[2].mxu0 }
 0x25a   :  { %4045 = vmatprep.mubr.bf16.mxu1 %v5824_v30  ;;  %v6104_v58 = vadd.f32 %v2309_v10, %v6742_v44  ;;  %v2311_v52 = vpop.f32.mrb[3].mxu0 }
 0x25b   :  { %v6748_v52 = vld [vmem:[#allocation49_spill] sm:$0xff] }
 0x25c   :  { %v6096_v18 = vpop.f32.mrb[68].mxu1  ;;  %2521 = vmatmul.mubr.bf16.gmra.mrb[108].mxu0 %v5728_v45 }
 0x25d   :  { %v1866_v35 = vpop.f32.mrb[69].mxu1  ;;  %2528 = vmatprep.mubr.bf16.mxu0 %v5703_v3 }
 0x25e   :  { %v6101_v59 = vpop.f32.mrb[70].mxu1  ;;  %v6747_v35 = vld [vmem:[#allocation48_spill] sm:$0xff] }
 0x25f   :  { %v1869_v50 = vpop.f32.mrb[71].mxu1  ;;  %v2314_v30 = vpop.f32.mrb[4].mxu0 }
 0x260   :  { %v6113_v34 = vadd.f32 %v2314_v30, %v6743_v57  ;;  %v2316_v46 = vpop.f32.mrb[5].mxu0 }
 0x261   :  { %4046 = vmatmul.mubr.bf16.gmra.mrb[176].mxu1 %v5846_v14  ;;  %v2317_v19 = vpop.f32.mrb[6].mxu0 }
 0x262   :  { %4049 = vmatprep.mubr.bf16.mxu1 %v5864_v32  ;;  %v6118_v14 = vadd.f32 %v2317_v19, %v6744_v24  ;;  %v2319_v45 = vpop.f32.mrb[7].mxu0 }
 0x263   :  { %v6750_v45 = vld [vmem:[#allocation51_spill] sm:$0xff] }
 0x264   :  { %v6110_v54 = vpop.f32.mrb[72].mxu1  ;;  %2529 = vmatmul.mubr.bf16.gmra.mrb[112].mxu0 %v5756_v28 }
 0x265   :  { %v1874_v16 = vpop.f32.mrb[73].mxu1  ;;  %2536 = vmatprep.mubr.bf16.mxu0 %v5733_v22 }
 0x266   :  { %v6115_v11 = vpop.f32.mrb[74].mxu1  ;;  %v6749_v16 = vld [vmem:[#allocation50_spill] sm:$0xff] }
 0x267   :  { %v1877_v13 = vpop.f32.mrb[75].mxu1  ;;  %v2322_v32 = vpop.f32.mrb[8].mxu0 }
 0x268   :  { %v6127_v21 = vadd.f32 %v2322_v32, %v6745_v23  ;;  %v2324_v43 = vpop.f32.mrb[9].mxu0  ;;  %v6751_v23 = vld [vmem:[#allocation52_spill] sm:$0xff] }
 0x269   :  { %4050 = vmatmul.mubr.bf16.gmra.mrb[180].mxu1 %v5881_v47  ;;  %v2325_v5 = vpop.f32.mrb[10].mxu0 }
 0x26a   :  { %4053 = vmatprep.mubr.bf16.mxu1 %v5897_v1  ;;  %v6132_v47 = vadd.f32 %v2325_v5, %v6746_v12  ;;  %v2327_v28 = vpop.f32.mrb[11].mxu0 }
 0x26c   :  { %v6124_v3 = vpop.f32.mrb[76].mxu1  ;;  %2537 = vmatmul.mubr.bf16.gmra.mrb[116].mxu0 %v5781_v9 }
 0x26d   :  { %v1882_v40 = vpop.f32.mrb[77].mxu1  ;;  %2544 = vmatprep.mubr.bf16.mxu0 %v5901_v38 }
 0x26e   :  { %v6129_v36 = vpop.f32.mrb[78].mxu1 }
 0x26f   :  { %v1885_v39 = vpop.f32.mrb[79].mxu1  ;;  %v2330_v1 = vpop.f32.mrb[12].mxu0 }
 0x270   :  { %v6141_v56 = vadd.f32 %v2330_v1, %v6747_v35  ;;  %v2332_v33 = vpop.f32.mrb[13].mxu0  ;;  %v6752_v1 = vld [vmem:[#allocation53_spill] sm:$0xff] }
 0x271   :  { %4054 = vmatmul.mubr.bf16.gmra.mrb[184].mxu1 %v5918_v48  ;;  %v2333_v50 = vpop.f32.mrb[14].mxu0 }
 0x272   :  { %4057 = vmatprep.mubr.bf16.mxu1 %v5934_v2  ;;  %v6146_v48 = vadd.f32 %v2333_v50, %v6748_v52  ;;  %v2335_v9 = vpop.f32.mrb[15].mxu0 }
 0x274   :  { %v6138_v22 = vpop.f32.mrb[80].mxu1  ;;  %2545 = vmatmul.mubr.bf16.gmra.mrb[120].mxu0 %v6002_v37 }
 0x275   :  { %v1890_v49 = vpop.f32.mrb[81].mxu1  ;;  %2552 = vmatprep.mubr.bf16.mxu0 %v6723_v20 }
 0x276   :  { %v6143_v10 = vpop.f32.mrb[82].mxu1 }
 0x277   :  { %v1893_v44 = vpop.f32.mrb[83].mxu1  ;;  %v2338_v2 = vpop.f32.mrb[16].mxu0 }
 0x278   :  { %v6154_v57 = vadd.f32 %v2338_v2, %v6749_v16  ;;  %v2340_v46 = vpop.f32.mrb[17].mxu0  ;;  %v6754_v44 = vld [vmem:[#allocation54_spill] sm:$0xff] }
 0x279   :  { %4058 = vmatmul.mubr.bf16.gmra.mrb[188].mxu1 %v4795_v62  ;;  %v2341_v13 = vpop.f32.mrb[18].mxu0  ;;  %v6756_v46 = vld [vmem:[#allocation55_spill] sm:$0xff] }
 0x27a   :  { %v6159_v32 = vadd.f32 %v2341_v13, %v6750_v45  ;;  %v2343_v62 = vpop.f32.mrb[19].mxu0 }
 0x27c   :  { %v6151_v38 = vpop.f32.mrb[84].mxu1  ;;  %2553 = vmatmul.mubr.bf16.gmra.mrb[124].mxu0 %v6725_v60 }
 0x27d   :  { %v1898_v30 = vpop.f32.mrb[85].mxu1 }
 0x27e   :  { %v6156_v19 = vpop.f32.mrb[86].mxu1 }
 0x27f   :  { %v1901_v24 = vpop.f32.mrb[87].mxu1  ;;  %v2346_v20 = vpop.f32.mrb[20].mxu0 }
 0x280   :  { %v6165_v43 = vadd.f32 %v2346_v20, %v6751_v23  ;;  %v2348_v5 = vpop.f32.mrb[21].mxu0 }
 0x281   :  { %v2349_v12 = vpop.f32.mrb[22].mxu0 }
 0x282   :  { %v6170_v49 = vadd.f32 %v2349_v12, %v6752_v1  ;;  %v2351_v35 = vpop.f32.mrb[23].mxu0 }
 0x283   :  { %v6760_v35 = vld [vmem:[#allocation57_spill] sm:$0xff] }
 0x284   :  { %v6162_v37 = vpop.f32.mrb[88].mxu1 }
 0x285   :  { %v1906_v40 = vpop.f32.mrb[89].mxu1 }
 0x286   :  { %v6167_v39 = vpop.f32.mrb[90].mxu1  ;;  %v6758_v40 = vld [vmem:[#allocation56_spill] sm:$0xff] }
 0x287   :  { %v1909_v28 = vpop.f32.mrb[91].mxu1  ;;  %v2354_v50 = vpop.f32.mrb[24].mxu0 }
 0x288   :  { %v6175_v52 = vadd.f32 %v2354_v50, %v6754_v44  ;;  %v2356_v9 = vpop.f32.mrb[25].mxu0 }
 0x289   :  { %v2357_v30 = vpop.f32.mrb[26].mxu0 }
 0x28a   :  { %v6180_v13 = vadd.f32 %v2357_v30, %v6756_v46  ;;  %v2359_v24 = vpop.f32.mrb[27].mxu0 }
 0x28c   :  { %v6172_v33 = vpop.f32.mrb[92].mxu1 }
 0x28d   :  { %6753 = vst [vmem:[#allocation29_spill] sm:$0xff] %v6172_v33  ;;  %v1914_v60 = vpop.f32.mrb[93].mxu1  ;;  %v4490_v33 = vmov 0.0  }
 0x28e   :  { %v6177_v2 = vpop.f32.mrb[94].mxu1  ;;  %3174 = vst [vmem:[%s6505_s5] sm:$0xff] %v4490_v33 }
 0x28f   :  { %6755 = vst [vmem:[#allocation3_spill] sm:$0xff] %v6177_v2  ;;  %v1917_v16 = vpop.f32.mrb[95].mxu1  ;;  %v2362_v62 = vpop.f32.mrb[28].mxu0 }
 0x290   :  { %v6185_v23 = vadd.f32 %v2362_v62, %v6758_v40  ;;  %v2364_v5 = vpop.f32.mrb[29].mxu0 }
 0x291   :  { %v2365_v28 = vpop.f32.mrb[30].mxu0 }
 0x292   :  { %v6190_v50 = vadd.f32 %v2365_v28, %v6760_v35  ;;  %v2367_v60 = vpop.f32.mrb[31].mxu0 }
 0x294   :  { %v6182_v45 = vpop.f32.mrb[96].mxu1 }
 0x295   :  { %6757 = vst [vmem:[#allocation7_spill] sm:$0xff] %v6182_v45  ;;  %v1922_v20 = vpop.f32.mrb[97].mxu1 }
 0x296   :  { %v6187_v12 = vpop.f32.mrb[98].mxu1 }
 0x297   :  { %6759 = vst [vmem:[#allocation31_spill] sm:$0xff] %v6187_v12  ;;  %v1925_v1 = vpop.f32.mrb[99].mxu1  ;;  %v2370_v9 = vpop.f32.mrb[32].mxu0 }
 0x298   :  { %v6195_v16 = vadd.f32 %v2370_v9, %v6024_v31  ;;  %v2372_v46 = vpop.f32.mrb[33].mxu0 }
 0x299   :  { %v2373_v62 = vpop.f32.mrb[34].mxu0 }
 0x29a   :  { %v6200_v40 = vadd.f32 %v2373_v62, %v6026_v15  ;;  %v2375_v5 = vpop.f32.mrb[35].mxu0 }
 0x29c   :  { %v6192_v44 = vpop.f32.mrb[100].mxu1 }
 0x29d   :  { %6761 = vst [vmem:[#allocation5_spill] sm:$0xff] %v6192_v44  ;;  %v1930_v30 = vpop.f32.mrb[101].mxu1 }
 0x29e   :  { %v6197_v24 = vpop.f32.mrb[102].mxu1 }
 0x29f   :  { %6762 = vst [vmem:[#allocation10_spill] sm:$0xff] %v6197_v24  ;;  %v1933_v20 = vpop.f32.mrb[103].mxu1  ;;  %v2378_v28 = vpop.f32.mrb[36].mxu0 }
 0x2a0   :  { %v6205_v60 = vadd.f32 %v2378_v28, %v6032_v29  ;;  %v2380_v30 = vpop.f32.mrb[37].mxu0 }
 0x2a1   :  { %v2381_v31 = vpop.f32.mrb[38].mxu0 }
 0x2a2   :  { %v6210_v46 = vadd.f32 %v2381_v31, %v6034_v61  ;;  %v2383_v20 = vpop.f32.mrb[39].mxu0 }
 0x2a4   :  { %v6202_v1 = vpop.f32.mrb[104].mxu1 }
 0x2a5   :  { %6763 = vst [vmem:[#allocation33_spill] sm:$0xff] %v6202_v1  ;;  %v1938_v35 = vpop.f32.mrb[105].mxu1 }
 0x2a6   :  { %v6207_v44 = vpop.f32.mrb[106].mxu1 }
 0x2a7   :  { %6764 = vst [vmem:[#allocation8_spill] sm:$0xff] %v6207_v44  ;;  %v1941_v9 = vpop.f32.mrb[107].mxu1  ;;  %v2386_v15 = vpop.f32.mrb[40].mxu0 }
 0x2a8   :  { %v6215_v5 = vadd.f32 %v2386_v15, %v6040_v4  ;;  %v2388_v35 = vpop.f32.mrb[41].mxu0 }
 0x2a9   :  { %v2389_v29 = vpop.f32.mrb[42].mxu0 }
 0x2aa   :  { %v6220_v30 = vadd.f32 %v2389_v29, %v6042_v42  ;;  %v2391_v9 = vpop.f32.mrb[43].mxu0 }
 0x2ac   :  { %v6212_v24 = vpop.f32.mrb[108].mxu1 }
 0x2ad   :  { %6765 = vst [vmem:[#allocation13_spill] sm:$0xff] %v6212_v24  ;;  %v1946_v62 = vpop.f32.mrb[109].mxu1 }
 0x2ae   :  { %v6217_v1 = vpop.f32.mrb[110].mxu1 }
 0x2af   :  { %6766 = vst [vmem:[#allocation36_spill] sm:$0xff] %v6217_v1  ;;  %v1949_v28 = vpop.f32.mrb[111].mxu1  ;;  %v2394_v61 = vpop.f32.mrb[44].mxu0 }
 0x2b0   :  { %v6225_v20 = vadd.f32 %v2394_v61, %v6048_v8  ;;  %v2396_v62 = vpop.f32.mrb[45].mxu0 }
 0x2b1   :  { %v2397_v4 = vpop.f32.mrb[46].mxu0 }
 0x2b2   :  { %v6230_v35 = vadd.f32 %v2397_v4, %v6050_v63  ;;  %v2399_v28 = vpop.f32.mrb[47].mxu0 }
 0x2b4   :  { %v6222_v44 = vpop.f32.mrb[112].mxu1 }
 0x2b5   :  { %6767 = vst [vmem:[#allocation11_spill] sm:$0xff] %v6222_v44  ;;  %v1954_v31 = vpop.f32.mrb[113].mxu1 }
 0x2b6   :  { %v6227_v24 = vpop.f32.mrb[114].mxu1 }
 0x2b7   :  { %6768 = vst [vmem:[#allocation16_spill] sm:$0xff] %v6227_v24  ;;  %v1957_v15 = vpop.f32.mrb[115].mxu1  ;;  %v2402_v42 = vpop.f32.mrb[48].mxu0 }
 0x2b8   :  { %v6235_v9 = vadd.f32 %v2402_v42, %v6056_v0  ;;  %v2404_v31 = vpop.f32.mrb[49].mxu0 }
 0x2b9   :  { %v2405_v8 = vpop.f32.mrb[50].mxu0 }
 0x2ba   :  { %v6240_v62 = vadd.f32 %v2405_v8, %v6058_v7  ;;  %v2407_v15 = vpop.f32.mrb[51].mxu0 }
 0x2bc   :  { %v6232_v1 = vpop.f32.mrb[116].mxu1 }
 0x2bd   :  { %6769 = vst [vmem:[#allocation39_spill] sm:$0xff] %v6232_v1  ;;  %v1962_v29 = vpop.f32.mrb[117].mxu1 }
 0x2be   :  { %v6237_v44 = vpop.f32.mrb[118].mxu1 }
 0x2bf   :  { %6770 = vst [vmem:[#allocation14_spill] sm:$0xff] %v6237_v44  ;;  %v1965_v61 = vpop.f32.mrb[119].mxu1  ;;  %v2410_v63 = vpop.f32.mrb[52].mxu0 }
 0x2c0   :  { %v6245_v28 = vadd.f32 %v2410_v63, %v6064_v27  ;;  %v2412_v29 = vpop.f32.mrb[53].mxu0 }
 0x2c1   :  { %v2413_v0 = vpop.f32.mrb[54].mxu0 }
 0x2c2   :  { %v6250_v31 = vadd.f32 %v2413_v0, %v6066_v25  ;;  %v2415_v61 = vpop.f32.mrb[55].mxu0 }
 0x2c4   :  { %v6242_v24 = vpop.f32.mrb[120].mxu1 }
 0x2c5   :  { %6771 = vst [vmem:[#allocation40_spill] sm:$0xff] %v6242_v24  ;;  %v1970_v4 = vpop.f32.mrb[121].mxu1 }
 0x2c6   :  { %v6247_v1 = vpop.f32.mrb[122].mxu1 }
 0x2c7   :  { %6772 = vst [vmem:[#allocation17_spill] sm:$0xff] %v6247_v1  ;;  %v1973_v42 = vpop.f32.mrb[123].mxu1  ;;  %v2418_v7 = vpop.f32.mrb[56].mxu0 }
 0x2c8   :  { %v6255_v15 = vadd.f32 %v2418_v7, %v6072_v26  ;;  %v2420_v4 = vpop.f32.mrb[57].mxu0 }
 0x2c9   :  { %v2421_v27 = vpop.f32.mrb[58].mxu0 }
 0x2ca   :  { %v6260_v29 = vadd.f32 %v2421_v27, %v6074_v17  ;;  %v2423_v42 = vpop.f32.mrb[59].mxu0 }
 0x2cc   :  { %v6252_v44 = vpop.f32.mrb[124].mxu1 }
 0x2cd   :  { %6773 = vst [vmem:[#allocation43_spill] sm:$0xff] %v6252_v44  ;;  %v1978_v8 = vpop.f32.mrb[125].mxu1 }
 0x2ce   :  { %v6257_v24 = vpop.f32.mrb[126].mxu1 }
 0x2cf   :  { %6774 = vst [vmem:[#allocation19_spill] sm:$0xff] %v6257_v24  ;;  %v1981_v63 = vpop.f32.mrb[127].mxu1  ;;  %v2426_v25 = vpop.f32.mrb[60].mxu0 }
 0x2d0   :  { %v6264_v44 = vadd.f32 %v2426_v25, %v6080_v53  ;;  %v2428_v8 = vpop.f32.mrb[61].mxu0 }
 0x2d1   :  { %v2429_v4 = vpop.f32.mrb[62].mxu0 }
 0x2d2   :  { %v6269_v17 = vadd.f32 %v2429_v4, %v6082_v6  ;;  %v2431_v27 = vpop.f32.mrb[63].mxu0 }
 0x2d4   :  { %v3999_v1 = vpop.f32.mrb[128].mxu1 }
 0x2d5   :  { %v2604_v0 = vadd.f32 %v6113_v34, %v3999_v1  ;;  %v2595_v61 = vpop.f32.mrb[129].mxu1 }
 0x2d6   :  { %v2596_v26 = vadd.f32 %v6099_v51, %v2595_v61  ;;  %v4000_v7 = vpop.f32.mrb[130].mxu1 }
 0x2d7   :  { %v2607_v24 = vadd.f32 %v6118_v14, %v4000_v7  ;;  %v2598_v63 = vpop.f32.mrb[131].mxu1  ;;  %v3250_v51 = vmul.f32 %v2604_v0, %v2604_v0  ;;  %v2434_v61 = vpop.f32.mrb[64].mxu0 }
 0x2d8   :  { %v2599_v42 = vadd.f32 %v6104_v58, %v2598_v63  ;;  %v3248_v34 = vmul.f32 %v2596_v26, %v2596_v26  ;;  %v2436_v4 = vpop.f32.mrb[65].mxu0 }
 0x2d9   :  { %v3727_v12 = vpack.c.bf16 %v2607_v24, %v2604_v0  ;;  %v3251_v8 = vmul.f32 %v2607_v24, %v2607_v24  ;;  %v2437_v2 = vpop.f32.mrb[66].mxu0 }
 0x2da   :  { %v3722_v1 = vpack.c.bf16 %v2599_v42, %v2596_v26  ;;  %v3176_v45 = vadd.f32 %v2599_v42, %v2596_v26  ;;  %v3249_v53 = vmul.f32 %v2599_v42, %v2599_v42  ;;  %v6280_v26 = vadd.f32 %v2434_v61, %v6088_v41 }
 0x2db   :  { %3910 = vst [vmem:[%s6504_s4 + $0x8] sm:$0xff] %v3727_v12  }
 0x2dc   :  { %3723 = vst [vmem:[%s6504_s4] sm:$0xff] %v3722_v1   ;;  %v3177_v14 = vadd.f32 %v3176_v45, %v2604_v0  ;;  %v3312_v6 = vadd.f32 %v3249_v53, %v3248_v34  ;;  %v4003_v25 = vpop.f32.mrb[132].mxu1  ;;  %v6285_v0 = vadd.f32 %v2437_v2, %v6090_v55  ;;  %v2439_v34 = vpop.f32.mrb[67].mxu0 }
 0x2dd   :  { %v2620_v58 = vadd.f32 %v6141_v56, %v4003_v25  ;;  %v2611_v7 = vpop.f32.mrb[133].mxu1 }
 0x2de   :  { %v3313_v63 = vadd.f32 %v3312_v6, %v3250_v51  ;;  %v2612_v12 = vadd.f32 %v6127_v21, %v2611_v7  ;;  %v3178_v27 = vadd.f32 %v3177_v14, %v2607_v24  ;;  %v4004_v42 = vpop.f32.mrb[134].mxu1 }
 0x2df   :  { %v2623_v1 = vadd.f32 %v6146_v48, %v4004_v42  ;;  %v2614_v45 = vpop.f32.mrb[135].mxu1  ;;  %v2442_v14 = vpop.f32.mrb[68].mxu0  ;;  %v3254_v6 = vmul.f32 %v2620_v58, %v2620_v58 }
 0x2e0   :  { %v3179_v53 = vadd.f32 %v3178_v27, %v2612_v12  ;;  %v3252_v56 = vmul.f32 %v2612_v12, %v2612_v12  ;;  %v3314_v25 = vadd.f32 %v3313_v63, %v3251_v8  ;;  %v2615_v21 = vadd.f32 %v6132_v47, %v2614_v45  ;;  %v2444_v4 = vpop.f32.mrb[69].mxu0 }
 0x2e1   :  { %v3737_v41 = vpack.c.bf16 %v2623_v1, %v2620_v58  ;;  %v6299_v7 = vadd.f32 %v2442_v14, %v6096_v18  ;;  %v2445_v27 = vpop.f32.mrb[70].mxu0  ;;  %v3255_v42 = vmul.f32 %v2623_v1, %v2623_v1 }
 0x2e2   :  { %v3315_v24 = vadd.f32 %v3314_v25, %v3252_v56  ;;  %v3732_v48 = vpack.c.bf16 %v2615_v21, %v2612_v12  ;;  %v3180_v55 = vadd.f32 %v3179_v53, %v2615_v21  ;;  %v3253_v2 = vmul.f32 %v2615_v21, %v2615_v21  ;;  %v2447_v25 = vpop.f32.mrb[71].mxu0 }
 0x2e3   :  { %3912 = vst [vmem:[%s6504_s4 + $0x18] sm:$0xff] %v3737_v41  }
 0x2e4   :  { %v4007_v51 = vpop.f32.mrb[136].mxu1  ;;  %3911 = vst [vmem:[%s6504_s4 + $0x10] sm:$0xff] %v3732_v48   ;;  %v3181_v61 = vadd.f32 %v3180_v55, %v2620_v58  ;;  %v3316_v33 = vadd.f32 %v3315_v24, %v3253_v2  ;;  %v6304_v58 = vadd.f32 %v2445_v27, %v6101_v59 }
 0x2e5   :  { %v2636_v8 = vadd.f32 %v6165_v43, %v4007_v51  ;;  %v2627_v47 = vpop.f32.mrb[137].mxu1 }
 0x2e6   :  { %v2628_v63 = vadd.f32 %v6154_v57, %v2627_v47  ;;  %v4008_v12 = vpop.f32.mrb[138].mxu1  ;;  %v3317_v45 = vadd.f32 %v3316_v33, %v3254_v6  ;;  %v3182_v34 = vadd.f32 %v3181_v61, %v2623_v1 }
 0x2e7   :  { %v2639_v53 = vadd.f32 %v6170_v49, %v4008_v12  ;;  %v2630_v56 = vpop.f32.mrb[139].mxu1  ;;  %v2450_v49 = vpop.f32.mrb[72].mxu0  ;;  %v3258_v2 = vmul.f32 %v2636_v8, %v2636_v8 }
 0x2e8   :  { %v3256_v43 = vmul.f32 %v2628_v63, %v2628_v63  ;;  %v2631_v41 = vadd.f32 %v6159_v32, %v2630_v56  ;;  %v3183_v18 = vadd.f32 %v3182_v34, %v2628_v63  ;;  %v3318_v21 = vadd.f32 %v3317_v45, %v3255_v42  ;;  %v2452_v33 = vpop.f32.mrb[73].mxu0 }
 0x2e9   :  { %v3747_v24 = vpack.c.bf16 %v2639_v53, %v2636_v8  ;;  %v6315_v61 = vadd.f32 %v2450_v49, %v6110_v54  ;;  %v3259_v12 = vmul.f32 %v2639_v53, %v2639_v53 }
 0x2ea   :  { %v3742_v48 = vpack.c.bf16 %v2631_v41, %v2628_v63  ;;  %v3257_v57 = vmul.f32 %v2631_v41, %v2631_v41  ;;  %v3319_v55 = vadd.f32 %v3318_v21, %v3256_v43  ;;  %v3184_v1 = vadd.f32 %v3183_v18, %v2631_v41  ;;  %v2453_v63 = vpop.f32.mrb[74].mxu0 }
 0x2eb   :  { %3914 = vst [vmem:[%s6504_s4 + $0x28] sm:$0xff] %v3747_v24   ;;  %v2455_v56 = vpop.f32.mrb[75].mxu0 }
 0x2ec   :  { %3913 = vst [vmem:[%s6504_s4 + $0x20] sm:$0xff] %v3742_v48   ;;  %v4011_v59 = vpop.f32.mrb[140].mxu1  ;;  %v3185_v51 = vadd.f32 %v3184_v1, %v2636_v8  ;;  %v3320_v32 = vadd.f32 %v3319_v55, %v3257_v57  ;;  %v6320_v8 = vadd.f32 %v2453_v63, %v6115_v11 }
 0x2ed   :  { %v2652_v14 = vadd.f32 %v6185_v23, %v4011_v59  ;;  %v2643_v6 = vpop.f32.mrb[141].mxu1 }
 0x2ee   :  { %v2644_v47 = vadd.f32 %v6175_v52, %v2643_v6  ;;  %v4012_v4 = vpop.f32.mrb[142].mxu1  ;;  %v3321_v27 = vadd.f32 %v3320_v32, %v3258_v2  ;;  %v3186_v42 = vadd.f32 %v3185_v51, %v2639_v53 }
 0x2ef   :  { %v2655_v45 = vadd.f32 %v6190_v50, %v4012_v4  ;;  %v2646_v34 = vpop.f32.mrb[143].mxu1  ;;  %v2458_v50 = vpop.f32.mrb[76].mxu0  ;;  %v3262_v24 = vmul.f32 %v2652_v14, %v2652_v14 }
 0x2f0   :  { %v3260_v23 = vmul.f32 %v2644_v47, %v2644_v47  ;;  %v2647_v25 = vadd.f32 %v6180_v13, %v2646_v34  ;;  %v3187_v54 = vadd.f32 %v3186_v42, %v2644_v47  ;;  %v3322_v43 = vadd.f32 %v3321_v27, %v3259_v12  ;;  %v2460_v59 = vpop.f32.mrb[77].mxu0 }
 0x2f1   :  { %v3757_v41 = vpack.c.bf16 %v2655_v45, %v2652_v14  ;;  %v6331_v1 = vadd.f32 %v2458_v50, %v6124_v3  ;;  %v2461_v51 = vpop.f32.mrb[78].mxu0  ;;  %v3263_v32 = vmul.f32 %v2655_v45, %v2655_v45 }
 0x2f2   :  { %v3752_v18 = vpack.c.bf16 %v2647_v25, %v2644_v47  ;;  %v3261_v52 = vmul.f32 %v2647_v25, %v2647_v25  ;;  %v3323_v21 = vadd.f32 %v3322_v43, %v3260_v23  ;;  %v3188_v53 = vadd.f32 %v3187_v54, %v2647_v25  ;;  %v2463_v63 = vpop.f32.mrb[79].mxu0 }
 0x2f3   :  { %3916 = vst [vmem:[%s6504_s4 + $0x38] sm:$0xff] %v3757_v41  }
 0x2f4   :  { %3915 = vst [vmem:[%s6504_s4 + $0x30] sm:$0xff] %v3752_v18   ;;  %v4015_v11 = vpop.f32.mrb[144].mxu1  ;;  %v3189_v48 = vadd.f32 %v3188_v53, %v2652_v14  ;;  %v3324_v13 = vadd.f32 %v3323_v21, %v3261_v52  ;;  %v6336_v14 = vadd.f32 %v2461_v51, %v6129_v36 }
 0x2f5   :  { %v2668_v57 = vadd.f32 %v6205_v60, %v4015_v11  ;;  %v2659_v55 = vpop.f32.mrb[145].mxu1 }
 0x2f6   :  { %v2660_v49 = vadd.f32 %v6195_v16, %v2659_v55  ;;  %v4016_v2 = vpop.f32.mrb[146].mxu1  ;;  %v3325_v6 = vadd.f32 %v3324_v13, %v3262_v24  ;;  %v3190_v33 = vadd.f32 %v3189_v48, %v2655_v45 }
 0x2f7   :  { %v2671_v47 = vadd.f32 %v6210_v46, %v4016_v2  ;;  %v2662_v4 = vpop.f32.mrb[147].mxu1  ;;  %v2466_v46 = vpop.f32.mrb[80].mxu0  ;;  %v3266_v23 = vmul.f32 %v2668_v57, %v2668_v57 }
 0x2f8   :  { %v3264_v60 = vmul.f32 %v2660_v49, %v2660_v49  ;;  %v2663_v12 = vadd.f32 %v6200_v40, %v2662_v4  ;;  %v3191_v3 = vadd.f32 %v3190_v33, %v2660_v49  ;;  %v3326_v27 = vadd.f32 %v3325_v6, %v3263_v32  ;;  %v2468_v18 = vpop.f32.mrb[81].mxu0 }
 0x2f9   :  { %v3767_v42 = vpack.c.bf16 %v2671_v47, %v2668_v57  ;;  %v6347_v41 = vadd.f32 %v2466_v46, %v6138_v22  ;;  %v2469_v53 = vpop.f32.mrb[82].mxu0  ;;  %v3267_v11 = vmul.f32 %v2671_v47, %v2671_v47 }
 0x2fa   :  { %v3762_v34 = vpack.c.bf16 %v2663_v12, %v2660_v49  ;;  %v3265_v16 = vmul.f32 %v2663_v12, %v2663_v12  ;;  %v3327_v56 = vadd.f32 %v3326_v27, %v3264_v60  ;;  %v3192_v45 = vadd.f32 %v3191_v3, %v2663_v12  ;;  %v2471_v55 = vpop.f32.mrb[83].mxu0 }
 0x2fb   :  { %3918 = vst [vmem:[%s6504_s4 + $0x48] sm:$0xff] %v3767_v42  }
 0x2fc   :  { %3917 = vst [vmem:[%s6504_s4 + $0x40] sm:$0xff] %v3762_v34   ;;  %v4019_v36 = vpop.f32.mrb[148].mxu1  ;;  %v3193_v25 = vadd.f32 %v3192_v45, %v2668_v57  ;;  %v3328_v40 = vadd.f32 %v3327_v56, %v3265_v16  ;;  %v6352_v57 = vadd.f32 %v2469_v53, %v6143_v10 }
 0x2fd   :  { %v2684_v54 = vadd.f32 %v6225_v20, %v4019_v36  ;;  %v2675_v43 = vpop.f32.mrb[149].mxu1 }
 0x2fe   :  { %v2676_v52 = vadd.f32 %v6215_v5, %v2675_v43  ;;  %v4020_v21 = vpop.f32.mrb[150].mxu1  ;;  %v3329_v50 = vadd.f32 %v3328_v40, %v3266_v23  ;;  %v3194_v24 = vadd.f32 %v3193_v25, %v2671_v47 }
 0x2ff   :  { %v2687_v48 = vadd.f32 %v6230_v35, %v4020_v21  ;;  %v2678_v13 = vpop.f32.mrb[151].mxu1  ;;  %v2474_v35 = vpop.f32.mrb[84].mxu0  ;;  %v3270_v33 = vmul.f32 %v2684_v54, %v2684_v54 }
 0x300   :  { %v3268_v20 = vmul.f32 %v2676_v52, %v2676_v52  ;;  %v2679_v59 = vadd.f32 %v6220_v30, %v2678_v13  ;;  %v3195_v22 = vadd.f32 %v3194_v24, %v2676_v52  ;;  %v3330_v49 = vadd.f32 %v3329_v50, %v3267_v11  ;;  %v2476_v12 = vpop.f32.mrb[85].mxu0 }
 0x301   :  { %v3777_v2 = vpack.c.bf16 %v2687_v48, %v2684_v54  ;;  %v6363_v60 = vadd.f32 %v2474_v35, %v6151_v38  ;;  %v2477_v42 = vpop.f32.mrb[86].mxu0  ;;  %v3271_v34 = vmul.f32 %v2687_v48, %v2687_v48 }
 0x302   :  { %v3772_v51 = vpack.c.bf16 %v2679_v59, %v2676_v52  ;;  %v3269_v5 = vmul.f32 %v2679_v59, %v2679_v59  ;;  %v3331_v32 = vadd.f32 %v3330_v49, %v3268_v20  ;;  %v3196_v6 = vadd.f32 %v3195_v22, %v2679_v59  ;;  %v2479_v23 = vpop.f32.mrb[87].mxu0 }
 0x303   :  { %3920 = vst [vmem:[%s6504_s4 + $0x58] sm:$0xff] %v3777_v2   ;;  %v6368_v46 = vadd.f32 %v2477_v42, %v6156_v19 }
 0x304   :  { %3919 = vst [vmem:[%s6504_s4 + $0x50] sm:$0xff] %v3772_v51   ;;  %v4023_v10 = vpop.f32.mrb[152].mxu1  ;;  %v3197_v47 = vadd.f32 %v3196_v6, %v2684_v54  ;;  %v3332_v30 = vadd.f32 %v3331_v32, %v3269_v5 }
 0x305   :  { %v2700_v4 = vadd.f32 %v6245_v28, %v4023_v10  ;;  %v2691_v63 = vpop.f32.mrb[153].mxu1 }
 0x306   :  { %v2692_v3 = vadd.f32 %v6235_v9, %v2691_v63  ;;  %v4024_v27 = vpop.f32.mrb[154].mxu1  ;;  %v3333_v16 = vadd.f32 %v3332_v30, %v3270_v33  ;;  %v3198_v56 = vadd.f32 %v3197_v47, %v2687_v48 }
 0x307   :  { %v2703_v45 = vadd.f32 %v6250_v31, %v4024_v27  ;;  %v2694_v36 = vpop.f32.mrb[155].mxu1  ;;  %v2482_v31 = vpop.f32.mrb[88].mxu0  ;;  %v3274_v21 = vmul.f32 %v2700_v4, %v2700_v4  ;;  %v6775_v27 = vld [vmem:[#allocation29_spill] sm:$0xff] }
 0x308   :  { %v3272_v28 = vmul.f32 %v2692_v3, %v2692_v3  ;;  %v2695_v25 = vadd.f32 %v6240_v62, %v2694_v36  ;;  %v3199_v38 = vadd.f32 %v3198_v56, %v2692_v3  ;;  %v3334_v40 = vadd.f32 %v3333_v16, %v3271_v34  ;;  %v2484_v48 = vpop.f32.mrb[89].mxu0 }
 0x309   :  { %v3787_v54 = vpack.c.bf16 %v2703_v45, %v2700_v4  ;;  %v6379_v24 = vadd.f32 %v2482_v31, %v6162_v37  ;;  %v2485_v20 = vpop.f32.mrb[90].mxu0  ;;  %v3275_v59 = vmul.f32 %v2703_v45, %v2703_v45 }
 0x30a   :  { %v3782_v43 = vpack.c.bf16 %v2695_v25, %v2692_v3  ;;  %v3273_v9 = vmul.f32 %v2695_v25, %v2695_v25  ;;  %v3335_v18 = vadd.f32 %v3334_v40, %v3272_v28  ;;  %v3200_v52 = vadd.f32 %v3199_v38, %v2695_v25  ;;  %v2487_v32 = vpop.f32.mrb[91].mxu0  ;;  %v6776_v40 = vld [vmem:[#allocation3_spill] sm:$0xff] }
 0x30b   :  { %3922 = vst [vmem:[%s6504_s4 + $0x68] sm:$0xff] %v3787_v54   ;;  %v6384_v5 = vadd.f32 %v2485_v20, %v6167_v39 }
 0x30c   :  { %3921 = vst [vmem:[%s6504_s4 + $0x60] sm:$0xff] %v3782_v43   ;;  %v4027_v19 = vpop.f32.mrb[156].mxu1  ;;  %v3201_v53 = vadd.f32 %v3200_v52, %v2700_v4  ;;  %v3336_v62 = vadd.f32 %v3335_v18, %v3273_v9 }
 0x30d   :  { %v2716_v11 = vadd.f32 %v6264_v44, %v4027_v19  ;;  %v2707_v50 = vpop.f32.mrb[157].mxu1 }
 0x30e   :  { %v2708_v13 = vadd.f32 %v6255_v15, %v2707_v50  ;;  %v4028_v55 = vpop.f32.mrb[158].mxu1  ;;  %v3337_v22 = vadd.f32 %v3336_v62, %v3274_v21  ;;  %v3202_v49 = vadd.f32 %v3201_v53, %v2703_v45 }
 0x30f   :  { %v2719_v2 = vadd.f32 %v6269_v17, %v4028_v55  ;;  %v2710_v51 = vpop.f32.mrb[159].mxu1  ;;  %v2490_v17 = vpop.f32.mrb[92].mxu0  ;;  %v3278_v4 = vmul.f32 %v2716_v11, %v2716_v11  ;;  %v6777_v55 = vld [vmem:[#allocation7_spill] sm:$0xff] }
 0x310   :  { %v3276_v44 = vmul.f32 %v2708_v13, %v2708_v13  ;;  %v2711_v6 = vadd.f32 %v6260_v29, %v2710_v51  ;;  %v3203_v37 = vadd.f32 %v3202_v49, %v2708_v13  ;;  %v3338_v10 = vadd.f32 %v3337_v22, %v3275_v59  ;;  %v2492_v34 = vpop.f32.mrb[93].mxu0 }
 0x311   :  { %v3797_v35 = vpack.c.bf16 %v2719_v2, %v2716_v11  ;;  %v6395_v42 = vadd.f32 %v2490_v17, %v6775_v27  ;;  %v2493_v45 = vpop.f32.mrb[94].mxu0  ;;  %v3279_v36 = vmul.f32 %v2719_v2, %v2719_v2 }
 0x312   :  { %v3792_v33 = vpack.c.bf16 %v2711_v6, %v2708_v13  ;;  %v3277_v15 = vmul.f32 %v2711_v6, %v2711_v6  ;;  %v3339_v47 = vadd.f32 %v3338_v10, %v3276_v44  ;;  %v3204_v30 = vadd.f32 %v3203_v37, %v2711_v6  ;;  %v2495_v43 = vpop.f32.mrb[95].mxu0  ;;  %v6778_v10 = vld [vmem:[#allocation31_spill] sm:$0xff] }
 0x313   :  { %3924 = vst [vmem:[%s6504_s4 + $0x78] sm:$0xff] %v3797_v35   ;;  %v6400_v54 = vadd.f32 %v2493_v45, %v6776_v40 }
 0x314   :  { %3923 = vst [vmem:[%s6504_s4 + $0x70] sm:$0xff] %v3792_v33   ;;  %v4031_v39 = vpop.f32.mrb[160].mxu1  ;;  %v3205_v63 = vadd.f32 %v3204_v30, %v2716_v11  ;;  %v3340_v29 = vadd.f32 %v3339_v47, %v3277_v15 }
 0x315   :  { %v2732_v12 = vadd.f32 %v6299_v7, %v4031_v39  ;;  %v2723_v3 = vpop.f32.mrb[161].mxu1 }
 0x316   :  { %v2724_v16 = vadd.f32 %v6280_v26, %v2723_v3  ;;  %v4032_v56 = vpop.f32.mrb[162].mxu1  ;;  %v3341_v23 = vadd.f32 %v3340_v29, %v3278_v4  ;;  %v3206_v28 = vadd.f32 %v3205_v63, %v2719_v2 }
 0x317   :  { %v2735_v25 = vadd.f32 %v6304_v58, %v4032_v56  ;;  %v2726_v38 = vpop.f32.mrb[163].mxu1  ;;  %v2498_v62 = vpop.f32.mrb[96].mxu0  ;;  %v3282_v11 = vmul.f32 %v2732_v12, %v2732_v12 }
 0x318   :  { %v3280_v7 = vmul.f32 %v2724_v16, %v2724_v16  ;;  %v2727_v9 = vadd.f32 %v6285_v0, %v2726_v38  ;;  %v3207_v18 = vadd.f32 %v3206_v28, %v2724_v16  ;;  %v3342_v52 = vadd.f32 %v3341_v23, %v3279_v36  ;;  %v2500_v59 = vpop.f32.mrb[97].mxu0 }
 0x319   :  { %v3807_v19 = vpack.c.bf16 %v2735_v25, %v2732_v12  ;;  %v6411_v20 = vadd.f32 %v2498_v62, %v6777_v55  ;;  %v2501_v2 = vpop.f32.mrb[98].mxu0  ;;  %v3283_v51 = vmul.f32 %v2735_v25, %v2735_v25  ;;  %v6781_v55 = vld [vmem:[#allocation33_spill] sm:$0xff] }
 0x31a   :  { %v3802_v31 = vpack.c.bf16 %v2727_v9, %v2724_v16  ;;  %v3281_v26 = vmul.f32 %v2727_v9, %v2727_v9  ;;  %v3343_v21 = vadd.f32 %v3342_v52, %v3280_v7  ;;  %v3208_v53 = vadd.f32 %v3207_v18, %v2727_v9  ;;  %v2503_v33 = vpop.f32.mrb[99].mxu0  ;;  %v6779_v16 = vld [vmem:[#allocation5_spill] sm:$0xff]  ;;  %v6780_v9 = vld [vmem:[#allocation10_spill] sm:$0xff] }
 0x31b   :  { %3926 = vst [vmem:[%s6504_s4 + $0x88] sm:$0xff] %v3807_v19   ;;  %v6416_v35 = vadd.f32 %v2501_v2, %v6778_v10  ;;  %v6782_v33 = vld [vmem:[#allocation8_spill] sm:$0xff] }
 0x31c   :  { %3925 = vst [vmem:[%s6504_s4 + $0x80] sm:$0xff] %v3802_v31   ;;  %v4035_v58 = vpop.f32.mrb[164].mxu1  ;;  %v3209_v50 = vadd.f32 %v3208_v53, %v2732_v12  ;;  %v3344_v0 = vadd.f32 %v3343_v21, %v3281_v26 }
 0x31d   :  { %v2748_v48 = vadd.f32 %v6331_v1, %v4035_v58  ;;  %v2739_v13 = vpop.f32.mrb[165].mxu1 }
 0x31e   :  { %v2740_v22 = vadd.f32 %v6315_v61, %v2739_v13  ;;  %v4036_v49 = vpop.f32.mrb[166].mxu1  ;;  %v3345_v32 = vadd.f32 %v3344_v0, %v3282_v11  ;;  %v3210_v44 = vadd.f32 %v3209_v50, %v2735_v25 }
 0x31f   :  { %v2751_v6 = vadd.f32 %v6336_v14, %v4036_v49  ;;  %v2742_v37 = vpop.f32.mrb[167].mxu1  ;;  %v2506_v29 = vpop.f32.mrb[100].mxu0  ;;  %v3286_v12 = vmul.f32 %v2748_v48, %v2748_v48 }
 0x320   :  { %v3284_v1 = vmul.f32 %v2740_v22, %v2740_v22  ;;  %v2743_v15 = vadd.f32 %v6320_v8, %v2742_v37  ;;  %v3211_v47 = vadd.f32 %v3210_v44, %v2740_v22  ;;  %v3346_v30 = vadd.f32 %v3345_v32, %v3283_v51  ;;  %v2508_v45 = vpop.f32.mrb[101].mxu0 }
 0x321   :  { %v3817_v39 = vpack.c.bf16 %v2751_v6, %v2748_v48  ;;  %v4143_v56 = vadd.f32 %v2506_v29, %v6779_v16  ;;  %v2509_v28 = vpop.f32.mrb[102].mxu0  ;;  %v3287_v25 = vmul.f32 %v2751_v6, %v2751_v6 }
 0x322   :  { %v3812_v17 = vpack.c.bf16 %v2743_v15, %v2740_v22  ;;  %v3285_v61 = vmul.f32 %v2743_v15, %v2743_v15  ;;  %v3347_v4 = vadd.f32 %v3346_v30, %v3284_v1  ;;  %v3212_v63 = vadd.f32 %v3211_v47, %v2743_v15  ;;  %v2511_v52 = vpop.f32.mrb[103].mxu0 }
 0x323   :  { %3928 = vst [vmem:[%s6504_s4 + $0x98] sm:$0xff] %v3817_v39   ;;  %v4144_v18 = vadd.f32 %v2509_v28, %v6780_v9 }
 0x324   :  { %3927 = vst [vmem:[%s6504_s4 + $0x90] sm:$0xff] %v3812_v17   ;;  %v4039_v14 = vpop.f32.mrb[168].mxu1  ;;  %v3213_v3 = vadd.f32 %v3212_v63, %v2748_v48  ;;  %v3348_v8 = vadd.f32 %v3347_v4, %v3285_v61 }
 0x325   :  { %v2764_v27 = vadd.f32 %v6363_v60, %v4039_v14  ;;  %v2755_v34 = vpop.f32.mrb[169].mxu1 }
 0x326   :  { %v2756_v36 = vadd.f32 %v6347_v41, %v2755_v34  ;;  %v4040_v23 = vpop.f32.mrb[170].mxu1  ;;  %v3349_v38 = vadd.f32 %v3348_v8, %v3286_v12  ;;  %v3214_v40 = vadd.f32 %v3213_v3, %v2751_v6 }
 0x327   :  { %v2767_v43 = vadd.f32 %v6368_v46, %v4040_v23  ;;  %v2758_v7 = vpop.f32.mrb[171].mxu1  ;;  %v2514_v11 = vpop.f32.mrb[104].mxu0  ;;  %v3290_v50 = vmul.f32 %v2764_v27, %v2764_v27 }
 0x328   :  { %v3288_v19 = vmul.f32 %v2756_v36, %v2756_v36  ;;  %v2759_v60 = vadd.f32 %v6352_v57, %v2758_v7  ;;  %v3215_v31 = vadd.f32 %v3214_v40, %v2756_v36  ;;  %v3350_v26 = vadd.f32 %v3349_v38, %v3287_v25  ;;  %v2516_v22 = vpop.f32.mrb[105].mxu0  ;;  %v6784_v7 = vld [vmem:[#allocation36_spill] sm:$0xff] }
 0x329   :  { %v3827_v21 = vpack.c.bf16 %v2767_v43, %v2764_v27  ;;  %v4145_v59 = vadd.f32 %v2514_v11, %v6781_v55  ;;  %v2517_v51 = vpop.f32.mrb[106].mxu0  ;;  %v3291_v32 = vmul.f32 %v2767_v43, %v2767_v43 }
 0x32a   :  { %v3822_v53 = vpack.c.bf16 %v2759_v60, %v2756_v36  ;;  %v3289_v58 = vmul.f32 %v2759_v60, %v2759_v60  ;;  %v3351_v41 = vadd.f32 %v3350_v26, %v3288_v19  ;;  %v3216_v62 = vadd.f32 %v3215_v31, %v2759_v60  ;;  %v2519_v15 = vpop.f32.mrb[107].mxu0 }
 0x32b   :  { %3930 = vst [vmem:[%s6504_s4 + $0xa8] sm:$0xff] %v3827_v21   ;;  %v6442_v1 = vadd.f32 %v2517_v51, %v6782_v33 }
 0x32c   :  { %3929 = vst [vmem:[%s6504_s4 + $0xa0] sm:$0xff] %v3822_v53   ;;  %v4043_v46 = vpop.f32.mrb[172].mxu1  ;;  %v3217_v0 = vadd.f32 %v3216_v62, %v2764_v27  ;;  %v3352_v57 = vadd.f32 %v3351_v41, %v3289_v58  ;;  %v6783_v27 = vld [vmem:[#allocation13_spill] sm:$0xff] }
 0x32d   :  { %v2780_v48 = vadd.f32 %v6395_v42, %v4043_v46  ;;  %v2771_v13 = vpop.f32.mrb[173].mxu1 }
 0x32e   :  { %v2772_v49 = vadd.f32 %v6379_v24, %v2771_v13  ;;  %v4044_v2 = vpop.f32.mrb[174].mxu1  ;;  %v3353_v44 = vadd.f32 %v3352_v57, %v3290_v50  ;;  %v3218_v6 = vadd.f32 %v3217_v0, %v2767_v43  ;;  %v6785_v0 = vld [vmem:[#allocation11_spill] sm:$0xff] }
 0x32f   :  { %v2783_v37 = vadd.f32 %v6400_v54, %v4044_v2  ;;  %v2774_v10 = vpop.f32.mrb[175].mxu1  ;;  %v2522_v14 = vpop.f32.mrb[108].mxu0  ;;  %v3294_v29 = vmul.f32 %v2780_v48, %v2780_v48 }
 0x330   :  { %v3292_v47 = vmul.f32 %v2772_v49, %v2772_v49  ;;  %v2775_v42 = vadd.f32 %v6384_v5, %v2774_v10  ;;  %v3219_v30 = vadd.f32 %v3218_v6, %v2772_v49  ;;  %v3354_v39 = vadd.f32 %v3353_v44, %v3291_v32  ;;  %v2524_v16 = vpop.f32.mrb[109].mxu0  ;;  %v6786_v6 = vld [vmem:[#allocation16_spill] sm:$0xff] }
 0x331   :  { %v3837_v17 = vpack.c.bf16 %v2783_v37, %v2780_v48  ;;  %v4147_v34 = vadd.f32 %v2522_v14, %v6783_v27  ;;  %v2525_v23 = vpop.f32.mrb[110].mxu0  ;;  %v3295_v28 = vmul.f32 %v2783_v37, %v2783_v37 }
 0x332   :  { %v3832_v61 = vpack.c.bf16 %v2775_v42, %v2772_v49  ;;  %v3293_v24 = vmul.f32 %v2775_v42, %v2775_v42  ;;  %v3355_v4 = vadd.f32 %v3354_v39, %v3292_v47  ;;  %v3220_v63 = vadd.f32 %v3219_v30, %v2775_v42  ;;  %v2527_v52 = vpop.f32.mrb[111].mxu0 }
 0x333   :  { %3932 = vst [vmem:[%s6504_s4 + $0xb8] sm:$0xff] %v3837_v17   ;;  %v4148_v9 = vadd.f32 %v2525_v23, %v6784_v7  ;;  %v6788_v23 = vld [vmem:[#allocation14_spill] sm:$0xff] }
 0x334   :  { %3931 = vst [vmem:[%s6504_s4 + $0xb0] sm:$0xff] %v3832_v61   ;;  %v4047_v54 = vpop.f32.mrb[176].mxu1  ;;  %v3221_v12 = vadd.f32 %v3220_v63, %v2780_v48  ;;  %v3356_v5 = vadd.f32 %v3355_v4, %v3293_v24 }
 0x335   :  { %v2796_v3 = vadd.f32 %v4143_v56, %v4047_v54  ;;  %v2787_v8 = vpop.f32.mrb[177].mxu1 }
 0x336   :  { %v2788_v45 = vadd.f32 %v6411_v20, %v2787_v8  ;;  %v4048_v36 = vpop.f32.mrb[178].mxu1  ;;  %v3357_v25 = vadd.f32 %v3356_v5, %v3294_v29  ;;  %v3222_v38 = vadd.f32 %v3221_v12, %v2783_v37  ;;  %v6787_v29 = vld [vmem:[#allocation39_spill] sm:$0xff] }
 0x337   :  { %v2799_v40 = vadd.f32 %v4144_v18, %v4048_v36  ;;  %v2790_v43 = vpop.f32.mrb[179].mxu1  ;;  %v2530_v41 = vpop.f32.mrb[112].mxu0  ;;  %v3298_v62 = vmul.f32 %v2796_v3, %v2796_v3 }
 0x338   :  { %v3296_v19 = vmul.f32 %v2788_v45, %v2788_v45  ;;  %v2791_v60 = vadd.f32 %v6416_v35, %v2790_v43  ;;  %v3223_v56 = vadd.f32 %v3222_v38, %v2788_v45  ;;  %v3358_v31 = vadd.f32 %v3357_v25, %v3295_v28  ;;  %v2532_v48 = vpop.f32.mrb[113].mxu0 }
 0x339   :  { %v3847_v26 = vpack.c.bf16 %v2799_v40, %v2796_v3  ;;  %v4149_v57 = vadd.f32 %v2530_v41, %v6785_v0  ;;  %v2533_v22 = vpop.f32.mrb[114].mxu0  ;;  %v3299_v49 = vmul.f32 %v2799_v40, %v2799_v40 }
 0x33a   :  { %v3842_v21 = vpack.c.bf16 %v2791_v60, %v2788_v45  ;;  %v3297_v53 = vmul.f32 %v2791_v60, %v2791_v60  ;;  %v3359_v58 = vadd.f32 %v3358_v31, %v3296_v19  ;;  %v3224_v20 = vadd.f32 %v3223_v56, %v2791_v60  ;;  %v2535_v10 = vpop.f32.mrb[115].mxu0 }
 0x33b   :  { %3934 = vst [vmem:[%s6504_s4 + $0xc8] sm:$0xff] %v3847_v26   ;;  %v4150_v37 = vadd.f32 %v2533_v22, %v6786_v6 }
 0x33c   :  { %3933 = vst [vmem:[%s6504_s4 + $0xc0] sm:$0xff] %v3842_v21   ;;  %v4051_v18 = vpop.f32.mrb[180].mxu1  ;;  %v3225_v46 = vadd.f32 %v3224_v20, %v2796_v3  ;;  %v3360_v35 = vadd.f32 %v3359_v58, %v3297_v53 }
 0x33d   :  { %v2812_v11 = vadd.f32 %v4147_v34, %v4051_v18  ;;  %v2803_v50 = vpop.f32.mrb[181].mxu1 }
 0x33e   :  { %v2804_v13 = vadd.f32 %v4145_v59, %v2803_v50  ;;  %v4052_v55 = vpop.f32.mrb[182].mxu1  ;;  %v3361_v2 = vadd.f32 %v3360_v35, %v3298_v62  ;;  %v3226_v51 = vadd.f32 %v3225_v46, %v2799_v40  ;;  %v6789_v62 = vld [vmem:[#allocation40_spill] sm:$0xff] }
 0x33f   :  { %v2815_v32 = vadd.f32 %v4148_v9, %v4052_v55  ;;  %v2806_v44 = vpop.f32.mrb[183].mxu1  ;;  %v2538_v4 = vpop.f32.mrb[116].mxu0  ;;  %v3302_v63 = vmul.f32 %v2812_v11, %v2812_v11  ;;  %v6790_v55 = vld [vmem:[#allocation17_spill] sm:$0xff] }
 0x340   :  { %v3300_v33 = vmul.f32 %v2804_v13, %v2804_v13  ;;  %v2807_v15 = vadd.f32 %v6442_v1, %v2806_v44  ;;  %v3227_v47 = vadd.f32 %v3226_v51, %v2804_v13  ;;  %v3362_v42 = vadd.f32 %v3361_v2, %v3299_v49  ;;  %v2540_v5 = vpop.f32.mrb[117].mxu0 }
 0x341   :  { %v3857_v30 = vpack.c.bf16 %v2815_v32, %v2812_v11  ;;  %v4151_v12 = vadd.f32 %v2538_v4, %v6787_v29  ;;  %v2541_v27 = vpop.f32.mrb[118].mxu0  ;;  %v3303_v34 = vmul.f32 %v2815_v32, %v2815_v32 }
 0x342   :  { %v3852_v39 = vpack.c.bf16 %v2807_v15, %v2804_v13  ;;  %v3301_v17 = vmul.f32 %v2807_v15, %v2807_v15  ;;  %v3363_v61 = vadd.f32 %v3362_v42, %v3300_v33  ;;  %v3228_v59 = vadd.f32 %v3227_v47, %v2807_v15  ;;  %v2543_v25 = vpop.f32.mrb[119].mxu0  ;;  %v6791_v42 = vld [vmem:[#allocation43_spill] sm:$0xff] }
 0x343   :  { %3936 = vst [vmem:[%s6504_s4 + $0xd8] sm:$0xff] %v3857_v30   ;;  %v4152_v28 = vadd.f32 %v2541_v27, %v6788_v23 }
 0x344   :  { %3935 = vst [vmem:[%s6504_s4 + $0xd0] sm:$0xff] %v3852_v39   ;;  %v4055_v24 = vpop.f32.mrb[184].mxu1  ;;  %v3229_v54 = vadd.f32 %v3228_v59, %v2812_v11  ;;  %v3364_v1 = vadd.f32 %v3363_v61, %v3301_v17 }
 0x345   :  { %v2819_v14 = vpop.f32.mrb[185].mxu1  ;;  %v2828_v38 = vadd.f32 %v4151_v12, %v4055_v24  ;;  %v6792_v24 = vld [vmem:[#allocation19_spill] sm:$0xff] }
 0x346   :  { %v2820_v3 = vadd.f32 %v4149_v57, %v2819_v14  ;;  %v4056_v8 = vpop.f32.mrb[186].mxu1  ;;  %v3365_v16 = vadd.f32 %v3364_v1, %v3302_v63  ;;  %v3230_v45 = vadd.f32 %v3229_v54, %v2815_v32 }
 0x347   :  { %v2822_v36 = vpop.f32.mrb[187].mxu1  ;;  %v2831_v52 = vadd.f32 %v4152_v28, %v4056_v8  ;;  %v2546_v53 = vpop.f32.mrb[120].mxu0  ;;  %v3306_v58 = vmul.f32 %v2828_v38, %v2828_v38 }
 0x348   :  { %v3304_v40 = vmul.f32 %v2820_v3, %v2820_v3  ;;  %v2823_v43 = vadd.f32 %v4150_v37, %v2822_v36  ;;  %v3231_v7 = vadd.f32 %v3230_v45, %v2820_v3  ;;  %v3366_v9 = vadd.f32 %v3365_v16, %v3303_v34  ;;  %v2548_v35 = vpop.f32.mrb[121].mxu0 }
 0x349   :  { %v3867_v26 = vpack.c.bf16 %v2831_v52, %v2828_v38  ;;  %v4153_v46 = vadd.f32 %v2546_v53, %v6789_v62  ;;  %v2549_v50 = vpop.f32.mrb[122].mxu0  ;;  %v3307_v0 = vmul.f32 %v2831_v52, %v2831_v52 }
 0x34a   :  { %v3862_v19 = vpack.c.bf16 %v2823_v43, %v2820_v3  ;;  %v3305_v60 = vmul.f32 %v2823_v43, %v2823_v43  ;;  %v3367_v56 = vadd.f32 %v3366_v9, %v3304_v40  ;;  %v3232_v31 = vadd.f32 %v3231_v7, %v2823_v43  ;;  %v2551_v49 = vpop.f32.mrb[123].mxu0  ;;  %v3175_v40 = vld [vmem:[%s6505_s5] sm:$0x1]  ;;  %v3247_v9 = vld [vmem:[%s6505_s5 + $0x1] sm:$0x1] }
 0x34b   :  { %3938 = vst [vmem:[%s6504_s4 + $0xe8] sm:$0xff] %v3867_v26   ;;  %v4154_v22 = vadd.f32 %v2549_v50, %v6790_v55 }
 0x34c   :  { %3937 = vst [vmem:[%s6504_s4 + $0xe0] sm:$0xff] %v3862_v19   ;;  %v4059_v21 = vpop.f32.mrb[188].mxu1  ;;  %v3233_v20 = vadd.f32 %v3232_v31, %v2828_v38  ;;  %v3368_v18 = vadd.f32 %v3367_v56, %v3305_v60 }
 0x34d   :  { %v2835_v41 = vpop.f32.mrb[189].mxu1 }
 0x34e   :  { %v4060_v11 = vpop.f32.mrb[190].mxu1  ;;  %v3369_v57 = vadd.f32 %v3368_v18, %v3306_v58  ;;  %v3234_v48 = vadd.f32 %v3233_v20, %v2831_v52  ;;  %v2836_v2 = vadd.f32 %v4153_v46, %v2835_v41 }
 0x34f   :  { %v2838_v13 = vpop.f32.mrb[191].mxu1  ;;  %v2554_v47 = vpop.f32.mrb[124].mxu0 }
 0x350   :  { %v3370_v51 = vadd.f32 %v3369_v57, %v3307_v0  ;;  %v3235_v32 = vadd.f32 %v3234_v48, %v2836_v2  ;;  %v3308_v44 = vmul.f32 %v2836_v2, %v2836_v2  ;;  %v2839_v6 = vadd.f32 %v4154_v22, %v2838_v13  ;;  %v2556_v39 = vpop.f32.mrb[125].mxu0 }
 0x351   :  { %v4155_v30 = vadd.f32 %v2554_v47, %v6791_v42  ;;  %v2557_v61 = vpop.f32.mrb[126].mxu0 }
 0x352   :  { %v3371_v37 = vadd.f32 %v3370_v51, %v3308_v44  ;;  %v3872_v10 = vpack.c.bf16 %v2839_v6, %v2836_v2  ;;  %v3236_v33 = vadd.f32 %v3235_v32, %v2839_v6  ;;  %v3309_v15 = vmul.f32 %v2839_v6, %v2839_v6  ;;  %v2559_v63 = vpop.f32.mrb[127].mxu0 }
 0x353   :  { %v2844_v59 = vadd.f32 %v4155_v30, %v4059_v21  ;;  %v4156_v4 = vadd.f32 %v2557_v61, %v6792_v24 }
 0x354   :  { %3939 = vst [vmem:[%s6504_s4 + $0xf0] sm:$0xff] %v3872_v10   ;;  %v3372_v17 = vadd.f32 %v3371_v37, %v3309_v15 }
 0x355   :  { %v3310_v54 = vmul.f32 %v2844_v59, %v2844_v59  ;;  %v2847_v1 = vadd.f32 %v4156_v4, %v4060_v11  ;;  %v3237_v14 = vadd.f32 %v3236_v33, %v2844_v59 }
 0x357   :  { %v3877_v29 = vpack.c.bf16 %v2847_v1, %v2844_v59  ;;  %v3311_v12 = vmul.f32 %v2847_v1, %v2847_v1  ;;  %v3238_v5 = vadd.f32 %v3237_v14, %v2847_v1  ;;  %v3373_v3 = vadd.f32 %v3372_v17, %v3310_v54 }
 0x359   :  { %3940 = vst [vmem:[%s6504_s4 + $0xf8] sm:$0xff] %v3877_v29   ;;  %v3239_v8 = vrot.slane %v3238_v5, 4  ;;  %v3374_v27 = vadd.f32 %v3373_v3, %v3311_v12 }
 0x35b   :  { %v3240_v34 = vadd.f32 %v3239_v8, %v3238_v5  ;;  %v3375_v16 = vrot.slane %v3374_v27, 4 }
 0x35d   :  { %v3241_v45 = vrot.slane %v3240_v34, 2  ;;  %v3376_v36 = vadd.f32 %v3375_v16, %v3374_v27 }
 0x35f   :  { %v3242_v23 = vadd.f32 %v3241_v45, %v3240_v34  ;;  %v3377_v28 = vrot.slane %v3376_v36, 2 }
 0x361   :  { %v3243_v25 = vrot.slane %v3242_v23, 1  ;;  %v3378_v38 = vadd.f32 %v3377_v28, %v3376_v36 }
 0x363   :  { %v3244_v43 = vadd.f32 %v3243_v25, %v3242_v23  ;;  %v3379_v7 = vrot.slane %v3378_v38, 1 }
 0x365   :  { %v3245_v52 = vadd.f32 %v3244_v43, %v3175_v40  ;;  %v3380_v19 = vadd.f32 %v3379_v7, %v3378_v38 }
 0x367   :  { %3246 = vst [vmem:[%s6505_s5] sm:$0x1] %v3245_v52  ;;  %v3381_v60 = vadd.f32 %v3380_v19, %v3247_v9 }
 0x369   :  { %3382 = vst [vmem:[%s6505_s5 + $0x1] sm:$0x1] %v3381_v60 }

</bundles_post_ra>
